<compile_context>
chip_gen: v7x
topology: tpu7x:2x2x1
jax: 0.10.0
libtpu: 0.0.40
codegen_flags: <defaults>
</compile_context>

<pallas_src>
import functools

import jax
import jax.numpy as jnp
from jax.experimental import pallas as pl
from jax.experimental.pallas import tpu as pltpu

BN_EPS = 1e-5
EXPANSION = 4


# --------------------------------------------------------------------------------------
# fused kernel: conv1 -> conv2(9 taps) -> SPBlock gate -> conv3 -> SE -> +res -> ReLU
# --------------------------------------------------------------------------------------
def _newsp_bottleneck_kernel(
        x_ref, w1_ref, b1_ref, w2_ref, b2_ref,
        sp1w_ref, sp1b_ref, sp2w_ref, sp2b_ref, sp3w_ref, sp3b_ref,
        w3_ref, b3_ref, sew1_ref, sew2_ref,
        o_ref, pad_ref, *, Nb, H, W, Cin, Cmid, Cout):
    f32 = jnp.float32
    cdt = w1_ref.dtype                        # MXU operand dtype (bf16 in production)
    M = Nb * H * W

    x = x_ref[...]                            # (Nb, H, W, Cin)  io dtype (bf16 or f32)
    x2d = x.reshape(M, Cin)

    # ---- conv1 (1x1) + BN1 + ReLU : single matmul, BN scale folded into w --------------
    t1 = jnp.dot(x2d.astype(cdt), w1_ref[...], preferred_element_type=f32) + b1_ref[...]
    t1 = jnp.maximum(t1, 0.0)                 # (M, Cmid) f32

    # ---- conv2 (3x3, pad=1) + BN2 + ReLU ------------------------------------------------
    # Halo padding in VMEM scratch: zero only the 4 border strips (interior is fully
    # overwritten every step), then 9 accumulating K=Cmid dots (no im2col lane-concat).
    zrow = jnp.zeros((Nb, 1, W + 2, Cmid), f32)
    zcol = jnp.zeros((Nb, H + 2, 1, Cmid), f32)
    pad_ref[:, 0:1, :, :] = zrow
    pad_ref[:, H + 1:H + 2, :, :] = zrow
    pad_ref[:, :, 0:1, :] = zcol
    pad_ref[:, :, W + 1:W + 2, :] = zcol
    pad_ref[:, 1:H + 1, 1:W + 1, :] = t1.reshape(Nb, H, W, Cmid)

    acc = b2_ref[...].astype(f32)             # (1, Cmid) -> broadcasts on first add
    for dy in range(3):
        for dx in range(3):
            tap = pad_ref[:, dy:dy + H, dx:dx + W, :].reshape(M, Cmid)
            acc = acc + jnp.dot(tap.astype(cdt), w2_ref[dy, dx],
                                preferred_element_type=f32)
    t2 = jnp.maximum(acc, 0.0)                # (M, Cmid) f32
    t2_hwc = t2.reshape(Nb, H, W, Cmid)

    # ---- SPBlock gate (strip pooling) ---------------------------------------------------
    ph = jnp.mean(t2_hwc, axis=2)             # (Nb, H, Cmid)  pool over W
    pw = jnp.mean(t2_hwc, axis=1)             # (Nb, W, Cmid)  pool over H
    zh = jnp.zeros((Nb, 1, Cmid), f32)
    ph_p = jnp.concatenate([zh, ph, zh], axis=1)          # (Nb, H+2, Cmid)
    pw_p = jnp.concatenate([zh, pw, zh], axis=1)          # (Nb, W+2, Cmid)
    g1 = sp1b_ref[...].astype(f32)            # (1, Cmid) -> broadcasts
    g2 = sp2b_ref[...].astype(f32)
    for d in range(3):                        # 3 accumulating K=Cmid dots per strip conv
        g1 = g1 + jnp.dot(ph_p[:, d:d + H, :].reshape(Nb * H, Cmid).astype(cdt),
                          sp1w_ref[d], preferred_element_type=f32)
        g2 = g2 + jnp.dot(pw_p[:, d:d + W, :].reshape(Nb * W, Cmid).astype(cdt),
                          sp2w_ref[d], preferred_element_type=f32)
    s = jnp.maximum(g1.reshape(Nb, H, 1, Cmid) + g2.reshape(Nb, 1, W, Cmid), 0.0)
    gate = jax.nn.sigmoid(
        jnp.dot(s.reshape(M, Cmid).astype(cdt), sp3w_ref[...],
                preferred_element_type=f32) + sp3b_ref[...])   # (M, Cmid) f32
    t2g = t2 * gate

    # ---- conv3 (1x1) + BN3 --------------------------------------------------------------
    t3 = jnp.dot(t2g.astype(cdt), w3_ref[...], preferred_element_type=f32) + b3_ref[...]
    t3n = t3.reshape(Nb, H * W, Cout)

    # ---- SE : avgpool -> FC -> ReLU -> FC -> sigmoid on the VPU (tiny M) ----------------
    sq = jnp.mean(t3n, axis=1)                                             # (Nb, Cout)
    h = jnp.maximum(jnp.sum(sq[:, None, :] * sew1_ref[...][None, :, :],
                            axis=-1), 0.0)                                 # (Nb, Ch)
    g = jax.nn.sigmoid(jnp.sum(h[:, :, None] * sew2_ref[...][None, :, :],
                               axis=1))                                    # (Nb, Cout)
    t3n = t3n * g[:, None, :]

    # ---- residual add (f32) + final ReLU, lane-dense Cout=128 store ---------------------
    res = x2d.astype(f32).reshape(Nb, H * W, Cout)
    out = jnp.maximum(t3n + res, 0.0)
    o_ref[...] = out.reshape(Nb, H, W, Cout).astype(o_ref.dtype)


def newsp_bottleneck(x_nhwc, p, *, compute_dtype=jnp.bfloat16, out_dtype=None,
                     images_per_step=2):
    N, H, W, Cin = x_nhwc.shape
    Cmid = p["w1"].shape[1]
    Cout = p["w3"].shape[1]
    assert Cin == Cout, "downsample is None => inplanes must equal planes*expansion"
    if out_dtype is None:
        out_dtype = x_nhwc.dtype              # bf16-in -> bf16-out (half the HBM traffic)
    Nb = max(1, min(images_per_step, N))
    assert N % Nb == 0, "batch must be divisible by images_per_step"
    f32 = jnp.float32

    # trace-time BN folding: scale into the conv weights, bias kept as a (1, C) row.
    w1f = (p["w1"] * p["bn1_scale"][None, :]).astype(compute_dtype)
    b1 = p["bn1_bias"].reshape(1, Cmid).astype(f32)
    w2f = (p["w2"] * p["bn2_scale"][None, None, None, :]).astype(compute_dtype)  # (3,3,Cmid,Cmid)
    b2 = p["bn2_bias"].reshape(1, Cmid).astype(f32)
    w3f = (p["w3"] * p["bn3_scale"][None, :]).astype(compute_dtype)
    b3 = p["bn3_bias"].reshape(1, Cout).astype(f32)
    sp1w = (p["sp1_w"] * p["sp_bn1_scale"][None, None, :]).astype(compute_dtype)  # (3,Cmid,Cmid)
    sp1b = p["sp_bn1_bias"].reshape(1, Cmid).astype(f32)
    sp2w = (p["sp2_w"] * p["sp_bn2_scale"][None, None, :]).astype(compute_dtype)
    sp2b = p["sp_bn2_bias"].reshape(1, Cmid).astype(f32)
    sp3w = p["sp3_w"].astype(compute_dtype)
    sp3b = p["sp3_b"].reshape(1, Cmid).astype(f32)
    sew1 = p["se_w1"].astype(f32)             # (Ch, Cout)  fc1, torch (out,in) layout
    sew2 = p["se_w2"].astype(f32)             # (Ch, Cout)  fc2, stored (in,out)

    def wspec(a):
        zeros = (0,) * a.ndim
        return pl.BlockSpec(a.shape, lambda n, zeros=zeros: zeros)

    kern = functools.partial(_newsp_bottleneck_kernel,
                             Nb=Nb, H=H, W=W, Cin=Cin, Cmid=Cmid, Cout=Cout)
    return pl.pallas_call(
        kern,
        out_shape=jax.ShapeDtypeStruct((N, H, W, Cout), out_dtype),
        grid=(N // Nb,),
        in_specs=[
            pl.BlockSpec((Nb, H, W, Cin), lambda n: (n, 0, 0, 0)),
            wspec(w1f), wspec(b1), wspec(w2f), wspec(b2),
            wspec(sp1w), wspec(sp1b), wspec(sp2w), wspec(sp2b),
            wspec(sp3w), wspec(sp3b), wspec(w3f), wspec(b3),
            wspec(sew1), wspec(sew2),
        ],
        out_specs=pl.BlockSpec((Nb, H, W, Cout), lambda n: (n, 0, 0, 0)),
        scratch_shapes=[pltpu.VMEM((Nb, H + 2, W + 2, Cmid), f32)],
        compiler_params=pltpu.CompilerParams(
            dimension_semantics=("parallel",),
            vmem_limit_bytes=32 * 1024 * 1024),
    )(x_nhwc, w1f, b1, w2f, b2, sp1w, sp1b, sp2w, sp2b, sp3w, sp3b, w3f, b3, sew1, sew2)


# --------------------------------------------------------------------------------------
# pure-JAX reference (same folded-BN eval-mode math) at HIGHEST matmul precision
# --------------------------------------------------------------------------------------
def newsp_bottleneck_ref(x, p):
    P = jax.lax.Precision.HIGHEST
    conv2d = lambda a, w: jax.lax.conv_general_dilated(
        a, w, (1, 1), "SAME", dimension_numbers=("NHWC", "HWIO", "NHWC"), precision=P)

    def conv1d(a, w):  # a: (N, L, C), w: (3, Cin, Cout)
        return jax.lax.conv_general_dilated(
            a[:, :, None, :], w[:, None, :, :], (1, 1), "SAME",
            dimension_numbers=("NHWC", "HWIO", "NHWC"), precision=P)[:, :, 0, :]

    t1 = jnp.maximum(jnp.einsum("nhwc,cd->nhwd", x, p["w1"], precision=P)
                     * p["bn1_scale"] + p["bn1_bias"], 0.0)
    t2 = jnp.maximum(conv2d(t1, p["w2"]) * p["bn2_scale"] + p["bn2_bias"], 0.0)
    # SPBlock gate
    ph = jnp.mean(t2, axis=2)                                     # (N, H, C)
    pw = jnp.mean(t2, axis=1)                                     # (N, W, C)
    g1 = conv1d(ph, p["sp1_w"]) * p["sp_bn1_scale"] + p["sp_bn1_bias"]
    g2 = conv1d(pw, p["sp2_w"]) * p["sp_bn2_scale"] + p["sp_bn2_bias"]
    s = jnp.maximum(g1[:, :, None, :] + g2[:, None, :, :], 0.0)
    gate = jax.nn.sigmoid(jnp.einsum("nhwc,cd->nhwd", s, p["sp3_w"], precision=P)
                          + p["sp3_b"])
    t2 = t2 * gate
    t3 = jnp.einsum("nhwc,cd->nhwd", t2, p["w3"], precision=P) * p["bn3_scale"] + p["bn3_bias"]
    # SE
    sq = jnp.mean(t3, axis=(1, 2))                                # (N, Cout)
    h = jnp.maximum(jnp.einsum("nc,jc->nj", sq, p["se_w1"], precision=P), 0.0)
    g = jax.nn.sigmoid(jnp.einsum("nj,jc->nc", h, p["se_w2"], precision=P))
    t3 = t3 * g[:, None, None, :]
    return jnp.maximum(t3 + x, 0.0)


# --------------------------------------------------------------------------------------
# deterministic parameter init (eval-mode BN folded to scale/bias)
# --------------------------------------------------------------------------------------
def _fold_bn(gamma, beta, mean, var):
    scale = gamma / jnp.sqrt(var + BN_EPS)
    return scale, beta - mean * scale


def init_params(key, inplanes, planes, reduction=16):
    cout = planes * EXPANSION
    assert inplanes == cout
    ch = max(1, cout // reduction)
    ks = list(jax.random.split(key, 16))

    def bn(k, c):
        k1, k2, k3, k4 = jax.random.split(k, 4)
        gamma = 1.0 + 0.1 * jax.random.normal(k1, (c,), jnp.float32)
        beta = 0.1 * jax.random.normal(k2, (c,), jnp.float32)
        mean = 0.05 * jax.random.normal(k3, (c,), jnp.float32)
        var = 0.5 + jax.random.uniform(k4, (c,), jnp.float32)
        return _fold_bn(gamma, beta, mean, var)

    p = {}
    p["w1"] = 0.1 * jax.random.normal(ks[0], (inplanes, planes), jnp.float32)
    p["bn1_scale"], p["bn1_bias"] = bn(ks[1], planes)
    p["w2"] = 0.1 * jax.random.normal(ks[2], (3, 3, planes, planes), jnp.float32)
    p["bn2_scale"], p["bn2_bias"] = bn(ks[3], planes)
    p["w3"] = 0.1 * jax.random.normal(ks[4], (planes, cout), jnp.float32)
    p["bn3_scale"], p["bn3_bias"] = bn(ks[5], cout)
    # SPBlock: (3,1) and (1,3) strip convs (no bias) + BN, then 1x1 conv with bias
    p["sp1_w"] = 0.1 * jax.random.normal(ks[6], (3, planes, planes), jnp.float32)
    p["sp_bn1_scale"], p["sp_bn1_bias"] = bn(ks[7], planes)
    p["sp2_w"] = 0.1 * jax.random.normal(ks[8], (3, planes, planes), jnp.float32)
    p["sp_bn2_scale"], p["sp_bn2_bias"] = bn(ks[9], planes)
    p["sp3_w"] = 0.1 * jax.random.normal(ks[10], (planes, planes), jnp.float32)
    p["sp3_b"] = 0.1 * jax.random.normal(ks[11], (planes,), jnp.float32)
    # SE (bias-free FCs)
    p["se_w1"] = 0.2 * jax.random.normal(ks[12], (ch, cout), jnp.float32)
    p["se_w2"] = 0.2 * jax.random.normal(ks[13], (ch, cout), jnp.float32)
    return p


if __name__ == "__main__":
    key = jax.random.PRNGKey(0)
    N, H, W = 4, 16, 16
    planes = 32
    inplanes = planes * EXPANSION            # 128 -> lane-dense channels, residual works

    kx, kp = jax.random.split(key)
    # NHWC (torch NCHW equivalent: [4, 128, 16, 16])
    x = jax.random.normal(kx, (N, H, W, inplanes), jnp.float32)
    params = init_params(kp, inplanes, planes, reduction=16)

    ref = newsp_bottleneck_ref(x, params)

    # correctness: f32 I/O + f32 MXU path vs pure-JAX HIGHEST-precision reference
    out_f32 = jax.block_until_ready(
        newsp_bottleneck(x, params, compute_dtype=jnp.float32, images_per_step=2))
    err = float(jnp.max(jnp.abs(out_f32 - ref)))
    assert err < 1e-3, f"f32 kernel mismatch vs reference: max|err|={err}"

    # production path: bf16 HBM I/O, bf16 MXU operands, f32 accumulation / elementwise
    x_bf16 = x.astype(jnp.bfloat16)
    out = jax.block_until_ready(
        newsp_bottleneck(x_bf16, params, compute_dtype=jnp.bfloat16, images_per_step=2))
    assert out.shape == (N, H, W, inplanes) and out.dtype == jnp.bfloat16
    out_f = out.astype(jnp.float32)
    err_bf16 = float(jnp.max(jnp.abs(out_f - ref)))
    assert err_bf16 < 2.5e-1, f"bf16 kernel mismatch vs reference: max|err|={err_bf16}"
    assert bool(jnp.all(jnp.isfinite(out_f)))

    print("KERNEL_OK")
</pallas_src>

<mosaic_0001>
module attributes {stable_mosaic.version = 11 : i64} {
  func.func @_newsp_bottleneck_kernel(%arg0: i32, %arg1: memref<2x16x16x128xf32, #tpu.memory_space<vmem>>, %arg2: memref<128x32xf32, #tpu.memory_space<vmem>>, %arg3: memref<1x32xf32, #tpu.memory_space<vmem>>, %arg4: memref<3x3x32x32xf32, #tpu.memory_space<vmem>>, %arg5: memref<1x32xf32, #tpu.memory_space<vmem>>, %arg6: memref<3x32x32xf32, #tpu.memory_space<vmem>>, %arg7: memref<1x32xf32, #tpu.memory_space<vmem>>, %arg8: memref<3x32x32xf32, #tpu.memory_space<vmem>>, %arg9: memref<1x32xf32, #tpu.memory_space<vmem>>, %arg10: memref<32x32xf32, #tpu.memory_space<vmem>>, %arg11: memref<1x32xf32, #tpu.memory_space<vmem>>, %arg12: memref<32x128xf32, #tpu.memory_space<vmem>>, %arg13: memref<1x128xf32, #tpu.memory_space<vmem>>, %arg14: memref<8x128xf32, #tpu.memory_space<vmem>>, %arg15: memref<8x128xf32, #tpu.memory_space<vmem>>, %arg16: memref<2x16x16x128xf32, #tpu.memory_space<vmem>>, %arg17: memref<2x18x18x32xf32, #tpu.memory_space<vmem>>) attributes {dimension_semantics = [#tpu.dimension_semantics<parallel>], iteration_bounds = array<i64: 2>, scalar_prefetch = 0 : i64, scratch_operands = 1 : i64, tpu.core_type = #tpu.core_type<tc>, window_params = [{transform_indices = @transform_0, window_bounds = array<i64: 2, 16, 16, 128>}, {pipeline_mode = #tpu.pipeline_mode<synchronous>, transform_indices = @transform_1, window_bounds = array<i64: 128, 32>}, {pipeline_mode = #tpu.pipeline_mode<synchronous>, transform_indices = @transform_2, window_bounds = array<i64: 1, 32>}, {pipeline_mode = #tpu.pipeline_mode<synchronous>, transform_indices = @transform_3, window_bounds = array<i64: 3, 3, 32, 32>}, {pipeline_mode = #tpu.pipeline_mode<synchronous>, transform_indices = @transform_4, window_bounds = array<i64: 1, 32>}, {pipeline_mode = #tpu.pipeline_mode<synchronous>, transform_indices = @transform_5, window_bounds = array<i64: 3, 32, 32>}, {pipeline_mode = #tpu.pipeline_mode<synchronous>, transform_indices = @transform_6, window_bounds = array<i64: 1, 32>}, {pipeline_mode = #tpu.pipeline_mode<synchronous>, transform_indices = @transform_7, window_bounds = array<i64: 3, 32, 32>}, {pipeline_mode = #tpu.pipeline_mode<synchronous>, transform_indices = @transform_8, window_bounds = array<i64: 1, 32>}, {pipeline_mode = #tpu.pipeline_mode<synchronous>, transform_indices = @transform_9, window_bounds = array<i64: 32, 32>}, {pipeline_mode = #tpu.pipeline_mode<synchronous>, transform_indices = @transform_10, window_bounds = array<i64: 1, 32>}, {pipeline_mode = #tpu.pipeline_mode<synchronous>, transform_indices = @transform_11, window_bounds = array<i64: 32, 128>}, {pipeline_mode = #tpu.pipeline_mode<synchronous>, transform_indices = @transform_12, window_bounds = array<i64: 1, 128>}, {pipeline_mode = #tpu.pipeline_mode<synchronous>, transform_indices = @transform_13, window_bounds = array<i64: 8, 128>}, {pipeline_mode = #tpu.pipeline_mode<synchronous>, transform_indices = @transform_14, window_bounds = array<i64: 8, 128>}, {transform_indices = @transform_15, window_bounds = array<i64: 2, 16, 16, 128>}]} {
    %c0 = arith.constant 0 : index
    %c0_0 = arith.constant 0 : index
    %c0_1 = arith.constant 0 : index
    %c0_2 = arith.constant 0 : index
    %0 = vector.load %arg1[%c0, %c0_0, %c0_1, %c0_2] : memref<2x16x16x128xf32, #tpu.memory_space<vmem>>, vector<2x16x16x128xf32>
    %1 = vector.shape_cast %0 : vector<2x16x16x128xf32> to vector<512x128xf32>
    %c0_3 = arith.constant 0 : index
    %c0_4 = arith.constant 0 : index
    %2 = vector.load %arg2[%c0_3, %c0_4] : memref<128x32xf32, #tpu.memory_space<vmem>>, vector<128x32xf32>
    %cst = arith.constant dense<0.000000e+00> : vector<512x32xf32>
    %3 = tpu.matmul %1, %2, %cst {dimension_numbers = #tpu.dot_dimension_numbers<[1], [0], [0], [1], [0, 0, 1, 1], [], []>} : vector<512x128xf32>, vector<128x32xf32>, vector<512x32xf32> -> vector<512x32xf32>
    %c0_5 = arith.constant 0 : index
    %c0_6 = arith.constant 0 : index
    %4 = vector.load %arg3[%c0_5, %c0_6] : memref<1x32xf32, #tpu.memory_space<vmem>>, vector<1x32xf32>
    %5 = vector.broadcast %4 : vector<1x32xf32> to vector<512x32xf32>
    %6 = arith.addf %3, %5 : vector<512x32xf32>
    %cst_7 = arith.constant 0.000000e+00 : f32
    %7 = vector.broadcast %cst_7 : f32 to vector<512x32xf32>
    %8 = arith.maximumf %6, %7 : vector<512x32xf32>
    %cst_8 = arith.constant 0.000000e+00 : f32
    %9 = vector.broadcast %cst_8 : f32 to vector<2x1x18x32xf32>
    %cst_9 = arith.constant 0.000000e+00 : f32
    %10 = vector.broadcast %cst_9 : f32 to vector<2x18x1x32xf32>
    %c0_10 = arith.constant 0 : index
    %c0_11 = arith.constant 0 : index
    %c0_12 = arith.constant 0 : index
    %c0_13 = arith.constant 0 : index
    %11 = vector.load %arg17[%c0_10, %c0_11, %c0_12, %c0_13] : memref<2x18x18x32xf32, #tpu.memory_space<vmem>>, vector<2x1x18x32xf32>
    tpu.vector_store %arg17[%c0_10, %c0_11, %c0_12, %c0_13], %9 {strides = array<i32>} : memref<2x18x18x32xf32, #tpu.memory_space<vmem>>, vector<2x1x18x32xf32>,
    %c0_14 = arith.constant 0 : index
    %c17 = arith.constant 17 : index
    %c0_15 = arith.constant 0 : index
    %c0_16 = arith.constant 0 : index
    %12 = vector.load %arg17[%c0_14, %c17, %c0_15, %c0_16] : memref<2x18x18x32xf32, #tpu.memory_space<vmem>>, vector<2x1x18x32xf32>
    tpu.vector_store %arg17[%c0_14, %c17, %c0_15, %c0_16], %9 {strides = array<i32>} : memref<2x18x18x32xf32, #tpu.memory_space<vmem>>, vector<2x1x18x32xf32>,
    %c0_17 = arith.constant 0 : index
    %c0_18 = arith.constant 0 : index
    %c0_19 = arith.constant 0 : index
    %c0_20 = arith.constant 0 : index
    %13 = vector.load %arg17[%c0_17, %c0_18, %c0_19, %c0_20] : memref<2x18x18x32xf32, #tpu.memory_space<vmem>>, vector<2x18x1x32xf32>
    tpu.vector_store %arg17[%c0_17, %c0_18, %c0_19, %c0_20], %10 {strides = array<i32>} : memref<2x18x18x32xf32, #tpu.memory_space<vmem>>, vector<2x18x1x32xf32>,
    %c0_21 = arith.constant 0 : index
    %c0_22 = arith.constant 0 : index
    %c17_23 = arith.constant 17 : index
    %c0_24 = arith.constant 0 : index
    %14 = vector.load %arg17[%c0_21, %c0_22, %c17_23, %c0_24] : memref<2x18x18x32xf32, #tpu.memory_space<vmem>>, vector<2x18x1x32xf32>
    tpu.vector_store %arg17[%c0_21, %c0_22, %c17_23, %c0_24], %10 {strides = array<i32>} : memref<2x18x18x32xf32, #tpu.memory_space<vmem>>, vector<2x18x1x32xf32>,
    %15 = vector.shape_cast %8 : vector<512x32xf32> to vector<2x16x16x32xf32>
    %c0_25 = arith.constant 0 : index
    %c1 = arith.constant 1 : index
    %c1_26 = arith.constant 1 : index
    %c0_27 = arith.constant 0 : index
    %16 = vector.load %arg17[%c0_25, %c1, %c1_26, %c0_27] : memref<2x18x18x32xf32, #tpu.memory_space<vmem>>, vector<2x16x16x32xf32>
    tpu.vector_store %arg17[%c0_25, %c1, %c1_26, %c0_27], %15 {strides = array<i32>} : memref<2x18x18x32xf32, #tpu.memory_space<vmem>>, vector<2x16x16x32xf32>,
    %c0_28 = arith.constant 0 : index
    %c0_29 = arith.constant 0 : index
    %17 = vector.load %arg5[%c0_28, %c0_29] : memref<1x32xf32, #tpu.memory_space<vmem>>, vector<1x32xf32>
    %c0_30 = arith.constant 0 : index
    %c0_31 = arith.constant 0 : index
    %c0_32 = arith.constant 0 : index
    %c0_33 = arith.constant 0 : index
    %18 = vector.load %arg17[%c0_30, %c0_31, %c0_32, %c0_33] : memref<2x18x18x32xf32, #tpu.memory_space<vmem>>, vector<2x16x16x32xf32>
    %19 = vector.shape_cast %18 : vector<2x16x16x32xf32> to vector<512x32xf32>
    %c0_34 = arith.constant 0 : index
    %c0_35 = arith.constant 0 : index
    %c0_36 = arith.constant 0 : index
    %c0_37 = arith.constant 0 : index
    %20 = vector.load %arg4[%c0_34, %c0_35, %c0_36, %c0_37] : memref<3x3x32x32xf32, #tpu.memory_space<vmem>>, vector<1x1x32x32xf32>
    %21 = vector.shape_cast %20 : vector<1x1x32x32xf32> to vector<32x32xf32>
    %cst_38 = arith.constant dense<0.000000e+00> : vector<512x32xf32>
    %22 = tpu.matmul %19, %21, %cst_38 {dimension_numbers = #tpu.dot_dimension_numbers<[1], [0], [0], [1], [0, 0, 1, 1], [], []>} : vector<512x32xf32>, vector<32x32xf32>, vector<512x32xf32> -> vector<512x32xf32>
    %23 = vector.broadcast %17 : vector<1x32xf32> to vector<512x32xf32>
    %24 = arith.addf %23, %22 : vector<512x32xf32>
    %c0_39 = arith.constant 0 : index
    %c0_40 = arith.constant 0 : index
    %c1_41 = arith.constant 1 : index
    %c0_42 = arith.constant 0 : index
    %25 = vector.load %arg17[%c0_39, %c0_40, %c1_41, %c0_42] : memref<2x18x18x32xf32, #tpu.memory_space<vmem>>, vector<2x16x16x32xf32>
    %26 = vector.shape_cast %25 : vector<2x16x16x32xf32> to vector<512x32xf32>
    %c0_43 = arith.constant 0 : index
    %c1_44 = arith.constant 1 : index
    %c0_45 = arith.constant 0 : index
    %c0_46 = arith.constant 0 : index
    %27 = vector.load %arg4[%c0_43, %c1_44, %c0_45, %c0_46] : memref<3x3x32x32xf32, #tpu.memory_space<vmem>>, vector<1x1x32x32xf32>
    %28 = vector.shape_cast %27 : vector<1x1x32x32xf32> to vector<32x32xf32>
    %cst_47 = arith.constant dense<0.000000e+00> : vector<512x32xf32>
    %29 = tpu.matmul %26, %28, %cst_47 {dimension_numbers = #tpu.dot_dimension_numbers<[1], [0], [0], [1], [0, 0, 1, 1], [], []>} : vector<512x32xf32>, vector<32x32xf32>, vector<512x32xf32> -> vector<512x32xf32>
    %30 = arith.addf %24, %29 : vector<512x32xf32>
    %c0_48 = arith.constant 0 : index
    %c0_49 = arith.constant 0 : index
    %c2 = arith.constant 2 : index
    %c0_50 = arith.constant 0 : index
    %31 = vector.load %arg17[%c0_48, %c0_49, %c2, %c0_50] : memref<2x18x18x32xf32, #tpu.memory_space<vmem>>, vector<2x16x16x32xf32>
    %32 = vector.shape_cast %31 : vector<2x16x16x32xf32> to vector<512x32xf32>
    %c0_51 = arith.constant 0 : index
    %c2_52 = arith.constant 2 : index
    %c0_53 = arith.constant 0 : index
    %c0_54 = arith.constant 0 : index
    %33 = vector.load %arg4[%c0_51, %c2_52, %c0_53, %c0_54] : memref<3x3x32x32xf32, #tpu.memory_space<vmem>>, vector<1x1x32x32xf32>
    %34 = vector.shape_cast %33 : vector<1x1x32x32xf32> to vector<32x32xf32>
    %cst_55 = arith.constant dense<0.000000e+00> : vector<512x32xf32>
    %35 = tpu.matmul %32, %34, %cst_55 {dimension_numbers = #tpu.dot_dimension_numbers<[1], [0], [0], [1], [0, 0, 1, 1], [], []>} : vector<512x32xf32>, vector<32x32xf32>, vector<512x32xf32> -> vector<512x32xf32>
    %36 = arith.addf %30, %35 : vector<512x32xf32>
    %c0_56 = arith.constant 0 : index
    %c1_57 = arith.constant 1 : index
    %c0_58 = arith.constant 0 : index
    %c0_59 = arith.constant 0 : index
    %37 = vector.load %arg17[%c0_56, %c1_57, %c0_58, %c0_59] : memref<2x18x18x32xf32, #tpu.memory_space<vmem>>, vector<2x16x16x32xf32>
    %38 = vector.shape_cast %37 : vector<2x16x16x32xf32> to vector<512x32xf32>
    %c1_60 = arith.constant 1 : index
    %c0_61 = arith.constant 0 : index
    %c0_62 = arith.constant 0 : index
    %c0_63 = arith.constant 0 : index
    %39 = vector.load %arg4[%c1_60, %c0_61, %c0_62, %c0_63] : memref<3x3x32x32xf32, #tpu.memory_space<vmem>>, vector<1x1x32x32xf32>
    %40 = vector.shape_cast %39 : vector<1x1x32x32xf32> to vector<32x32xf32>
    %cst_64 = arith.constant dense<0.000000e+00> : vector<512x32xf32>
    %41 = tpu.matmul %38, %40, %cst_64 {dimension_numbers = #tpu.dot_dimension_numbers<[1], [0], [0], [1], [0, 0, 1, 1], [], []>} : vector<512x32xf32>, vector<32x32xf32>, vector<512x32xf32> -> vector<512x32xf32>
    %42 = arith.addf %36, %41 : vector<512x32xf32>
    %c0_65 = arith.constant 0 : index
    %c1_66 = arith.constant 1 : index
    %c1_67 = arith.constant 1 : index
    %c0_68 = arith.constant 0 : index
    %43 = vector.load %arg17[%c0_65, %c1_66, %c1_67, %c0_68] : memref<2x18x18x32xf32, #tpu.memory_space<vmem>>, vector<2x16x16x32xf32>
    %44 = vector.shape_cast %43 : vector<2x16x16x32xf32> to vector<512x32xf32>
    %c1_69 = arith.constant 1 : index
    %c1_70 = arith.constant 1 : index
    %c0_71 = arith.constant 0 : index
    %c0_72 = arith.constant 0 : index
    %45 = vector.load %arg4[%c1_69, %c1_70, %c0_71, %c0_72] : memref<3x3x32x32xf32, #tpu.memory_space<vmem>>, vector<1x1x32x32xf32>
    %46 = vector.shape_cast %45 : vector<1x1x32x32xf32> to vector<32x32xf32>
    %cst_73 = arith.constant dense<0.000000e+00> : vector<512x32xf32>
    %47 = tpu.matmul %44, %46, %cst_73 {dimension_numbers = #tpu.dot_dimension_numbers<[1], [0], [0], [1], [0, 0, 1, 1], [], []>} : vector<512x32xf32>, vector<32x32xf32>, vector<512x32xf32> -> vector<512x32xf32>
    %48 = arith.addf %42, %47 : vector<512x32xf32>
    %c0_74 = arith.constant 0 : index
    %c1_75 = arith.constant 1 : index
    %c2_76 = arith.constant 2 : index
    %c0_77 = arith.constant 0 : index
    %49 = vector.load %arg17[%c0_74, %c1_75, %c2_76, %c0_77] : memref<2x18x18x32xf32, #tpu.memory_space<vmem>>, vector<2x16x16x32xf32>
    %50 = vector.shape_cast %49 : vector<2x16x16x32xf32> to vector<512x32xf32>
    %c1_78 = arith.constant 1 : index
    %c2_79 = arith.constant 2 : index
    %c0_80 = arith.constant 0 : index
    %c0_81 = arith.constant 0 : index
    %51 = vector.load %arg4[%c1_78, %c2_79, %c0_80, %c0_81] : memref<3x3x32x32xf32, #tpu.memory_space<vmem>>, vector<1x1x32x32xf32>
    %52 = vector.shape_cast %51 : vector<1x1x32x32xf32> to vector<32x32xf32>
    %cst_82 = arith.constant dense<0.000000e+00> : vector<512x32xf32>
    %53 = tpu.matmul %50, %52, %cst_82 {dimension_numbers = #tpu.dot_dimension_numbers<[1], [0], [0], [1], [0, 0, 1, 1], [], []>} : vector<512x32xf32>, vector<32x32xf32>, vector<512x32xf32> -> vector<512x32xf32>
    %54 = arith.addf %48, %53 : vector<512x32xf32>
    %c0_83 = arith.constant 0 : index
    %c2_84 = arith.constant 2 : index
    %c0_85 = arith.constant 0 : index
    %c0_86 = arith.constant 0 : index
    %55 = vector.load %arg17[%c0_83, %c2_84, %c0_85, %c0_86] : memref<2x18x18x32xf32, #tpu.memory_space<vmem>>, vector<2x16x16x32xf32>
    %56 = vector.shape_cast %55 : vector<2x16x16x32xf32> to vector<512x32xf32>
    %c2_87 = arith.constant 2 : index
    %c0_88 = arith.constant 0 : index
    %c0_89 = arith.constant 0 : index
    %c0_90 = arith.constant 0 : index
    %57 = vector.load %arg4[%c2_87, %c0_88, %c0_89, %c0_90] : memref<3x3x32x32xf32, #tpu.memory_space<vmem>>, vector<1x1x32x32xf32>
    %58 = vector.shape_cast %57 : vector<1x1x32x32xf32> to vector<32x32xf32>
    %cst_91 = arith.constant dense<0.000000e+00> : vector<512x32xf32>
    %59 = tpu.matmul %56, %58, %cst_91 {dimension_numbers = #tpu.dot_dimension_numbers<[1], [0], [0], [1], [0, 0, 1, 1], [], []>} : vector<512x32xf32>, vector<32x32xf32>, vector<512x32xf32> -> vector<512x32xf32>
    %60 = arith.addf %54, %59 : vector<512x32xf32>
    %c0_92 = arith.constant 0 : index
    %c2_93 = arith.constant 2 : index
    %c1_94 = arith.constant 1 : index
    %c0_95 = arith.constant 0 : index
    %61 = vector.load %arg17[%c0_92, %c2_93, %c1_94, %c0_95] : memref<2x18x18x32xf32, #tpu.memory_space<vmem>>, vector<2x16x16x32xf32>
    %62 = vector.shape_cast %61 : vector<2x16x16x32xf32> to vector<512x32xf32>
    %c2_96 = arith.constant 2 : index
    %c1_97 = arith.constant 1 : index
    %c0_98 = arith.constant 0 : index
    %c0_99 = arith.constant 0 : index
    %63 = vector.load %arg4[%c2_96, %c1_97, %c0_98, %c0_99] : memref<3x3x32x32xf32, #tpu.memory_space<vmem>>, vector<1x1x32x32xf32>
    %64 = vector.shape_cast %63 : vector<1x1x32x32xf32> to vector<32x32xf32>
    %cst_100 = arith.constant dense<0.000000e+00> : vector<512x32xf32>
    %65 = tpu.matmul %62, %64, %cst_100 {dimension_numbers = #tpu.dot_dimension_numbers<[1], [0], [0], [1], [0, 0, 1, 1], [], []>} : vector<512x32xf32>, vector<32x32xf32>, vector<512x32xf32> -> vector<512x32xf32>
    %66 = arith.addf %60, %65 : vector<512x32xf32>
    %c0_101 = arith.constant 0 : index
    %c2_102 = arith.constant 2 : index
    %c2_103 = arith.constant 2 : index
    %c0_104 = arith.constant 0 : index
    %67 = vector.load %arg17[%c0_101, %c2_102, %c2_103, %c0_104] : memref<2x18x18x32xf32, #tpu.memory_space<vmem>>, vector<2x16x16x32xf32>
    %68 = vector.shape_cast %67 : vector<2x16x16x32xf32> to vector<512x32xf32>
    %c2_105 = arith.constant 2 : index
    %c2_106 = arith.constant 2 : index
    %c0_107 = arith.constant 0 : index
    %c0_108 = arith.constant 0 : index
    %69 = vector.load %arg4[%c2_105, %c2_106, %c0_107, %c0_108] : memref<3x3x32x32xf32, #tpu.memory_space<vmem>>, vector<1x1x32x32xf32>
    %70 = vector.shape_cast %69 : vector<1x1x32x32xf32> to vector<32x32xf32>
    %cst_109 = arith.constant dense<0.000000e+00> : vector<512x32xf32>
    %71 = tpu.matmul %68, %70, %cst_109 {dimension_numbers = #tpu.dot_dimension_numbers<[1], [0], [0], [1], [0, 0, 1, 1], [], []>} : vector<512x32xf32>, vector<32x32xf32>, vector<512x32xf32> -> vector<512x32xf32>
    %72 = arith.addf %66, %71 : vector<512x32xf32>
    %cst_110 = arith.constant 0.000000e+00 : f32
    %73 = vector.broadcast %cst_110 : f32 to vector<512x32xf32>
    %74 = arith.maximumf %72, %73 : vector<512x32xf32>
    %75 = vector.shape_cast %74 : vector<512x32xf32> to vector<2x16x16x32xf32>
    %cst_111 = arith.constant dense<0.000000e+00> : vector<2x16x32xf32>
    %76 = vector.multi_reduction <add>, %75, %cst_111 [2] : vector<2x16x16x32xf32> to vector<2x16x32xf32>
    %cst_112 = arith.constant 1.600000e+01 : f32
    %77 = vector.broadcast %cst_112 : f32 to vector<2x16x32xf32>
    %78 = arith.divf %76, %77 : vector<2x16x32xf32>
    %cst_113 = arith.constant dense<0.000000e+00> : vector<2x16x32xf32>
    %79 = vector.multi_reduction <add>, %75, %cst_113 [1] : vector<2x16x16x32xf32> to vector<2x16x32xf32>
    %cst_114 = arith.constant 1.600000e+01 : f32
    %80 = vector.broadcast %cst_114 : f32 to vector<2x16x32xf32>
    %81 = arith.divf %79, %80 : vector<2x16x32xf32>
    %cst_115 = arith.constant 0.000000e+00 : f32
    %82 = vector.broadcast %cst_115 : f32 to vector<2x1x32xf32>
    %83 = tpu.concatenate %82, %78, %82 in 1 : vector<2x1x32xf32>, vector<2x16x32xf32>, vector<2x1x32xf32> -> vector<2x18x32xf32>
    %84 = tpu.concatenate %82, %81, %82 in 1 : vector<2x1x32xf32>, vector<2x16x32xf32>, vector<2x1x32xf32> -> vector<2x18x32xf32>
    %c0_116 = arith.constant 0 : index
    %c0_117 = arith.constant 0 : index
    %85 = vector.load %arg7[%c0_116, %c0_117] : memref<1x32xf32, #tpu.memory_space<vmem>>, vector<1x32xf32>
    %c0_118 = arith.constant 0 : index
    %c0_119 = arith.constant 0 : index
    %86 = vector.load %arg9[%c0_118, %c0_119] : memref<1x32xf32, #tpu.memory_space<vmem>>, vector<1x32xf32>
    %87 = vector.extract_strided_slice %83 {offsets = [0, 0, 0], sizes = [2, 16, 32], strides = [1, 1, 1]} : vector<2x18x32xf32> to vector<2x16x32xf32>
    %88 = vector.shape_cast %87 : vector<2x16x32xf32> to vector<32x32xf32>
    %c0_120 = arith.constant 0 : index
    %c0_121 = arith.constant 0 : index
    %c0_122 = arith.constant 0 : index
    %89 = vector.load %arg6[%c0_120, %c0_121, %c0_122] : memref<3x32x32xf32, #tpu.memory_space<vmem>>, vector<1x32x32xf32>
    %90 = vector.shape_cast %89 : vector<1x32x32xf32> to vector<32x32xf32>
    %cst_123 = arith.constant dense<0.000000e+00> : vector<32x32xf32>
    %91 = tpu.matmul %88, %90, %cst_123 {dimension_numbers = #tpu.dot_dimension_numbers<[1], [0], [0], [1], [0, 0, 1, 1], [], []>} : vector<32x32xf32>, vector<32x32xf32>, vector<32x32xf32> -> vector<32x32xf32>
    %92 = vector.broadcast %85 : vector<1x32xf32> to vector<32x32xf32>
    %93 = arith.addf %92, %91 : vector<32x32xf32>
    %94 = vector.extract_strided_slice %84 {offsets = [0, 0, 0], sizes = [2, 16, 32], strides = [1, 1, 1]} : vector<2x18x32xf32> to vector<2x16x32xf32>
    %95 = vector.shape_cast %94 : vector<2x16x32xf32> to vector<32x32xf32>
    %c0_124 = arith.constant 0 : index
    %c0_125 = arith.constant 0 : index
    %c0_126 = arith.constant 0 : index
    %96 = vector.load %arg8[%c0_124, %c0_125, %c0_126] : memref<3x32x32xf32, #tpu.memory_space<vmem>>, vector<1x32x32xf32>
    %97 = vector.shape_cast %96 : vector<1x32x32xf32> to vector<32x32xf32>
    %cst_127 = arith.constant dense<0.000000e+00> : vector<32x32xf32>
    %98 = tpu.matmul %95, %97, %cst_127 {dimension_numbers = #tpu.dot_dimension_numbers<[1], [0], [0], [1], [0, 0, 1, 1], [], []>} : vector<32x32xf32>, vector<32x32xf32>, vector<32x32xf32> -> vector<32x32xf32>
    %99 = vector.broadcast %86 : vector<1x32xf32> to vector<32x32xf32>
    %100 = arith.addf %99, %98 : vector<32x32xf32>
    %101 = vector.extract_strided_slice %83 {offsets = [0, 1, 0], sizes = [2, 16, 32], strides = [1, 1, 1]} : vector<2x18x32xf32> to vector<2x16x32xf32>
    %102 = vector.shape_cast %101 : vector<2x16x32xf32> to vector<32x32xf32>
    %c1_128 = arith.constant 1 : index
    %c0_129 = arith.constant 0 : index
    %c0_130 = arith.constant 0 : index
    %103 = vector.load %arg6[%c1_128, %c0_129, %c0_130] : memref<3x32x32xf32, #tpu.memory_space<vmem>>, vector<1x32x32xf32>
    %104 = vector.shape_cast %103 : vector<1x32x32xf32> to vector<32x32xf32>
    %cst_131 = arith.constant dense<0.000000e+00> : vector<32x32xf32>
    %105 = tpu.matmul %102, %104, %cst_131 {dimension_numbers = #tpu.dot_dimension_numbers<[1], [0], [0], [1], [0, 0, 1, 1], [], []>} : vector<32x32xf32>, vector<32x32xf32>, vector<32x32xf32> -> vector<32x32xf32>
    %106 = arith.addf %93, %105 : vector<32x32xf32>
    %107 = vector.extract_strided_slice %84 {offsets = [0, 1, 0], sizes = [2, 16, 32], strides = [1, 1, 1]} : vector<2x18x32xf32> to vector<2x16x32xf32>
    %108 = vector.shape_cast %107 : vector<2x16x32xf32> to vector<32x32xf32>
    %c1_132 = arith.constant 1 : index
    %c0_133 = arith.constant 0 : index
    %c0_134 = arith.constant 0 : index
    %109 = vector.load %arg8[%c1_132, %c0_133, %c0_134] : memref<3x32x32xf32, #tpu.memory_space<vmem>>, vector<1x32x32xf32>
    %110 = vector.shape_cast %109 : vector<1x32x32xf32> to vector<32x32xf32>
    %cst_135 = arith.constant dense<0.000000e+00> : vector<32x32xf32>
    %111 = tpu.matmul %108, %110, %cst_135 {dimension_numbers = #tpu.dot_dimension_numbers<[1], [0], [0], [1], [0, 0, 1, 1], [], []>} : vector<32x32xf32>, vector<32x32xf32>, vector<32x32xf32> -> vector<32x32xf32>
    %112 = arith.addf %100, %111 : vector<32x32xf32>
    %113 = vector.extract_strided_slice %83 {offsets = [0, 2, 0], sizes = [2, 16, 32], strides = [1, 1, 1]} : vector<2x18x32xf32> to vector<2x16x32xf32>
    %114 = vector.shape_cast %113 : vector<2x16x32xf32> to vector<32x32xf32>
    %c2_136 = arith.constant 2 : index
    %c0_137 = arith.constant 0 : index
    %c0_138 = arith.constant 0 : index
    %115 = vector.load %arg6[%c2_136, %c0_137, %c0_138] : memref<3x32x32xf32, #tpu.memory_space<vmem>>, vector<1x32x32xf32>
    %116 = vector.shape_cast %115 : vector<1x32x32xf32> to vector<32x32xf32>
    %cst_139 = arith.constant dense<0.000000e+00> : vector<32x32xf32>
    %117 = tpu.matmul %114, %116, %cst_139 {dimension_numbers = #tpu.dot_dimension_numbers<[1], [0], [0], [1], [0, 0, 1, 1], [], []>} : vector<32x32xf32>, vector<32x32xf32>, vector<32x32xf32> -> vector<32x32xf32>
    %118 = arith.addf %106, %117 : vector<32x32xf32>
    %119 = vector.extract_strided_slice %84 {offsets = [0, 2, 0], sizes = [2, 16, 32], strides = [1, 1, 1]} : vector<2x18x32xf32> to vector<2x16x32xf32>
    %120 = vector.shape_cast %119 : vector<2x16x32xf32> to vector<32x32xf32>
    %c2_140 = arith.constant 2 : index
    %c0_141 = arith.constant 0 : index
    %c0_142 = arith.constant 0 : index
    %121 = vector.load %arg8[%c2_140, %c0_141, %c0_142] : memref<3x32x32xf32, #tpu.memory_space<vmem>>, vector<1x32x32xf32>
    %122 = vector.shape_cast %121 : vector<1x32x32xf32> to vector<32x32xf32>
    %cst_143 = arith.constant dense<0.000000e+00> : vector<32x32xf32>
    %123 = tpu.matmul %120, %122, %cst_143 {dimension_numbers = #tpu.dot_dimension_numbers<[1], [0], [0], [1], [0, 0, 1, 1], [], []>} : vector<32x32xf32>, vector<32x32xf32>, vector<32x32xf32> -> vector<32x32xf32>
    %124 = arith.addf %112, %123 : vector<32x32xf32>
    %125 = vector.shape_cast %118 : vector<32x32xf32> to vector<2x16x1x32xf32>
    %126 = vector.shape_cast %124 : vector<32x32xf32> to vector<2x1x16x32xf32>
    %127 = vector.broadcast %125 : vector<2x16x1x32xf32> to vector<2x16x16x32xf32>
    %128 = vector.broadcast %126 : vector<2x1x16x32xf32> to vector<2x16x16x32xf32>
    %129 = arith.addf %127, %128 : vector<2x16x16x32xf32>
    %cst_144 = arith.constant 0.000000e+00 : f32
    %130 = vector.broadcast %cst_144 : f32 to vector<2x16x16x32xf32>
    %131 = arith.maximumf %129, %130 : vector<2x16x16x32xf32>
    %132 = vector.shape_cast %131 : vector<2x16x16x32xf32> to vector<512x32xf32>
    %c0_145 = arith.constant 0 : index
    %c0_146 = arith.constant 0 : index
    %133 = vector.load %arg10[%c0_145, %c0_146] : memref<32x32xf32, #tpu.memory_space<vmem>>, vector<32x32xf32>
    %cst_147 = arith.constant dense<0.000000e+00> : vector<512x32xf32>
    %134 = tpu.matmul %132, %133, %cst_147 {dimension_numbers = #tpu.dot_dimension_numbers<[1], [0], [0], [1], [0, 0, 1, 1], [], []>} : vector<512x32xf32>, vector<32x32xf32>, vector<512x32xf32> -> vector<512x32xf32>
    %c0_148 = arith.constant 0 : index
    %c0_149 = arith.constant 0 : index
    %135 = vector.load %arg11[%c0_148, %c0_149] : memref<1x32xf32, #tpu.memory_space<vmem>>, vector<1x32xf32>
    %136 = vector.broadcast %135 : vector<1x32xf32> to vector<512x32xf32>
    %137 = arith.addf %134, %136 : vector<512x32xf32>
    %138 = arith.negf %137 : vector<512x32xf32>
    %139 = math.exp %138 : vector<512x32xf32>
    %cst_150 = arith.constant 1.000000e+00 : f32
    %140 = vector.broadcast %cst_150 : f32 to vector<512x32xf32>
    %141 = arith.addf %140, %139 : vector<512x32xf32>
    %142 = arith.divf %140, %141 : vector<512x32xf32>
    %143 = arith.mulf %74, %142 : vector<512x32xf32>
    %c0_151 = arith.constant 0 : index
    %c0_152 = arith.constant 0 : index
    %144 = vector.load %arg12[%c0_151, %c0_152] : memref<32x128xf32, #tpu.memory_space<vmem>>, vector<32x128xf32>
    %cst_153 = arith.constant dense<0.000000e+00> : vector<512x128xf32>
    %145 = tpu.matmul %143, %144, %cst_153 {dimension_numbers = #tpu.dot_dimension_numbers<[1], [0], [0], [1], [0, 0, 1, 1], [], []>} : vector<512x32xf32>, vector<32x128xf32>, vector<512x128xf32> -> vector<512x128xf32>
    %c0_154 = arith.constant 0 : index
    %c0_155 = arith.constant 0 : index
    %146 = vector.load %arg13[%c0_154, %c0_155] : memref<1x128xf32, #tpu.memory_space<vmem>>, vector<1x128xf32>
    %147 = vector.broadcast %146 : vector<1x128xf32> to vector<512x128xf32>
    %148 = arith.addf %145, %147 : vector<512x128xf32>
    %149 = vector.shape_cast %148 : vector<512x128xf32> to vector<2x256x128xf32>
    %cst_156 = arith.constant dense<0.000000e+00> : vector<2x128xf32>
    %150 = vector.multi_reduction <add>, %149, %cst_156 [1] : vector<2x256x128xf32> to vector<2x128xf32>
    %cst_157 = arith.constant 2.560000e+02 : f32
    %151 = vector.broadcast %cst_157 : f32 to vector<2x128xf32>
    %152 = arith.divf %150, %151 : vector<2x128xf32>
    %153 = vector.shape_cast %152 : vector<2x128xf32> to vector<2x1x128xf32>
    %c0_158 = arith.constant 0 : index
    %c0_159 = arith.constant 0 : index
    %154 = vector.load %arg14[%c0_158, %c0_159] : memref<8x128xf32, #tpu.memory_space<vmem>>, vector<8x128xf32>
    %155 = vector.shape_cast %154 : vector<8x128xf32> to vector<1x8x128xf32>
    %156 = vector.broadcast %153 : vector<2x1x128xf32> to vector<2x8x128xf32>
    %157 = vector.broadcast %155 : vector<1x8x128xf32> to vector<2x8x128xf32>
    %158 = arith.mulf %156, %157 : vector<2x8x128xf32>
    %cst_160 = arith.constant dense<0.000000e+00> : vector<2x8xf32>
    %159 = vector.multi_reduction <add>, %158, %cst_160 [2] : vector<2x8x128xf32> to vector<2x8xf32>
    %cst_161 = arith.constant 0.000000e+00 : f32
    %160 = vector.broadcast %cst_161 : f32 to vector<2x8xf32>
    %161 = arith.maximumf %159, %160 : vector<2x8xf32>
    %162 = vector.shape_cast %161 : vector<2x8xf32> to vector<2x8x1xf32>
    %c0_162 = arith.constant 0 : index
    %c0_163 = arith.constant 0 : index
    %163 = vector.load %arg15[%c0_162, %c0_163] : memref<8x128xf32, #tpu.memory_space<vmem>>, vector<8x128xf32>
    %164 = vector.shape_cast %163 : vector<8x128xf32> to vector<1x8x128xf32>
    %165 = vector.broadcast %162 : vector<2x8x1xf32> to vector<2x8x128xf32>
    %166 = vector.broadcast %164 : vector<1x8x128xf32> to vector<2x8x128xf32>
    %167 = arith.mulf %165, %166 : vector<2x8x128xf32>
    %cst_164 = arith.constant dense<0.000000e+00> : vector<2x128xf32>
    %168 = vector.multi_reduction <add>, %167, %cst_164 [1] : vector<2x8x128xf32> to vector<2x128xf32>
    %169 = arith.negf %168 : vector<2x128xf32>
    %170 = math.exp %169 : vector<2x128xf32>
    %cst_165 = arith.constant 1.000000e+00 : f32
    %171 = vector.broadcast %cst_165 : f32 to vector<2x128xf32>
    %172 = arith.addf %171, %170 : vector<2x128xf32>
    %173 = arith.divf %171, %172 : vector<2x128xf32>
    %174 = vector.shape_cast %173 : vector<2x128xf32> to vector<2x1x128xf32>
    %175 = vector.broadcast %174 : vector<2x1x128xf32> to vector<2x256x128xf32>
    %176 = arith.mulf %149, %175 : vector<2x256x128xf32>
    %177 = vector.shape_cast %1 : vector<512x128xf32> to vector<2x256x128xf32>
    %178 = arith.addf %176, %177 : vector<2x256x128xf32>
    %cst_166 = arith.constant 0.000000e+00 : f32
    %179 = vector.broadcast %cst_166 : f32 to vector<2x256x128xf32>
    %180 = arith.maximumf %178, %179 : vector<2x256x128xf32>
    %181 = vector.shape_cast %180 : vector<2x256x128xf32> to vector<2x16x16x128xf32>
    %c0_167 = arith.constant 0 : index
    %c0_168 = arith.constant 0 : index
    %c0_169 = arith.constant 0 : index
    %c0_170 = arith.constant 0 : index
    %182 = vector.load %arg16[%c0_167, %c0_168, %c0_169, %c0_170] : memref<2x16x16x128xf32, #tpu.memory_space<vmem>>, vector<2x16x16x128xf32>
    tpu.vector_store %arg16[%c0_167, %c0_168, %c0_169, %c0_170], %181 {strides = array<i32>} : memref<2x16x16x128xf32, #tpu.memory_space<vmem>>, vector<2x16x16x128xf32>,
    return
  }
  func.func @transform_0(%arg0: i32) -> (i32, i32, i32, i32) {
    %c0_i32 = arith.constant 0 : i32
    %c0_i32_0 = arith.constant 0 : i32
    %c0_i32_1 = arith.constant 0 : i32
    %c0_i32_2 = arith.constant 0 : i32
    return %arg0, %c0_i32, %c0_i32_0, %c0_i32_1 : i32, i32, i32, i32
  }
  func.func @transform_1(%arg0: i32) -> (i32, i32) {
    %c0_i32 = arith.constant 0 : i32
    %c0_i32_0 = arith.constant 0 : i32
    %c0_i32_1 = arith.constant 0 : i32
    return %c0_i32, %c0_i32_0 : i32, i32
  }
  func.func @transform_2(%arg0: i32) -> (i32, i32) {
    %c0_i32 = arith.constant 0 : i32
    %c0_i32_0 = arith.constant 0 : i32
    %c0_i32_1 = arith.constant 0 : i32
    return %c0_i32, %c0_i32_0 : i32, i32
  }
  func.func @transform_3(%arg0: i32) -> (i32, i32, i32, i32) {
    %c0_i32 = arith.constant 0 : i32
    %c0_i32_0 = arith.constant 0 : i32
    %c0_i32_1 = arith.constant 0 : i32
    %c0_i32_2 = arith.constant 0 : i32
    %c0_i32_3 = arith.constant 0 : i32
    return %c0_i32, %c0_i32_0, %c0_i32_1, %c0_i32_2 : i32, i32, i32, i32
  }
  func.func @transform_4(%arg0: i32) -> (i32, i32) {
    %c0_i32 = arith.constant 0 : i32
    %c0_i32_0 = arith.constant 0 : i32
    %c0_i32_1 = arith.constant 0 : i32
    return %c0_i32, %c0_i32_0 : i32, i32
  }
  func.func @transform_5(%arg0: i32) -> (i32, i32, i32) {
    %c0_i32 = arith.constant 0 : i32
    %c0_i32_0 = arith.constant 0 : i32
    %c0_i32_1 = arith.constant 0 : i32
    %c0_i32_2 = arith.constant 0 : i32
    return %c0_i32, %c0_i32_0, %c0_i32_1 : i32, i32, i32
  }
  func.func @transform_6(%arg0: i32) -> (i32, i32) {
    %c0_i32 = arith.constant 0 : i32
    %c0_i32_0 = arith.constant 0 : i32
    %c0_i32_1 = arith.constant 0 : i32
    return %c0_i32, %c0_i32_0 : i32, i32
  }
  func.func @transform_7(%arg0: i32) -> (i32, i32, i32) {
    %c0_i32 = arith.constant 0 : i32
    %c0_i32_0 = arith.constant 0 : i32
    %c0_i32_1 = arith.constant 0 : i32
    %c0_i32_2 = arith.constant 0 : i32
    return %c0_i32, %c0_i32_0, %c0_i32_1 : i32, i32, i32
  }
  func.func @transform_8(%arg0: i32) -> (i32, i32) {
    %c0_i32 = arith.constant 0 : i32
    %c0_i32_0 = arith.constant 0 : i32
    %c0_i32_1 = arith.constant 0 : i32
    return %c0_i32, %c0_i32_0 : i32, i32
  }
  func.func @transform_9(%arg0: i32) -> (i32, i32) {
    %c0_i32 = arith.constant 0 : i32
    %c0_i32_0 = arith.constant 0 : i32
    %c0_i32_1 = arith.constant 0 : i32
    return %c0_i32, %c0_i32_0 : i32, i32
  }
  func.func @transform_10(%arg0: i32) -> (i32, i32) {
    %c0_i32 = arith.constant 0 : i32
    %c0_i32_0 = arith.constant 0 : i32
    %c0_i32_1 = arith.constant 0 : i32
    return %c0_i32, %c0_i32_0 : i32, i32
  }
  func.func @transform_11(%arg0: i32) -> (i32, i32) {
    %c0_i32 = arith.constant 0 : i32
    %c0_i32_0 = arith.constant 0 : i32
    %c0_i32_1 = arith.constant 0 : i32
    return %c0_i32, %c0_i32_0 : i32, i32
  }
  func.func @transform_12(%arg0: i32) -> (i32, i32) {
    %c0_i32 = arith.constant 0 : i32
    %c0_i32_0 = arith.constant 0 : i32
    %c0_i32_1 = arith.constant 0 : i32
    return %c0_i32, %c0_i32_0 : i32, i32
  }
  func.func @transform_13(%arg0: i32) -> (i32, i32) {
    %c0_i32 = arith.constant 0 : i32
    %c0_i32_0 = arith.constant 0 : i32
    %c0_i32_1 = arith.constant 0 : i32
    return %c0_i32, %c0_i32_0 : i32, i32
  }
  func.func @transform_14(%arg0: i32) -> (i32, i32) {
    %c0_i32 = arith.constant 0 : i32
    %c0_i32_0 = arith.constant 0 : i32
    %c0_i32_1 = arith.constant 0 : i32
    return %c0_i32, %c0_i32_0 : i32, i32
  }
  func.func @transform_15(%arg0: i32) -> (i32, i32, i32, i32) {
    %c0_i32 = arith.constant 0 : i32
    %c0_i32_0 = arith.constant 0 : i32
    %c0_i32_1 = arith.constant 0 : i32
    %c0_i32_2 = arith.constant 0 : i32
    return %arg0, %c0_i32, %c0_i32_0, %c0_i32_1 : i32, i32, i32, i32
  }
}

</mosaic_0001>

<bundles_post_ra>
// kernel: tpu_custom_call.1
= control target key start
LH: loop header
LB: loop body
LE: loop exit
PB: predicated region body
PF: predicated region fallthrough
CT: control target
= control target key end

     0   :  { %s20447_s0 = inlined_call_operand.hbm [shape: f32[4,16,16,128], index: 0, kind: input, shape index: {}]   ;;  %s20448_s1 = inlined_call_operand.vmem [shape: f32[128,32], index: 1, kind: input, shape index: {}]   ;;  %s20449_s2 = inlined_call_operand.vmem [shape: f32[1,32], index: 2, kind: input, shape index: {}]   ;;  %s20450_s3 = inlined_call_operand.hbm [shape: f32[3,3,32,32], index: 3, kind: input, shape index: {}]   ;;  %s20451_s4 = inlined_call_operand.vmem [shape: f32[1,32], index: 4, kind: input, shape index: {}]   ;;  %s20452_s5 = inlined_call_operand.vmem [shape: f32[3,32,32], index: 5, kind: input, shape index: {}]   ;;  %s20453_s6 = inlined_call_operand.vmem [shape: f32[1,32], index: 6, kind: input, shape index: {}]   ;;  %s20454_s7 = inlined_call_operand.hbm [shape: f32[3,32,32], index: 7, kind: input, shape index: {}]   ;;  %s20455_s8 = inlined_call_operand.vmem [shape: f32[1,32], index: 8, kind: input, shape index: {}]   ;;  %s20456_s9 = inlined_call_operand.vmem [shape: f32[32,32], index: 9, kind: input, shape index: {}]   ;;  %s20457_s10 = inlined_call_operand.vmem [shape: f32[1,32], index: 10, kind: input, shape index: {}]   ;;  %s20458_s11 = inlined_call_operand.vmem [shape: f32[32,128], index: 11, kind: input, shape index: {}]   ;;  %s20459_s12 = inlined_call_operand.vmem [shape: f32[1,128], index: 12, kind: input, shape index: {}]   ;;  %s20460_s13 = inlined_call_operand.vmem [shape: f32[8,128], index: 13, kind: input, shape index: {}]   ;;  %s20461_s14 = inlined_call_operand.vmem [shape: f32[8,128], index: 14, kind: input, shape index: {}]   ;;  %s20462_s15 = inlined_call_operand.hbm [shape: f32[4,16,16,128], index: 15, kind: output, shape index: {}]  }
   0x1   :  { %20622 = sst [smem:[#allocation76_spill]] %s20457_s10 }
   0x2   :  { %20623 = sst [smem:[#allocation77_spill]] %s20459_s12 }
   0x3   :  { %20624 = sst [smem:[#allocation78_spill]] %s20460_s13 }
   0x4   :  { %20625 = sst [smem:[#allocation79_spill]] %s20461_s14 }
   0x5   :  { %20626 = sst [smem:[#allocation80_spill]] %s20462_s15 }
   0x6   :  { %20 = vsyncpa [#allocation4], 0 }
   0x7   :  { %22 = vsyncpa [#allocation4 + $0x1], 0 }
   0x8   :  { %23 = vsyncpa [#allocation7], 0 }
   0x9   :  { %24 = vsyncpa [#allocation5], 0 }
   0xa   :  { %26 = vsyncpa [#allocation5 + $0x1], 0  ;;  %s15920_s18 = smov 0   ;;  %s15922_s19 = smov 0  }
   0xb   :  { %s15924_s20 = smov 0   ;;  %s15926_s21 = smov 0  }
   0xc LB: > { %20627 = sst [smem:[#allocation13_spill]] %s15816_s18  ;;  %s15941_s22 = sadd.s32 4294967295, %s15828_s21   ;;  %s15828_s21 = sphi %s15926_s21, %s20990_s21   ;;  %s15824_s20 = sphi %s15924_s20, %s20989_s20   ;;  %s15820_s19 = sphi %s15922_s19, %s20988_s19   ;;  %s15816_s18 = sphi %s15920_s18, %s20987_s18  }
   0xd   : > { %s11434_s23 = sadd.s32 4294967294, %s15828_s21   ;;  %p52_p0 = scmp.ne.s32.totalorder %s15820_s19, %s15816_s18 }
   0xe   : > { %p20466_p1 = scmp.eq.s32.totalorder %s15941_s22, 0  ;;  %p376_p3 = scmp.eq.s32.totalorder %s11434_s23, 1 }
   0xf   : > { %p11435_p5 = scmp.ge.s32.totalorder %s15828_s21, 1  ;;  %p383_p7 = scmp.lt.s32.totalorder %s15828_s21, 3 }
  0x10   : > { %p15950_p4 = por %p20466_p1, %p52_p0  ;;  %p15955_p6 = por %p376_p3, %p52_p0 }
  0x11   : > { %p15960_p8 = pnand %p11435_p5, %p383_p7  ;;  %s15830_s27 = smov [#allocation6]  }
  0x12   : > { %s20628_s24 = scalar_select %p15950_p4, 1, 0 }
  0x13   : > { %s20629_s25 = scalar_select %p15955_p6, 1, 0 }
  0x14   : > { %s401_s28 = sshll.u32 %s15830_s27, 4  ;;  %p15282_p9 = pneg %p15960_p8  ;;  %s15964_s28 = int_to_ptr.vmem [resolvable:$true] %s401_s28 }
  0x15   : > { %20630 = sst [smem:[#allocation14_spill]] %s20629_s25  ;;  %s15831_s30 = smov [#allocation8]  }
  0x16   : > { %p15971_p11 = pnand %p15282_p9, %p20466_p1  ;;  %s423_s16 = sshll.u32 %s15831_s30, 4  ;;  %s15975_s16 = int_to_ptr.vmem [resolvable:$true] %s423_s16 }
  0x17   : > { %s15672_s27 = scalar_lea.hbm %s20450_s3, 4608 }
  0x18   : > { %p15673_p12 = scmp.ne.s32.totalorder %s20450_s3, %s15672_s27  ;;  %p15674_p13 = pneg %p15971_p11 }
  0x19   : > { %p15679_p5 = scmp.lt.u32.totalorder %s15672_s27, %s20450_s3 }
  0x1a   : > { %p15675_p0 = pnand %p15674_p13, %p15673_p12 }
  0x1c   : > { %p15676_p3 = pneg %p15675_p0 }
  0x1e   : > { %p15681_p7 = pnand %p15679_p5, %p15676_p3 }
  0x20   : > { %15684 = shalt.err (!%p15681_p7)
}
  0x21   : > { %s15685_s30 = scalar_lea.vmem %s15964_s28, 4608  ;;  %p15693_p2 = scmp.lt.s32.totalorder %s15964_s28, %s15964_s28 }
  0x22   : > { %p15686_p9 = scmp.ne.s32.totalorder %s15964_s28, %s15685_s30  ;;  %p15694_p12 = scmp.lt.s32.totalorder %s15685_s30, %s15685_s30 }
  0x24   : > { %p15688_p10 = pnand %p15686_p9, %p15674_p13  ;;  %p15695_p0 = por %p15694_p12, %p15693_p2 }
  0x26   : > { %p15689_p1 = pneg %p15688_p10 }
  0x28   : > { %p15696_p6 = pnand %p15695_p0, %p15689_p1 }
  0x2a   : > { %15699 = shalt.err (!%p15696_p6)
}
  0x2b   : > { %s20468_s14 = smov 128   ;;  %s20469_s15 = smov 8  }
  0x2c   : > { %15285 = dma.hbm_to_vmem [thread:$0]  (!%p15971_p11), %s20450_s3, 4608, %s15964_s28, [#allocation7], %s20468_s14, %s20468_s14, %s20469_s15  }
  0x2d   : > { %s15700_s27 = scalar_lea.hbm %s20454_s7, 1536 }
  0x2e   : > { %p15701_p1 = scmp.ne.s32.totalorder %s20454_s7, %s15700_s27  ;;  %p15707_p10 = scmp.lt.u32.totalorder %s15700_s27, %s20454_s7 }
  0x30   : > { %p15703_p2 = pnand %p15701_p1, %p15674_p13 }
  0x32   : > { %p15704_p6 = pneg %p15703_p2 }
  0x34   : > { %p15709_p3 = pnand %p15707_p10, %p15704_p6 }
  0x36   : > { %15712 = shalt.err (!%p15709_p3)
}
  0x37   : > { %s15713_s28 = scalar_lea.vmem %s15975_s16, 1536  ;;  %p15721_p12 = scmp.lt.s32.totalorder %s15975_s16, %s15975_s16 }
  0x38   : > { %p15714_p5 = scmp.ne.s32.totalorder %s15975_s16, %s15713_s28  ;;  %p15722_p0 = scmp.lt.s32.totalorder %s15713_s28, %s15713_s28 }
  0x3a   : > { %p15716_p7 = pnand %p15714_p5, %p15674_p13  ;;  %p15723_p1 = por %p15722_p0, %p15721_p12 }
  0x3c   : > { %p15717_p9 = pneg %p15716_p7 }
  0x3e   : > { %p15724_p2 = pnand %p15723_p1, %p15717_p9 }
  0x40   : > { %15727 = shalt.err (!%p15724_p2)
}
  0x41   : > { %15288 = dma.hbm_to_vmem [thread:$0]  (!%p15971_p11), %s20454_s7, 1536, %s15975_s16, [#allocation7], %s20468_s14, %s20468_s14, %s20469_s15  }
  0x42   : > { %s16036_s13 = sadd.s32 1, %s15828_s21   ;;  %s39_s29 = sadd.s32 1, %s15824_s20 }
  0x43   : > { %s36_s18 = ssub.s32 %s15828_s21, %s16036_s13  ;;  %p46_p13 = scmp.ne.s32.totalorder %s15824_s20, %s15820_s19 }
  0x44   : > { %p37_p6 = scmp.eq.s32.totalorder %s36_s18, 0  ;;  %p47_p10 = scmp.eq.s32.totalorder %s15828_s21, 0 }
  0x45   : > { %p20633_p3 = scmp.eq.s32.totalorder %s15941_s22, 1  ;;  %p15299_p7 = scmp.lt.s32.totalorder %s15828_s21, 2 }
  0x46   : > { %s16052_s17 = scalar_select %p37_p6, %s15824_s20, %s39_s29  }
  0x47   : > { %p16046_p5 = por %p20633_p3, %p46_p13  ;;  %p48_p9 = por %p47_p10, %p46_p13 }
  0x48   : > { %s458_s23 = sand.u32 1, %s15824_s20   ;;  %s12263_s16 = sshll.u32 %s15828_s21, 13 }
  0x49   : > { %s20634_s25 = scalar_select %p16046_p5, 1, 0 }
  0x4a   : > { %s11439_s27 = sshll.u32 %s458_s23, 9  ;;  %s16059_s10 = scalar_lea.hbm %s20447_s0, %s12263_s16 }
  0x4b   : > { %s462_s12 = scalar_lea.vmem [#allocation3], %s11439_s27  ;;  %p16063_p11 = pnand %p15299_p7, %p48_p9 }
  0x4c   : > { %s470_s18 = sshll.u32 %s462_s12, 4  ;;  %s16067_s14 = scalar_lea.sflag [#allocation4], %s458_s23  ;;  %s16061_s18 = int_to_ptr.vmem [resolvable:$true] %s470_s18 }
  0x4d   : > { %s15728_s15 = scalar_lea.hbm %s16059_s10, 8192  ;;  %p15730_p0 = pneg %p16063_p11 }
  0x4e   : > { %p15729_p12 = scmp.ne.s32.totalorder %s16059_s10, %s15728_s15  ;;  %s15733_s30 = scalar_lea.hbm %s20447_s0, 16384 }
  0x4f   : > { %p15734_p13 = scmp.lt.u32.totalorder %s16059_s10, %s20447_s0  ;;  %p15735_p6 = scmp.lt.u32.totalorder %s15733_s30, %s15728_s15 }
  0x50   : > { %p15731_p1 = pnand %p15730_p0, %p15729_p12  ;;  %p15737_p3 = scmp.lt.u32.totalorder %s15728_s15, %s16059_s10 }
  0x51   : > { %p15736_p10 = por %p15735_p6, %p15734_p13 }
  0x52   : > { %p15732_p2 = pneg %p15731_p1 }
  0x53   : > { %p15738_p7 = por %p15737_p3, %p15736_p10 }
  0x55   : > { %p15739_p9 = pnand %p15738_p7, %p15732_p2 }
  0x57   : > { %15742 = shalt.err (!%p15739_p9)
}
  0x58   : > { %s15743_s23 = scalar_lea.vmem %s16061_s18, 8192  ;;  %s15834_s27 = smov [#allocation3]  }
  0x59   : > { %p15744_p12 = scmp.ne.s32.totalorder %s16061_s18, %s15743_s23  ;;  %s15748_s16 = sshll.u32 %s15834_s27, 4  ;;  %s15749_s16 = int_to_ptr.vmem [resolvable:$false] %s15748_s16 }
  0x5a   : > { %s15750_s28 = scalar_lea.vmem %s15749_s16, 16384  ;;  %p15751_p4 = scmp.lt.s32.totalorder %s16061_s18, %s15749_s16 }
  0x5b   : > { %p15746_p1 = pnand %p15744_p12, %p15730_p0  ;;  %p15752_p13 = scmp.lt.s32.totalorder %s15750_s28, %s15743_s23 }
  0x5d   : > { %p15747_p5 = pneg %p15746_p1  ;;  %p15753_p6 = por %p15752_p13, %p15751_p4 }
  0x5f   : > { %p15754_p10 = pnand %p15753_p6, %p15747_p5 }
  0x61   : > { %15757 = shalt.err (!%p15754_p10)
}
  0x62   : > { %s20636_s15 = smov 8   ;;  %s20637_s30 = smov 128  }
  0x63   : > { %15292 = dma.hbm_to_vmem [thread:$0]  (!%p16063_p11), %s16059_s10, 8192, %s16061_s18, %s16067_s14, %s20637_s30, %s20637_s30, %s20636_s15  }
  0x64   : > { %482 = sbr.rel (%p15960_p8) target bundleno = 2604 (0xa2c), region = 80 }
  0x6b   : > { %s16101_s12 = sand.u32 1, %s15820_s19   ;;  %p20638_p4 = scmp.ne.s32.totalorder %s20628_s24, 0 }
  0x6c   : > { %s11444_s23 = sshll.u32 %s16101_s12, 9  ;;  %s485_s27 = scalar_lea.sflag [#allocation4], %s16101_s12 }
  0x6d   : > { %s16107_s29 = scalar_lea.vmem [#allocation3], %s11444_s23 }
  0x6e   : > { %15803 = dma.done.wait (%p20638_p4), %s485_s27, 8192  }
  0x6f   : > { %15805 = vsyncadd (%p20638_p4), %s485_s27, 4294959104  ;;  %p20639_p5 = scmp.eq.s32.totalorder %s15941_s22, 0 }
  0x71   : > { %15807 = dma.done.wait (%p20639_p5), [#allocation7], 6144   ;;  %p20640_p8 = pmov %p20639_p5 }
  0x72   : > { %v609_v0 = vld [vmem:[%s20448_s1] sm:$0xff]  ;;  %v610_v1 = vld [vmem:[%s20448_s1 + $0x8] sm:$0xff]  ;;  %v611_v2 = vld [vmem:[%s20448_s1 + $0x10] sm:$0xff]  ;;  %vm1081_vm0 = vcmask 261120   ;;  %vm1096_vm1 = vcmask 253952   ;;  %vm1084_vm2 = vcmask 254976  }
  0x73   : > { %15809 = vsyncadd (%p20640_p8), [#allocation7], 4294961152  ;;  %v14498_v3 = vpack.c.bf16 %v610_v1, %v609_v0  ;;  %v612_v4 = vld [vmem:[%s20448_s1 + $0x18] sm:$0xff]  ;;  %v613_v6 = vld [vmem:[%s20448_s1 + $0x20] sm:$0xff]  ;;  %vm8112_vm3 = vcmask 1042434   ;;  %vm8114_vm4 = vcmask 1043459  }
  0x74   : > { %v14502_v5 = vpack.c.bf16 %v612_v4, %v611_v2  ;;  %v614_v7 = vld [vmem:[%s20448_s1 + $0x28] sm:$0xff]  ;;  %v545_v9 = vld [vmem:[%s16107_s29] sm:$0xff]  ;;  %v615_v10 = vld [vmem:[%s20448_s1 + $0x30] sm:$0xff]  ;;  %vm8116_vm5 = vcmask 1044484   ;;  %vm8118_vm6 = vcmask 1045509   ;;  %vm8120_vm7 = vcmask 1046534  }
  0x75   : > { %14499 = vmatprep.subr.bf16.mxu0 %v14498_v3  ;;  %v14506_v8 = vpack.c.bf16 %v614_v7, %v613_v6  ;;  %v616_v11 = vld [vmem:[%s20448_s1 + $0x38] sm:$0xff]  ;;  %13174 = vmatprep.mubr.f32.mxu0 %v545_v9  ;;  %v617_v13 = vld [vmem:[%s20448_s1 + $0x40] sm:$0xff]  ;;  %v618_v14 = vld [vmem:[%s20448_s1 + $0x48] sm:$0xff]  ;;  %vm8122_vm8 = vcmask 1047559   ;;  %vm8149_vm9 = vcmask 1040384   ;;  %vm8124_vm10 = vcmask 1041409  }
  0x76   : > { %14501 = vmatpush3.bf16.msra.mxu0 %v14498_v3  ;;  %v14510_v12 = vpack.c.bf16 %v616_v11, %v615_v10  ;;  %v14514_v15 = vpack.c.bf16 %v618_v14, %v617_v13  ;;  %v619_v16 = vld [vmem:[%s20448_s1 + $0x50] sm:$0xff]  ;;  %v620_v17 = vld [vmem:[%s20448_s1 + $0x58] sm:$0xff]  ;;  %v621_v19 = vld [vmem:[%s20448_s1 + $0x60] sm:$0xff]  ;;  %vm8394_vm11 = vcmask 1046528   ;;  %vm8621_vm12 = vcmask 1045504   ;;  %s20820_s10 = sld [smem:[#allocation76_spill]] }
  0x77   : > { %14503 = vmatprep.subr.bf16.mxu0 %v14502_v5  ;;  %v14518_v18 = vpack.c.bf16 %v620_v17, %v619_v16  ;;  %v622_v20 = vld [vmem:[%s20448_s1 + $0x68] sm:$0xff]  ;;  %v623_v22 = vld [vmem:[%s20448_s1 + $0x70] sm:$0xff]  ;;  %v624_v23 = vld [vmem:[%s20448_s1 + $0x78] sm:$0xff]  ;;  %s20946_s15 = sld [smem:[#allocation77_spill]]  ;;  %s20947_s26 = sld [smem:[#allocation78_spill]] }
  0x78   : > { %v14522_v21 = vpack.c.bf16 %v622_v20, %v621_v19  ;;  %v14526_v24 = vpack.c.bf16 %v624_v23, %v623_v22  ;;  %v546_v25 = vld [vmem:[%s16107_s29 + $0x8] sm:$0xff]  ;;  %v547_v26 = vld [vmem:[%s16107_s29 + $0x10] sm:$0xff]  ;;  %v548_v27 = vld [vmem:[%s16107_s29 + $0x18] sm:$0xff]  ;;  %s20964_s16 = sld [smem:[#allocation79_spill]]  ;;  %s20143_s28 = scalar_lea.vmem [#allocation9], %s11444_s23 }
  0x79   : > { %v549_v28 = vld [vmem:[%s16107_s29 + $0x20] sm:$0xff]  ;;  %v550_v29 = vld [vmem:[%s16107_s29 + $0x28] sm:$0xff]  ;;  %v551_v30 = vld [vmem:[%s16107_s29 + $0x30] sm:$0xff]  ;;  %s12265_s23 = sshll.u32 %s15941_s22, 13  ;;  %s11328_s27 = scalar_lea.sflag [#allocation5], %s16101_s12 }
  0x7a   : > { %14505 = vmatpush3.bf16.msra.mxu0 %v14502_v5  ;;  %v552_v31 = vld [vmem:[%s16107_s29 + $0x38] sm:$0xff]  ;;  %v553_v32 = vld [vmem:[%s16107_s29 + $0x40] sm:$0xff]  ;;  %v554_v33 = vld [vmem:[%s16107_s29 + $0x48] sm:$0xff]  ;;  %p20982_p0 = scmp.ne.s32.totalorder %s20634_s25, 0  ;;  %s15837_s14 = smov [#allocation9]  }
  0x7b   : > { %14507 = vmatprep.subr.bf16.mxu0 %v14506_v8  ;;  %v555_v34 = vld [vmem:[%s16107_s29 + $0x50] sm:$0xff]  ;;  %v556_v35 = vld [vmem:[%s16107_s29 + $0x58] sm:$0xff]  ;;  %v557_v36 = vld [vmem:[%s16107_s29 + $0x60] sm:$0xff]  ;;  %s15762_s18 = sshll.u32 %s15837_s14, 4  ;;  %s15763_s18 = int_to_ptr.vmem [resolvable:$false] %s15762_s18 }
  0x7c   : > { %v558_v37 = vld [vmem:[%s16107_s29 + $0x68] sm:$0xff]  ;;  %v559_v38 = vld [vmem:[%s16107_s29 + $0x70] sm:$0xff]  ;;  %v560_v39 = vld [vmem:[%s16107_s29 + $0x78] sm:$0xff] }
  0x7d   : > { %v561_v40 = vld [vmem:[%s16107_s29 + $0x80] sm:$0xff]  ;;  %v562_v41 = vld [vmem:[%s16107_s29 + $0x88] sm:$0xff]  ;;  %v563_v42 = vld [vmem:[%s16107_s29 + $0x90] sm:$0xff] }
  0x7e   : > { %14509 = vmatpush3.bf16.msra.mxu0 %v14506_v8  ;;  %v564_v43 = vld [vmem:[%s16107_s29 + $0x98] sm:$0xff]  ;;  %v565_v44 = vld [vmem:[%s16107_s29 + $0xa0] sm:$0xff]  ;;  %v566_v45 = vld [vmem:[%s16107_s29 + $0xa8] sm:$0xff]  ;;  %v15835_v8 = vmov 0.0  }
  0x7f   : > { %14511 = vmatprep.subr.bf16.mxu0 %v14510_v12  ;;  %v567_v46 = vld [vmem:[%s16107_s29 + $0xb0] sm:$0xff]  ;;  %v568_v47 = vld [vmem:[%s16107_s29 + $0xb8] sm:$0xff]  ;;  %v569_v48 = vld [vmem:[%s16107_s29 + $0xc0] sm:$0xff]  ;;  %1082 = vst.msk [vmem:[#allocation2] sm:$0xff] %vm1081_vm0, %v15835_v8 }
  0x80   : > { %v570_v49 = vld [vmem:[%s16107_s29 + $0xc8] sm:$0xff]  ;;  %v571_v50 = vld [vmem:[%s16107_s29 + $0xd0] sm:$0xff]  ;;  %v572_v51 = vld [vmem:[%s16107_s29 + $0xd8] sm:$0xff]  ;;  %1083 = vst.msk [vmem:[#allocation2 + $0x8] sm:$0xff] %vm1081_vm0, %v15835_v8 }
  0x81   : > { %v573_v52 = vld [vmem:[%s16107_s29 + $0xe0] sm:$0xff]  ;;  %v574_v53 = vld [vmem:[%s16107_s29 + $0xe8] sm:$0xff]  ;;  %v575_v54 = vld [vmem:[%s16107_s29 + $0xf0] sm:$0xff]  ;;  %1086 = vst.msk [vmem:[#allocation2 + $0x1b0] sm:$0xff] %vm1081_vm0, %v15835_v8 }
  0x82   : > { %14513 = vmatpush3.bf16.msra.mxu0 %v14510_v12  ;;  %v576_v55 = vld [vmem:[%s16107_s29 + $0xf8] sm:$0xff]  ;;  %v577_v56 = vld [vmem:[%s16107_s29 + $0x100] sm:$0xff]  ;;  %v578_v57 = vld [vmem:[%s16107_s29 + $0x108] sm:$0xff]  ;;  %1087 = vst.msk [vmem:[#allocation2 + $0x1b8] sm:$0xff] %vm1081_vm0, %v15835_v8 }
  0x83   : > { %14515 = vmatprep.subr.bf16.mxu0 %v14514_v15  ;;  %v579_v58 = vld [vmem:[%s16107_s29 + $0x110] sm:$0xff]  ;;  %v580_v59 = vld [vmem:[%s16107_s29 + $0x118] sm:$0xff]  ;;  %v581_v60 = vld [vmem:[%s16107_s29 + $0x120] sm:$0xff]  ;;  %1090 = vst.msk [vmem:[#allocation2 + $0x198] sm:$0xff] %vm1081_vm0, %v15835_v8 }
  0x84   : > { %v582_v61 = vld [vmem:[%s16107_s29 + $0x128] sm:$0xff]  ;;  %v583_v62 = vld [vmem:[%s16107_s29 + $0x130] sm:$0xff]  ;;  %v584_v63 = vld [vmem:[%s16107_s29 + $0x138] sm:$0xff]  ;;  %1091 = vst.msk [vmem:[#allocation2 + $0x1a0] sm:$0xff] %vm1081_vm0, %v15835_v8 }
  0x85   : > { %v585_v0 = vld [vmem:[%s16107_s29 + $0x140] sm:$0xff]  ;;  %v586_v1 = vld [vmem:[%s16107_s29 + $0x148] sm:$0xff]  ;;  %v587_v2 = vld [vmem:[%s16107_s29 + $0x150] sm:$0xff]  ;;  %1093 = vst.msk [vmem:[#allocation2 + $0x348] sm:$0xff] %vm1081_vm0, %v15835_v8 }
  0x86   : > { %14517 = vmatpush3.bf16.msra.mxu0 %v14514_v15  ;;  %v588_v3 = vld [vmem:[%s16107_s29 + $0x158] sm:$0xff]  ;;  %v589_v4 = vld [vmem:[%s16107_s29 + $0x160] sm:$0xff]  ;;  %v1300_v6 = vld [vmem:[#allocation6 + $0x8] sm:$0xff]  ;;  %1094 = vst.msk [vmem:[#allocation2 + $0x350] sm:$0xff] %vm1081_vm0, %v15835_v8 }
  0x87   : > { %14519 = vmatprep.subr.bf16.mxu0 %v14518_v18  ;;  %v1299_v5 = vld [vmem:[#allocation6] sm:$0xff]  ;;  %v16229_v9 = vld [vmem:[%s16107_s29 + $0x168] sm:$0xff]  ;;  %1097 = vst.msk [vmem:[#allocation2] sm:$0x1] %vm1096_vm1, %v15835_v8  ;;  %1098 = vst.msk [vmem:[#allocation2 + $0x18] sm:$0x1] %vm1096_vm1, %v15835_v8 }
  0x88   : > { %v16210_v7 = vpack.c.bf16 %v1300_v6, %v1299_v5  ;;  %1099 = vst.msk [vmem:[#allocation2 + $0x30] sm:$0x1] %vm1096_vm1, %v15835_v8  ;;  %1100 = vst.msk [vmem:[#allocation2 + $0x48] sm:$0x1] %vm1096_vm1, %v15835_v8  ;;  %v591_v10 = vld [vmem:[%s16107_s29 + $0x170] sm:$0xff]  ;;  %v1302_v12 = vld [vmem:[#allocation6 + $0x18] sm:$0xff] }
  0x89   : > { %1101 = vst.msk [vmem:[#allocation2 + $0x60] sm:$0x1] %vm1096_vm1, %v15835_v8  ;;  %1102 = vst.msk [vmem:[#allocation2 + $0x78] sm:$0x1] %vm1096_vm1, %v15835_v8  ;;  %v1301_v11 = vld [vmem:[#allocation6 + $0x10] sm:$0xff]  ;;  %v592_v14 = vld [vmem:[%s16107_s29 + $0x178] sm:$0xff] }
  0x8a   : > { %14521 = vmatpush3.bf16.msra.mxu0 %v14518_v18  ;;  %1103 = vst.msk [vmem:[#allocation2 + $0x90] sm:$0x1] %vm1096_vm1, %v15835_v8  ;;  %1104 = vst.msk [vmem:[#allocation2 + $0xa8] sm:$0x1] %vm1096_vm1, %v15835_v8  ;;  %v14534_v13 = vpack.c.bf16 %v1302_v12, %v1301_v11  ;;  %v593_v15 = vld [vmem:[%s16107_s29 + $0x180] sm:$0xff]  ;;  %v594_v16 = vld [vmem:[%s16107_s29 + $0x188] sm:$0xff] }
  0x8b   : > { %14523 = vmatprep.subr.bf16.mxu0 %v14522_v21  ;;  %1105 = vst.msk [vmem:[#allocation2 + $0xc0] sm:$0x1] %vm1096_vm1, %v15835_v8  ;;  %1106 = vst.msk [vmem:[#allocation2 + $0xd8] sm:$0x1] %vm1096_vm1, %v15835_v8  ;;  %v595_v17 = vld [vmem:[%s16107_s29 + $0x190] sm:$0xff]  ;;  %v596_v18 = vld [vmem:[%s16107_s29 + $0x198] sm:$0xff] }
  0x8c   : > { %1107 = vst.msk [vmem:[#allocation2 + $0xf0] sm:$0x1] %vm1096_vm1, %v15835_v8  ;;  %1108 = vst.msk [vmem:[#allocation2 + $0x108] sm:$0x1] %vm1096_vm1, %v15835_v8  ;;  %v597_v19 = vld [vmem:[%s16107_s29 + $0x1a0] sm:$0xff]  ;;  %v598_v20 = vld [vmem:[%s16107_s29 + $0x1a8] sm:$0xff] }
  0x8d   : > { %1109 = vst.msk [vmem:[#allocation2 + $0x120] sm:$0x1] %vm1096_vm1, %v15835_v8  ;;  %1110 = vst.msk [vmem:[#allocation2 + $0x138] sm:$0x1] %vm1096_vm1, %v15835_v8  ;;  %v600_v22 = vld [vmem:[%s16107_s29 + $0x1b8] sm:$0xff]  ;;  %v601_v23 = vld [vmem:[%s16107_s29 + $0x1c0] sm:$0xff] }
  0x8e   : > { %14525 = vmatpush3.bf16.msra.mxu0 %v14522_v21  ;;  %1111 = vst.msk [vmem:[#allocation2 + $0x150] sm:$0x1] %vm1096_vm1, %v15835_v8  ;;  %1112 = vst.msk [vmem:[#allocation2 + $0x168] sm:$0x1] %vm1096_vm1, %v15835_v8  ;;  %v599_v21 = vld [vmem:[%s16107_s29 + $0x1b0] sm:$0xff] }
  0x8f   : > { %14527 = vmatprep.subr.bf16.mxu0 %v14526_v24  ;;  %1113 = vst.msk [vmem:[#allocation2 + $0x180] sm:$0x1] %vm1096_vm1, %v15835_v8  ;;  %1116 = vst.msk [vmem:[#allocation2 + $0x1c8] sm:$0x1] %vm1096_vm1, %v15835_v8 }
  0x90   : > { %1117 = vst.msk [vmem:[#allocation2 + $0x1e0] sm:$0x1] %vm1096_vm1, %v15835_v8  ;;  %1118 = vst.msk [vmem:[#allocation2 + $0x1f8] sm:$0x1] %vm1096_vm1, %v15835_v8 }
  0x91   : > { %1119 = vst.msk [vmem:[#allocation2 + $0x210] sm:$0x1] %vm1096_vm1, %v15835_v8  ;;  %1120 = vst.msk [vmem:[#allocation2 + $0x228] sm:$0x1] %vm1096_vm1, %v15835_v8 }
  0x92   : > { %14529 = vmatpush3.bf16.msra.mxu0 %v14526_v24  ;;  %1121 = vst.msk [vmem:[#allocation2 + $0x240] sm:$0x1] %vm1096_vm1, %v15835_v8  ;;  %1122 = vst.msk [vmem:[#allocation2 + $0x258] sm:$0x1] %vm1096_vm1, %v15835_v8  ;;  %v602_v24 = vld [vmem:[%s16107_s29 + $0x1c8] sm:$0xff] }
  0x93   : > { %1123 = vst.msk [vmem:[#allocation2 + $0x270] sm:$0x1] %vm1096_vm1, %v15835_v8  ;;  %1124 = vst.msk [vmem:[#allocation2 + $0x288] sm:$0x1] %vm1096_vm1, %v15835_v8  ;;  %14531 = vmatprep.subr.bf16.mxu0 %v16210_v7 }
  0x94   : > { %1125 = vst.msk [vmem:[#allocation2 + $0x2a0] sm:$0x1] %vm1096_vm1, %v15835_v8  ;;  %1126 = vst.msk [vmem:[#allocation2 + $0x2b8] sm:$0x1] %vm1096_vm1, %v15835_v8 }
  0x95   : > { %13175 = vmatmul.mubr.f32.vlgmr.msra.gmra.mrb[0].mxu0 %v546_v25  ;;  %1127 = vst.msk [vmem:[#allocation2 + $0x2d0] sm:$0x1] %vm1096_vm1, %v15835_v8  ;;  %1128 = vst.msk [vmem:[#allocation2 + $0x2e8] sm:$0x1] %vm1096_vm1, %v15835_v8  ;;  %v603_v25 = vld [vmem:[%s16107_s29 + $0x1d0] sm:$0xff] }
  0x96   : > { %13177 = vmatprep.mubr.f32.mxu0 %v547_v26  ;;  %1129 = vst.msk [vmem:[#allocation2 + $0x300] sm:$0x1] %vm1096_vm1, %v15835_v8  ;;  %1130 = vst.msk [vmem:[#allocation2 + $0x318] sm:$0x1] %vm1096_vm1, %v15835_v8  ;;  %14533 = vmatpush3.bf16.msra.mxu0 %v16210_v7  ;;  %v604_v26 = vld [vmem:[%s16107_s29 + $0x1d8] sm:$0xff] }
  0x97   : > { %1131 = vst.msk [vmem:[#allocation2 + $0x330] sm:$0x1] %vm1096_vm1, %v15835_v8  ;;  %1134 = vst.msk [vmem:[#allocation2 + $0x29] sm:$0x1] %vm1096_vm1, %v15835_v8  ;;  %14535 = vmatprep.subr.bf16.mxu0 %v14534_v13 }
  0x98   : > { %1135 = vst.msk [vmem:[#allocation2 + $0x41] sm:$0x1] %vm1096_vm1, %v15835_v8  ;;  %1136 = vst.msk [vmem:[#allocation2 + $0x59] sm:$0x1] %vm1096_vm1, %v15835_v8 }
  0x99   : > { %13178 = vmatmul.mubr.f32.gmra.mrb[2].mxu0 %v548_v27  ;;  %1137 = vst.msk [vmem:[#allocation2 + $0x71] sm:$0x1] %vm1096_vm1, %v15835_v8  ;;  %1138 = vst.msk [vmem:[#allocation2 + $0x89] sm:$0x1] %vm1096_vm1, %v15835_v8  ;;  %v605_v27 = vld [vmem:[%s16107_s29 + $0x1e0] sm:$0xff] }
  0x9a   : > { %13180 = vmatprep.mubr.f32.mxu0 %v549_v28  ;;  %1139 = vst.msk [vmem:[#allocation2 + $0xa1] sm:$0x1] %vm1096_vm1, %v15835_v8  ;;  %1140 = vst.msk [vmem:[#allocation2 + $0xb9] sm:$0x1] %vm1096_vm1, %v15835_v8  ;;  %14537 = vmatpush3.bf16.msra.mxu0 %v14534_v13  ;;  %v606_v28 = vld [vmem:[%s16107_s29 + $0x1e8] sm:$0xff] }
  0x9b   : > { %1141 = vst.msk [vmem:[#allocation2 + $0xd1] sm:$0x1] %vm1096_vm1, %v15835_v8  ;;  %1142 = vst.msk [vmem:[#allocation2 + $0xe9] sm:$0x1] %vm1096_vm1, %v15835_v8 }
  0x9c   : > { %1143 = vst.msk [vmem:[#allocation2 + $0x101] sm:$0x1] %vm1096_vm1, %v15835_v8  ;;  %1144 = vst.msk [vmem:[#allocation2 + $0x119] sm:$0x1] %vm1096_vm1, %v15835_v8 }
  0x9d   : > { %13181 = vmatmul.mubr.f32.gmra.mrb[4].mxu0 %v550_v29  ;;  %1145 = vst.msk [vmem:[#allocation2 + $0x131] sm:$0x1] %vm1096_vm1, %v15835_v8  ;;  %1146 = vst.msk [vmem:[#allocation2 + $0x149] sm:$0x1] %vm1096_vm1, %v15835_v8  ;;  %v607_v29 = vld [vmem:[%s16107_s29 + $0x1f0] sm:$0xff] }
  0x9e   : > { %13183 = vmatprep.mubr.f32.mxu0 %v551_v30  ;;  %1147 = vst.msk [vmem:[#allocation2 + $0x161] sm:$0x1] %vm1096_vm1, %v15835_v8  ;;  %1148 = vst.msk [vmem:[#allocation2 + $0x179] sm:$0x1] %vm1096_vm1, %v15835_v8  ;;  %v608_v30 = vld [vmem:[%s16107_s29 + $0x1f8] sm:$0xff] }
  0x9f   : > { %1149 = vst.msk [vmem:[#allocation2 + $0x191] sm:$0x1] %vm1096_vm1, %v15835_v8  ;;  %1152 = vst.msk [vmem:[#allocation2 + $0x1d9] sm:$0x1] %vm1096_vm1, %v15835_v8 }
  0xa0   : > { %1153 = vst.msk [vmem:[#allocation2 + $0x1f1] sm:$0x1] %vm1096_vm1, %v15835_v8  ;;  %1154 = vst.msk [vmem:[#allocation2 + $0x209] sm:$0x1] %vm1096_vm1, %v15835_v8 }
  0xa1   : > { %13184 = vmatmul.mubr.f32.gmra.mrb[6].mxu0 %v552_v31  ;;  %1155 = vst.msk [vmem:[#allocation2 + $0x221] sm:$0x1] %vm1096_vm1, %v15835_v8  ;;  %1156 = vst.msk [vmem:[#allocation2 + $0x239] sm:$0x1] %vm1096_vm1, %v15835_v8  ;;  %v1235_v31 = vld [vmem:[#allocation2] sm:$0xff] }
  0xa2   : > { %13186 = vmatprep.mubr.f32.mxu0 %v553_v32  ;;  %1157 = vst.msk [vmem:[#allocation2 + $0x251] sm:$0x1] %vm1096_vm1, %v15835_v8  ;;  %1158 = vst.msk [vmem:[#allocation2 + $0x269] sm:$0x1] %vm1096_vm1, %v15835_v8  ;;  %v1236_v32 = vld [vmem:[#allocation2 + $0x8] sm:$0xff] }
  0xa3   : > { %1159 = vst.msk [vmem:[#allocation2 + $0x281] sm:$0x1] %vm1096_vm1, %v15835_v8  ;;  %1160 = vst.msk [vmem:[#allocation2 + $0x299] sm:$0x1] %vm1096_vm1, %v15835_v8 }
  0xa4   : > { %1161 = vst.msk [vmem:[#allocation2 + $0x2b1] sm:$0x1] %vm1096_vm1, %v15835_v8  ;;  %1162 = vst.msk [vmem:[#allocation2 + $0x2c9] sm:$0x1] %vm1096_vm1, %v15835_v8 }
  0xa5   : > { %13187 = vmatmul.mubr.f32.gmra.mrb[8].mxu0 %v554_v33  ;;  %1163 = vst.msk [vmem:[#allocation2 + $0x2e1] sm:$0x1] %vm1096_vm1, %v15835_v8  ;;  %1164 = vst.msk [vmem:[#allocation2 + $0x2f9] sm:$0x1] %vm1096_vm1, %v15835_v8  ;;  %v2725_v33 = vld [vmem:[#allocation6 + $0x40] sm:$0xff] }
  0xa6   : > { %13189 = vmatprep.mubr.f32.mxu0 %v555_v34  ;;  %1165 = vst.msk [vmem:[#allocation2 + $0x311] sm:$0x1] %vm1096_vm1, %v15835_v8  ;;  %1166 = vst.msk [vmem:[#allocation2 + $0x329] sm:$0x1] %vm1096_vm1, %v15835_v8  ;;  %v2726_v34 = vld [vmem:[#allocation6 + $0x48] sm:$0xff] }
  0xa7   : > { %1167 = vst.msk [vmem:[#allocation2 + $0x341] sm:$0x1] %vm1096_vm1, %v15835_v8  ;;  %1114 = vst.msk [vmem:[#allocation2 + $0x198] sm:$0x1] %vm1096_vm1, %v15835_v8 }
  0xa8   : > { %1115 = vst.msk [vmem:[#allocation2 + $0x1b0] sm:$0x1] %vm1096_vm1, %v15835_v8  ;;  %1132 = vst.msk [vmem:[#allocation2 + $0x348] sm:$0x1] %vm1096_vm1, %v15835_v8 }
  0xa9   : > { %13190 = vmatmul.mubr.f32.gmra.mrb[10].mxu0 %v556_v35  ;;  %v16390_v35 = vpack.c.bf16 %v2726_v34, %v2725_v33  ;;  %1085 = vst.msk [vmem:[#allocation2 + $0x10] sm:$0x3] %vm1084_vm2, %v15835_v8  ;;  %1088 = vst.msk [vmem:[#allocation2 + $0x1c0] sm:$0x3] %vm1084_vm2, %v15835_v8 }
  0xaa   : > { %13192 = vmatprep.mubr.f32.mxu0 %v557_v36  ;;  %v2727_v36 = vld [vmem:[#allocation6 + $0x50] sm:$0xff]  ;;  %1092 = vst.msk [vmem:[#allocation2 + $0x1a8] sm:$0x3] %vm1084_vm2, %v15835_v8  ;;  %1095 = vst.msk [vmem:[#allocation2 + $0x358] sm:$0x3] %vm1084_vm2, %v15835_v8 }
  0xab   : > { %14666 = vmatprep.subr.bf16.mxu1 %v16390_v35  ;;  %1133 = vst.msk [vmem:[#allocation2 + $0x11] sm:$0x1] %vm1096_vm1, %v15835_v8  ;;  %1150 = vst.msk [vmem:[#allocation2 + $0x1a9] sm:$0x1] %vm1096_vm1, %v15835_v8 }
  0xac   : > { %14668 = vmatpush3.bf16.msra.mxu1 %v16390_v35  ;;  %1151 = vst.msk [vmem:[#allocation2 + $0x1c1] sm:$0x1] %vm1096_vm1, %v15835_v8  ;;  %1168 = vst.msk [vmem:[#allocation2 + $0x359] sm:$0x1] %vm1096_vm1, %v15835_v8 }
  0xad   : > { %13193 = vmatmul.mubr.f32.gmra.mrb[12].mxu0 %v558_v37  ;;  %v2728_v37 = vld [vmem:[#allocation6 + $0x58] sm:$0xff] }
  0xae   : > { %13195 = vmatprep.mubr.f32.mxu0 %v559_v38  ;;  %v16394_v38 = vpack.c.bf16 %v2728_v37, %v2727_v36 }
  0xb0   : > { %14667 = vmatprep.subr.bf16.mxu1 %v16394_v38 }
  0xb1   : > { %13196 = vmatmul.mubr.f32.gmra.mrb[14].mxu0 %v560_v39  ;;  %14669 = vmatpush3.bf16.msra.mxu1 %v16394_v38  ;;  %v3435_v39 = vld [vmem:[#allocation6 + $0x60] sm:$0xff] }
  0xb2   : > { %13198 = vmatprep.mubr.f32.mxu0 %v561_v40  ;;  %v3436_v40 = vld [vmem:[#allocation6 + $0x68] sm:$0xff] }
  0xb5   : > { %13199 = vmatmul.mubr.f32.gmra.mrb[16].mxu0 %v562_v41  ;;  %v16398_v41 = vpack.c.bf16 %v3436_v40, %v3435_v39 }
  0xb6   : > { %13201 = vmatprep.mubr.f32.mxu0 %v563_v42  ;;  %v16404_v42 = vld [vmem:[%s20449_s2] ss:$0 sm:$0xff] }
  0xb7   : > { %14555 = vmatprep.subr.bf16.mxu1 %v16398_v41 }
  0xb9   : > { %13202 = vmatmul.mubr.f32.gmra.mrb[18].mxu0 %v564_v43 }
  0xba   : > { %13204 = vmatprep.mubr.f32.mxu0 %v565_v44  ;;  %v2015_v44 = vld [vmem:[#allocation6 + $0x20] sm:$0xff] }
  0xbd   : > { %13205 = vmatmul.mubr.f32.gmra.mrb[20].mxu0 %v566_v45  ;;  %v2016_v45 = vld [vmem:[#allocation6 + $0x28] sm:$0xff] }
  0xbe   : > { %13207 = vmatprep.mubr.f32.mxu0 %v567_v46 }
  0xc1   : > { %13208 = vmatmul.mubr.f32.gmra.mrb[22].mxu0 %v568_v47 }
  0xc2   : > { %13210 = vmatprep.mubr.f32.mxu0 %v569_v48  ;;  %v14538_v48 = vpack.c.bf16 %v2016_v45, %v2015_v44 }
  0xc4   : > { %14539 = vmatprep.subr.bf16.mxu0 %v14538_v48 }
  0xc5   : > { %13211 = vmatmul.mubr.f32.gmra.mrb[24].mxu0 %v570_v49 }
  0xc6   : > { %13213 = vmatprep.mubr.f32.mxu0 %v571_v50 }
  0xc9   : > { %13214 = vmatmul.mubr.f32.gmra.mrb[26].mxu0 %v572_v51 }
  0xca   : > { %13216 = vmatprep.mubr.f32.mxu0 %v573_v52 }
  0xcd   : > { %13217 = vmatmul.mubr.f32.gmra.mrb[28].mxu0 %v574_v53  ;;  %v2017_v53 = vld [vmem:[#allocation6 + $0x30] sm:$0xff] }
  0xce   : > { %13219 = vmatprep.mubr.f32.mxu0 %v575_v54  ;;  %v2018_v54 = vld [vmem:[#allocation6 + $0x38] sm:$0xff] }
  0xd1   : > { %13220 = vmatmul.mubr.f32.gmra.mrb[30].mxu0 %v576_v55 }
  0xd2   : > { %13222 = vmatprep.mubr.f32.mxu0 %v577_v56 }
  0xd5   : > { %13223 = vmatmul.mubr.f32.gmra.mrb[32].mxu0 %v578_v57  ;;  %v14542_v57 = vpack.c.bf16 %v2018_v54, %v2017_v53 }
  0xd6   : > { %13225 = vmatprep.mubr.f32.mxu0 %v579_v58 }
  0xd9   : > { %13226 = vmatmul.mubr.f32.gmra.mrb[34].mxu0 %v580_v59 }
  0xda   : > { %13228 = vmatprep.mubr.f32.mxu0 %v581_v60 }
  0xdd   : > { %13229 = vmatmul.mubr.f32.gmra.mrb[36].mxu0 %v582_v61 }
  0xde   : > { %13231 = vmatprep.mubr.f32.mxu0 %v583_v62 }
  0xe1   : > { %13232 = vmatmul.mubr.f32.gmra.mrb[38].mxu0 %v584_v63 }
  0xe2   : > { %13234 = vmatprep.mubr.f32.mxu0 %v585_v0 }
  0xe5   : > { %13235 = vmatmul.mubr.f32.gmra.mrb[40].mxu0 %v586_v1 }
  0xe6   : > { %13237 = vmatprep.mubr.f32.mxu0 %v587_v2 }
  0xe9   : > { %13238 = vmatmul.mubr.f32.gmra.mrb[42].mxu0 %v588_v3 }
  0xea   : > { %13240 = vmatprep.mubr.f32.mxu0 %v589_v4 }
  0xed   : > { %13241 = vmatmul.mubr.f32.gmra.mrb[44].mxu0 %v16229_v9 }
  0xee   : > { %13243 = vmatprep.mubr.f32.mxu0 %v591_v10 }
  0xf1   : > { %13244 = vmatmul.mubr.f32.gmra.mrb[46].mxu0 %v592_v14 }
  0xf2   : > { %13246 = vmatprep.mubr.f32.mxu0 %v593_v15 }
  0xf5   : > { %13247 = vmatmul.mubr.f32.gmra.mrb[48].mxu0 %v594_v16 }
  0xf6   : > { %13249 = vmatprep.mubr.f32.mxu0 %v595_v17 }
  0xf9   : > { %13250 = vmatmul.mubr.f32.gmra.mrb[50].mxu0 %v596_v18 }
  0xfa   : > { %13252 = vmatprep.mubr.f32.mxu0 %v597_v19 }
  0xfd   : > { %13253 = vmatmul.mubr.f32.gmra.mrb[52].mxu0 %v598_v20 }
  0xfe   : > { %13255 = vmatprep.mubr.f32.mxu0 %v599_v21 }
 0x101   : > { %13256 = vmatmul.mubr.f32.gmra.mrb[54].mxu0 %v600_v22 }
 0x102   : > { %13258 = vmatprep.mubr.f32.mxu0 %v601_v23 }
 0x105   : > { %13259 = vmatmul.mubr.f32.gmra.mrb[56].mxu0 %v602_v24 }
 0x106   : > { %13261 = vmatprep.mubr.f32.mxu0 %v603_v25 }
 0x109   : > { %13262 = vmatmul.mubr.f32.gmra.mrb[58].mxu0 %v604_v26 }
 0x10a   : > { %13264 = vmatprep.mubr.f32.mxu0 %v605_v27 }
 0x10d   : > { %13265 = vmatmul.mubr.f32.gmra.mrb[60].mxu0 %v606_v28 }
 0x10e   : > { %13267 = vmatprep.mubr.f32.mxu0 %v607_v29 }
 0x111   : > { %13268 = vmatmul.mubr.f32.gmra.mrb[62].mxu0 %v608_v30 }
 0x112   : > { %13278 = vmatprep.mubr.msk.f32.mxu0 %vm1081_vm0, %v1235_v31 }
 0x115   : > { %13279 = vmatmul.mubr.msk.f32.vlgmr.msra.gmra.mrb[64].mxu0 %vm1081_vm0, %v1236_v32 }
 0x116   : > { %14541 = vmatpush3.bf16.msra.mxu0 %v14538_v48 }
 0x117   : > { %14543 = vmatprep.subr.bf16.mxu0 %v14542_v57 }
 0x11a   : > { %14545 = vmatpush3.bf16.msra.mxu0 %v14542_v57 }
 0x11b   : > { %14547 = vmatprep.subr.bf16.mxu0 %v16390_v35 }
 0x168   : > { %v13176_v43 = vpop.f32.mrb[0].mxu0 }
 0x169   : > { %v704_v46 = vadd.f32 %v13176_v43, %v16404_v42  ;;  %v698_v47 = vpop.f32.mrb[1].mxu0 }
 0x16a   : > { %v699_v49 = vadd.f32 %v16404_v42, %v698_v47 }
 0x16b   : > { %v1018_v50 = vmax.f32 %v704_v46, 0.0 }
 0x16c   : > { %v1017_v51 = vmax.f32 %v699_v49, 0.0  ;;  %v13179_v52 = vpop.f32.mrb[2].mxu0 }
 0x16d   : > { %1171 = vst.msk [vmem:[#allocation2 + $0x21] sm:$0xff] %vm1081_vm0, %v1018_v50  ;;  %v714_v55 = vadd.f32 %v13179_v52, %v16404_v42  ;;  %v708_v56 = vpop.f32.mrb[3].mxu0 }
 0x16e   : > { %1170 = vst.msk [vmem:[#allocation2 + $0x19] sm:$0xff] %vm1081_vm0, %v1017_v51  ;;  %v709_v58 = vadd.f32 %v16404_v42, %v708_v56 }
 0x16f   : > { %v1020_v59 = vmax.f32 %v714_v55, 0.0 }
 0x170   : > { %v1019_v60 = vmax.f32 %v709_v58, 0.0  ;;  %v13182_v61 = vpop.f32.mrb[4].mxu0 }
 0x171   : > { %1173 = vst.msk [vmem:[#allocation2 + $0x39] sm:$0xff] %vm1081_vm0, %v1020_v59  ;;  %v724_v62 = vadd.f32 %v13182_v61, %v16404_v42  ;;  %v718_v63 = vpop.f32.mrb[5].mxu0 }
 0x172   : > { %1172 = vst.msk [vmem:[#allocation2 + $0x31] sm:$0xff] %vm1081_vm0, %v1019_v60  ;;  %v719_v0 = vadd.f32 %v16404_v42, %v718_v63 }
 0x173   : > { %v1022_v1 = vmax.f32 %v724_v62, 0.0 }
 0x174   : > { %v1021_v2 = vmax.f32 %v719_v0, 0.0  ;;  %v13185_v3 = vpop.f32.mrb[6].mxu0 }
 0x175   : > { %1175 = vst.msk [vmem:[#allocation2 + $0x51] sm:$0xff] %vm1081_vm0, %v1022_v1  ;;  %v734_v4 = vadd.f32 %v13185_v3, %v16404_v42  ;;  %v728_v5 = vpop.f32.mrb[7].mxu0  ;;  %v16431_v6 = vld [vmem:[#allocation2 + $0x18] sm:$0xff]  ;;  %v16433_v7 = vld [vmem:[#allocation2 + $0x20] sm:$0xff] }
 0x176   : > { %1174 = vst.msk [vmem:[#allocation2 + $0x49] sm:$0xff] %vm1081_vm0, %v1021_v2  ;;  %v729_v8 = vadd.f32 %v16404_v42, %v728_v5  ;;  %13281 = vmatprep.mubr.msk.f32.mxu0 %vm1081_vm0, %v16431_v6 }
 0x177   : > { %v1024_v9 = vmax.f32 %v734_v4, 0.0  ;;  %13282 = vmatmul.mubr.msk.f32.gmra.mrb[66].mxu0 %vm1081_vm0, %v16433_v7 }
 0x178   : > { %v1023_v10 = vmax.f32 %v729_v8, 0.0  ;;  %v13188_v11 = vpop.f32.mrb[8].mxu0 }
 0x179   : > { %1177 = vst.msk [vmem:[#allocation2 + $0x69] sm:$0xff] %vm1081_vm0, %v1024_v9  ;;  %v744_v12 = vadd.f32 %v13188_v11, %v16404_v42  ;;  %v738_v13 = vpop.f32.mrb[9].mxu0  ;;  %v16443_v14 = vld [vmem:[#allocation2 + $0x30] sm:$0xff]  ;;  %v16445_v15 = vld [vmem:[#allocation2 + $0x38] sm:$0xff] }
 0x17a   : > { %1176 = vst.msk [vmem:[#allocation2 + $0x61] sm:$0xff] %vm1081_vm0, %v1023_v10  ;;  %v739_v16 = vadd.f32 %v16404_v42, %v738_v13  ;;  %13284 = vmatprep.mubr.msk.f32.mxu0 %vm1081_vm0, %v16443_v14 }
 0x17b   : > { %v1026_v17 = vmax.f32 %v744_v12, 0.0  ;;  %13285 = vmatmul.mubr.msk.f32.gmra.mrb[68].mxu0 %vm1081_vm0, %v16445_v15 }
 0x17c   : > { %v1025_v18 = vmax.f32 %v739_v16, 0.0  ;;  %v13191_v19 = vpop.f32.mrb[10].mxu0 }
 0x17d   : > { %1179 = vst.msk [vmem:[#allocation2 + $0x81] sm:$0xff] %vm1081_vm0, %v1026_v17  ;;  %v754_v20 = vadd.f32 %v13191_v19, %v16404_v42  ;;  %v748_v21 = vpop.f32.mrb[11].mxu0  ;;  %v16455_v22 = vld [vmem:[#allocation2 + $0x48] sm:$0xff]  ;;  %v16457_v23 = vld [vmem:[#allocation2 + $0x50] sm:$0xff] }
 0x17e   : > { %1178 = vst.msk [vmem:[#allocation2 + $0x79] sm:$0xff] %vm1081_vm0, %v1025_v18  ;;  %v749_v24 = vadd.f32 %v16404_v42, %v748_v21  ;;  %13287 = vmatprep.mubr.msk.f32.mxu0 %vm1081_vm0, %v16455_v22 }
 0x17f   : > { %v1028_v25 = vmax.f32 %v754_v20, 0.0  ;;  %13288 = vmatmul.mubr.msk.f32.gmra.mrb[70].mxu0 %vm1081_vm0, %v16457_v23 }
 0x180   : > { %v1027_v26 = vmax.f32 %v749_v24, 0.0  ;;  %v13194_v27 = vpop.f32.mrb[12].mxu0 }
 0x181   : > { %1181 = vst.msk [vmem:[#allocation2 + $0x99] sm:$0xff] %vm1081_vm0, %v1028_v25  ;;  %v764_v28 = vadd.f32 %v13194_v27, %v16404_v42  ;;  %v758_v29 = vpop.f32.mrb[13].mxu0  ;;  %v16467_v30 = vld [vmem:[#allocation2 + $0x60] sm:$0xff]  ;;  %v16469_v31 = vld [vmem:[#allocation2 + $0x68] sm:$0xff] }
 0x182   : > { %1180 = vst.msk [vmem:[#allocation2 + $0x91] sm:$0xff] %vm1081_vm0, %v1027_v26  ;;  %v759_v32 = vadd.f32 %v16404_v42, %v758_v29  ;;  %13290 = vmatprep.mubr.msk.f32.mxu0 %vm1081_vm0, %v16467_v30 }
 0x183   : > { %v1030_v33 = vmax.f32 %v764_v28, 0.0  ;;  %13291 = vmatmul.mubr.msk.f32.gmra.mrb[72].mxu0 %vm1081_vm0, %v16469_v31 }
 0x184   : > { %v1029_v34 = vmax.f32 %v759_v32, 0.0  ;;  %v13197_v36 = vpop.f32.mrb[14].mxu0 }
 0x185   : > { %1183 = vst.msk [vmem:[#allocation2 + $0xb1] sm:$0xff] %vm1081_vm0, %v1030_v33  ;;  %v774_v37 = vadd.f32 %v13197_v36, %v16404_v42  ;;  %v768_v39 = vpop.f32.mrb[15].mxu0  ;;  %v16479_v40 = vld [vmem:[#allocation2 + $0x78] sm:$0xff]  ;;  %v16481_v43 = vld [vmem:[#allocation2 + $0x80] sm:$0xff] }
 0x186   : > { %1182 = vst.msk [vmem:[#allocation2 + $0xa9] sm:$0xff] %vm1081_vm0, %v1029_v34  ;;  %v769_v44 = vadd.f32 %v16404_v42, %v768_v39  ;;  %13293 = vmatprep.mubr.msk.f32.mxu0 %vm1081_vm0, %v16479_v40 }
 0x187   : > { %v1032_v45 = vmax.f32 %v774_v37, 0.0  ;;  %13294 = vmatmul.mubr.msk.f32.gmra.mrb[74].mxu0 %vm1081_vm0, %v16481_v43 }
 0x188   : > { %v1031_v46 = vmax.f32 %v769_v44, 0.0  ;;  %v13200_v47 = vpop.f32.mrb[16].mxu0 }
 0x189   : > { %1185 = vst.msk [vmem:[#allocation2 + $0xc9] sm:$0xff] %vm1081_vm0, %v1032_v45  ;;  %v784_v48 = vadd.f32 %v13200_v47, %v16404_v42  ;;  %v778_v49 = vpop.f32.mrb[17].mxu0  ;;  %v16491_v50 = vld [vmem:[#allocation2 + $0x90] sm:$0xff]  ;;  %v16493_v51 = vld [vmem:[#allocation2 + $0x98] sm:$0xff] }
 0x18a   : > { %1184 = vst.msk [vmem:[#allocation2 + $0xc1] sm:$0xff] %vm1081_vm0, %v1031_v46  ;;  %v779_v52 = vadd.f32 %v16404_v42, %v778_v49  ;;  %13296 = vmatprep.mubr.msk.f32.mxu0 %vm1081_vm0, %v16491_v50 }
 0x18b   : > { %v1034_v53 = vmax.f32 %v784_v48, 0.0  ;;  %13297 = vmatmul.mubr.msk.f32.gmra.mrb[76].mxu0 %vm1081_vm0, %v16493_v51 }
 0x18c   : > { %v1033_v54 = vmax.f32 %v779_v52, 0.0  ;;  %v13203_v55 = vpop.f32.mrb[18].mxu0 }
 0x18d   : > { %1187 = vst.msk [vmem:[#allocation2 + $0xe1] sm:$0xff] %vm1081_vm0, %v1034_v53  ;;  %v794_v56 = vadd.f32 %v13203_v55, %v16404_v42  ;;  %v788_v57 = vpop.f32.mrb[19].mxu0  ;;  %v16503_v58 = vld [vmem:[#allocation2 + $0xa8] sm:$0xff]  ;;  %v16505_v59 = vld [vmem:[#allocation2 + $0xb0] sm:$0xff] }
 0x18e   : > { %1186 = vst.msk [vmem:[#allocation2 + $0xd9] sm:$0xff] %vm1081_vm0, %v1033_v54  ;;  %v789_v60 = vadd.f32 %v16404_v42, %v788_v57  ;;  %13299 = vmatprep.mubr.msk.f32.mxu0 %vm1081_vm0, %v16503_v58 }
 0x18f   : > { %v1036_v61 = vmax.f32 %v794_v56, 0.0  ;;  %13300 = vmatmul.mubr.msk.f32.gmra.mrb[78].mxu0 %vm1081_vm0, %v16505_v59 }
 0x190   : > { %v1035_v62 = vmax.f32 %v789_v60, 0.0  ;;  %v13206_v63 = vpop.f32.mrb[20].mxu0 }
 0x191   : > { %1189 = vst.msk [vmem:[#allocation2 + $0xf9] sm:$0xff] %vm1081_vm0, %v1036_v61  ;;  %v804_v0 = vadd.f32 %v13206_v63, %v16404_v42  ;;  %v798_v1 = vpop.f32.mrb[21].mxu0  ;;  %v16515_v2 = vld [vmem:[#allocation2 + $0xc0] sm:$0xff]  ;;  %v16517_v3 = vld [vmem:[#allocation2 + $0xc8] sm:$0xff] }
 0x192   : > { %1188 = vst.msk [vmem:[#allocation2 + $0xf1] sm:$0xff] %vm1081_vm0, %v1035_v62  ;;  %v799_v4 = vadd.f32 %v16404_v42, %v798_v1  ;;  %13302 = vmatprep.mubr.msk.f32.mxu0 %vm1081_vm0, %v16515_v2 }
 0x193   : > { %v1038_v5 = vmax.f32 %v804_v0, 0.0  ;;  %13303 = vmatmul.mubr.msk.f32.gmra.mrb[80].mxu0 %vm1081_vm0, %v16517_v3 }
 0x194   : > { %v1037_v8 = vmax.f32 %v799_v4, 0.0  ;;  %v13209_v9 = vpop.f32.mrb[22].mxu0 }
 0x195   : > { %1191 = vst.msk [vmem:[#allocation2 + $0x111] sm:$0xff] %vm1081_vm0, %v1038_v5  ;;  %v814_v10 = vadd.f32 %v13209_v9, %v16404_v42  ;;  %v808_v11 = vpop.f32.mrb[23].mxu0  ;;  %v16527_v12 = vld [vmem:[#allocation2 + $0xd8] sm:$0xff]  ;;  %v16529_v13 = vld [vmem:[#allocation2 + $0xe0] sm:$0xff] }
 0x196   : > { %1190 = vst.msk [vmem:[#allocation2 + $0x109] sm:$0xff] %vm1081_vm0, %v1037_v8  ;;  %v809_v16 = vadd.f32 %v16404_v42, %v808_v11  ;;  %13305 = vmatprep.mubr.msk.f32.mxu0 %vm1081_vm0, %v16527_v12 }
 0x197   : > { %v1040_v17 = vmax.f32 %v814_v10, 0.0  ;;  %13306 = vmatmul.mubr.msk.f32.gmra.mrb[82].mxu0 %vm1081_vm0, %v16529_v13 }
 0x198   : > { %v1039_v18 = vmax.f32 %v809_v16, 0.0  ;;  %v13212_v19 = vpop.f32.mrb[24].mxu0 }
 0x199   : > { %1193 = vst.msk [vmem:[#allocation2 + $0x129] sm:$0xff] %vm1081_vm0, %v1040_v17  ;;  %v824_v20 = vadd.f32 %v13212_v19, %v16404_v42  ;;  %v818_v21 = vpop.f32.mrb[25].mxu0  ;;  %v16539_v24 = vld [vmem:[#allocation2 + $0xf0] sm:$0xff]  ;;  %v16541_v25 = vld [vmem:[#allocation2 + $0xf8] sm:$0xff] }
 0x19a   : > { %1192 = vst.msk [vmem:[#allocation2 + $0x121] sm:$0xff] %vm1081_vm0, %v1039_v18  ;;  %v819_v26 = vadd.f32 %v16404_v42, %v818_v21  ;;  %13308 = vmatprep.mubr.msk.f32.mxu0 %vm1081_vm0, %v16539_v24 }
 0x19b   : > { %v1042_v27 = vmax.f32 %v824_v20, 0.0  ;;  %13309 = vmatmul.mubr.msk.f32.gmra.mrb[84].mxu0 %vm1081_vm0, %v16541_v25 }
 0x19c   : > { %v1041_v28 = vmax.f32 %v819_v26, 0.0  ;;  %v13215_v29 = vpop.f32.mrb[26].mxu0  ;;  %v1267_v26 = vld [vmem:[#allocation2 + $0x1b0] sm:$0xff] }
 0x19d   : > { %1195 = vst.msk [vmem:[#allocation2 + $0x141] sm:$0xff] %vm1081_vm0, %v1042_v27  ;;  %v834_v32 = vadd.f32 %v13215_v29, %v16404_v42  ;;  %v828_v33 = vpop.f32.mrb[27].mxu0  ;;  %v16551_v34 = vld [vmem:[#allocation2 + $0x108] sm:$0xff]  ;;  %v16553_v36 = vld [vmem:[#allocation2 + $0x110] sm:$0xff] }
 0x19e   : > { %1194 = vst.msk [vmem:[#allocation2 + $0x139] sm:$0xff] %vm1081_vm0, %v1041_v28  ;;  %v829_v37 = vadd.f32 %v16404_v42, %v828_v33  ;;  %13311 = vmatprep.mubr.msk.f32.mxu0 %vm1081_vm0, %v16551_v34  ;;  %v1268_v33 = vld [vmem:[#allocation2 + $0x1b8] sm:$0xff] }
 0x19f   : > { %v1044_v39 = vmax.f32 %v834_v32, 0.0  ;;  %13312 = vmatmul.mubr.msk.f32.gmra.mrb[86].mxu0 %vm1081_vm0, %v16553_v36 }
 0x1a0   : > { %v1043_v44 = vmax.f32 %v829_v37, 0.0  ;;  %v13218_v45 = vpop.f32.mrb[28].mxu0 }
 0x1a1   : > { %1197 = vst.msk [vmem:[#allocation2 + $0x159] sm:$0xff] %vm1081_vm0, %v1044_v39  ;;  %v844_v46 = vadd.f32 %v13218_v45, %v16404_v42  ;;  %v838_v47 = vpop.f32.mrb[29].mxu0  ;;  %v16563_v48 = vld [vmem:[#allocation2 + $0x120] sm:$0xff]  ;;  %v16565_v49 = vld [vmem:[#allocation2 + $0x128] sm:$0xff] }
 0x1a2   : > { %1196 = vst.msk [vmem:[#allocation2 + $0x151] sm:$0xff] %vm1081_vm0, %v1043_v44  ;;  %v839_v52 = vadd.f32 %v16404_v42, %v838_v47  ;;  %13314 = vmatprep.mubr.msk.f32.mxu0 %vm1081_vm0, %v16563_v48 }
 0x1a3   : > { %v1046_v53 = vmax.f32 %v844_v46, 0.0  ;;  %13315 = vmatmul.mubr.msk.f32.gmra.mrb[88].mxu0 %vm1081_vm0, %v16565_v49 }
 0x1a4   : > { %v1045_v54 = vmax.f32 %v839_v52, 0.0  ;;  %v13221_v55 = vpop.f32.mrb[30].mxu0 }
 0x1a5   : > { %1199 = vst.msk [vmem:[#allocation2 + $0x171] sm:$0xff] %vm1081_vm0, %v1046_v53  ;;  %v854_v56 = vadd.f32 %v13221_v55, %v16404_v42  ;;  %v848_v57 = vpop.f32.mrb[31].mxu0  ;;  %v16575_v60 = vld [vmem:[#allocation2 + $0x138] sm:$0xff]  ;;  %v16577_v61 = vld [vmem:[#allocation2 + $0x140] sm:$0xff] }
 0x1a6   : > { %1198 = vst.msk [vmem:[#allocation2 + $0x169] sm:$0xff] %vm1081_vm0, %v1045_v54  ;;  %v849_v62 = vadd.f32 %v16404_v42, %v848_v57  ;;  %13317 = vmatprep.mubr.msk.f32.mxu0 %vm1081_vm0, %v16575_v60 }
 0x1a7   : > { %v1048_v63 = vmax.f32 %v854_v56, 0.0  ;;  %13318 = vmatmul.mubr.msk.f32.gmra.mrb[90].mxu0 %vm1081_vm0, %v16577_v61 }
 0x1a8   : > { %v1047_v0 = vmax.f32 %v849_v62, 0.0  ;;  %v13224_v1 = vpop.f32.mrb[32].mxu0 }
 0x1a9   : > { %1201 = vst.msk [vmem:[#allocation2 + $0x189] sm:$0xff] %vm1081_vm0, %v1048_v63  ;;  %v864_v4 = vadd.f32 %v13224_v1, %v16404_v42  ;;  %v858_v5 = vpop.f32.mrb[33].mxu0  ;;  %v16587_v8 = vld [vmem:[#allocation2 + $0x150] sm:$0xff]  ;;  %v16589_v9 = vld [vmem:[#allocation2 + $0x158] sm:$0xff] }
 0x1aa   : > { %1200 = vst.msk [vmem:[#allocation2 + $0x181] sm:$0xff] %vm1081_vm0, %v1047_v0  ;;  %v859_v10 = vadd.f32 %v16404_v42, %v858_v5  ;;  %13320 = vmatprep.mubr.msk.f32.mxu0 %vm1081_vm0, %v16587_v8 }
 0x1ab   : > { %v1050_v11 = vmax.f32 %v864_v4, 0.0  ;;  %13321 = vmatmul.mubr.msk.f32.gmra.mrb[92].mxu0 %vm1081_vm0, %v16589_v9 }
 0x1ac   : > { %v1049_v16 = vmax.f32 %v859_v10, 0.0  ;;  %v13227_v17 = vpop.f32.mrb[34].mxu0 }
 0x1ad   : > { %1203 = vst.msk [vmem:[#allocation2 + $0x1d1] sm:$0xff] %vm1081_vm0, %v1050_v11  ;;  %v874_v18 = vadd.f32 %v13227_v17, %v16404_v42  ;;  %v868_v19 = vpop.f32.mrb[35].mxu0  ;;  %v16599_v20 = vld [vmem:[#allocation2 + $0x168] sm:$0xff]  ;;  %v16601_v21 = vld [vmem:[#allocation2 + $0x170] sm:$0xff] }
 0x1ae   : > { %1202 = vst.msk [vmem:[#allocation2 + $0x1c9] sm:$0xff] %vm1081_vm0, %v1049_v16  ;;  %v869_v27 = vadd.f32 %v16404_v42, %v868_v19  ;;  %13323 = vmatprep.mubr.msk.f32.mxu0 %vm1081_vm0, %v16599_v20 }
 0x1af   : > { %v1052_v28 = vmax.f32 %v874_v18, 0.0  ;;  %13324 = vmatmul.mubr.msk.f32.gmra.mrb[94].mxu0 %vm1081_vm0, %v16601_v21 }
 0x1b0   : > { %v1051_v29 = vmax.f32 %v869_v27, 0.0  ;;  %v13230_v32 = vpop.f32.mrb[36].mxu0  ;;  %13326 = vmatprep.mubr.msk.f32.mxu0 %vm1081_vm0, %v1267_v26 }
 0x1b1   : > { %1205 = vst.msk [vmem:[#allocation2 + $0x1e9] sm:$0xff] %vm1081_vm0, %v1052_v28  ;;  %v884_v37 = vadd.f32 %v13230_v32, %v16404_v42  ;;  %v878_v39 = vpop.f32.mrb[37].mxu0 }
 0x1b2   : > { %1204 = vst.msk [vmem:[#allocation2 + $0x1e1] sm:$0xff] %vm1081_vm0, %v1051_v29  ;;  %v879_v44 = vadd.f32 %v16404_v42, %v878_v39 }
 0x1b3   : > { %v1054_v45 = vmax.f32 %v884_v37, 0.0  ;;  %13327 = vmatmul.mubr.msk.f32.gmra.mrb[96].mxu0 %vm1081_vm0, %v1268_v33 }
 0x1b4   : > { %v1053_v46 = vmax.f32 %v879_v44, 0.0  ;;  %v13233_v47 = vpop.f32.mrb[38].mxu0 }
 0x1b5   : > { %1207 = vst.msk [vmem:[#allocation2 + $0x201] sm:$0xff] %vm1081_vm0, %v1054_v45  ;;  %v894_v52 = vadd.f32 %v13233_v47, %v16404_v42  ;;  %v888_v53 = vpop.f32.mrb[39].mxu0  ;;  %v16617_v54 = vld [vmem:[#allocation2 + $0x1c8] sm:$0xff]  ;;  %v16619_v55 = vld [vmem:[#allocation2 + $0x1d0] sm:$0xff] }
 0x1b6   : > { %1206 = vst.msk [vmem:[#allocation2 + $0x1f9] sm:$0xff] %vm1081_vm0, %v1053_v46  ;;  %v889_v56 = vadd.f32 %v16404_v42, %v888_v53  ;;  %13329 = vmatprep.mubr.msk.f32.mxu0 %vm1081_vm0, %v16617_v54 }
 0x1b7   : > { %v1056_v57 = vmax.f32 %v894_v52, 0.0  ;;  %13330 = vmatmul.mubr.msk.f32.gmra.mrb[98].mxu0 %vm1081_vm0, %v16619_v55 }
 0x1b8   : > { %v1055_v62 = vmax.f32 %v889_v56, 0.0  ;;  %v13236_v63 = vpop.f32.mrb[40].mxu0 }
 0x1b9   : > { %1209 = vst.msk [vmem:[#allocation2 + $0x219] sm:$0xff] %vm1081_vm0, %v1056_v57  ;;  %v904_v0 = vadd.f32 %v13236_v63, %v16404_v42  ;;  %v898_v1 = vpop.f32.mrb[41].mxu0  ;;  %v16629_v4 = vld [vmem:[#allocation2 + $0x1e0] sm:$0xff]  ;;  %v16631_v5 = vld [vmem:[#allocation2 + $0x1e8] sm:$0xff] }
 0x1ba   : > { %1208 = vst.msk [vmem:[#allocation2 + $0x211] sm:$0xff] %vm1081_vm0, %v1055_v62  ;;  %v899_v10 = vadd.f32 %v16404_v42, %v898_v1  ;;  %13332 = vmatprep.mubr.msk.f32.mxu0 %vm1081_vm0, %v16629_v4 }
 0x1bb   : > { %v1058_v11 = vmax.f32 %v904_v0, 0.0  ;;  %13333 = vmatmul.mubr.msk.f32.gmra.mrb[100].mxu0 %vm1081_vm0, %v16631_v5 }
 0x1bc   : > { %v1057_v16 = vmax.f32 %v899_v10, 0.0  ;;  %v13239_v17 = vpop.f32.mrb[42].mxu0 }
 0x1bd   : > { %1211 = vst.msk [vmem:[#allocation2 + $0x231] sm:$0xff] %vm1081_vm0, %v1058_v11  ;;  %v914_v18 = vadd.f32 %v13239_v17, %v16404_v42  ;;  %v908_v19 = vpop.f32.mrb[43].mxu0  ;;  %v16641_v26 = vld [vmem:[#allocation2 + $0x1f8] sm:$0xff]  ;;  %v16643_v27 = vld [vmem:[#allocation2 + $0x200] sm:$0xff] }
 0x1be   : > { %1210 = vst.msk [vmem:[#allocation2 + $0x229] sm:$0xff] %vm1081_vm0, %v1057_v16  ;;  %v909_v28 = vadd.f32 %v16404_v42, %v908_v19  ;;  %13335 = vmatprep.mubr.msk.f32.mxu0 %vm1081_vm0, %v16641_v26 }
 0x1bf   : > { %v1060_v29 = vmax.f32 %v914_v18, 0.0  ;;  %13336 = vmatmul.mubr.msk.f32.gmra.mrb[102].mxu0 %vm1081_vm0, %v16643_v27 }
 0x1c0   : > { %v1059_v32 = vmax.f32 %v909_v28, 0.0  ;;  %v13242_v33 = vpop.f32.mrb[44].mxu0 }
 0x1c1   : > { %1213 = vst.msk [vmem:[#allocation2 + $0x249] sm:$0xff] %vm1081_vm0, %v1060_v29  ;;  %v924_v37 = vadd.f32 %v13242_v33, %v16404_v42  ;;  %v918_v39 = vpop.f32.mrb[45].mxu0  ;;  %v16653_v44 = vld [vmem:[#allocation2 + $0x210] sm:$0xff]  ;;  %v16655_v45 = vld [vmem:[#allocation2 + $0x218] sm:$0xff] }
 0x1c2   : > { %1212 = vst.msk [vmem:[#allocation2 + $0x241] sm:$0xff] %vm1081_vm0, %v1059_v32  ;;  %v919_v46 = vadd.f32 %v16404_v42, %v918_v39  ;;  %13338 = vmatprep.mubr.msk.f32.mxu0 %vm1081_vm0, %v16653_v44  ;;  %v3437_v29 = vld [vmem:[#allocation6 + $0x70] sm:$0xff]  ;;  %v3438_v32 = vld [vmem:[#allocation6 + $0x78] sm:$0xff] }
 0x1c3   : > { %v1062_v47 = vmax.f32 %v924_v37, 0.0  ;;  %13339 = vmatmul.mubr.msk.f32.gmra.mrb[104].mxu0 %vm1081_vm0, %v16655_v45 }
 0x1c4   : > { %v1061_v52 = vmax.f32 %v919_v46, 0.0  ;;  %v13245_v53 = vpop.f32.mrb[46].mxu0 }
 0x1c5   : > { %1215 = vst.msk [vmem:[#allocation2 + $0x261] sm:$0xff] %vm1081_vm0, %v1062_v47  ;;  %v934_v56 = vadd.f32 %v13245_v53, %v16404_v42  ;;  %v928_v57 = vpop.f32.mrb[47].mxu0  ;;  %v16665_v62 = vld [vmem:[#allocation2 + $0x228] sm:$0xff]  ;;  %v16667_v63 = vld [vmem:[#allocation2 + $0x230] sm:$0xff] }
 0x1c6   : > { %1214 = vst.msk [vmem:[#allocation2 + $0x259] sm:$0xff] %vm1081_vm0, %v1061_v52  ;;  %v929_v0 = vadd.f32 %v16404_v42, %v928_v57  ;;  %13341 = vmatprep.mubr.msk.f32.mxu0 %vm1081_vm0, %v16665_v62  ;;  %v14558_v57 = vpack.c.bf16 %v3438_v32, %v3437_v29 }
 0x1c7   : > { %v1064_v1 = vmax.f32 %v934_v56, 0.0  ;;  %13342 = vmatmul.mubr.msk.f32.gmra.mrb[106].mxu0 %vm1081_vm0, %v16667_v63 }
 0x1c8   : > { %v1063_v10 = vmax.f32 %v929_v0, 0.0  ;;  %v13248_v11 = vpop.f32.mrb[48].mxu0 }
 0x1c9   : > { %1217 = vst.msk [vmem:[#allocation2 + $0x279] sm:$0xff] %vm1081_vm0, %v1064_v1  ;;  %v944_v16 = vadd.f32 %v13248_v11, %v16404_v42  ;;  %v938_v17 = vpop.f32.mrb[49].mxu0  ;;  %v16677_v18 = vld [vmem:[#allocation2 + $0x240] sm:$0xff]  ;;  %v16679_v19 = vld [vmem:[#allocation2 + $0x248] sm:$0xff] }
 0x1ca   : > { %1216 = vst.msk [vmem:[#allocation2 + $0x271] sm:$0xff] %vm1081_vm0, %v1063_v10  ;;  %v939_v28 = vadd.f32 %v16404_v42, %v938_v17  ;;  %13344 = vmatprep.mubr.msk.f32.mxu0 %vm1081_vm0, %v16677_v18  ;;  %v4145_v10 = vld [vmem:[#allocation6 + $0x80] sm:$0xff]  ;;  %v4146_v11 = vld [vmem:[#allocation6 + $0x88] sm:$0xff] }
 0x1cb   : > { %v1066_v33 = vmax.f32 %v944_v16, 0.0  ;;  %13345 = vmatmul.mubr.msk.f32.gmra.mrb[108].mxu0 %vm1081_vm0, %v16679_v19 }
 0x1cc   : > { %v1065_v37 = vmax.f32 %v939_v28, 0.0  ;;  %v13251_v39 = vpop.f32.mrb[50].mxu0  ;;  %v2707_v1 = vld [vmem:[#allocation2 + $0x262] sm:$0xff] }
 0x1cd   : > { %1219 = vst.msk [vmem:[#allocation2 + $0x291] sm:$0xff] %vm1081_vm0, %v1066_v33  ;;  %v954_v46 = vadd.f32 %v13251_v39, %v16404_v42  ;;  %v948_v47 = vpop.f32.mrb[51].mxu0  ;;  %v16689_v52 = vld [vmem:[#allocation2 + $0x258] sm:$0xff]  ;;  %v16691_v56 = vld [vmem:[#allocation2 + $0x260] sm:$0xff] }
 0x1ce   : > { %v2706_v53 = vld [vmem:[#allocation2 + $0x25a] sm:$0xff]  ;;  %1218 = vst.msk [vmem:[#allocation2 + $0x289] sm:$0xff] %vm1081_vm0, %v1065_v37  ;;  %v949_v0 = vadd.f32 %v16404_v42, %v948_v47  ;;  %13347 = vmatprep.mubr.msk.f32.mxu0 %vm1081_vm0, %v16689_v52 }
 0x1cf   : > { %13555 = vmatprep.mubr.msk.f32.mxu1 %vm1081_vm0, %v2706_v53  ;;  %v1068_v16 = vmax.f32 %v954_v46, 0.0  ;;  %13348 = vmatmul.mubr.msk.f32.gmra.mrb[110].mxu0 %vm1081_vm0, %v16691_v56  ;;  %v16708_v46 = vpack.c.bf16 %v4146_v11, %v4145_v10 }
 0x1d0   : > { %13556 = vmatmul.mubr.msk.f32.vlgmr.msra.gmra.mrb[0].mxu1 %vm1081_vm0, %v2707_v1  ;;  %v1067_v17 = vmax.f32 %v949_v0, 0.0  ;;  %v13254_v28 = vpop.f32.mrb[52].mxu0 }
 0x1d1   : > { %14557 = vmatpush3.bf16.msra.mxu1 %v16398_v41  ;;  %1221 = vst.msk [vmem:[#allocation2 + $0x2a9] sm:$0xff] %vm1081_vm0, %v1068_v16  ;;  %v964_v29 = vadd.f32 %v13254_v28, %v16404_v42  ;;  %v958_v32 = vpop.f32.mrb[53].mxu0  ;;  %v16704_v33 = vld [vmem:[#allocation2 + $0x270] sm:$0xff]  ;;  %v16706_v39 = vld [vmem:[#allocation2 + $0x278] sm:$0xff] }
 0x1d2   : > { %v2708_v37 = vld [vmem:[#allocation2 + $0x272] sm:$0xff]  ;;  %14559 = vmatprep.subr.bf16.mxu1 %v14558_v57  ;;  %1220 = vst.msk [vmem:[#allocation2 + $0x2a1] sm:$0xff] %vm1081_vm0, %v1067_v17  ;;  %v959_v47 = vadd.f32 %v16404_v42, %v958_v32  ;;  %13350 = vmatprep.mubr.msk.f32.mxu0 %vm1081_vm0, %v16704_v33  ;;  %v2709_v41 = vld [vmem:[#allocation2 + $0x27a] sm:$0xff] }
 0x1d3   : > { %13558 = vmatprep.mubr.msk.f32.mxu1 %vm1081_vm0, %v2708_v37  ;;  %v1070_v53 = vmax.f32 %v964_v29, 0.0  ;;  %13351 = vmatmul.mubr.msk.f32.gmra.mrb[112].mxu0 %vm1081_vm0, %v16706_v39 }
 0x1d4   : > { %13559 = vmatmul.mubr.msk.f32.gmra.mrb[2].mxu1 %vm1081_vm0, %v2709_v41  ;;  %v1069_v0 = vmax.f32 %v959_v47, 0.0  ;;  %v13257_v1 = vpop.f32.mrb[54].mxu0 }
 0x1d5   : > { %14561 = vmatpush3.bf16.msra.mxu1 %v14558_v57  ;;  %1223 = vst.msk [vmem:[#allocation2 + $0x2c1] sm:$0xff] %vm1081_vm0, %v1070_v53  ;;  %v974_v10 = vadd.f32 %v13257_v1, %v16404_v42  ;;  %v968_v11 = vpop.f32.mrb[55].mxu0  ;;  %v16720_v16 = vld [vmem:[#allocation2 + $0x288] sm:$0xff]  ;;  %v16722_v28 = vld [vmem:[#allocation2 + $0x290] sm:$0xff] }
 0x1d6   : > { %v2710_v17 = vld [vmem:[#allocation2 + $0x28a] sm:$0xff]  ;;  %20641 = vst [vmem:[#allocation15_spill] sm:$0xff] %v16722_v28  ;;  %14563 = vmatprep.subr.bf16.mxu1 %v16708_v46  ;;  %1222 = vst.msk [vmem:[#allocation2 + $0x2b9] sm:$0xff] %vm1081_vm0, %v1069_v0  ;;  %v969_v29 = vadd.f32 %v16404_v42, %v968_v11  ;;  %13353 = vmatprep.mubr.msk.f32.mxu0 %vm1081_vm0, %v16720_v16  ;;  %v2711_v57 = vld [vmem:[#allocation2 + $0x292] sm:$0xff] }
 0x1d7   : > { %13561 = vmatprep.mubr.msk.f32.mxu1 %vm1081_vm0, %v2710_v17  ;;  %v1072_v32 = vmax.f32 %v974_v10, 0.0  ;;  %13354 = vmatmul.mubr.msk.f32.gmra.mrb[114].mxu0 %vm1081_vm0, %v16722_v28 }
 0x1d8   : > { %13562 = vmatmul.mubr.msk.f32.gmra.mrb[4].mxu1 %vm1081_vm0, %v2711_v57  ;;  %v1071_v37 = vmax.f32 %v969_v29, 0.0  ;;  %v13260_v47 = vpop.f32.mrb[56].mxu0  ;;  %v2713_v17 = vld [vmem:[#allocation2 + $0x2aa] sm:$0xff] }
 0x1d9   : > { %1225 = vst.msk [vmem:[#allocation2 + $0x2d9] sm:$0xff] %vm1081_vm0, %v1072_v32  ;;  %v984_v41 = vadd.f32 %v13260_v47, %v16404_v42  ;;  %v978_v53 = vpop.f32.mrb[57].mxu0  ;;  %v16735_v0 = vld [vmem:[#allocation2 + $0x2a0] sm:$0xff]  ;;  %v16737_v11 = vld [vmem:[#allocation2 + $0x2a8] sm:$0xff] }
 0x1da   : > { %20642 = vst [vmem:[#allocation16_spill] sm:$0xff] %v16735_v0  ;;  %v2712_v1 = vld [vmem:[#allocation2 + $0x2a2] sm:$0xff]  ;;  %20643 = vst [vmem:[#allocation17_spill] sm:$0xff] %v16737_v11  ;;  %v979_v10 = vadd.f32 %v16404_v42, %v978_v53  ;;  %13356 = vmatprep.mubr.msk.f32.mxu0 %vm1081_vm0, %v16735_v0 }
 0x1db   : > { %1224 = vst.msk [vmem:[#allocation2 + $0x2d1] sm:$0xff] %vm1081_vm0, %v1071_v37  ;;  %13564 = vmatprep.mubr.msk.f32.mxu1 %vm1081_vm0, %v2712_v1  ;;  %v1074_v29 = vmax.f32 %v984_v41, 0.0  ;;  %13357 = vmatmul.mubr.msk.f32.gmra.mrb[116].mxu0 %vm1081_vm0, %v16737_v11 }
 0x1dc   : > { %13565 = vmatmul.mubr.msk.f32.gmra.mrb[6].mxu1 %vm1081_vm0, %v2713_v17  ;;  %v1073_v57 = vmax.f32 %v979_v10, 0.0  ;;  %v13263_v32 = vpop.f32.mrb[58].mxu0  ;;  %v2715_v1 = vld [vmem:[#allocation2 + $0x2c2] sm:$0xff] }
 0x1dd   : > { %1227 = vst.msk [vmem:[#allocation2 + $0x2f1] sm:$0xff] %vm1081_vm0, %v1074_v29  ;;  %v994_v37 = vadd.f32 %v13263_v32, %v16404_v42  ;;  %v988_v47 = vpop.f32.mrb[59].mxu0  ;;  %v16749_v53 = vld [vmem:[#allocation2 + $0x2b8] sm:$0xff]  ;;  %v16751_v0 = vld [vmem:[#allocation2 + $0x2c0] sm:$0xff] }
 0x1de   : > { %20644 = vst [vmem:[#allocation18_spill] sm:$0xff] %v16749_v53  ;;  %v2714_v28 = vld [vmem:[#allocation2 + $0x2ba] sm:$0xff]  ;;  %20645 = vst [vmem:[#allocation19_spill] sm:$0xff] %v16751_v0  ;;  %v989_v41 = vadd.f32 %v16404_v42, %v988_v47  ;;  %13359 = vmatprep.mubr.msk.f32.mxu0 %vm1081_vm0, %v16749_v53 }
 0x1df   : > { %1226 = vst.msk [vmem:[#allocation2 + $0x2e9] sm:$0xff] %vm1081_vm0, %v1073_v57  ;;  %13567 = vmatprep.mubr.msk.f32.mxu1 %vm1081_vm0, %v2714_v28  ;;  %v1076_v10 = vmax.f32 %v994_v37, 0.0  ;;  %13360 = vmatmul.mubr.msk.f32.gmra.mrb[118].mxu0 %vm1081_vm0, %v16751_v0 }
 0x1e0   : > { %13568 = vmatmul.mubr.msk.f32.gmra.mrb[8].mxu1 %vm1081_vm0, %v2715_v1  ;;  %v1075_v17 = vmax.f32 %v989_v41, 0.0  ;;  %v13266_v29 = vpop.f32.mrb[60].mxu0  ;;  %v2717_v37 = vld [vmem:[#allocation2 + $0x2da] sm:$0xff] }
 0x1e1   : > { %1229 = vst.msk [vmem:[#allocation2 + $0x309] sm:$0xff] %vm1081_vm0, %v1076_v10  ;;  %v1004_v57 = vadd.f32 %v13266_v29, %v16404_v42  ;;  %v998_v32 = vpop.f32.mrb[61].mxu0 }
 0x1e2   : > { %v16763_v47 = vld [vmem:[#allocation2 + $0x2d0] sm:$0xff]  ;;  %v16765_v53 = vld [vmem:[#allocation2 + $0x2d8] sm:$0xff]  ;;  %1228 = vst.msk [vmem:[#allocation2 + $0x301] sm:$0xff] %vm1081_vm0, %v1075_v17  ;;  %v999_v28 = vadd.f32 %v16404_v42, %v998_v32 }
 0x1e3   : > { %20646 = vst [vmem:[#allocation20_spill] sm:$0xff] %v16763_v47  ;;  %v2716_v11 = vld [vmem:[#allocation2 + $0x2d2] sm:$0xff]  ;;  %20647 = vst [vmem:[#allocation21_spill] sm:$0xff] %v16765_v53  ;;  %13362 = vmatprep.mubr.msk.f32.mxu0 %vm1081_vm0, %v16763_v47  ;;  %v1078_v41 = vmax.f32 %v1004_v57, 0.0 }
 0x1e4   : > { %13570 = vmatprep.mubr.msk.f32.mxu1 %vm1081_vm0, %v2716_v11  ;;  %13363 = vmatmul.mubr.msk.f32.gmra.mrb[120].mxu0 %vm1081_vm0, %v16765_v53  ;;  %v1077_v1 = vmax.f32 %v999_v28, 0.0  ;;  %v13269_v10 = vpop.f32.mrb[62].mxu0  ;;  %v2719_v11 = vld [vmem:[#allocation2 + $0x2f2] sm:$0xff] }
 0x1e5   : > { %13571 = vmatmul.mubr.msk.f32.gmra.mrb[10].mxu1 %vm1081_vm0, %v2717_v37  ;;  %1231 = vst.msk [vmem:[#allocation2 + $0x321] sm:$0xff] %vm1081_vm0, %v1078_v41  ;;  %v1014_v47 = vadd.f32 %v13269_v10, %v16404_v42  ;;  %v1008_v0 = vpop.f32.mrb[63].mxu0 }
 0x1e6   : > { %v16776_v29 = vld [vmem:[#allocation2 + $0x2e8] sm:$0xff]  ;;  %v16778_v32 = vld [vmem:[#allocation2 + $0x2f0] sm:$0xff]  ;;  %1230 = vst.msk [vmem:[#allocation2 + $0x319] sm:$0xff] %vm1081_vm0, %v1077_v1  ;;  %v1009_v57 = vadd.f32 %v16404_v42, %v1008_v0 }
 0x1e7   : > { %v2718_v17 = vld [vmem:[#allocation2 + $0x2ea] sm:$0xff]  ;;  %13365 = vmatprep.mubr.msk.f32.mxu0 %vm1081_vm0, %v16776_v29  ;;  %v1080_v28 = vmax.f32 %v1014_v47, 0.0  ;;  %v1950_v0 = vld [vmem:[#allocation2 + $0x1] sm:$0xff] }
 0x1e8   : > { %13573 = vmatprep.mubr.msk.f32.mxu1 %vm1081_vm0, %v2718_v17  ;;  %13366 = vmatmul.mubr.msk.f32.gmra.mrb[122].mxu0 %vm1081_vm0, %v16778_v32  ;;  %v1079_v37 = vmax.f32 %v1009_v57, 0.0  ;;  %v2721_v42 = vld [vmem:[#allocation2 + $0x30a] sm:$0xff] }
 0x1e9   : > { %13574 = vmatmul.mubr.msk.f32.gmra.mrb[12].mxu1 %vm1081_vm0, %v2719_v11  ;;  %v16789_v41 = vld [vmem:[#allocation2 + $0x300] sm:$0xff]  ;;  %v16791_v53 = vld [vmem:[#allocation2 + $0x308] sm:$0xff]  ;;  %1233 = vst.msk [vmem:[#allocation2 + $0x339] sm:$0xff] %vm1081_vm0, %v1080_v28  ;;  %v4147_v57 = vld [vmem:[#allocation6 + $0x90] sm:$0xff] }
 0x1ea   : > { %v2720_v10 = vld [vmem:[#allocation2 + $0x302] sm:$0xff]  ;;  %13368 = vmatprep.mubr.msk.f32.mxu0 %vm1081_vm0, %v16789_v41  ;;  %1232 = vst.msk [vmem:[#allocation2 + $0x331] sm:$0xff] %vm1081_vm0, %v1079_v37  ;;  %v4148_v28 = vld [vmem:[#allocation6 + $0x98] sm:$0xff] }
 0x1eb   : > { %13576 = vmatprep.mubr.msk.f32.mxu1 %vm1081_vm0, %v2720_v10  ;;  %v1951_v37 = vld [vmem:[#allocation2 + $0x9] sm:$0xff]  ;;  %v14566_v10 = vpack.c.bf16 %v4148_v28, %v4147_v57  ;;  %v17110_v28 = vld [vmem:[#allocation2 + $0x291] sm:$0xff] }
 0x1ec   : > { %13369 = vmatmul.mubr.msk.f32.gmra.mrb[124].mxu0 %vm1081_vm0, %v16791_v53  ;;  %v2723_v11 = vld [vmem:[#allocation2 + $0x322] sm:$0xff] }
 0x1ed   : > { %13577 = vmatmul.mubr.msk.f32.gmra.mrb[14].mxu1 %vm1081_vm0, %v2721_v42  ;;  %v16801_v47 = vld [vmem:[#allocation2 + $0x318] sm:$0xff]  ;;  %v16803_v17 = vld [vmem:[#allocation2 + $0x320] sm:$0xff]  ;;  %v17104_v57 = vld [vmem:[#allocation2 + $0x289] sm:$0xff] }
 0x1ee   : > { %20648 = vst [vmem:[#allocation22_spill] sm:$0xff] %v16801_v47  ;;  %v2722_v1 = vld [vmem:[#allocation2 + $0x31a] sm:$0xff]  ;;  %13371 = vmatprep.mubr.msk.f32.mxu0 %vm1081_vm0, %v16801_v47  ;;  %v4856_v47 = vld [vmem:[#allocation6 + $0xa8] sm:$0xff] }
 0x1ef   : > { %13579 = vmatprep.mubr.msk.f32.mxu1 %vm1081_vm0, %v2722_v1  ;;  %v16817_v42 = vld [vmem:[#allocation2 + $0x19] sm:$0xff] }
 0x1f0   : > { %13372 = vmatmul.mubr.msk.f32.gmra.mrb[126].mxu0 %vm1081_vm0, %v16803_v17  ;;  %v4855_v1 = vld [vmem:[#allocation6 + $0xa0] sm:$0xff] }
 0x1f1   : > { %13580 = vmatmul.mubr.msk.f32.gmra.mrb[16].mxu1 %vm1081_vm0, %v2723_v11  ;;  %13382 = vmatprep.mubr.msk.f32.mxu0 %vm1081_vm0, %v1950_v0  ;;  %v16827_v0 = vpack.c.bf16 %v4856_v47, %v4855_v1  ;;  %v17008_v47 = vld [vmem:[#allocation2 + $0x1c9] sm:$0xff]  ;;  %v17014_v11 = vld [vmem:[#allocation2 + $0x1d1] sm:$0xff] }
 0x1f2   : > { %13590 = vmatprep.mubr.msk.f32.mxu1 %vm1081_vm0, %v16431_v6  ;;  %v16824_v6 = vld [vmem:[#allocation2 + $0x21] sm:$0xff]  ;;  %v17122_v1 = vld [vmem:[#allocation2 + $0x2a9] sm:$0xff] }
 0x1f4   : > { %13383 = vmatmul.mubr.msk.f32.vlgmr.msra.gmra.mrb[64].mxu0 %vm1081_vm0, %v1951_v37  ;;  %v17116_v37 = vld [vmem:[#allocation2 + $0x2a1] sm:$0xff] }
 0x1f5   : > { %13591 = vmatmul.mubr.msk.f32.vlgmr.msra.gmra.mrb[18].mxu1 %vm1081_vm0, %v16433_v7  ;;  %13385 = vmatprep.mubr.msk.f32.mxu0 %vm1081_vm0, %v16817_v42  ;;  %v16833_v7 = vld [vmem:[#allocation2 + $0x31] sm:$0xff] }
 0x1f6   : > { %14565 = vmatpush3.bf16.msra.mxu1 %v16708_v46  ;;  %13593 = vmatprep.mubr.msk.f32.mxu1 %vm1081_vm0, %v16443_v14  ;;  %v16848_v14 = vld [vmem:[#allocation2 + $0x49] sm:$0xff]  ;;  %v16997_v46 = vld [vmem:[#allocation2 + $0x171] sm:$0xff] }
 0x1f7   : > { %14567 = vmatprep.subr.bf16.mxu1 %v14566_v10  ;;  %14549 = vmatpush3.bf16.msra.mxu0 %v16390_v35  ;;  %v16840_v35 = vld [vmem:[#allocation2 + $0x39] sm:$0xff] }
 0x1f8   : > { %13386 = vmatmul.mubr.msk.f32.gmra.mrb[66].mxu0 %vm1081_vm0, %v16824_v6  ;;  %14551 = vmatprep.subr.bf16.mxu0 %v16394_v38 }
 0x1f9   : > { %13594 = vmatmul.mubr.msk.f32.gmra.mrb[20].mxu1 %vm1081_vm0, %v16445_v15  ;;  %13388 = vmatprep.mubr.msk.f32.mxu0 %vm1081_vm0, %v16833_v7  ;;  %v16854_v15 = vld [vmem:[#allocation2 + $0x51] sm:$0xff] }
 0x1fa   : > { %13596 = vmatprep.mubr.msk.f32.mxu1 %vm1081_vm0, %v16455_v22  ;;  %14569 = vmatpush3.bf16.msra.mxu1 %v14566_v10  ;;  %v16866_v22 = vld [vmem:[#allocation2 + $0x69] sm:$0xff]  ;;  %v20652_v10 = vld [vmem:[#allocation18_spill] sm:$0xff] }
 0x1fb   : > { %14553 = vmatpush3.bf16.msra.mxu0 %v16394_v38  ;;  %14571 = vmatprep.subr.bf16.mxu1 %v16827_v0  ;;  %v16860_v38 = vld [vmem:[#allocation2 + $0x61] sm:$0xff] }
 0x1fc   : > { %13389 = vmatmul.mubr.msk.f32.gmra.mrb[68].mxu0 %vm1081_vm0, %v16840_v35 }
 0x1fd   : > { %13597 = vmatmul.mubr.msk.f32.gmra.mrb[22].mxu1 %vm1081_vm0, %v16457_v23  ;;  %13391 = vmatprep.mubr.msk.f32.mxu0 %vm1081_vm0, %v16848_v14  ;;  %v16872_v23 = vld [vmem:[#allocation2 + $0x79] sm:$0xff] }
 0x1fe   : > { %13599 = vmatprep.mubr.msk.f32.mxu1 %vm1081_vm0, %v16467_v30  ;;  %v16878_v30 = vld [vmem:[#allocation2 + $0x81] sm:$0xff] }
 0x200   : > { %13392 = vmatmul.mubr.msk.f32.gmra.mrb[70].mxu0 %vm1081_vm0, %v16854_v15 }
 0x201   : > { %13600 = vmatmul.mubr.msk.f32.gmra.mrb[24].mxu1 %vm1081_vm0, %v16469_v31  ;;  %13394 = vmatprep.mubr.msk.f32.mxu0 %vm1081_vm0, %v16860_v38  ;;  %v16884_v31 = vld [vmem:[#allocation2 + $0x91] sm:$0xff] }
 0x202   : > { %13602 = vmatprep.mubr.msk.f32.mxu1 %vm1081_vm0, %v16479_v40  ;;  %v16890_v40 = vld [vmem:[#allocation2 + $0x99] sm:$0xff] }
 0x204   : > { %13395 = vmatmul.mubr.msk.f32.gmra.mrb[72].mxu0 %vm1081_vm0, %v16866_v22 }
 0x205   : > { %13603 = vmatmul.mubr.msk.f32.gmra.mrb[26].mxu1 %vm1081_vm0, %v16481_v43  ;;  %13397 = vmatprep.mubr.msk.f32.mxu0 %vm1081_vm0, %v16872_v23  ;;  %v16896_v43 = vld [vmem:[#allocation2 + $0xa9] sm:$0xff] }
 0x206   : > { %13605 = vmatprep.mubr.msk.f32.mxu1 %vm1081_vm0, %v16491_v50  ;;  %v16902_v50 = vld [vmem:[#allocation2 + $0xb1] sm:$0xff] }
 0x208   : > { %13398 = vmatmul.mubr.msk.f32.gmra.mrb[74].mxu0 %vm1081_vm0, %v16878_v30 }
 0x209   : > { %13606 = vmatmul.mubr.msk.f32.gmra.mrb[28].mxu1 %vm1081_vm0, %v16493_v51  ;;  %13400 = vmatprep.mubr.msk.f32.mxu0 %vm1081_vm0, %v16884_v31  ;;  %v16908_v51 = vld [vmem:[#allocation2 + $0xc1] sm:$0xff] }
 0x20a   : > { %13608 = vmatprep.mubr.msk.f32.mxu1 %vm1081_vm0, %v16503_v58  ;;  %v16914_v58 = vld [vmem:[#allocation2 + $0xc9] sm:$0xff] }
 0x20c   : > { %13401 = vmatmul.mubr.msk.f32.gmra.mrb[76].mxu0 %vm1081_vm0, %v16890_v40 }
 0x20d   : > { %13609 = vmatmul.mubr.msk.f32.gmra.mrb[30].mxu1 %vm1081_vm0, %v16505_v59  ;;  %13403 = vmatprep.mubr.msk.f32.mxu0 %vm1081_vm0, %v16896_v43  ;;  %v16920_v59 = vld [vmem:[#allocation2 + $0xd9] sm:$0xff] }
 0x20e   : > { %13611 = vmatprep.mubr.msk.f32.mxu1 %vm1081_vm0, %v16515_v2  ;;  %v16926_v2 = vld [vmem:[#allocation2 + $0xe1] sm:$0xff] }
 0x210   : > { %13404 = vmatmul.mubr.msk.f32.gmra.mrb[78].mxu0 %vm1081_vm0, %v16902_v50 }
 0x211   : > { %13612 = vmatmul.mubr.msk.f32.gmra.mrb[32].mxu1 %vm1081_vm0, %v16517_v3  ;;  %13406 = vmatprep.mubr.msk.f32.mxu0 %vm1081_vm0, %v16908_v51  ;;  %v16932_v3 = vld [vmem:[#allocation2 + $0xf1] sm:$0xff] }
 0x212   : > { %13614 = vmatprep.mubr.msk.f32.mxu1 %vm1081_vm0, %v16527_v12  ;;  %v16938_v12 = vld [vmem:[#allocation2 + $0xf9] sm:$0xff] }
 0x214   : > { %13407 = vmatmul.mubr.msk.f32.gmra.mrb[80].mxu0 %vm1081_vm0, %v16914_v58 }
 0x215   : > { %13615 = vmatmul.mubr.msk.f32.gmra.mrb[34].mxu1 %vm1081_vm0, %v16529_v13  ;;  %13409 = vmatprep.mubr.msk.f32.mxu0 %vm1081_vm0, %v16920_v59  ;;  %v16944_v13 = vld [vmem:[#allocation2 + $0x109] sm:$0xff] }
 0x216   : > { %13617 = vmatprep.mubr.msk.f32.mxu1 %vm1081_vm0, %v16539_v24  ;;  %v16950_v24 = vld [vmem:[#allocation2 + $0x111] sm:$0xff] }
 0x218   : > { %13410 = vmatmul.mubr.msk.f32.gmra.mrb[82].mxu0 %vm1081_vm0, %v16926_v2 }
 0x219   : > { %13618 = vmatmul.mubr.msk.f32.gmra.mrb[36].mxu1 %vm1081_vm0, %v16541_v25  ;;  %13412 = vmatprep.mubr.msk.f32.mxu0 %vm1081_vm0, %v16932_v3  ;;  %v16956_v25 = vld [vmem:[#allocation2 + $0x121] sm:$0xff] }
 0x21a   : > { %13620 = vmatprep.mubr.msk.f32.mxu1 %vm1081_vm0, %v16551_v34  ;;  %v16962_v34 = vld [vmem:[#allocation2 + $0x129] sm:$0xff] }
 0x21c   : > { %13413 = vmatmul.mubr.msk.f32.gmra.mrb[84].mxu0 %vm1081_vm0, %v16938_v12 }
 0x21d   : > { %13621 = vmatmul.mubr.msk.f32.gmra.mrb[38].mxu1 %vm1081_vm0, %v16553_v36  ;;  %13415 = vmatprep.mubr.msk.f32.mxu0 %vm1081_vm0, %v16944_v13  ;;  %v16968_v36 = vld [vmem:[#allocation2 + $0x139] sm:$0xff] }
 0x21e   : > { %13623 = vmatprep.mubr.msk.f32.mxu1 %vm1081_vm0, %v16563_v48  ;;  %v16974_v48 = vld [vmem:[#allocation2 + $0x141] sm:$0xff] }
 0x220   : > { %13416 = vmatmul.mubr.msk.f32.gmra.mrb[86].mxu0 %vm1081_vm0, %v16950_v24 }
 0x221   : > { %13624 = vmatmul.mubr.msk.f32.gmra.mrb[40].mxu1 %vm1081_vm0, %v16565_v49  ;;  %13418 = vmatprep.mubr.msk.f32.mxu0 %vm1081_vm0, %v16956_v25  ;;  %v16980_v49 = vld [vmem:[#allocation2 + $0x151] sm:$0xff] }
 0x222   : > { %13626 = vmatprep.mubr.msk.f32.mxu1 %vm1081_vm0, %v16575_v60  ;;  %v16986_v60 = vld [vmem:[#allocation2 + $0x159] sm:$0xff] }
 0x224   : > { %13419 = vmatmul.mubr.msk.f32.gmra.mrb[88].mxu0 %vm1081_vm0, %v16962_v34 }
 0x225   : > { %13627 = vmatmul.mubr.msk.f32.gmra.mrb[42].mxu1 %vm1081_vm0, %v16577_v61  ;;  %13421 = vmatprep.mubr.msk.f32.mxu0 %vm1081_vm0, %v16968_v36  ;;  %v16992_v61 = vld [vmem:[#allocation2 + $0x169] sm:$0xff] }
 0x226   : > { %13629 = vmatprep.mubr.msk.f32.mxu1 %vm1081_vm0, %v16587_v8  ;;  %v3400_v8 = vld [vmem:[#allocation2 + $0x180] sm:$0xff] }
 0x228   : > { %13422 = vmatmul.mubr.msk.f32.gmra.mrb[90].mxu0 %vm1081_vm0, %v16974_v48 }
 0x229   : > { %13630 = vmatmul.mubr.msk.f32.gmra.mrb[44].mxu1 %vm1081_vm0, %v16589_v9  ;;  %13424 = vmatprep.mubr.msk.f32.mxu0 %vm1081_vm0, %v16980_v49  ;;  %v1982_v9 = vld [vmem:[#allocation2 + $0x1b1] sm:$0xff] }
 0x22a   : > { %13632 = vmatprep.mubr.msk.f32.mxu1 %vm1081_vm0, %v16599_v20  ;;  %v3401_v20 = vld [vmem:[#allocation2 + $0x188] sm:$0xff] }
 0x22c   : > { %13425 = vmatmul.mubr.msk.f32.gmra.mrb[92].mxu0 %vm1081_vm0, %v16986_v60 }
 0x22d   : > { %13633 = vmatmul.mubr.msk.f32.gmra.mrb[46].mxu1 %vm1081_vm0, %v16601_v21  ;;  %13427 = vmatprep.mubr.msk.f32.mxu0 %vm1081_vm0, %v16992_v61  ;;  %v1983_v21 = vld [vmem:[#allocation2 + $0x1b9] sm:$0xff] }
 0x22e   : > { %13635 = vmatprep.mubr.msk.f32.mxu1 %vm1081_vm0, %v3400_v8  ;;  %v20653_v8 = vld [vmem:[#allocation19_spill] sm:$0xff] }
 0x230   : > { %13428 = vmatmul.mubr.msk.f32.gmra.mrb[94].mxu0 %vm1081_vm0, %v16997_v46 }
 0x231   : > { %13636 = vmatmul.mubr.msk.f32.gmra.mrb[48].mxu1 %vm1081_vm0, %v3401_v20  ;;  %13430 = vmatprep.mubr.msk.f32.mxu0 %vm1081_vm0, %v1982_v9  ;;  %v17128_v9 = vld [vmem:[#allocation2 + $0x2b9] sm:$0xff]  ;;  %v20654_v20 = vld [vmem:[#allocation20_spill] sm:$0xff] }
 0x232   : > { %13638 = vmatprep.mubr.msk.f32.mxu1 %vm1081_vm0, %v16617_v54  ;;  %v17020_v54 = vld [vmem:[#allocation2 + $0x1e1] sm:$0xff] }
 0x234   : > { %13431 = vmatmul.mubr.msk.f32.gmra.mrb[96].mxu0 %vm1081_vm0, %v1983_v21  ;;  %v17134_v21 = vld [vmem:[#allocation2 + $0x2c1] sm:$0xff] }
 0x235   : > { %13639 = vmatmul.mubr.msk.f32.gmra.mrb[50].mxu1 %vm1081_vm0, %v16619_v55  ;;  %13433 = vmatprep.mubr.msk.f32.mxu0 %vm1081_vm0, %v17008_v47  ;;  %v17026_v55 = vld [vmem:[#allocation2 + $0x1e9] sm:$0xff] }
 0x236   : > { %13641 = vmatprep.mubr.msk.f32.mxu1 %vm1081_vm0, %v16629_v4  ;;  %v17032_v4 = vld [vmem:[#allocation2 + $0x1f9] sm:$0xff] }
 0x238   : > { %13434 = vmatmul.mubr.msk.f32.gmra.mrb[98].mxu0 %vm1081_vm0, %v17014_v11 }
 0x239   : > { %13642 = vmatmul.mubr.msk.f32.gmra.mrb[52].mxu1 %vm1081_vm0, %v16631_v5  ;;  %13436 = vmatprep.mubr.msk.f32.mxu0 %vm1081_vm0, %v17020_v54  ;;  %v17038_v5 = vld [vmem:[#allocation2 + $0x201] sm:$0xff] }
 0x23a   : > { %13644 = vmatprep.mubr.msk.f32.mxu1 %vm1081_vm0, %v16641_v26  ;;  %v17044_v26 = vld [vmem:[#allocation2 + $0x211] sm:$0xff] }
 0x23c   : > { %13437 = vmatmul.mubr.msk.f32.gmra.mrb[100].mxu0 %vm1081_vm0, %v17026_v55 }
 0x23d   : > { %13645 = vmatmul.mubr.msk.f32.gmra.mrb[54].mxu1 %vm1081_vm0, %v16643_v27  ;;  %13439 = vmatprep.mubr.msk.f32.mxu0 %vm1081_vm0, %v17032_v4  ;;  %v17050_v27 = vld [vmem:[#allocation2 + $0x219] sm:$0xff] }
 0x23e   : > { %13647 = vmatprep.mubr.msk.f32.mxu1 %vm1081_vm0, %v16653_v44  ;;  %v17056_v44 = vld [vmem:[#allocation2 + $0x229] sm:$0xff] }
 0x240   : > { %13440 = vmatmul.mubr.msk.f32.gmra.mrb[102].mxu0 %vm1081_vm0, %v17038_v5 }
 0x241   : > { %13648 = vmatmul.mubr.msk.f32.gmra.mrb[56].mxu1 %vm1081_vm0, %v16655_v45  ;;  %13442 = vmatprep.mubr.msk.f32.mxu0 %vm1081_vm0, %v17044_v26  ;;  %v17062_v45 = vld [vmem:[#allocation2 + $0x231] sm:$0xff] }
 0x242   : > { %13650 = vmatprep.mubr.msk.f32.mxu1 %vm1081_vm0, %v16665_v62  ;;  %v17068_v62 = vld [vmem:[#allocation2 + $0x241] sm:$0xff] }
 0x244   : > { %13443 = vmatmul.mubr.msk.f32.gmra.mrb[104].mxu0 %vm1081_vm0, %v17050_v27 }
 0x245   : > { %13651 = vmatmul.mubr.msk.f32.gmra.mrb[58].mxu1 %vm1081_vm0, %v16667_v63  ;;  %13445 = vmatprep.mubr.msk.f32.mxu0 %vm1081_vm0, %v17056_v44  ;;  %v17074_v63 = vld [vmem:[#allocation2 + $0x249] sm:$0xff] }
 0x246   : > { %13653 = vmatprep.mubr.msk.f32.mxu1 %vm1081_vm0, %v16677_v18  ;;  %v17080_v18 = vld [vmem:[#allocation2 + $0x259] sm:$0xff] }
 0x248   : > { %13446 = vmatmul.mubr.msk.f32.gmra.mrb[106].mxu0 %vm1081_vm0, %v17062_v45 }
 0x249   : > { %13654 = vmatmul.mubr.msk.f32.gmra.mrb[60].mxu1 %vm1081_vm0, %v16679_v19  ;;  %13448 = vmatprep.mubr.msk.f32.mxu0 %vm1081_vm0, %v17068_v62  ;;  %v17086_v19 = vld [vmem:[#allocation2 + $0x261] sm:$0xff] }
 0x24a   : > { %13656 = vmatprep.mubr.msk.f32.mxu1 %vm1081_vm0, %v16689_v52  ;;  %v17092_v52 = vld [vmem:[#allocation2 + $0x271] sm:$0xff] }
 0x24c   : > { %13449 = vmatmul.mubr.msk.f32.gmra.mrb[108].mxu0 %vm1081_vm0, %v17074_v63 }
 0x24d   : > { %13657 = vmatmul.mubr.msk.f32.gmra.mrb[62].mxu1 %vm1081_vm0, %v16691_v56  ;;  %13451 = vmatprep.mubr.msk.f32.mxu0 %vm1081_vm0, %v17080_v18  ;;  %v17098_v56 = vld [vmem:[#allocation2 + $0x279] sm:$0xff] }
 0x24e   : > { %13659 = vmatprep.mubr.msk.f32.mxu1 %vm1081_vm0, %v16704_v33  ;;  %v20649_v33 = vld [vmem:[#allocation15_spill] sm:$0xff] }
 0x250   : > { %13452 = vmatmul.mubr.msk.f32.gmra.mrb[110].mxu0 %vm1081_vm0, %v17086_v19 }
 0x251   : > { %13660 = vmatmul.mubr.msk.f32.gmra.mrb[0].mxu1 %vm1081_vm0, %v16706_v39  ;;  %13454 = vmatprep.mubr.msk.f32.mxu0 %vm1081_vm0, %v17092_v52  ;;  %v20650_v39 = vld [vmem:[#allocation16_spill] sm:$0xff] }
 0x252   : > { %13662 = vmatprep.mubr.msk.f32.mxu1 %vm1081_vm0, %v16720_v16  ;;  %v20651_v16 = vld [vmem:[#allocation17_spill] sm:$0xff] }
 0x254   : > { %13455 = vmatmul.mubr.msk.f32.gmra.mrb[112].mxu0 %vm1081_vm0, %v17098_v56 }
 0x255   : > { %13663 = vmatmul.mubr.msk.f32.gmra.mrb[2].mxu1 %vm1081_vm0, %v20649_v33  ;;  %13457 = vmatprep.mubr.msk.f32.mxu0 %vm1081_vm0, %v17104_v57  ;;  %v20655_v33 = vld [vmem:[#allocation21_spill] sm:$0xff] }
 0x256   : > { %13665 = vmatprep.mubr.msk.f32.mxu1 %vm1081_vm0, %v20650_v39  ;;  %v17140_v39 = vld [vmem:[#allocation2 + $0x2d1] sm:$0xff] }
 0x258   : > { %13458 = vmatmul.mubr.msk.f32.gmra.mrb[114].mxu0 %vm1081_vm0, %v17110_v28 }
 0x259   : > { %13666 = vmatmul.mubr.msk.f32.gmra.mrb[4].mxu1 %vm1081_vm0, %v20651_v16  ;;  %13460 = vmatprep.mubr.msk.f32.mxu0 %vm1081_vm0, %v17116_v37  ;;  %v17146_v16 = vld [vmem:[#allocation2 + $0x2d9] sm:$0xff] }
 0x25a   : > { %13668 = vmatprep.mubr.msk.f32.mxu1 %vm1081_vm0, %v20652_v10  ;;  %20656 = vst [vmem:[#allocation15_spill] sm:$0xff] %v17146_v16  ;;  %v17152_v10 = vld [vmem:[#allocation2 + $0x2e9] sm:$0xff] }
 0x25b   : > { %20657 = vst [vmem:[#allocation16_spill] sm:$0xff] %v17152_v10 }
 0x25c   : > { %13461 = vmatmul.mubr.msk.f32.gmra.mrb[116].mxu0 %vm1081_vm0, %v17122_v1 }
 0x25d   : > { %13669 = vmatmul.mubr.msk.f32.gmra.mrb[6].mxu1 %vm1081_vm0, %v20653_v8  ;;  %13463 = vmatprep.mubr.msk.f32.mxu0 %vm1081_vm0, %v17128_v9  ;;  %v17158_v8 = vld [vmem:[#allocation2 + $0x2f1] sm:$0xff] }
 0x25e   : > { %13671 = vmatprep.mubr.msk.f32.mxu1 %vm1081_vm0, %v20654_v20  ;;  %20658 = vst [vmem:[#allocation17_spill] sm:$0xff] %v17158_v8  ;;  %v3432_v20 = vld [vmem:[#allocation2 + $0x330] sm:$0xff] }
 0x260   : > { %13464 = vmatmul.mubr.msk.f32.gmra.mrb[118].mxu0 %vm1081_vm0, %v17134_v21 }
 0x261   : > { %13672 = vmatmul.mubr.msk.f32.gmra.mrb[8].mxu1 %vm1081_vm0, %v20655_v33  ;;  %13466 = vmatprep.mubr.msk.f32.mxu0 %vm1081_vm0, %v17140_v39  ;;  %v17170_v33 = vld [vmem:[#allocation2 + $0x309] sm:$0xff] }
 0x262   : > { %13674 = vmatprep.mubr.msk.f32.mxu1 %vm1081_vm0, %v16776_v29  ;;  %v17164_v29 = vld [vmem:[#allocation2 + $0x301] sm:$0xff]  ;;  %20661 = vst [vmem:[#allocation19_spill] sm:$0xff] %v17170_v33 }
 0x263   : > { %20659 = vst [vmem:[#allocation18_spill] sm:$0xff] %v17164_v29 }
 0x264   : > { %13467 = vmatmul.mubr.msk.f32.gmra.mrb[120].mxu0 %vm1081_vm0, %v17146_v16  ;;  %v5567_v16 = vld [vmem:[#allocation6 + $0xc8] sm:$0xff] }
 0x265   : > { %13675 = vmatmul.mubr.msk.f32.gmra.mrb[10].mxu1 %vm1081_vm0, %v16778_v32  ;;  %13469 = vmatprep.mubr.msk.f32.mxu0 %vm1081_vm0, %v17152_v10  ;;  %v20660_v32 = vld [vmem:[#allocation22_spill] sm:$0xff] }
 0x266   : > { %13677 = vmatprep.mubr.msk.f32.mxu1 %vm1081_vm0, %v16789_v41  ;;  %v17176_v41 = vld [vmem:[#allocation2 + $0x319] sm:$0xff] }
 0x267   : > { %20662 = vst [vmem:[#allocation20_spill] sm:$0xff] %v17176_v41  ;;  %v4858_v10 = vld [vmem:[#allocation6 + $0xb8] sm:$0xff] }
 0x268   : > { %13470 = vmatmul.mubr.msk.f32.gmra.mrb[122].mxu0 %vm1081_vm0, %v17158_v8  ;;  %v4857_v8 = vld [vmem:[#allocation6 + $0xb0] sm:$0xff] }
 0x269   : > { %13678 = vmatmul.mubr.msk.f32.gmra.mrb[12].mxu1 %vm1081_vm0, %v16791_v53  ;;  %13472 = vmatprep.mubr.msk.f32.mxu0 %vm1081_vm0, %v17164_v29  ;;  %v17181_v53 = vld [vmem:[#allocation2 + $0x321] sm:$0xff] }
 0x26a   : > { %13680 = vmatprep.mubr.msk.f32.mxu1 %vm1081_vm0, %v20660_v32  ;;  %v2660_v29 = vld [vmem:[#allocation2 + $0x2] sm:$0xff]  ;;  %v3433_v32 = vld [vmem:[#allocation2 + $0x338] sm:$0xff] }
 0x26c   : > { %13473 = vmatmul.mubr.msk.f32.gmra.mrb[124].mxu0 %vm1081_vm0, %v17170_v33  ;;  %v5566_v33 = vld [vmem:[#allocation6 + $0xc0] sm:$0xff] }
 0x26d   : > { %13681 = vmatmul.mubr.msk.f32.gmra.mrb[14].mxu1 %vm1081_vm0, %v16803_v17  ;;  %13475 = vmatprep.mubr.msk.f32.mxu0 %vm1081_vm0, %v17176_v41  ;;  %v2661_v17 = vld [vmem:[#allocation2 + $0xa] sm:$0xff]  ;;  %v14574_v41 = vpack.c.bf16 %v4858_v10, %v4857_v8  ;;  %v17201_v10 = vpack.c.bf16 %v5567_v16, %v5566_v33  ;;  %v4110_v16 = vld [vmem:[#allocation2 + $0x181] sm:$0xff]  ;;  %v17369_v8 = vld [vmem:[#allocation2 + $0x172] sm:$0xff] }
 0x26e   : > { %13683 = vmatprep.mubr.msk.f32.mxu1 %vm1081_vm0, %v3432_v20  ;;  %v17192_v20 = vld [vmem:[#allocation2 + $0x1a] sm:$0xff]  ;;  %v17386_v33 = vld [vmem:[#allocation2 + $0x1d2] sm:$0xff] }
 0x270   : > { %13476 = vmatmul.mubr.msk.f32.gmra.mrb[126].mxu0 %vm1081_vm0, %v17181_v53 }
 0x271   : > { %13684 = vmatmul.mubr.msk.f32.gmra.mrb[16].mxu1 %vm1081_vm0, %v3433_v32  ;;  %13486 = vmatprep.mubr.msk.f32.mxu0 %vm1081_vm0, %v2660_v29  ;;  %v17380_v29 = vld [vmem:[#allocation2 + $0x1ca] sm:$0xff] }
 0x272   : > { %13694 = vmatprep.mubr.msk.f32.mxu1 %vm1081_vm0, %v16817_v42  ;;  %v17199_v42 = vld [vmem:[#allocation2 + $0x22] sm:$0xff] }
 0x274   : > { %13487 = vmatmul.mubr.msk.f32.vlgmr.msra.gmra.mrb[64].mxu0 %vm1081_vm0, %v2661_v17 }
 0x275   : > { %13695 = vmatmul.mubr.msk.f32.vlgmr.msra.gmra.mrb[18].mxu1 %vm1081_vm0, %v16824_v6  ;;  %13489 = vmatprep.mubr.msk.f32.mxu0 %vm1081_vm0, %v17192_v20  ;;  %v17207_v6 = vld [vmem:[#allocation2 + $0x32] sm:$0xff] }
 0x276   : > { %14573 = vmatpush3.bf16.msra.mxu1 %v16827_v0  ;;  %13697 = vmatprep.mubr.msk.f32.mxu1 %vm1081_vm0, %v16833_v7  ;;  %v17213_v0 = vld [vmem:[#allocation2 + $0x3a] sm:$0xff]  ;;  %v17220_v7 = vld [vmem:[#allocation2 + $0x4a] sm:$0xff] }
 0x277   : > { %14575 = vmatprep.subr.bf16.mxu1 %v14574_v41 }
 0x278   : > { %13490 = vmatmul.mubr.msk.f32.gmra.mrb[66].mxu0 %vm1081_vm0, %v17199_v42 }
 0x279   : > { %13698 = vmatmul.mubr.msk.f32.gmra.mrb[20].mxu1 %vm1081_vm0, %v16840_v35  ;;  %13492 = vmatprep.mubr.msk.f32.mxu0 %vm1081_vm0, %v17207_v6  ;;  %v17226_v35 = vld [vmem:[#allocation2 + $0x52] sm:$0xff] }
 0x27a   : > { %13700 = vmatprep.mubr.msk.f32.mxu1 %vm1081_vm0, %v16848_v14  ;;  %14577 = vmatpush3.bf16.msra.mxu1 %v14574_v41  ;;  %v17232_v14 = vld [vmem:[#allocation2 + $0x62] sm:$0xff] }
 0x27b   : > { %14579 = vmatprep.subr.bf16.mxu1 %v17201_v10 }
 0x27c   : > { %13493 = vmatmul.mubr.msk.f32.gmra.mrb[68].mxu0 %vm1081_vm0, %v17213_v0 }
 0x27d   : > { %13701 = vmatmul.mubr.msk.f32.gmra.mrb[22].mxu1 %vm1081_vm0, %v16854_v15  ;;  %13495 = vmatprep.mubr.msk.f32.mxu0 %vm1081_vm0, %v17220_v7  ;;  %v17238_v15 = vld [vmem:[#allocation2 + $0x6a] sm:$0xff] }
 0x27e   : > { %13703 = vmatprep.mubr.msk.f32.mxu1 %vm1081_vm0, %v16860_v38  ;;  %v17244_v38 = vld [vmem:[#allocation2 + $0x7a] sm:$0xff] }
 0x280   : > { %13496 = vmatmul.mubr.msk.f32.gmra.mrb[70].mxu0 %vm1081_vm0, %v17226_v35 }
 0x281   : > { %13704 = vmatmul.mubr.msk.f32.gmra.mrb[24].mxu1 %vm1081_vm0, %v16866_v22  ;;  %13498 = vmatprep.mubr.msk.f32.mxu0 %vm1081_vm0, %v17232_v14  ;;  %v17250_v22 = vld [vmem:[#allocation2 + $0x82] sm:$0xff] }
 0x282   : > { %13706 = vmatprep.mubr.msk.f32.mxu1 %vm1081_vm0, %v16872_v23  ;;  %v17256_v23 = vld [vmem:[#allocation2 + $0x92] sm:$0xff] }
 0x284   : > { %13499 = vmatmul.mubr.msk.f32.gmra.mrb[72].mxu0 %vm1081_vm0, %v17238_v15 }
 0x285   : > { %13707 = vmatmul.mubr.msk.f32.gmra.mrb[26].mxu1 %vm1081_vm0, %v16878_v30  ;;  %13501 = vmatprep.mubr.msk.f32.mxu0 %vm1081_vm0, %v17244_v38  ;;  %v17262_v30 = vld [vmem:[#allocation2 + $0x9a] sm:$0xff] }
 0x286   : > { %13709 = vmatprep.mubr.msk.f32.mxu1 %vm1081_vm0, %v16884_v31  ;;  %v17268_v31 = vld [vmem:[#allocation2 + $0xaa] sm:$0xff] }
 0x288   : > { %13502 = vmatmul.mubr.msk.f32.gmra.mrb[74].mxu0 %vm1081_vm0, %v17250_v22 }
 0x289   : > { %13710 = vmatmul.mubr.msk.f32.gmra.mrb[28].mxu1 %vm1081_vm0, %v16890_v40  ;;  %13504 = vmatprep.mubr.msk.f32.mxu0 %vm1081_vm0, %v17256_v23  ;;  %v17274_v40 = vld [vmem:[#allocation2 + $0xb2] sm:$0xff] }
 0x28a   : > { %13712 = vmatprep.mubr.msk.f32.mxu1 %vm1081_vm0, %v16896_v43  ;;  %v17280_v43 = vld [vmem:[#allocation2 + $0xc2] sm:$0xff] }
 0x28c   : > { %13505 = vmatmul.mubr.msk.f32.gmra.mrb[76].mxu0 %vm1081_vm0, %v17262_v30 }
 0x28d   : > { %13713 = vmatmul.mubr.msk.f32.gmra.mrb[30].mxu1 %vm1081_vm0, %v16902_v50  ;;  %13507 = vmatprep.mubr.msk.f32.mxu0 %vm1081_vm0, %v17268_v31  ;;  %v17286_v50 = vld [vmem:[#allocation2 + $0xca] sm:$0xff] }
 0x28e   : > { %13715 = vmatprep.mubr.msk.f32.mxu1 %vm1081_vm0, %v16908_v51  ;;  %v17292_v51 = vld [vmem:[#allocation2 + $0xda] sm:$0xff] }
 0x290   : > { %13508 = vmatmul.mubr.msk.f32.gmra.mrb[78].mxu0 %vm1081_vm0, %v17274_v40 }
 0x291   : > { %13716 = vmatmul.mubr.msk.f32.gmra.mrb[32].mxu1 %vm1081_vm0, %v16914_v58  ;;  %13510 = vmatprep.mubr.msk.f32.mxu0 %vm1081_vm0, %v17280_v43  ;;  %v17298_v58 = vld [vmem:[#allocation2 + $0xe2] sm:$0xff] }
 0x292   : > { %13718 = vmatprep.mubr.msk.f32.mxu1 %vm1081_vm0, %v16920_v59  ;;  %v17304_v59 = vld [vmem:[#allocation2 + $0xf2] sm:$0xff] }
 0x294   : > { %13511 = vmatmul.mubr.msk.f32.gmra.mrb[80].mxu0 %vm1081_vm0, %v17286_v50 }
 0x295   : > { %13719 = vmatmul.mubr.msk.f32.gmra.mrb[34].mxu1 %vm1081_vm0, %v16926_v2  ;;  %13513 = vmatprep.mubr.msk.f32.mxu0 %vm1081_vm0, %v17292_v51  ;;  %v17310_v2 = vld [vmem:[#allocation2 + $0xfa] sm:$0xff] }
 0x296   : > { %13721 = vmatprep.mubr.msk.f32.mxu1 %vm1081_vm0, %v16932_v3  ;;  %v17316_v3 = vld [vmem:[#allocation2 + $0x10a] sm:$0xff] }
 0x298   : > { %13514 = vmatmul.mubr.msk.f32.gmra.mrb[82].mxu0 %vm1081_vm0, %v17298_v58 }
 0x299   : > { %13722 = vmatmul.mubr.msk.f32.gmra.mrb[36].mxu1 %vm1081_vm0, %v16938_v12  ;;  %13516 = vmatprep.mubr.msk.f32.mxu0 %vm1081_vm0, %v17304_v59  ;;  %v17322_v12 = vld [vmem:[#allocation2 + $0x112] sm:$0xff] }
 0x29a   : > { %13724 = vmatprep.mubr.msk.f32.mxu1 %vm1081_vm0, %v16944_v13  ;;  %v17328_v13 = vld [vmem:[#allocation2 + $0x122] sm:$0xff] }
 0x29c   : > { %13517 = vmatmul.mubr.msk.f32.gmra.mrb[84].mxu0 %vm1081_vm0, %v17310_v2 }
 0x29d   : > { %13725 = vmatmul.mubr.msk.f32.gmra.mrb[38].mxu1 %vm1081_vm0, %v16950_v24  ;;  %13519 = vmatprep.mubr.msk.f32.mxu0 %vm1081_vm0, %v17316_v3  ;;  %v17334_v24 = vld [vmem:[#allocation2 + $0x12a] sm:$0xff] }
 0x29e   : > { %13727 = vmatprep.mubr.msk.f32.mxu1 %vm1081_vm0, %v16956_v25  ;;  %v17340_v25 = vld [vmem:[#allocation2 + $0x13a] sm:$0xff] }
 0x2a0   : > { %13520 = vmatmul.mubr.msk.f32.gmra.mrb[86].mxu0 %vm1081_vm0, %v17322_v12 }
 0x2a1   : > { %13728 = vmatmul.mubr.msk.f32.gmra.mrb[40].mxu1 %vm1081_vm0, %v16962_v34  ;;  %13522 = vmatprep.mubr.msk.f32.mxu0 %vm1081_vm0, %v17328_v13  ;;  %v17346_v34 = vld [vmem:[#allocation2 + $0x142] sm:$0xff] }
 0x2a2   : > { %13730 = vmatprep.mubr.msk.f32.mxu1 %vm1081_vm0, %v16968_v36  ;;  %v17352_v36 = vld [vmem:[#allocation2 + $0x152] sm:$0xff] }
 0x2a4   : > { %13523 = vmatmul.mubr.msk.f32.gmra.mrb[88].mxu0 %vm1081_vm0, %v17334_v24 }
 0x2a5   : > { %13731 = vmatmul.mubr.msk.f32.gmra.mrb[42].mxu1 %vm1081_vm0, %v16974_v48  ;;  %13525 = vmatprep.mubr.msk.f32.mxu0 %vm1081_vm0, %v17340_v25  ;;  %v17358_v48 = vld [vmem:[#allocation2 + $0x15a] sm:$0xff] }
 0x2a6   : > { %13733 = vmatprep.mubr.msk.f32.mxu1 %vm1081_vm0, %v16980_v49  ;;  %v17364_v49 = vld [vmem:[#allocation2 + $0x16a] sm:$0xff] }
 0x2a8   : > { %13526 = vmatmul.mubr.msk.f32.gmra.mrb[90].mxu0 %vm1081_vm0, %v17346_v34 }
 0x2a9   : > { %13734 = vmatmul.mubr.msk.f32.gmra.mrb[44].mxu1 %vm1081_vm0, %v16986_v60  ;;  %13528 = vmatprep.mubr.msk.f32.mxu0 %vm1081_vm0, %v17352_v36  ;;  %v2692_v60 = vld [vmem:[#allocation2 + $0x1b2] sm:$0xff] }
 0x2aa   : > { %13736 = vmatprep.mubr.msk.f32.mxu1 %vm1081_vm0, %v16992_v61  ;;  %v4111_v61 = vld [vmem:[#allocation2 + $0x189] sm:$0xff] }
 0x2ac   : > { %13529 = vmatmul.mubr.msk.f32.gmra.mrb[92].mxu0 %vm1081_vm0, %v17358_v48 }
 0x2ad   : > { %13737 = vmatmul.mubr.msk.f32.gmra.mrb[46].mxu1 %vm1081_vm0, %v16997_v46  ;;  %13531 = vmatprep.mubr.msk.f32.mxu0 %vm1081_vm0, %v17364_v49  ;;  %v2693_v46 = vld [vmem:[#allocation2 + $0x1ba] sm:$0xff] }
 0x2ae   : > { %13739 = vmatprep.mubr.msk.f32.mxu1 %vm1081_vm0, %v4110_v16 }
 0x2b0   : > { %13532 = vmatmul.mubr.msk.f32.gmra.mrb[94].mxu0 %vm1081_vm0, %v17369_v8 }
 0x2b1   : > { %13740 = vmatmul.mubr.msk.f32.gmra.mrb[48].mxu1 %vm1081_vm0, %v4111_v61  ;;  %13534 = vmatprep.mubr.msk.f32.mxu0 %vm1081_vm0, %v2692_v60  ;;  %v17652_v60 = vld [vmem:[#allocation2 + $0x2a2] sm:$0xff]  ;;  %v17658_v61 = vld [vmem:[#allocation2 + $0x2aa] sm:$0xff] }
 0x2b2   : > { %13742 = vmatprep.mubr.msk.f32.mxu1 %vm1081_vm0, %v17008_v47  ;;  %v17392_v47 = vld [vmem:[#allocation2 + $0x1e2] sm:$0xff] }
 0x2b4   : > { %13535 = vmatmul.mubr.msk.f32.gmra.mrb[96].mxu0 %vm1081_vm0, %v2693_v46 }
 0x2b5   : > { %13743 = vmatmul.mubr.msk.f32.gmra.mrb[50].mxu1 %vm1081_vm0, %v17014_v11  ;;  %13537 = vmatprep.mubr.msk.f32.mxu0 %vm1081_vm0, %v17380_v29  ;;  %v17398_v11 = vld [vmem:[#allocation2 + $0x1ea] sm:$0xff] }
 0x2b6   : > { %13745 = vmatprep.mubr.msk.f32.mxu1 %vm1081_vm0, %v17020_v54  ;;  %v17404_v54 = vld [vmem:[#allocation2 + $0x1fa] sm:$0xff] }
 0x2b8   : > { %13538 = vmatmul.mubr.msk.f32.gmra.mrb[98].mxu0 %vm1081_vm0, %v17386_v33 }
 0x2b9   : > { %13746 = vmatmul.mubr.msk.f32.gmra.mrb[52].mxu1 %vm1081_vm0, %v17026_v55  ;;  %13540 = vmatprep.mubr.msk.f32.mxu0 %vm1081_vm0, %v17392_v47  ;;  %v17410_v55 = vld [vmem:[#allocation2 + $0x202] sm:$0xff] }
 0x2ba   : > { %13748 = vmatprep.mubr.msk.f32.mxu1 %vm1081_vm0, %v17032_v4  ;;  %v17416_v4 = vld [vmem:[#allocation2 + $0x212] sm:$0xff] }
 0x2bc   : > { %13541 = vmatmul.mubr.msk.f32.gmra.mrb[100].mxu0 %vm1081_vm0, %v17398_v11 }
 0x2bd   : > { %13749 = vmatmul.mubr.msk.f32.gmra.mrb[54].mxu1 %vm1081_vm0, %v17038_v5  ;;  %13543 = vmatprep.mubr.msk.f32.mxu0 %vm1081_vm0, %v17404_v54  ;;  %v17422_v5 = vld [vmem:[#allocation2 + $0x21a] sm:$0xff] }
 0x2be   : > { %13751 = vmatprep.mubr.msk.f32.mxu1 %vm1081_vm0, %v17044_v26  ;;  %v17428_v26 = vld [vmem:[#allocation2 + $0x22a] sm:$0xff] }
 0x2c0   : > { %13544 = vmatmul.mubr.msk.f32.gmra.mrb[102].mxu0 %vm1081_vm0, %v17410_v55 }
 0x2c1   : > { %13752 = vmatmul.mubr.msk.f32.gmra.mrb[56].mxu1 %vm1081_vm0, %v17050_v27  ;;  %13546 = vmatprep.mubr.msk.f32.mxu0 %vm1081_vm0, %v17416_v4  ;;  %v17434_v27 = vld [vmem:[#allocation2 + $0x232] sm:$0xff] }
 0x2c2   : > { %13754 = vmatprep.mubr.msk.f32.mxu1 %vm1081_vm0, %v17056_v44  ;;  %v17440_v44 = vld [vmem:[#allocation2 + $0x242] sm:$0xff] }
 0x2c4   : > { %13547 = vmatmul.mubr.msk.f32.gmra.mrb[104].mxu0 %vm1081_vm0, %v17422_v5 }
 0x2c5   : > { %13755 = vmatmul.mubr.msk.f32.gmra.mrb[58].mxu1 %vm1081_vm0, %v17062_v45  ;;  %13549 = vmatprep.mubr.msk.f32.mxu0 %vm1081_vm0, %v17428_v26  ;;  %v17446_v45 = vld [vmem:[#allocation2 + $0x24a] sm:$0xff] }
 0x2c6   : > { %13757 = vmatprep.mubr.msk.f32.mxu1 %vm1081_vm0, %v17068_v62  ;;  %v20663_v62 = vld [vmem:[#allocation15_spill] sm:$0xff] }
 0x2c8   : > { %13550 = vmatmul.mubr.msk.f32.gmra.mrb[106].mxu0 %vm1081_vm0, %v17434_v27 }
 0x2c9   : > { %13758 = vmatmul.mubr.msk.f32.gmra.mrb[60].mxu1 %vm1081_vm0, %v17074_v63  ;;  %13552 = vmatprep.mubr.msk.f32.mxu0 %vm1081_vm0, %v17440_v44  ;;  %v20664_v63 = vld [vmem:[#allocation16_spill] sm:$0xff] }
 0x2ca   : > { %13760 = vmatprep.mubr.msk.f32.mxu1 %vm1081_vm0, %v17080_v18  ;;  %v20665_v18 = vld [vmem:[#allocation17_spill] sm:$0xff] }
 0x2cc   : > { %13553 = vmatmul.mubr.msk.f32.gmra.mrb[108].mxu0 %vm1081_vm0, %v17446_v45 }
 0x2cd   : > { %13761 = vmatmul.mubr.msk.f32.gmra.mrb[62].mxu1 %vm1081_vm0, %v17086_v19  ;;  %v20666_v19 = vld [vmem:[#allocation18_spill] sm:$0xff] }
 0x2ce   : > { %13763 = vmatprep.mubr.msk.f32.mxu1 %vm1081_vm0, %v17092_v52  ;;  %v20667_v52 = vld [vmem:[#allocation19_spill] sm:$0xff] }
 0x2d1   : > { %13764 = vmatmul.mubr.msk.f32.gmra.mrb[0].mxu1 %vm1081_vm0, %v17098_v56  ;;  %v20668_v56 = vld [vmem:[#allocation20_spill] sm:$0xff] }
 0x2d2   : > { %13766 = vmatprep.mubr.msk.f32.mxu1 %vm1081_vm0, %v17104_v57  ;;  %v4142_v57 = vld [vmem:[#allocation2 + $0x331] sm:$0xff] }
 0x2d5   : > { %13767 = vmatmul.mubr.msk.f32.gmra.mrb[2].mxu1 %vm1081_vm0, %v17110_v28  ;;  %v4143_v28 = vld [vmem:[#allocation2 + $0x339] sm:$0xff] }
 0x2d6   : > { %13769 = vmatprep.mubr.msk.f32.mxu1 %vm1081_vm0, %v17116_v37  ;;  %v5568_v37 = vld [vmem:[#allocation6 + $0xd0] sm:$0xff] }
 0x2d9   : > { %13770 = vmatmul.mubr.msk.f32.gmra.mrb[4].mxu1 %vm1081_vm0, %v17122_v1  ;;  %v5569_v1 = vld [vmem:[#allocation6 + $0xd8] sm:$0xff] }
 0x2da   : > { %13772 = vmatprep.mubr.msk.f32.mxu1 %vm1081_vm0, %v17128_v9  ;;  %v14582_v9 = vpack.c.bf16 %v5569_v1, %v5568_v37  ;;  %v17724_v37 = vld [vmem:[#allocation2 + $0x332] sm:$0xff] }
 0x2dd   : > { %13773 = vmatmul.mubr.msk.f32.gmra.mrb[6].mxu1 %vm1081_vm0, %v17134_v21  ;;  %v6276_v21 = vld [vmem:[#allocation6 + $0xe0] sm:$0xff] }
 0x2de   : > { %13775 = vmatprep.mubr.msk.f32.mxu1 %vm1081_vm0, %v17140_v39  ;;  %v6277_v39 = vld [vmem:[#allocation6 + $0xe8] sm:$0xff] }
 0x2df   : > { %v17493_v41 = vpack.c.bf16 %v6277_v39, %v6276_v21  ;;  %v6278_v21 = vld [vmem:[#allocation6 + $0xf0] sm:$0xff]  ;;  %v6279_v39 = vld [vmem:[#allocation6 + $0xf8] sm:$0xff] }
 0x2e1   : > { %13776 = vmatmul.mubr.msk.f32.gmra.mrb[8].mxu1 %vm1081_vm0, %v20663_v62  ;;  %v17700_v62 = vld [vmem:[#allocation2 + $0x302] sm:$0xff] }
 0x2e2   : > { %13778 = vmatprep.mubr.msk.f32.mxu1 %vm1081_vm0, %v20664_v63 }
 0x2e5   : > { %13779 = vmatmul.mubr.msk.f32.gmra.mrb[10].mxu1 %vm1081_vm0, %v20665_v18  ;;  %v17706_v18 = vld [vmem:[#allocation2 + $0x30a] sm:$0xff] }
 0x2e6   : > { %13781 = vmatprep.mubr.msk.f32.mxu1 %vm1081_vm0, %v20666_v19 }
 0x2e9   : > { %13782 = vmatmul.mubr.msk.f32.gmra.mrb[12].mxu1 %vm1081_vm0, %v20667_v52  ;;  %v17712_v52 = vld [vmem:[#allocation2 + $0x31a] sm:$0xff] }
 0x2ea   : > { %13784 = vmatprep.mubr.msk.f32.mxu1 %vm1081_vm0, %v20668_v56 }
 0x2ed   : > { %13785 = vmatmul.mubr.msk.f32.gmra.mrb[14].mxu1 %vm1081_vm0, %v17181_v53 }
 0x2ee   : > { %13787 = vmatprep.mubr.msk.f32.mxu1 %vm1081_vm0, %v4142_v57  ;;  %v17718_v57 = vld [vmem:[#allocation2 + $0x322] sm:$0xff] }
 0x2f1   : > { %13788 = vmatmul.mubr.msk.f32.gmra.mrb[16].mxu1 %vm1081_vm0, %v4143_v28 }
 0x2f2   : > { %13798 = vmatprep.mubr.msk.f32.mxu1 %vm1081_vm0, %v17192_v20 }
 0x2f5   : > { %13799 = vmatmul.mubr.msk.f32.vlgmr.msra.gmra.mrb[18].mxu1 %vm1081_vm0, %v17199_v42 }
 0x2f6   : > { %14581 = vmatpush3.bf16.msra.mxu1 %v17201_v10  ;;  %13801 = vmatprep.mubr.msk.f32.mxu1 %vm1081_vm0, %v17207_v6  ;;  %v4820_v6 = vld [vmem:[#allocation2 + $0x182] sm:$0xff] }
 0x2f7   : > { %14583 = vmatprep.subr.bf16.mxu1 %v14582_v9 }
 0x2f9   : > { %13802 = vmatmul.mubr.msk.f32.gmra.mrb[20].mxu1 %vm1081_vm0, %v17213_v0 }
 0x2fa   : > { %13804 = vmatprep.mubr.msk.f32.mxu1 %vm1081_vm0, %v17220_v7  ;;  %14585 = vmatpush3.bf16.msra.mxu1 %v14582_v9  ;;  %v4821_v7 = vld [vmem:[#allocation2 + $0x18a] sm:$0xff]  ;;  %v17730_v9 = vld [vmem:[#allocation2 + $0x33a] sm:$0xff] }
 0x2fb   : > { %14587 = vmatprep.subr.bf16.mxu1 %v17493_v41 }
 0x2fd   : > { %13805 = vmatmul.mubr.msk.f32.gmra.mrb[22].mxu1 %vm1081_vm0, %v17226_v35 }
 0x2fe   : > { %13807 = vmatprep.mubr.msk.f32.mxu1 %vm1081_vm0, %v17232_v14 }
 0x301   : > { %13808 = vmatmul.mubr.msk.f32.gmra.mrb[24].mxu1 %vm1081_vm0, %v17238_v15 }
 0x302   : > { %13810 = vmatprep.mubr.msk.f32.mxu1 %vm1081_vm0, %v17244_v38 }
 0x305   : > { %13811 = vmatmul.mubr.msk.f32.gmra.mrb[26].mxu1 %vm1081_vm0, %v17250_v22 }
 0x306   : > { %13813 = vmatprep.mubr.msk.f32.mxu1 %vm1081_vm0, %v17256_v23 }
 0x309   : > { %13814 = vmatmul.mubr.msk.f32.gmra.mrb[28].mxu1 %vm1081_vm0, %v17262_v30 }
 0x30a   : > { %13816 = vmatprep.mubr.msk.f32.mxu1 %vm1081_vm0, %v17268_v31 }
 0x30d   : > { %13817 = vmatmul.mubr.msk.f32.gmra.mrb[30].mxu1 %vm1081_vm0, %v17274_v40 }
 0x30e   : > { %13819 = vmatprep.mubr.msk.f32.mxu1 %vm1081_vm0, %v17280_v43 }
 0x311   : > { %13820 = vmatmul.mubr.msk.f32.gmra.mrb[32].mxu1 %vm1081_vm0, %v17286_v50 }
 0x312   : > { %13822 = vmatprep.mubr.msk.f32.mxu1 %vm1081_vm0, %v17292_v51 }
 0x315   : > { %13823 = vmatmul.mubr.msk.f32.gmra.mrb[34].mxu1 %vm1081_vm0, %v17298_v58  ;;  %v17614_v58 = vld [vmem:[#allocation2 + $0x25a] sm:$0xff] }
 0x316   : > { %13825 = vmatprep.mubr.msk.f32.mxu1 %vm1081_vm0, %v17304_v59 }
 0x319   : > { %13826 = vmatmul.mubr.msk.f32.gmra.mrb[36].mxu1 %vm1081_vm0, %v17310_v2 }
 0x31a   : > { %13828 = vmatprep.mubr.msk.f32.mxu1 %vm1081_vm0, %v17316_v3  ;;  %v17622_v3 = vld [vmem:[#allocation2 + $0x262] sm:$0xff] }
 0x31d   : > { %13829 = vmatmul.mubr.msk.f32.gmra.mrb[38].mxu1 %vm1081_vm0, %v17322_v12 }
 0x31e   : > { %13831 = vmatprep.mubr.msk.f32.mxu1 %vm1081_vm0, %v17328_v13  ;;  %v17628_v13 = vld [vmem:[#allocation2 + $0x272] sm:$0xff] }
 0x321   : > { %13832 = vmatmul.mubr.msk.f32.gmra.mrb[40].mxu1 %vm1081_vm0, %v17334_v24 }
 0x322   : > { %13834 = vmatprep.mubr.msk.f32.mxu1 %vm1081_vm0, %v17340_v25  ;;  %v17634_v25 = vld [vmem:[#allocation2 + $0x27a] sm:$0xff] }
 0x323   : > { %v17540_v53 = vpop.f32.mrb[110].mxu0 }
 0x324   : > { %v17542_v32 = vpop.f32.mrb[111].mxu0 }
 0x325   : > { %13835 = vmatmul.mubr.msk.f32.gmra.mrb[42].mxu1 %vm1081_vm0, %v17346_v34 }
 0x326   : > { %13837 = vmatprep.mubr.msk.f32.mxu1 %vm1081_vm0, %v17352_v36  ;;  %v17640_v36 = vld [vmem:[#allocation2 + $0x28a] sm:$0xff] }
 0x327   : > { %v17548_v17 = vpop.f32.mrb[112].mxu0 }
 0x328   : > { %v17550_v20 = vpop.f32.mrb[113].mxu0 }
 0x329   : > { %13838 = vmatmul.mubr.msk.f32.gmra.mrb[44].mxu1 %vm1081_vm0, %v17358_v48 }
 0x32a   : > { %13840 = vmatprep.mubr.msk.f32.mxu1 %vm1081_vm0, %v17364_v49  ;;  %v17646_v49 = vld [vmem:[#allocation2 + $0x292] sm:$0xff] }
 0x32b   : > { %v17556_v42 = vpop.f32.mrb[114].mxu0 }
 0x32c   : > { %v17558_v10 = vpop.f32.mrb[115].mxu0 }
 0x32d   : > { %13841 = vmatmul.mubr.msk.f32.gmra.mrb[46].mxu1 %vm1081_vm0, %v17369_v8 }
 0x32e   : > { %13843 = vmatprep.mubr.msk.f32.mxu1 %vm1081_vm0, %v4820_v6 }
 0x32f   : > { %v17563_v0 = vpop.f32.mrb[116].mxu0 }
 0x330   : > { %v17565_v35 = vpop.f32.mrb[117].mxu0 }
 0x331   : > { %13844 = vmatmul.mubr.msk.f32.gmra.mrb[48].mxu1 %vm1081_vm0, %v4821_v7  ;;  %v5501_v7 = vld [vmem:[#allocation2 + $0x30] sm:$0xff] }
 0x332   : > { %13846 = vmatprep.mubr.msk.f32.mxu1 %vm1081_vm0, %v17380_v29  ;;  %v17664_v29 = vld [vmem:[#allocation2 + $0x2ba] sm:$0xff] }
 0x333   : > { %v17570_v14 = vpop.f32.mrb[118].mxu0 }
 0x334   : > { %v17572_v15 = vpop.f32.mrb[119].mxu0 }
 0x335   : > { %13847 = vmatmul.mubr.msk.f32.gmra.mrb[50].mxu1 %vm1081_vm0, %v17386_v33 }
 0x336   : > { %13849 = vmatprep.mubr.msk.f32.mxu1 %vm1081_vm0, %v17392_v47  ;;  %v17670_v47 = vld [vmem:[#allocation2 + $0x2c2] sm:$0xff] }
 0x337   : > { %v17578_v38 = vpop.f32.mrb[120].mxu0 }
 0x338   : > { %v17580_v22 = vpop.f32.mrb[121].mxu0 }
 0x339   : > { %13850 = vmatmul.mubr.msk.f32.gmra.mrb[52].mxu1 %vm1081_vm0, %v17398_v11 }
 0x33a   : > { %13852 = vmatprep.mubr.msk.f32.mxu1 %vm1081_vm0, %v17404_v54  ;;  %v17676_v54 = vld [vmem:[#allocation2 + $0x2d2] sm:$0xff] }
 0x33b   : > { %v17586_v23 = vpop.f32.mrb[122].mxu0 }
 0x33c   : > { %v17588_v30 = vpop.f32.mrb[123].mxu0 }
 0x33d   : > { %13853 = vmatmul.mubr.msk.f32.gmra.mrb[54].mxu1 %vm1081_vm0, %v17410_v55 }
 0x33e   : > { %13855 = vmatprep.mubr.msk.f32.mxu1 %vm1081_vm0, %v17416_v4  ;;  %v17682_v4 = vld [vmem:[#allocation2 + $0x2da] sm:$0xff] }
 0x33f   : > { %v17594_v31 = vpop.f32.mrb[124].mxu0 }
 0x340   : > { %v17596_v40 = vpop.f32.mrb[125].mxu0 }
 0x341   : > { %13856 = vmatmul.mubr.msk.f32.gmra.mrb[56].mxu1 %vm1081_vm0, %v17422_v5 }
 0x342   : > { %13858 = vmatprep.mubr.msk.f32.mxu1 %vm1081_vm0, %v17428_v26  ;;  %v17688_v26 = vld [vmem:[#allocation2 + $0x2ea] sm:$0xff] }
 0x343   : > { %v17602_v43 = vpop.f32.mrb[126].mxu0 }
 0x344   : > { %v17604_v50 = vpop.f32.mrb[127].mxu0 }
 0x345   : > { %13859 = vmatmul.mubr.msk.f32.gmra.mrb[58].mxu1 %vm1081_vm0, %v17434_v27 }
 0x346   : > { %13861 = vmatprep.mubr.msk.f32.mxu1 %vm1081_vm0, %v17440_v44  ;;  %v17694_v44 = vld [vmem:[#allocation2 + $0x2f2] sm:$0xff] }
 0x347   : > { %v17610_v51 = vpop.f32.mrb[64].mxu0 }
 0x348   : > { %v17616_v59 = vpop.f32.mrb[65].mxu0 }
 0x349   : > { %13862 = vmatmul.mubr.msk.f32.gmra.mrb[60].mxu1 %vm1081_vm0, %v17446_v45 }
 0x34a   : > { %13864 = vmatprep.mubr.msk.f32.mxu1 %vm1081_vm0, %v17614_v58 }
 0x34b   : > { %v17620_v2 = vpop.f32.mrb[66].mxu0 }
 0x34c   : > { %v17624_v12 = vpop.f32.mrb[67].mxu0 }
 0x34d   : > { %13865 = vmatmul.mubr.msk.f32.gmra.mrb[62].mxu1 %vm1081_vm0, %v17622_v3 }
 0x34e   : > { %13867 = vmatprep.mubr.msk.f32.mxu1 %vm1081_vm0, %v17628_v13 }
 0x34f   : > { %v17632_v24 = vpop.f32.mrb[68].mxu0 }
 0x350   : > { %v17636_v34 = vpop.f32.mrb[69].mxu0 }
 0x351   : > { %13868 = vmatmul.mubr.msk.f32.gmra.mrb[0].mxu1 %vm1081_vm0, %v17634_v25 }
 0x352   : > { %13870 = vmatprep.mubr.msk.f32.mxu1 %vm1081_vm0, %v17640_v36 }
 0x353   : > { %v17644_v48 = vpop.f32.mrb[70].mxu0 }
 0x354   : > { %v17648_v16 = vpop.f32.mrb[71].mxu0 }
 0x355   : > { %13871 = vmatmul.mubr.msk.f32.gmra.mrb[2].mxu1 %vm1081_vm0, %v17646_v49 }
 0x356   : > { %13873 = vmatprep.mubr.msk.f32.mxu1 %vm1081_vm0, %v17652_v60 }
 0x357   : > { %v17656_v8 = vpop.f32.mrb[72].mxu0 }
 0x358   : > { %v17660_v46 = vpop.f32.mrb[73].mxu0 }
 0x359   : > { %13874 = vmatmul.mubr.msk.f32.gmra.mrb[4].mxu1 %vm1081_vm0, %v17658_v61 }
 0x35a   : > { %13876 = vmatprep.mubr.msk.f32.mxu1 %vm1081_vm0, %v17664_v29 }
 0x35b   : > { %v17668_v33 = vpop.f32.mrb[74].mxu0 }
 0x35c   : > { %v17672_v11 = vpop.f32.mrb[75].mxu0 }
 0x35d   : > { %13877 = vmatmul.mubr.msk.f32.gmra.mrb[6].mxu1 %vm1081_vm0, %v17670_v47 }
 0x35e   : > { %13879 = vmatprep.mubr.msk.f32.mxu1 %vm1081_vm0, %v17676_v54 }
 0x35f   : > { %v17680_v55 = vpop.f32.mrb[76].mxu0 }
 0x360   : > { %v17684_v5 = vpop.f32.mrb[77].mxu0 }
 0x361   : > { %20669 = vst [vmem:[#allocation21_spill] sm:$0xff] %v17684_v5  ;;  %13880 = vmatmul.mubr.msk.f32.gmra.mrb[8].mxu1 %vm1081_vm0, %v17682_v4 }
 0x362   : > { %13882 = vmatprep.mubr.msk.f32.mxu1 %vm1081_vm0, %v17688_v26 }
 0x363   : > { %v17692_v27 = vpop.f32.mrb[78].mxu0 }
 0x364   : > { %20670 = vst [vmem:[#allocation22_spill] sm:$0xff] %v17692_v27  ;;  %v17696_v45 = vpop.f32.mrb[79].mxu0 }
 0x365   : > { %20671 = vst [vmem:[#allocation15_spill] sm:$0xff] %v17696_v45  ;;  %13883 = vmatmul.mubr.msk.f32.gmra.mrb[10].mxu1 %vm1081_vm0, %v17694_v44  ;;  %v6987_v45 = vld [vmem:[#allocation6 + $0x108] sm:$0xff] }
 0x366   : > { %13885 = vmatprep.mubr.msk.f32.mxu1 %vm1081_vm0, %v17700_v62 }
 0x367   : > { %v17704_v63 = vpop.f32.mrb[80].mxu0 }
 0x368   : > { %20672 = vst [vmem:[#allocation16_spill] sm:$0xff] %v17704_v63  ;;  %v17708_v19 = vpop.f32.mrb[81].mxu0  ;;  %v6986_v63 = vld [vmem:[#allocation6 + $0x100] sm:$0xff] }
 0x369   : > { %20673 = vst [vmem:[#allocation17_spill] sm:$0xff] %v17708_v19  ;;  %13886 = vmatmul.mubr.msk.f32.gmra.mrb[12].mxu1 %vm1081_vm0, %v17706_v18  ;;  %v5502_v19 = vld [vmem:[#allocation2 + $0x38] sm:$0xff] }
 0x36a   : > { %13888 = vmatprep.mubr.msk.f32.mxu1 %vm1081_vm0, %v17712_v52 }
 0x36b   : > { %v17716_v56 = vpop.f32.mrb[82].mxu0 }
 0x36c   : > { %20674 = vst [vmem:[#allocation18_spill] sm:$0xff] %v17716_v56  ;;  %v17720_v28 = vpop.f32.mrb[83].mxu0 }
 0x36d   : > { %20675 = vst [vmem:[#allocation19_spill] sm:$0xff] %v17720_v28  ;;  %13889 = vmatmul.mubr.msk.f32.gmra.mrb[14].mxu1 %vm1081_vm0, %v17718_v57  ;;  %v14590_v28 = vpack.c.bf16 %v6279_v39, %v6278_v21  ;;  %v5504_v21 = vld [vmem:[#allocation2 + $0x50] sm:$0xff] }
 0x36e   : > { %13891 = vmatprep.mubr.msk.f32.mxu1 %vm1081_vm0, %v17724_v37 }
 0x36f   : > { %v17728_v1 = vpop.f32.mrb[84].mxu0 }
 0x370   : > { %20676 = vst [vmem:[#allocation20_spill] sm:$0xff] %v17728_v1  ;;  %v17732_v6 = vpop.f32.mrb[85].mxu0  ;;  %v5503_v1 = vld [vmem:[#allocation2 + $0x48] sm:$0xff] }
 0x371   : > { %20677 = vst [vmem:[#allocation23_spill] sm:$0xff] %v17732_v6  ;;  %13892 = vmatmul.mubr.msk.f32.gmra.mrb[16].mxu1 %vm1081_vm0, %v17730_v9  ;;  %v17744_v6 = vpack.c.bf16 %v6987_v45, %v6986_v63  ;;  %v5507_v45 = vld [vmem:[#allocation2 + $0x78] sm:$0xff] }
 0x372   : > { %13902 = vmatprep.mubr.msk.f32.mxu1 %vm1081_vm0, %v5501_v7  ;;  %v5505_v7 = vld [vmem:[#allocation2 + $0x60] sm:$0xff] }
 0x373   : > { %v17737_v56 = vpop.f32.mrb[86].mxu0 }
 0x374   : > { %v17739_v27 = vpop.f32.mrb[87].mxu0 }
 0x375   : > { %13903 = vmatmul.mubr.msk.f32.vlgmr.msra.gmra.mrb[18].mxu1 %vm1081_vm0, %v5502_v19 }
 0x376   : > { %14589 = vmatpush3.bf16.msra.mxu1 %v17493_v41  ;;  %13905 = vmatprep.mubr.msk.f32.mxu1 %vm1081_vm0, %v5503_v1  ;;  %v5506_v41 = vld [vmem:[#allocation2 + $0x68] sm:$0xff] }
 0x377   : > { %14591 = vmatprep.subr.bf16.mxu1 %v14590_v28  ;;  %v17746_v5 = vpop.f32.mrb[88].mxu0 }
 0x378   : > { %20678 = vst [vmem:[#allocation24_spill] sm:$0xff] %v17746_v5  ;;  %v17748_v39 = vpop.f32.mrb[89].mxu0 }
 0x379   : > { %20679 = vst [vmem:[#allocation25_spill] sm:$0xff] %v17748_v39  ;;  %13906 = vmatmul.mubr.msk.f32.gmra.mrb[20].mxu1 %vm1081_vm0, %v5504_v21  ;;  %v5508_v39 = vld [vmem:[#allocation2 + $0x80] sm:$0xff] }
 0x37a   : > { %13908 = vmatprep.mubr.msk.f32.mxu1 %vm1081_vm0, %v5505_v7  ;;  %14593 = vmatpush3.bf16.msra.mxu1 %v14590_v28  ;;  %v5509_v28 = vld [vmem:[#allocation2 + $0x90] sm:$0xff] }
 0x37b   : > { %14595 = vmatprep.subr.bf16.mxu1 %v17744_v6  ;;  %v17753_v19 = vpop.f32.mrb[90].mxu0 }
 0x37c   : > { %20680 = vst [vmem:[#allocation26_spill] sm:$0xff] %v17753_v19  ;;  %v17755_v1 = vpop.f32.mrb[91].mxu0  ;;  %v5510_v19 = vld [vmem:[#allocation2 + $0x98] sm:$0xff] }
 0x37d   : > { %20681 = vst [vmem:[#allocation27_spill] sm:$0xff] %v17755_v1  ;;  %13909 = vmatmul.mubr.msk.f32.gmra.mrb[22].mxu1 %vm1081_vm0, %v5506_v41  ;;  %v5511_v41 = vld [vmem:[#allocation2 + $0xa8] sm:$0xff] }
 0x37e   : > { %13911 = vmatprep.mubr.msk.f32.mxu1 %vm1081_vm0, %v5507_v45  ;;  %v5512_v45 = vld [vmem:[#allocation2 + $0xb0] sm:$0xff] }
 0x37f   : > { %v17759_v63 = vpop.f32.mrb[92].mxu0 }
 0x380   : > { %20682 = vst [vmem:[#allocation28_spill] sm:$0xff] %v17759_v63  ;;  %v17761_v21 = vpop.f32.mrb[93].mxu0 }
 0x381   : > { %20683 = vst [vmem:[#allocation29_spill] sm:$0xff] %v17761_v21  ;;  %13912 = vmatmul.mubr.msk.f32.gmra.mrb[24].mxu1 %vm1081_vm0, %v5508_v39  ;;  %v5513_v21 = vld [vmem:[#allocation2 + $0xc0] sm:$0xff] }
 0x382   : > { %13914 = vmatprep.mubr.msk.f32.mxu1 %vm1081_vm0, %v5509_v28 }
 0x383   : > { %v17765_v7 = vpop.f32.mrb[94].mxu0 }
 0x384   : > { %20684 = vst [vmem:[#allocation30_spill] sm:$0xff] %v17765_v7  ;;  %v17767_v5 = vpop.f32.mrb[95].mxu0  ;;  %v5514_v7 = vld [vmem:[#allocation2 + $0xc8] sm:$0xff] }
 0x385   : > { %20685 = vst [vmem:[#allocation31_spill] sm:$0xff] %v17767_v5  ;;  %13915 = vmatmul.mubr.msk.f32.gmra.mrb[26].mxu1 %vm1081_vm0, %v5510_v19  ;;  %v5515_v19 = vld [vmem:[#allocation2 + $0xd8] sm:$0xff] }
 0x386   : > { %13917 = vmatprep.mubr.msk.f32.mxu1 %vm1081_vm0, %v5511_v41 }
 0x387   : > { %v17771_v63 = vpop.f32.mrb[96].mxu0 }
 0x388   : > { %20686 = vst [vmem:[#allocation32_spill] sm:$0xff] %v17771_v63  ;;  %v17774_v39 = vpop.f32.mrb[97].mxu0  ;;  %v5516_v63 = vld [vmem:[#allocation2 + $0xe0] sm:$0xff] }
 0x389   : > { %13918 = vmatmul.mubr.msk.f32.gmra.mrb[28].mxu1 %vm1081_vm0, %v5512_v45  ;;  %20687 = vst [vmem:[#allocation33_spill] sm:$0xff] %v17774_v39  ;;  %v5517_v45 = vld [vmem:[#allocation2 + $0xf0] sm:$0xff] }
 0x38a   : > { %13920 = vmatprep.mubr.msk.f32.mxu1 %vm1081_vm0, %v5513_v21 }
 0x38b   : > { %v17777_v28 = vpop.f32.mrb[98].mxu0 }
 0x38c   : > { %20688 = vst [vmem:[#allocation34_spill] sm:$0xff] %v17777_v28  ;;  %v17779_v1 = vpop.f32.mrb[99].mxu0  ;;  %v5518_v28 = vld [vmem:[#allocation2 + $0xf8] sm:$0xff] }
 0x38d   : > { %20689 = vst [vmem:[#allocation35_spill] sm:$0xff] %v17779_v1  ;;  %13921 = vmatmul.mubr.msk.f32.gmra.mrb[30].mxu1 %vm1081_vm0, %v5514_v7  ;;  %v5519_v7 = vld [vmem:[#allocation2 + $0x108] sm:$0xff] }
 0x38e   : > { %13923 = vmatprep.mubr.msk.f32.mxu1 %vm1081_vm0, %v5515_v19 }
 0x38f   : > { %v17783_v41 = vpop.f32.mrb[100].mxu0 }
 0x390   : > { %20690 = vst [vmem:[#allocation36_spill] sm:$0xff] %v17783_v41  ;;  %v17785_v5 = vpop.f32.mrb[101].mxu0  ;;  %v5520_v41 = vld [vmem:[#allocation2 + $0x110] sm:$0xff] }
 0x391   : > { %20691 = vst [vmem:[#allocation37_spill] sm:$0xff] %v17785_v5  ;;  %13924 = vmatmul.mubr.msk.f32.gmra.mrb[32].mxu1 %vm1081_vm0, %v5516_v63  ;;  %v5521_v63 = vld [vmem:[#allocation2 + $0x120] sm:$0xff] }
 0x392   : > { %13926 = vmatprep.mubr.msk.f32.mxu1 %vm1081_vm0, %v5517_v45 }
 0x393   : > { %v17789_v21 = vpop.f32.mrb[102].mxu0 }
 0x394   : > { %20692 = vst [vmem:[#allocation38_spill] sm:$0xff] %v17789_v21  ;;  %v17791_v39 = vpop.f32.mrb[103].mxu0  ;;  %v5522_v21 = vld [vmem:[#allocation2 + $0x128] sm:$0xff] }
 0x395   : > { %20693 = vst [vmem:[#allocation39_spill] sm:$0xff] %v17791_v39  ;;  %13927 = vmatmul.mubr.msk.f32.gmra.mrb[34].mxu1 %vm1081_vm0, %v5518_v28  ;;  %v5523_v28 = vld [vmem:[#allocation2 + $0x138] sm:$0xff] }
 0x396   : > { %13929 = vmatprep.mubr.msk.f32.mxu1 %vm1081_vm0, %v5519_v7 }
 0x397   : > { %v17795_v19 = vpop.f32.mrb[104].mxu0 }
 0x398   : > { %20694 = vst [vmem:[#allocation40_spill] sm:$0xff] %v17795_v19  ;;  %v17797_v1 = vpop.f32.mrb[105].mxu0  ;;  %v5524_v19 = vld [vmem:[#allocation2 + $0x140] sm:$0xff] }
 0x399   : > { %20695 = vst [vmem:[#allocation41_spill] sm:$0xff] %v17797_v1  ;;  %13930 = vmatmul.mubr.msk.f32.gmra.mrb[36].mxu1 %vm1081_vm0, %v5520_v41  ;;  %v5525_v41 = vld [vmem:[#allocation2 + $0x150] sm:$0xff]  ;;  %v6212_v1 = vld [vmem:[#allocation2 + $0x39] sm:$0xff] }
 0x39a   : > { %13932 = vmatprep.mubr.msk.f32.mxu1 %vm1081_vm0, %v5521_v63  ;;  %v5526_v63 = vld [vmem:[#allocation2 + $0x158] sm:$0xff] }
 0x39b   : > { %v17801_v45 = vpop.f32.mrb[106].mxu0 }
 0x39c   : > { %20696 = vst [vmem:[#allocation42_spill] sm:$0xff] %v17801_v45  ;;  %v17803_v5 = vpop.f32.mrb[107].mxu0  ;;  %v5527_v45 = vld [vmem:[#allocation2 + $0x168] sm:$0xff] }
 0x39d   : > { %20697 = vst [vmem:[#allocation43_spill] sm:$0xff] %v17803_v5  ;;  %13933 = vmatmul.mubr.msk.f32.gmra.mrb[38].mxu1 %vm1081_vm0, %v5522_v21  ;;  %v5528_v21 = vld [vmem:[#allocation2 + $0x170] sm:$0xff]  ;;  %v5530_v5 = vld [vmem:[#allocation2 + $0x188] sm:$0xff] }
 0x39e   : > { %13935 = vmatprep.mubr.msk.f32.mxu1 %vm1081_vm0, %v5523_v28  ;;  %v5529_v28 = vld [vmem:[#allocation2 + $0x180] sm:$0xff] }
 0x39f   : > { %v17807_v7 = vpop.f32.mrb[108].mxu0 }
 0x3a0   : > { %20698 = vst [vmem:[#allocation44_spill] sm:$0xff] %v17807_v7  ;;  %v17809_v39 = vpop.f32.mrb[109].mxu0  ;;  %v5531_v7 = vld [vmem:[#allocation2 + $0x198] sm:$0xff] }
 0x3a1   : > { %20699 = vst [vmem:[#allocation45_spill] sm:$0xff] %v17809_v39  ;;  %13936 = vmatmul.mubr.msk.f32.gmra.mrb[40].mxu1 %vm1081_vm0, %v5524_v19  ;;  %v5532_v19 = vld [vmem:[#allocation2 + $0x1a0] sm:$0xff]  ;;  %v6989_v39 = vld [vmem:[#allocation6 + $0x118] sm:$0xff] }
 0x3a2   : > { %13938 = vmatprep.mubr.msk.f32.mxu1 %vm1081_vm0, %v5525_v41  ;;  %v5533_v41 = vld [vmem:[#allocation2 + $0x1e0] sm:$0xff] }
 0x3a5   : > { %13939 = vmatmul.mubr.msk.f32.gmra.mrb[42].mxu1 %vm1081_vm0, %v5526_v63  ;;  %v5534_v63 = vld [vmem:[#allocation2 + $0x1e8] sm:$0xff] }
 0x3a6   : > { %13941 = vmatprep.mubr.msk.f32.mxu1 %vm1081_vm0, %v5527_v45  ;;  %v5535_v45 = vld [vmem:[#allocation2 + $0x1f8] sm:$0xff] }
 0x3a9   : > { %13942 = vmatmul.mubr.msk.f32.gmra.mrb[44].mxu1 %vm1081_vm0, %v5528_v21  ;;  %v5536_v21 = vld [vmem:[#allocation2 + $0x200] sm:$0xff] }
 0x3aa   : > { %13944 = vmatprep.mubr.msk.f32.mxu1 %vm1081_vm0, %v5529_v28  ;;  %v5537_v28 = vld [vmem:[#allocation2 + $0x210] sm:$0xff] }
 0x3ad   : > { %13945 = vmatmul.mubr.msk.f32.gmra.mrb[46].mxu1 %vm1081_vm0, %v5530_v5  ;;  %v5538_v5 = vld [vmem:[#allocation2 + $0x218] sm:$0xff] }
 0x3ae   : > { %13947 = vmatprep.mubr.msk.f32.mxu1 %vm1081_vm0, %v5531_v7  ;;  %v5539_v7 = vld [vmem:[#allocation2 + $0x228] sm:$0xff] }
 0x3b1   : > { %13948 = vmatmul.mubr.msk.f32.gmra.mrb[48].mxu1 %vm1081_vm0, %v5532_v19  ;;  %v5540_v19 = vld [vmem:[#allocation2 + $0x230] sm:$0xff] }
 0x3b2   : > { %13950 = vmatprep.mubr.msk.f32.mxu1 %vm1081_vm0, %v5533_v41  ;;  %v5541_v41 = vld [vmem:[#allocation2 + $0x240] sm:$0xff] }
 0x3b5   : > { %13951 = vmatmul.mubr.msk.f32.gmra.mrb[50].mxu1 %vm1081_vm0, %v5534_v63  ;;  %v5542_v63 = vld [vmem:[#allocation2 + $0x248] sm:$0xff] }
 0x3b6   : > { %13953 = vmatprep.mubr.msk.f32.mxu1 %vm1081_vm0, %v5535_v45  ;;  %v5543_v45 = vld [vmem:[#allocation2 + $0x258] sm:$0xff] }
 0x3b9   : > { %13954 = vmatmul.mubr.msk.f32.gmra.mrb[52].mxu1 %vm1081_vm0, %v5536_v21  ;;  %v5544_v21 = vld [vmem:[#allocation2 + $0x260] sm:$0xff] }
 0x3ba   : > { %13956 = vmatprep.mubr.msk.f32.mxu1 %vm1081_vm0, %v5537_v28  ;;  %v5545_v28 = vld [vmem:[#allocation2 + $0x270] sm:$0xff] }
 0x3bd   : > { %13957 = vmatmul.mubr.msk.f32.gmra.mrb[54].mxu1 %vm1081_vm0, %v5538_v5  ;;  %v5546_v5 = vld [vmem:[#allocation2 + $0x278] sm:$0xff] }
 0x3be   : > { %13959 = vmatprep.mubr.msk.f32.mxu1 %vm1081_vm0, %v5539_v7  ;;  %v5547_v7 = vld [vmem:[#allocation2 + $0x288] sm:$0xff] }
 0x3c1   : > { %13960 = vmatmul.mubr.msk.f32.gmra.mrb[56].mxu1 %vm1081_vm0, %v5540_v19  ;;  %v5548_v19 = vld [vmem:[#allocation2 + $0x290] sm:$0xff] }
 0x3c2   : > { %13962 = vmatprep.mubr.msk.f32.mxu1 %vm1081_vm0, %v5541_v41  ;;  %v5549_v41 = vld [vmem:[#allocation2 + $0x2a0] sm:$0xff] }
 0x3c5   : > { %13963 = vmatmul.mubr.msk.f32.gmra.mrb[58].mxu1 %vm1081_vm0, %v5542_v63  ;;  %v5550_v63 = vld [vmem:[#allocation2 + $0x2a8] sm:$0xff] }
 0x3c6   : > { %13965 = vmatprep.mubr.msk.f32.mxu1 %vm1081_vm0, %v5543_v45  ;;  %v5551_v45 = vld [vmem:[#allocation2 + $0x2b8] sm:$0xff] }
 0x3c9   : > { %13966 = vmatmul.mubr.msk.f32.gmra.mrb[60].mxu1 %vm1081_vm0, %v5544_v21  ;;  %v5552_v21 = vld [vmem:[#allocation2 + $0x2c0] sm:$0xff] }
 0x3ca   : > { %13968 = vmatprep.mubr.msk.f32.mxu1 %vm1081_vm0, %v5545_v28  ;;  %v5553_v28 = vld [vmem:[#allocation2 + $0x2d0] sm:$0xff] }
 0x3cd   : > { %13969 = vmatmul.mubr.msk.f32.gmra.mrb[62].mxu1 %vm1081_vm0, %v5546_v5  ;;  %v5554_v5 = vld [vmem:[#allocation2 + $0x2d8] sm:$0xff] }
 0x3ce   : > { %13971 = vmatprep.mubr.msk.f32.mxu1 %vm1081_vm0, %v5547_v7  ;;  %v5555_v7 = vld [vmem:[#allocation2 + $0x2e8] sm:$0xff] }
 0x3d1   : > { %13972 = vmatmul.mubr.msk.f32.gmra.mrb[0].mxu1 %vm1081_vm0, %v5548_v19  ;;  %v5556_v19 = vld [vmem:[#allocation2 + $0x2f0] sm:$0xff] }
 0x3d2   : > { %13974 = vmatprep.mubr.msk.f32.mxu1 %vm1081_vm0, %v5549_v41  ;;  %v5557_v41 = vld [vmem:[#allocation2 + $0x300] sm:$0xff] }
 0x3d5   : > { %13975 = vmatmul.mubr.msk.f32.gmra.mrb[2].mxu1 %vm1081_vm0, %v5550_v63  ;;  %v5558_v63 = vld [vmem:[#allocation2 + $0x308] sm:$0xff] }
 0x3d6   : > { %13977 = vmatprep.mubr.msk.f32.mxu1 %vm1081_vm0, %v5551_v45  ;;  %v5559_v45 = vld [vmem:[#allocation2 + $0x318] sm:$0xff] }
 0x3d9   : > { %13978 = vmatmul.mubr.msk.f32.gmra.mrb[4].mxu1 %vm1081_vm0, %v5552_v21  ;;  %v5560_v21 = vld [vmem:[#allocation2 + $0x320] sm:$0xff] }
 0x3da   : > { %13980 = vmatprep.mubr.msk.f32.mxu1 %vm1081_vm0, %v5553_v28  ;;  %v5561_v28 = vld [vmem:[#allocation2 + $0x330] sm:$0xff] }
 0x3dd   : > { %13981 = vmatmul.mubr.msk.f32.gmra.mrb[6].mxu1 %vm1081_vm0, %v5554_v5  ;;  %v5563_v5 = vld [vmem:[#allocation2 + $0x348] sm:$0xff] }
 0x3de   : > { %13983 = vmatprep.mubr.msk.f32.mxu1 %vm1081_vm0, %v5555_v7  ;;  %v5562_v7 = vld [vmem:[#allocation2 + $0x338] sm:$0xff] }
 0x3e1   : > { %13984 = vmatmul.mubr.msk.f32.gmra.mrb[8].mxu1 %vm1081_vm0, %v5556_v19  ;;  %v5564_v19 = vld [vmem:[#allocation2 + $0x350] sm:$0xff] }
 0x3e2   : > { %13986 = vmatprep.mubr.msk.f32.mxu1 %vm1081_vm0, %v5557_v41  ;;  %v6988_v41 = vld [vmem:[#allocation6 + $0x110] sm:$0xff] }
 0x3e5   : > { %13987 = vmatmul.mubr.msk.f32.gmra.mrb[10].mxu1 %vm1081_vm0, %v5558_v63  ;;  %v6211_v63 = vld [vmem:[#allocation2 + $0x31] sm:$0xff] }
 0x3e6   : > { %13989 = vmatprep.mubr.msk.f32.mxu1 %vm1081_vm0, %v5559_v45  ;;  %v14598_v45 = vpack.c.bf16 %v6989_v39, %v6988_v41  ;;  %v6217_v39 = vld [vmem:[#allocation2 + $0x79] sm:$0xff]  ;;  %v6221_v41 = vld [vmem:[#allocation2 + $0xa9] sm:$0xff] }
 0x3e9   : > { %13990 = vmatmul.mubr.msk.f32.gmra.mrb[12].mxu1 %vm1081_vm0, %v5560_v21  ;;  %v6213_v21 = vld [vmem:[#allocation2 + $0x49] sm:$0xff] }
 0x3ea   : > { %13992 = vmatprep.mubr.msk.f32.mxu1 %vm1081_vm0, %v5561_v28  ;;  %v6214_v28 = vld [vmem:[#allocation2 + $0x51] sm:$0xff] }
 0x3ed   : > { %13993 = vmatmul.mubr.msk.f32.gmra.mrb[14].mxu1 %vm1081_vm0, %v5562_v7  ;;  %v6216_v7 = vld [vmem:[#allocation2 + $0x69] sm:$0xff] }
 0x3ee   : > { %13995 = vmatprep.mubr.msk.f32.mxu1 %vm1081_vm0, %v5563_v5  ;;  %v6215_v5 = vld [vmem:[#allocation2 + $0x61] sm:$0xff] }
 0x3f1   : > { %13996 = vmatmul.mubr.msk.f32.gmra.mrb[16].mxu1 %vm1081_vm0, %v5564_v19  ;;  %v6220_v19 = vld [vmem:[#allocation2 + $0x99] sm:$0xff] }
 0x3f2   : > { %14006 = vmatprep.mubr.msk.f32.mxu1 %vm1081_vm0, %v6211_v63  ;;  %v6222_v63 = vld [vmem:[#allocation2 + $0xb1] sm:$0xff] }
 0x3f5   : > { %14007 = vmatmul.mubr.msk.f32.vlgmr.msra.gmra.mrb[18].mxu1 %vm1081_vm0, %v6212_v1  ;;  %v6218_v1 = vld [vmem:[#allocation2 + $0x81] sm:$0xff] }
 0x3f6   : > { %14597 = vmatpush3.bf16.msra.mxu1 %v17744_v6  ;;  %14009 = vmatprep.mubr.msk.f32.mxu1 %vm1081_vm0, %v6213_v21  ;;  %v6219_v6 = vld [vmem:[#allocation2 + $0x91] sm:$0xff]  ;;  %v6224_v21 = vld [vmem:[#allocation2 + $0xc9] sm:$0xff] }
 0x3f7   : > { %14599 = vmatprep.subr.bf16.mxu1 %v14598_v45 }
 0x3f9   : > { %14010 = vmatmul.mubr.msk.f32.gmra.mrb[20].mxu1 %vm1081_vm0, %v6214_v28  ;;  %v6225_v28 = vld [vmem:[#allocation2 + $0xd9] sm:$0xff] }
 0x3fa   : > { %14012 = vmatprep.mubr.msk.f32.mxu1 %vm1081_vm0, %v6215_v5  ;;  %14601 = vmatpush3.bf16.msra.mxu1 %v14598_v45  ;;  %v6223_v45 = vld [vmem:[#allocation2 + $0xc1] sm:$0xff] }
 0x3fb   : > { %v6226_v5 = vld [vmem:[#allocation2 + $0xe1] sm:$0xff] }
 0x3fd   : > { %14013 = vmatmul.mubr.msk.f32.gmra.mrb[22].mxu1 %vm1081_vm0, %v6216_v7  ;;  %v6227_v7 = vld [vmem:[#allocation2 + $0xf1] sm:$0xff] }
 0x3fe   : > { %14015 = vmatprep.mubr.msk.f32.mxu1 %vm1081_vm0, %v6217_v39  ;;  %v6228_v39 = vld [vmem:[#allocation2 + $0xf9] sm:$0xff] }
 0x401   : > { %14016 = vmatmul.mubr.msk.f32.gmra.mrb[24].mxu1 %vm1081_vm0, %v6218_v1  ;;  %v6229_v1 = vld [vmem:[#allocation2 + $0x109] sm:$0xff] }
 0x402   : > { %14018 = vmatprep.mubr.msk.f32.mxu1 %vm1081_vm0, %v6219_v6  ;;  %v6230_v6 = vld [vmem:[#allocation2 + $0x111] sm:$0xff] }
 0x405   : > { %14019 = vmatmul.mubr.msk.f32.gmra.mrb[26].mxu1 %vm1081_vm0, %v6220_v19  ;;  %v6231_v19 = vld [vmem:[#allocation2 + $0x121] sm:$0xff] }
 0x406   : > { %14021 = vmatprep.mubr.msk.f32.mxu1 %vm1081_vm0, %v6221_v41  ;;  %v6232_v41 = vld [vmem:[#allocation2 + $0x129] sm:$0xff] }
 0x409   : > { %14022 = vmatmul.mubr.msk.f32.gmra.mrb[28].mxu1 %vm1081_vm0, %v6222_v63  ;;  %v6233_v63 = vld [vmem:[#allocation2 + $0x139] sm:$0xff] }
 0x40a   : > { %14024 = vmatprep.mubr.msk.f32.mxu1 %vm1081_vm0, %v6223_v45  ;;  %v6234_v45 = vld [vmem:[#allocation2 + $0x141] sm:$0xff] }
 0x40d   : > { %14025 = vmatmul.mubr.msk.f32.gmra.mrb[30].mxu1 %vm1081_vm0, %v6224_v21  ;;  %v6235_v21 = vld [vmem:[#allocation2 + $0x151] sm:$0xff] }
 0x40e   : > { %14027 = vmatprep.mubr.msk.f32.mxu1 %vm1081_vm0, %v6225_v28  ;;  %v6236_v28 = vld [vmem:[#allocation2 + $0x159] sm:$0xff] }
 0x411   : > { %14028 = vmatmul.mubr.msk.f32.gmra.mrb[32].mxu1 %vm1081_vm0, %v6226_v5  ;;  %v6237_v5 = vld [vmem:[#allocation2 + $0x169] sm:$0xff] }
 0x412   : > { %14030 = vmatprep.mubr.msk.f32.mxu1 %vm1081_vm0, %v6227_v7  ;;  %v6238_v7 = vld [vmem:[#allocation2 + $0x171] sm:$0xff] }
 0x415   : > { %14031 = vmatmul.mubr.msk.f32.gmra.mrb[34].mxu1 %vm1081_vm0, %v6228_v39  ;;  %v6239_v39 = vld [vmem:[#allocation2 + $0x181] sm:$0xff] }
 0x416   : > { %14033 = vmatprep.mubr.msk.f32.mxu1 %vm1081_vm0, %v6229_v1  ;;  %v6241_v1 = vld [vmem:[#allocation2 + $0x199] sm:$0xff] }
 0x419   : > { %14034 = vmatmul.mubr.msk.f32.gmra.mrb[36].mxu1 %vm1081_vm0, %v6230_v6  ;;  %v6240_v6 = vld [vmem:[#allocation2 + $0x189] sm:$0xff] }
 0x41a   : > { %14036 = vmatprep.mubr.msk.f32.mxu1 %vm1081_vm0, %v6231_v19  ;;  %v6242_v19 = vld [vmem:[#allocation2 + $0x1a1] sm:$0xff] }
 0x41d   : > { %14037 = vmatmul.mubr.msk.f32.gmra.mrb[38].mxu1 %vm1081_vm0, %v6232_v41  ;;  %v6243_v41 = vld [vmem:[#allocation2 + $0x1e1] sm:$0xff] }
 0x41e   : > { %14039 = vmatprep.mubr.msk.f32.mxu1 %vm1081_vm0, %v6233_v63  ;;  %v6244_v63 = vld [vmem:[#allocation2 + $0x1e9] sm:$0xff] }
 0x421   : > { %14040 = vmatmul.mubr.msk.f32.gmra.mrb[40].mxu1 %vm1081_vm0, %v6234_v45  ;;  %v6245_v45 = vld [vmem:[#allocation2 + $0x1f9] sm:$0xff] }
 0x422   : > { %14042 = vmatprep.mubr.msk.f32.mxu1 %vm1081_vm0, %v6235_v21  ;;  %v6246_v21 = vld [vmem:[#allocation2 + $0x201] sm:$0xff] }
 0x425   : > { %14043 = vmatmul.mubr.msk.f32.gmra.mrb[42].mxu1 %vm1081_vm0, %v6236_v28  ;;  %v6247_v28 = vld [vmem:[#allocation2 + $0x211] sm:$0xff] }
 0x426   : > { %14045 = vmatprep.mubr.msk.f32.mxu1 %vm1081_vm0, %v6237_v5  ;;  %v6248_v5 = vld [vmem:[#allocation2 + $0x219] sm:$0xff] }
 0x429   : > { %14046 = vmatmul.mubr.msk.f32.gmra.mrb[44].mxu1 %vm1081_vm0, %v6238_v7  ;;  %v6249_v7 = vld [vmem:[#allocation2 + $0x229] sm:$0xff] }
 0x42a   : > { %14048 = vmatprep.mubr.msk.f32.mxu1 %vm1081_vm0, %v6239_v39  ;;  %v6250_v39 = vld [vmem:[#allocation2 + $0x231] sm:$0xff] }
 0x42d   : > { %14049 = vmatmul.mubr.msk.f32.gmra.mrb[46].mxu1 %vm1081_vm0, %v6240_v6  ;;  %v6252_v6 = vld [vmem:[#allocation2 + $0x249] sm:$0xff] }
 0x42e   : > { %14051 = vmatprep.mubr.msk.f32.mxu1 %vm1081_vm0, %v6241_v1  ;;  %v6251_v1 = vld [vmem:[#allocation2 + $0x241] sm:$0xff] }
 0x431   : > { %14052 = vmatmul.mubr.msk.f32.gmra.mrb[48].mxu1 %vm1081_vm0, %v6242_v19  ;;  %v6253_v19 = vld [vmem:[#allocation2 + $0x259] sm:$0xff] }
 0x432   : > { %14054 = vmatprep.mubr.msk.f32.mxu1 %vm1081_vm0, %v6243_v41  ;;  %v6254_v41 = vld [vmem:[#allocation2 + $0x261] sm:$0xff] }
 0x435   : > { %14055 = vmatmul.mubr.msk.f32.gmra.mrb[50].mxu1 %vm1081_vm0, %v6244_v63  ;;  %v6255_v63 = vld [vmem:[#allocation2 + $0x271] sm:$0xff] }
 0x436   : > { %14057 = vmatprep.mubr.msk.f32.mxu1 %vm1081_vm0, %v6245_v45  ;;  %v6256_v45 = vld [vmem:[#allocation2 + $0x279] sm:$0xff] }
 0x439   : > { %14058 = vmatmul.mubr.msk.f32.gmra.mrb[52].mxu1 %vm1081_vm0, %v6246_v21  ;;  %v6257_v21 = vld [vmem:[#allocation2 + $0x289] sm:$0xff] }
 0x43a   : > { %14060 = vmatprep.mubr.msk.f32.mxu1 %vm1081_vm0, %v6247_v28  ;;  %v6258_v28 = vld [vmem:[#allocation2 + $0x291] sm:$0xff] }
 0x43d   : > { %14061 = vmatmul.mubr.msk.f32.gmra.mrb[54].mxu1 %vm1081_vm0, %v6248_v5  ;;  %v6259_v5 = vld [vmem:[#allocation2 + $0x2a1] sm:$0xff] }
 0x43e   : > { %14063 = vmatprep.mubr.msk.f32.mxu1 %vm1081_vm0, %v6249_v7  ;;  %v6260_v7 = vld [vmem:[#allocation2 + $0x2a9] sm:$0xff] }
 0x441   : > { %14064 = vmatmul.mubr.msk.f32.gmra.mrb[56].mxu1 %vm1081_vm0, %v6250_v39  ;;  %v6261_v39 = vld [vmem:[#allocation2 + $0x2b9] sm:$0xff] }
 0x442   : > { %14066 = vmatprep.mubr.msk.f32.mxu1 %vm1081_vm0, %v6251_v1  ;;  %v6262_v1 = vld [vmem:[#allocation2 + $0x2c1] sm:$0xff] }
 0x445   : > { %14067 = vmatmul.mubr.msk.f32.gmra.mrb[58].mxu1 %vm1081_vm0, %v6252_v6  ;;  %v6263_v6 = vld [vmem:[#allocation2 + $0x2d1] sm:$0xff] }
 0x446   : > { %14069 = vmatprep.mubr.msk.f32.mxu1 %vm1081_vm0, %v6253_v19  ;;  %v6264_v19 = vld [vmem:[#allocation2 + $0x2d9] sm:$0xff] }
 0x449   : > { %14070 = vmatmul.mubr.msk.f32.gmra.mrb[60].mxu1 %vm1081_vm0, %v6254_v41  ;;  %v6265_v41 = vld [vmem:[#allocation2 + $0x2e9] sm:$0xff] }
 0x44a   : > { %14072 = vmatprep.mubr.msk.f32.mxu1 %vm1081_vm0, %v6255_v63  ;;  %v6266_v63 = vld [vmem:[#allocation2 + $0x2f1] sm:$0xff] }
 0x44d   : > { %14073 = vmatmul.mubr.msk.f32.gmra.mrb[62].mxu1 %vm1081_vm0, %v6256_v45  ;;  %v6267_v45 = vld [vmem:[#allocation2 + $0x301] sm:$0xff] }
 0x44e   : > { %14075 = vmatprep.mubr.msk.f32.mxu1 %vm1081_vm0, %v6257_v21  ;;  %v6268_v21 = vld [vmem:[#allocation2 + $0x309] sm:$0xff] }
 0x451   : > { %14076 = vmatmul.mubr.msk.f32.gmra.mrb[0].mxu1 %vm1081_vm0, %v6258_v28  ;;  %v6269_v28 = vld [vmem:[#allocation2 + $0x319] sm:$0xff] }
 0x452   : > { %14078 = vmatprep.mubr.msk.f32.mxu1 %vm1081_vm0, %v6259_v5  ;;  %v6270_v5 = vld [vmem:[#allocation2 + $0x321] sm:$0xff] }
 0x455   : > { %14079 = vmatmul.mubr.msk.f32.gmra.mrb[2].mxu1 %vm1081_vm0, %v6260_v7  ;;  %v6271_v7 = vld [vmem:[#allocation2 + $0x331] sm:$0xff] }
 0x456   : > { %14081 = vmatprep.mubr.msk.f32.mxu1 %vm1081_vm0, %v6261_v39  ;;  %v6273_v39 = vld [vmem:[#allocation2 + $0x349] sm:$0xff] }
 0x459   : > { %14082 = vmatmul.mubr.msk.f32.gmra.mrb[4].mxu1 %vm1081_vm0, %v6262_v1  ;;  %v6272_v1 = vld [vmem:[#allocation2 + $0x339] sm:$0xff] }
 0x45a   : > { %14084 = vmatprep.mubr.msk.f32.mxu1 %vm1081_vm0, %v6263_v6  ;;  %v6274_v6 = vld [vmem:[#allocation2 + $0x351] sm:$0xff] }
 0x45d   : > { %14085 = vmatmul.mubr.msk.f32.gmra.mrb[6].mxu1 %vm1081_vm0, %v6264_v19  ;;  %v6921_v19 = vld [vmem:[#allocation2 + $0x32] sm:$0xff] }
 0x45e   : > { %14087 = vmatprep.mubr.msk.f32.mxu1 %vm1081_vm0, %v6265_v41  ;;  %v6922_v41 = vld [vmem:[#allocation2 + $0x3a] sm:$0xff] }
 0x461   : > { %14088 = vmatmul.mubr.msk.f32.gmra.mrb[8].mxu1 %vm1081_vm0, %v6266_v63  ;;  %v6923_v63 = vld [vmem:[#allocation2 + $0x4a] sm:$0xff] }
 0x462   : > { %14090 = vmatprep.mubr.msk.f32.mxu1 %vm1081_vm0, %v6267_v45  ;;  %v6924_v45 = vld [vmem:[#allocation2 + $0x52] sm:$0xff] }
 0x465   : > { %14091 = vmatmul.mubr.msk.f32.gmra.mrb[10].mxu1 %vm1081_vm0, %v6268_v21  ;;  %v6925_v21 = vld [vmem:[#allocation2 + $0x62] sm:$0xff] }
 0x466   : > { %14093 = vmatprep.mubr.msk.f32.mxu1 %vm1081_vm0, %v6269_v28  ;;  %v6926_v28 = vld [vmem:[#allocation2 + $0x6a] sm:$0xff] }
 0x469   : > { %14094 = vmatmul.mubr.msk.f32.gmra.mrb[12].mxu1 %vm1081_vm0, %v6270_v5  ;;  %v6927_v5 = vld [vmem:[#allocation2 + $0x7a] sm:$0xff] }
 0x46a   : > { %14096 = vmatprep.mubr.msk.f32.mxu1 %vm1081_vm0, %v6271_v7  ;;  %v6928_v7 = vld [vmem:[#allocation2 + $0x82] sm:$0xff] }
 0x46d   : > { %14097 = vmatmul.mubr.msk.f32.gmra.mrb[14].mxu1 %vm1081_vm0, %v6272_v1  ;;  %v6930_v1 = vld [vmem:[#allocation2 + $0x9a] sm:$0xff] }
 0x46e   : > { %14099 = vmatprep.mubr.msk.f32.mxu1 %vm1081_vm0, %v6273_v39  ;;  %v6929_v39 = vld [vmem:[#allocation2 + $0x92] sm:$0xff] }
 0x471   : > { %14100 = vmatmul.mubr.msk.f32.gmra.mrb[16].mxu1 %vm1081_vm0, %v6274_v6  ;;  %v6931_v6 = vld [vmem:[#allocation2 + $0xaa] sm:$0xff] }
 0x472   : > { %14110 = vmatprep.mubr.msk.f32.mxu1 %vm1081_vm0, %v6921_v19  ;;  %v6932_v19 = vld [vmem:[#allocation2 + $0xb2] sm:$0xff] }
 0x475   : > { %14111 = vmatmul.mubr.msk.f32.vlgmr.msra.gmra.mrb[18].mxu1 %vm1081_vm0, %v6922_v41  ;;  %v6933_v41 = vld [vmem:[#allocation2 + $0xc2] sm:$0xff] }
 0x476   : > { %14113 = vmatprep.mubr.msk.f32.mxu1 %vm1081_vm0, %v6923_v63  ;;  %v6934_v63 = vld [vmem:[#allocation2 + $0xca] sm:$0xff] }
 0x479   : > { %14114 = vmatmul.mubr.msk.f32.gmra.mrb[20].mxu1 %vm1081_vm0, %v6924_v45  ;;  %v6935_v45 = vld [vmem:[#allocation2 + $0xda] sm:$0xff] }
 0x47a   : > { %14116 = vmatprep.mubr.msk.f32.mxu1 %vm1081_vm0, %v6925_v21  ;;  %v6936_v21 = vld [vmem:[#allocation2 + $0xe2] sm:$0xff] }
 0x47d   : > { %14117 = vmatmul.mubr.msk.f32.gmra.mrb[22].mxu1 %vm1081_vm0, %v6926_v28  ;;  %v6937_v28 = vld [vmem:[#allocation2 + $0xf2] sm:$0xff] }
 0x47e   : > { %14119 = vmatprep.mubr.msk.f32.mxu1 %vm1081_vm0, %v6927_v5  ;;  %v6938_v5 = vld [vmem:[#allocation2 + $0xfa] sm:$0xff] }
 0x481   : > { %14120 = vmatmul.mubr.msk.f32.gmra.mrb[24].mxu1 %vm1081_vm0, %v6928_v7  ;;  %v6939_v7 = vld [vmem:[#allocation2 + $0x10a] sm:$0xff] }
 0x482   : > { %14122 = vmatprep.mubr.msk.f32.mxu1 %vm1081_vm0, %v6929_v39  ;;  %v6940_v39 = vld [vmem:[#allocation2 + $0x112] sm:$0xff] }
 0x485   : > { %14123 = vmatmul.mubr.msk.f32.gmra.mrb[26].mxu1 %vm1081_vm0, %v6930_v1  ;;  %v6941_v1 = vld [vmem:[#allocation2 + $0x122] sm:$0xff] }
 0x486   : > { %14125 = vmatprep.mubr.msk.f32.mxu1 %vm1081_vm0, %v6931_v6  ;;  %v6942_v6 = vld [vmem:[#allocation2 + $0x12a] sm:$0xff] }
 0x489   : > { %14126 = vmatmul.mubr.msk.f32.gmra.mrb[28].mxu1 %vm1081_vm0, %v6932_v19  ;;  %v6943_v19 = vld [vmem:[#allocation2 + $0x13a] sm:$0xff] }
 0x48a   : > { %14128 = vmatprep.mubr.msk.f32.mxu1 %vm1081_vm0, %v6933_v41  ;;  %v6944_v41 = vld [vmem:[#allocation2 + $0x142] sm:$0xff] }
 0x48d   : > { %14129 = vmatmul.mubr.msk.f32.gmra.mrb[30].mxu1 %vm1081_vm0, %v6934_v63  ;;  %v6945_v63 = vld [vmem:[#allocation2 + $0x152] sm:$0xff] }
 0x48e   : > { %14131 = vmatprep.mubr.msk.f32.mxu1 %vm1081_vm0, %v6935_v45  ;;  %v6946_v45 = vld [vmem:[#allocation2 + $0x15a] sm:$0xff] }
 0x491   : > { %14132 = vmatmul.mubr.msk.f32.gmra.mrb[32].mxu1 %vm1081_vm0, %v6936_v21  ;;  %v6947_v21 = vld [vmem:[#allocation2 + $0x16a] sm:$0xff] }
 0x492   : > { %14134 = vmatprep.mubr.msk.f32.mxu1 %vm1081_vm0, %v6937_v28  ;;  %v6948_v28 = vld [vmem:[#allocation2 + $0x172] sm:$0xff] }
 0x495   : > { %14135 = vmatmul.mubr.msk.f32.gmra.mrb[34].mxu1 %vm1081_vm0, %v6938_v5  ;;  %v6949_v5 = vld [vmem:[#allocation2 + $0x182] sm:$0xff] }
 0x496   : > { %14137 = vmatprep.mubr.msk.f32.mxu1 %vm1081_vm0, %v6939_v7  ;;  %v6951_v7 = vld [vmem:[#allocation2 + $0x19a] sm:$0xff] }
 0x499   : > { %14138 = vmatmul.mubr.msk.f32.gmra.mrb[36].mxu1 %vm1081_vm0, %v6940_v39  ;;  %v6950_v39 = vld [vmem:[#allocation2 + $0x18a] sm:$0xff] }
 0x49a   : > { %14140 = vmatprep.mubr.msk.f32.mxu1 %vm1081_vm0, %v6941_v1  ;;  %v6952_v1 = vld [vmem:[#allocation2 + $0x1a2] sm:$0xff] }
 0x49d   : > { %14141 = vmatmul.mubr.msk.f32.gmra.mrb[38].mxu1 %vm1081_vm0, %v6942_v6  ;;  %v6953_v6 = vld [vmem:[#allocation2 + $0x1e2] sm:$0xff] }
 0x49e   : > { %14143 = vmatprep.mubr.msk.f32.mxu1 %vm1081_vm0, %v6943_v19  ;;  %v6954_v19 = vld [vmem:[#allocation2 + $0x1ea] sm:$0xff] }
 0x4a1   : > { %14144 = vmatmul.mubr.msk.f32.gmra.mrb[40].mxu1 %vm1081_vm0, %v6944_v41  ;;  %v6955_v41 = vld [vmem:[#allocation2 + $0x1fa] sm:$0xff] }
 0x4a2   : > { %14146 = vmatprep.mubr.msk.f32.mxu1 %vm1081_vm0, %v6945_v63  ;;  %v6956_v63 = vld [vmem:[#allocation2 + $0x202] sm:$0xff] }
 0x4a5   : > { %14147 = vmatmul.mubr.msk.f32.gmra.mrb[42].mxu1 %vm1081_vm0, %v6946_v45  ;;  %v6957_v45 = vld [vmem:[#allocation2 + $0x212] sm:$0xff] }
 0x4a6   : > { %14149 = vmatprep.mubr.msk.f32.mxu1 %vm1081_vm0, %v6947_v21  ;;  %v6958_v21 = vld [vmem:[#allocation2 + $0x21a] sm:$0xff] }
 0x4a9   : > { %14150 = vmatmul.mubr.msk.f32.gmra.mrb[44].mxu1 %vm1081_vm0, %v6948_v28  ;;  %v6959_v28 = vld [vmem:[#allocation2 + $0x22a] sm:$0xff] }
 0x4aa   : > { %14152 = vmatprep.mubr.msk.f32.mxu1 %vm1081_vm0, %v6949_v5  ;;  %v6960_v5 = vld [vmem:[#allocation2 + $0x232] sm:$0xff] }
 0x4ad   : > { %14153 = vmatmul.mubr.msk.f32.gmra.mrb[46].mxu1 %vm1081_vm0, %v6950_v39  ;;  %v6962_v39 = vld [vmem:[#allocation2 + $0x24a] sm:$0xff] }
 0x4ae   : > { %14155 = vmatprep.mubr.msk.f32.mxu1 %vm1081_vm0, %v6951_v7  ;;  %v6961_v7 = vld [vmem:[#allocation2 + $0x242] sm:$0xff] }
 0x4b1   : > { %14156 = vmatmul.mubr.msk.f32.gmra.mrb[48].mxu1 %vm1081_vm0, %v6952_v1 }
 0x4b2   : > { %14158 = vmatprep.mubr.msk.f32.mxu1 %vm1081_vm0, %v6953_v6 }
 0x4b5   : > { %14159 = vmatmul.mubr.msk.f32.gmra.mrb[50].mxu1 %vm1081_vm0, %v6954_v19 }
 0x4b6   : > { %14161 = vmatprep.mubr.msk.f32.mxu1 %vm1081_vm0, %v6955_v41 }
 0x4b9   : > { %14162 = vmatmul.mubr.msk.f32.gmra.mrb[52].mxu1 %vm1081_vm0, %v6956_v63 }
 0x4ba   : > { %14164 = vmatprep.mubr.msk.f32.mxu1 %vm1081_vm0, %v6957_v45 }
 0x4bd   : > { %14165 = vmatmul.mubr.msk.f32.gmra.mrb[54].mxu1 %vm1081_vm0, %v6958_v21 }
 0x4be   : > { %14167 = vmatprep.mubr.msk.f32.mxu1 %vm1081_vm0, %v6959_v28  ;;  %v20712_v28 = vld [vmem:[#allocation21_spill] sm:$0xff] }
 0x4c1   : > { %14168 = vmatmul.mubr.msk.f32.gmra.mrb[56].mxu1 %vm1081_vm0, %v6960_v5 }
 0x4c2   : > { %14170 = vmatprep.mubr.msk.f32.mxu1 %vm1081_vm0, %v6961_v7 }
 0x4c5   : > { %14171 = vmatmul.mubr.msk.f32.gmra.mrb[58].mxu1 %vm1081_vm0, %v6962_v39 }
 0x4c6   : > { %14173 = vmatprep.mubr.msk.f32.mxu1 %vm1081_vm0, %v17614_v58  ;;  %v6983_v58 = vld [vmem:[#allocation2 + $0x34a] sm:$0xff] }
 0x4c9   : > { %14174 = vmatmul.mubr.msk.f32.gmra.mrb[60].mxu1 %vm1081_vm0, %v17622_v3  ;;  %v6984_v3 = vld [vmem:[#allocation2 + $0x352] sm:$0xff] }
 0x4ca   : > { %14176 = vmatprep.mubr.msk.f32.mxu1 %vm1081_vm0, %v17628_v13  ;;  %v8174_v13 = vld [vmem:[%s20452_s5] sm:$0xff] }
 0x4cd   : > { %14177 = vmatmul.mubr.msk.f32.gmra.mrb[62].mxu1 %vm1081_vm0, %v17634_v25  ;;  %v8175_v25 = vld [vmem:[%s20452_s5 + $0x8] sm:$0xff] }
 0x4ce   : > { %14179 = vmatprep.mubr.msk.f32.mxu1 %vm1081_vm0, %v17640_v36  ;;  %v14602_v36 = vpack.c.bf16 %v8175_v25, %v8174_v13 }
 0x4d0   : > { %14603 = vmatprep.subr.bf16.mxu0 %v14602_v36 }
 0x4d1   : > { %14180 = vmatmul.mubr.msk.f32.gmra.mrb[0].mxu1 %vm1081_vm0, %v17646_v49  ;;  %14605 = vmatpush3.bf16.msra.mxu0 %v14602_v36  ;;  %v8176_v49 = vld [vmem:[%s20452_s5 + $0x10] sm:$0xff] }
 0x4d2   : > { %14182 = vmatprep.mubr.msk.f32.mxu1 %vm1081_vm0, %v17652_v60  ;;  %v8177_v60 = vld [vmem:[%s20452_s5 + $0x18] sm:$0xff] }
 0x4d5   : > { %14183 = vmatmul.mubr.msk.f32.gmra.mrb[2].mxu1 %vm1081_vm0, %v17658_v61  ;;  %v14606_v61 = vpack.c.bf16 %v8177_v60, %v8176_v49  ;;  %v20717_v60 = vld [vmem:[#allocation16_spill] sm:$0xff] }
 0x4d6   : > { %14185 = vmatprep.mubr.msk.f32.mxu1 %vm1081_vm0, %v17664_v29  ;;  %v18016_v29 = vld [vmem:[%s20451_s4] ss:$0 sm:$0xff] }
 0x4d7   : > { %14607 = vmatprep.subr.bf16.mxu0 %v14606_v61  ;;  %v14678_v1 = vadd.f32 %v17632_v24, %v18016_v29  ;;  %v18128_v63 = vadd.f32 %v17668_v33, %v18016_v29  ;;  %v18133_v45 = vadd.f32 %v18016_v29, %v17672_v11  ;;  %v18137_v21 = vadd.f32 %v17680_v55, %v18016_v29  ;;  %v20713_v33 = vld [vmem:[#allocation22_spill] sm:$0xff] }
 0x4d8   : > { %14609 = vmatpush3.bf16.msra.mxu0 %v14606_v61  ;;  %v18146_v7 = vadd.f32 %v20713_v33, %v18016_v29  ;;  %v18164_v61 = vadd.f32 %v20717_v60, %v18016_v29 }
 0x4d9   : > { %14186 = vmatmul.mubr.msk.f32.gmra.mrb[4].mxu1 %vm1081_vm0, %v17670_v47  ;;  %v18020_v47 = vadd.f32 %v17540_v53, %v18016_v29  ;;  %v14670_v53 = vadd.f32 %v17610_v51, %v18016_v29 }
 0x4da   : > { %14188 = vmatprep.mubr.msk.f32.mxu1 %vm1081_vm0, %v17676_v54  ;;  %v18024_v54 = vadd.f32 %v18016_v29, %v17542_v32  ;;  %v18046_v32 = vadd.f32 %v17563_v0, %v18016_v29  ;;  %v18064_v0 = vadd.f32 %v17578_v38, %v18016_v29  ;;  %v18084_v38 = vadd.f32 %v17594_v31, %v18016_v29 }
 0x4db   : > { %v14676_v31 = vadd.f32 %v18016_v29, %v17624_v12 }
 0x4dc   : > { %20700 = vst [vmem:[#allocation46_spill] sm:$0xff] %v18064_v0  ;;  %20706 = vst [vmem:[#allocation52_spill] sm:$0xff] %v18084_v38 }
 0x4dd   : > { %14189 = vmatmul.mubr.msk.f32.gmra.mrb[6].mxu1 %vm1081_vm0, %v17682_v4  ;;  %v18028_v4 = vadd.f32 %v17548_v17, %v18016_v29  ;;  %v18050_v17 = vadd.f32 %v18016_v29, %v17565_v35 }
 0x4de   : > { %14191 = vmatprep.mubr.msk.f32.mxu1 %vm1081_vm0, %v17688_v26  ;;  %v18032_v26 = vadd.f32 %v18016_v29, %v17550_v20  ;;  %v14672_v20 = vadd.f32 %v18016_v29, %v17616_v59  ;;  %v18074_v59 = vadd.f32 %v17586_v23, %v18016_v29 }
 0x4e0   : > { %20703 = vst [vmem:[#allocation49_spill] sm:$0xff] %v18074_v59 }
 0x4e1   : > { %14192 = vmatmul.mubr.msk.f32.gmra.mrb[8].mxu1 %vm1081_vm0, %v17694_v44  ;;  %v18036_v44 = vadd.f32 %v17556_v42, %v18016_v29 }
 0x4e2   : > { %14194 = vmatprep.mubr.msk.f32.mxu1 %vm1081_vm0, %v17700_v62  ;;  %v18042_v62 = vadd.f32 %v18016_v29, %v17558_v10  ;;  %v18060_v10 = vadd.f32 %v18016_v29, %v17572_v15 }
 0x4e5   : > { %14195 = vmatmul.mubr.msk.f32.gmra.mrb[10].mxu1 %vm1081_vm0, %v17706_v18  ;;  %v18056_v18 = vadd.f32 %v17570_v14, %v18016_v29  ;;  %v18078_v14 = vadd.f32 %v18016_v29, %v17588_v30  ;;  %v18099_v30 = vadd.f32 %v18016_v29, %v17604_v50  ;;  %v14684_v50 = vadd.f32 %v18016_v29, %v17648_v16 }
 0x4e6   : > { %14197 = vmatprep.mubr.msk.f32.mxu1 %vm1081_vm0, %v17712_v52  ;;  %v18070_v52 = vadd.f32 %v18016_v29, %v17580_v22  ;;  %v14674_v22 = vadd.f32 %v17620_v2, %v18016_v29  ;;  %v14680_v2 = vadd.f32 %v18016_v29, %v17636_v34  ;;  %v14686_v34 = vadd.f32 %v17656_v8, %v18016_v29 }
 0x4e7   : > { %20704 = vst [vmem:[#allocation50_spill] sm:$0xff] %v18078_v14  ;;  %20709 = vst [vmem:[#allocation55_spill] sm:$0xff] %v18099_v30  ;;  %v18141_v8 = vadd.f32 %v18016_v29, %v20712_v28  ;;  %v20721_v28 = vld [vmem:[#allocation20_spill] sm:$0xff] }
 0x4e8   : > { %20702 = vst [vmem:[#allocation48_spill] sm:$0xff] %v18070_v52 }
 0x4e9   : > { %14198 = vmatmul.mubr.msk.f32.gmra.mrb[12].mxu1 %vm1081_vm0, %v17718_v57  ;;  %v18088_v57 = vadd.f32 %v18016_v29, %v17596_v40 }
 0x4ea   : > { %14200 = vmatprep.mubr.msk.f32.mxu1 %vm1081_vm0, %v17724_v37  ;;  %v18095_v37 = vadd.f32 %v17602_v43, %v18016_v29  ;;  %v14682_v43 = vadd.f32 %v17644_v48, %v18016_v29  ;;  %v14688_v48 = vadd.f32 %v18016_v29, %v17660_v46 }
 0x4eb   : > { %20707 = vst [vmem:[#allocation53_spill] sm:$0xff] %v18088_v57 }
 0x4ec   : > { %20708 = vst [vmem:[#allocation54_spill] sm:$0xff] %v18095_v37 }
 0x4ed   : > { %14201 = vmatmul.mubr.msk.f32.gmra.mrb[14].mxu1 %vm1081_vm0, %v17730_v9 }
 0x4ee   : > { %14203 = vmatprep.mubr.msk.f32.mxu1 %vm1081_vm0, %v6983_v58 }
 0x4f1   : > { %14204 = vmatmul.mubr.msk.f32.gmra.mrb[16].mxu1 %vm1081_vm0, %v6984_v3  ;;  %v20715_v3 = vld [vmem:[#allocation15_spill] sm:$0xff] }
 0x4f2   : > { %v18155_v13 = vadd.f32 %v18016_v29, %v20715_v3  ;;  %v20723_v3 = vld [vmem:[#allocation23_spill] sm:$0xff] }
 0x548   : > { %v14112_v42 = vpop.f32.mrb[18].mxu1 }
 0x549   : > { %v18066_v51 = vadd.f32 %v14670_v53, %v14112_v42  ;;  %v7248_v35 = vpop.f32.mrb[19].mxu1 }
 0x54a   : > { %v18080_v15 = vadd.f32 %v14672_v20, %v7248_v35  ;;  %v20718_v35 = vld [vmem:[#allocation17_spill] sm:$0xff] }
 0x54b   : > { %20701 = vst [vmem:[#allocation47_spill] sm:$0xff] %v18066_v51  ;;  %v20490_v23 = vmax.f32 %v18066_v51, 0.0 }
 0x54c   : > { %20705 = vst [vmem:[#allocation51_spill] sm:$0xff] %v18080_v15  ;;  %v20491_v9 = vmax.f32 %v18080_v15, 0.0  ;;  %v14115_v40 = vpop.f32.mrb[20].mxu1  ;;  %v20738_v15 = vld [vmem:[#allocation33_spill] sm:$0xff] }
 0x54d   : > { %v18110_v6 = vadd.f32 %v14674_v22, %v14115_v40  ;;  %v7258_v19 = vpop.f32.mrb[21].mxu1  ;;  %v7696_v12 = vsel %vm1081_vm0, %v20490_v23, 0.0  ;;  %v18169_v22 = vadd.f32 %v18016_v29, %v20718_v35 }
 0x54e   : > { %v7695_v24 = vsel %vm1081_vm0, %v20491_v9, 0.0  ;;  %v18120_v41 = vadd.f32 %v14676_v31, %v7258_v19  ;;  %v20719_v31 = vld [vmem:[#allocation18_spill] sm:$0xff] }
 0x54f   : > { %20710 = vst [vmem:[#allocation56_spill] sm:$0xff] %v18110_v6  ;;  %v20487_v16 = vmax.f32 %v18110_v6, 0.0  ;;  %v7697_v39 = vadd.f32 %v7696_v12, %v7695_v24  ;;  %v18173_v40 = vadd.f32 %v20719_v31, %v18016_v29 }
 0x550   : > { %20711 = vst [vmem:[#allocation57_spill] sm:$0xff] %v18120_v41  ;;  %v20489_v46 = vmax.f32 %v18120_v41, 0.0  ;;  %v14118_v5 = vpop.f32.mrb[22].mxu1 }
 0x551   : > { %v7705_v11 = vsel %vm1081_vm0, %v20487_v16, 0.0  ;;  %v18151_v58 = vadd.f32 %v14678_v1, %v14118_v5  ;;  %v7268_v55 = vpop.f32.mrb[23].mxu1  ;;  %v20720_v1 = vld [vmem:[#allocation19_spill] sm:$0xff]  ;;  %v7698_v5 = vrot.slane %v7697_v39, 4 }
 0x552   : > { %v8031_v25 = vadd.f32 %v7705_v11, %v7696_v12  ;;  %v7704_v36 = vsel %vm1081_vm0, %v20489_v46, 0.0  ;;  %v18160_v49 = vadd.f32 %v14680_v2, %v7268_v55  ;;  %v18177_v2 = vadd.f32 %v18016_v29, %v20720_v1 }
 0x553   : > { %20714 = vst [vmem:[#allocation21_spill] sm:$0xff] %v18151_v58  ;;  %v7706_v53 = vadd.f32 %v7705_v11, %v7704_v36  ;;  %v8016_v20 = vadd.f32 %v7704_v36, %v7695_v24  ;;  %v20486_v42 = vmax.f32 %v18151_v58, 0.0  ;;  %v18182_v24 = vadd.f32 %v20721_v28, %v18016_v29 }
 0x554   : > { %20716 = vst [vmem:[#allocation22_spill] sm:$0xff] %v18160_v49  ;;  %v20488_v19 = vmax.f32 %v18160_v49, 0.0  ;;  %v14121_v12 = vpop.f32.mrb[24].mxu1  ;;  %v18191_v36 = vadd.f32 %v18016_v29, %v20723_v3  ;;  %v18200_v1 = vadd.f32 %v17737_v56, %v18016_v29  ;;  %v20725_v3 = vld [vmem:[#allocation24_spill] sm:$0xff] }
 0x555   : > { %v7714_v33 = vsel %vm1081_vm0, %v20486_v42, 0.0  ;;  %v18187_v11 = vadd.f32 %v14682_v43, %v14121_v12  ;;  %v7278_v55 = vpop.f32.mrb[25].mxu1  ;;  %v18204_v43 = vadd.f32 %v18016_v29, %v17739_v27  ;;  %v7707_v12 = vrot.slane %v7706_v53, 4 }
 0x556   : > { %v8032_v60 = vadd.f32 %v8031_v25, %v7714_v33  ;;  %v7713_v35 = vsel %vm1081_vm0, %v20488_v19, 0.0  ;;  %v18196_v31 = vadd.f32 %v14684_v50, %v7278_v55  ;;  %v18208_v42 = vadd.f32 %v20725_v3, %v18016_v29  ;;  %v20726_v25 = vld [vmem:[#allocation25_spill] sm:$0xff]  ;;  %v20727_v19 = vld [vmem:[#allocation26_spill] sm:$0xff]  ;;  %v20729_v3 = vld [vmem:[#allocation27_spill] sm:$0xff] }
 0x557   : > { %20722 = vst [vmem:[#allocation15_spill] sm:$0xff] %v18187_v11  ;;  %v8017_v28 = vadd.f32 %v8016_v20, %v7713_v35  ;;  %v18212_v16 = vadd.f32 %v18016_v29, %v20726_v25  ;;  %v20495_v50 = vmax.f32 %v18187_v11, 0.0  ;;  %v18218_v46 = vadd.f32 %v20727_v19, %v18016_v29 }
 0x558   : > { %20724 = vst [vmem:[#allocation16_spill] sm:$0xff] %v18196_v31  ;;  %v20497_v55 = vmax.f32 %v18196_v31, 0.0  ;;  %v14124_v56 = vpop.f32.mrb[26].mxu1  ;;  %v7699_v27 = vadd.f32 %v7698_v5, %v7697_v39  ;;  %v7715_v23 = vadd.f32 %v7714_v33, %v7713_v35  ;;  %v18224_v58 = vadd.f32 %v18016_v29, %v20729_v3  ;;  %v20731_v39 = vld [vmem:[#allocation28_spill] sm:$0xff] }
 0x559   : > { %v18220_v20 = vadd.f32 %v14686_v34, %v14124_v56  ;;  %v7288_v9 = vpop.f32.mrb[27].mxu1  ;;  %v7723_v25 = vsel %vm1081_vm0, %v20495_v50, 0.0  ;;  %v18236_v19 = vadd.f32 %v20731_v39, %v18016_v29  ;;  %v20732_v34 = vld [vmem:[#allocation29_spill] sm:$0xff]  ;;  %v7708_v33 = vadd.f32 %v7707_v12, %v7706_v53  ;;  %v20733_v56 = vld [vmem:[#allocation30_spill] sm:$0xff] }
 0x55a   : > { %v7722_v49 = vsel %vm1081_vm0, %v20497_v55, 0.0  ;;  %v18232_v6 = vadd.f32 %v14688_v48, %v7288_v9  ;;  %v18240_v5 = vadd.f32 %v18016_v29, %v20732_v34  ;;  %v8033_v35 = vadd.f32 %v8032_v60, %v7723_v25  ;;  %v20734_v55 = vld [vmem:[#allocation31_spill] sm:$0xff] }
 0x55b   : > { %20728 = vst [vmem:[#allocation17_spill] sm:$0xff] %v18220_v20  ;;  %v18244_v3 = vadd.f32 %v20733_v56, %v18016_v29  ;;  %v8018_v50 = vadd.f32 %v8017_v28, %v7722_v49  ;;  %v20503_v11 = vmax.f32 %v18220_v20, 0.0  ;;  %v18250_v39 = vadd.f32 %v18016_v29, %v20734_v55  ;;  %v20737_v55 = vld [vmem:[#allocation32_spill] sm:$0xff] }
 0x55c   : > { %20730 = vst [vmem:[#allocation18_spill] sm:$0xff] %v18232_v6  ;;  %v20505_v9 = vmax.f32 %v18232_v6, 0.0  ;;  %v14127_v48 = vpop.f32.mrb[28].mxu1  ;;  %v7700_v31 = vrot.slane %v7699_v27, 2  ;;  %v7716_v41 = vrot.slane %v7715_v23, 4  ;;  %v7724_v60 = vadd.f32 %v7723_v25, %v7722_v49 }
 0x55d   : > { %v18253_v34 = vadd.f32 %v18128_v63, %v14127_v48  ;;  %v7298_v53 = vpop.f32.mrb[29].mxu1  ;;  %v7732_v12 = vsel %vm1081_vm0, %v20503_v11, 0.0  ;;  %v18266_v51 = vadd.f32 %v20737_v55, %v18016_v29  ;;  %v18270_v63 = vadd.f32 %v18016_v29, %v20738_v15 }
 0x55e   : > { %v7731_v28 = vsel %vm1081_vm0, %v20505_v9, 0.0  ;;  %v18262_v56 = vadd.f32 %v18133_v45, %v7298_v53  ;;  %v7709_v49 = vrot.slane %v7708_v33, 2  ;;  %v8034_v25 = vadd.f32 %v8033_v35, %v7732_v12  ;;  %v20739_v45 = vld [vmem:[#allocation34_spill] sm:$0xff] }
 0x55f   : > { %20735 = vst [vmem:[#allocation19_spill] sm:$0xff] %v18253_v34  ;;  %v7733_v48 = vadd.f32 %v7732_v12, %v7731_v28  ;;  %v8019_v20 = vadd.f32 %v8018_v50, %v7731_v28  ;;  %v20506_v11 = vmax.f32 %v18253_v34, 0.0  ;;  %v18276_v53 = vadd.f32 %v20739_v45, %v18016_v29  ;;  %v20742_v28 = vld [vmem:[#allocation35_spill] sm:$0xff] }
 0x560   : > { %20736 = vst [vmem:[#allocation20_spill] sm:$0xff] %v18262_v56  ;;  %v20509_v6 = vmax.f32 %v18262_v56, 0.0  ;;  %v14130_v9 = vpop.f32.mrb[30].mxu1  ;;  %v7701_v30 = vadd.f32 %v7700_v31, %v7699_v27  ;;  %v7717_v55 = vadd.f32 %v7716_v41, %v7715_v23  ;;  %v7725_v57 = vrot.slane %v7724_v60, 4  ;;  %v20743_v23 = vld [vmem:[#allocation36_spill] sm:$0xff] }
 0x561   : > { %v18279_v37 = vadd.f32 %v18137_v21, %v14130_v9  ;;  %v7308_v15 = vpop.f32.mrb[31].mxu1  ;;  %v7741_v50 = vsel %vm1081_vm0, %v20506_v11, 0.0  ;;  %v18292_v31 = vadd.f32 %v18016_v29, %v20742_v28  ;;  %v18296_v41 = vadd.f32 %v20743_v23, %v18016_v29 }
 0x562   : > { %v7740_v35 = vsel %vm1081_vm0, %v20509_v6, 0.0  ;;  %v18288_v12 = vadd.f32 %v18141_v8, %v7308_v15  ;;  %v7710_v21 = vadd.f32 %v7709_v49, %v7708_v33  ;;  %v8035_v27 = vadd.f32 %v8034_v25, %v7741_v50 }
 0x563   : > { %20740 = vst [vmem:[#allocation23_spill] sm:$0xff] %v18279_v37  ;;  %v7734_v9 = vrot.slane %v7733_v48, 4  ;;  %v7742_v45 = vadd.f32 %v7741_v50, %v7740_v35  ;;  %v8020_v11 = vadd.f32 %v8019_v20, %v7740_v35  ;;  %v20510_v34 = vmax.f32 %v18279_v37, 0.0 }
 0x564   : > { %20741 = vst [vmem:[#allocation24_spill] sm:$0xff] %v18288_v12  ;;  %v14133_v56 = vpop.f32.mrb[32].mxu1  ;;  %v7702_v6 = vrot.slane %v7701_v30, 1  ;;  %v7718_v38 = vrot.slane %v7717_v55, 2  ;;  %v20512_v8 = vmax.f32 %v18288_v12, 0.0  ;;  %v7726_v14 = vadd.f32 %v7725_v57, %v7724_v60 }
 0x565   : > { %v18301_v15 = vadd.f32 %v18146_v7, %v14133_v56  ;;  %v7318_v28 = vpop.f32.mrb[33].mxu1  ;;  %v7743_v59 = vrot.slane %v7742_v45, 4  ;;  %v7750_v33 = vsel %vm1081_vm0, %v20510_v34, 0.0  ;;  %v7711_v20 = vrot.slane %v7710_v21, 1 }
 0x566   : > { %v18307_v49 = vadd.f32 %v18155_v13, %v7318_v28  ;;  %v8036_v25 = vadd.f32 %v8035_v27, %v7750_v33  ;;  %v7749_v50 = vsel %vm1081_vm0, %v20512_v8, 0.0  ;;  %v7735_v7 = vadd.f32 %v7734_v9, %v7733_v48 }
 0x567   : > { %v20515_v35 = vmax.f32 %v18301_v15, 0.0  ;;  %v7744_v56 = vadd.f32 %v7743_v59, %v7742_v45  ;;  %v7751_v23 = vadd.f32 %v7750_v33, %v7749_v50  ;;  %v8021_v57 = vadd.f32 %v8020_v11, %v7749_v50 }
 0x568   : > { %v14136_v60 = vpop.f32.mrb[34].mxu1  ;;  %v7703_v52 = vadd.f32 %v7702_v6, %v7701_v30  ;;  %v20516_v13 = vmax.f32 %v18307_v49, 0.0  ;;  %v7719_v37 = vadd.f32 %v7718_v38, %v7717_v55  ;;  %v7727_v8 = vrot.slane %v7726_v14, 2 }
 0x569   : > { %v7759_v34 = vsel %vm1081_vm0, %v20515_v35, 0.0  ;;  %v18318_v27 = vadd.f32 %v18164_v61, %v14136_v60  ;;  %v7328_v28 = vpop.f32.mrb[35].mxu1  ;;  %v7752_v12 = vrot.slane %v7751_v23, 4  ;;  %v7712_v48 = vadd.f32 %v7711_v20, %v7710_v21 }
 0x56a   : > { %v8037_v0 = vadd.f32 %v8036_v25, %v7759_v34  ;;  %v7758_v59 = vsel %vm1081_vm0, %v20516_v13, 0.0  ;;  %v18325_v6 = vadd.f32 %v18169_v22, %v7328_v28  ;;  %v7736_v11 = vrot.slane %v7735_v7, 2 }
 0x56b   : > { %20744 = vst [vmem:[#allocation25_spill] sm:$0xff] %v18318_v27  ;;  %v20514_v30 = vmax.f32 %v18318_v27, 0.0  ;;  %v7745_v9 = vrot.slane %v7744_v56, 2  ;;  %v7753_v45 = vadd.f32 %v7752_v12, %v7751_v23  ;;  %v8022_v61 = vadd.f32 %v8021_v57, %v7758_v59 }
 0x56c   : > { %20745 = vst [vmem:[#allocation26_spill] sm:$0xff] %v18325_v6  ;;  %v14139_v33 = vpop.f32.mrb[36].mxu1  ;;  %v20518_v55 = vmax.f32 %v18325_v6, 0.0  ;;  %v7720_v25 = vrot.slane %v7719_v37, 1  ;;  %v7728_v50 = vadd.f32 %v7727_v8, %v7726_v14  ;;  %v7984_v28 = vmul.f32 0.0625, %v7703_v52 }
 0x56d   : > { %v7768_v38 = vsel %vm1081_vm0, %v20514_v30, 0.0  ;;  %v18332_v21 = vadd.f32 %v18173_v40, %v14139_v33  ;;  %v7338_v20 = vpop.f32.mrb[37].mxu1  ;;  %v7754_v22 = vrot.slane %v7753_v45, 2  ;;  %v7985_v30 = vmul.f32 0.0625, %v7712_v48 }
 0x56e   : > { %v8038_v60 = vadd.f32 %v8037_v0, %v7768_v38  ;;  %v7767_v12 = vsel %vm1081_vm0, %v20518_v55, 0.0  ;;  %v18339_v57 = vadd.f32 %v18177_v2, %v7338_v20  ;;  %v7737_v35 = vadd.f32 %v7736_v11, %v7735_v7 }
 0x56f   : > { %20746 = vst [vmem:[#allocation27_spill] sm:$0xff] %v18332_v21  ;;  %v20521_v23 = vmax.f32 %v18332_v21, 0.0  ;;  %v7746_v13 = vadd.f32 %v7745_v9, %v7744_v56  ;;  %v7760_v40 = vadd.f32 %v7759_v34, %v7758_v59  ;;  %v8023_v27 = vadd.f32 %v8022_v61, %v7767_v12 }
 0x570   : > { %v14142_v33 = vpop.f32.mrb[38].mxu1  ;;  %v20523_v52 = vmax.f32 %v18339_v57, 0.0  ;;  %v7721_v55 = vadd.f32 %v7720_v25, %v7719_v37  ;;  %v7729_v6 = vrot.slane %v7728_v50, 1  ;;  %v7755_v2 = vadd.f32 %v7754_v22, %v7753_v45 }
 0x571   : > { %v7777_v0 = vsel %vm1081_vm0, %v20521_v23, 0.0  ;;  %v18346_v14 = vadd.f32 %v18182_v24, %v14142_v33  ;;  %v7348_v8 = vpop.f32.mrb[39].mxu1  ;;  %v7769_v20 = vadd.f32 %v7768_v38, %v7767_v12  ;;  %v7738_v59 = vrot.slane %v7737_v35, 1 }
 0x572   : > { %v8039_v48 = vadd.f32 %v8038_v60, %v7777_v0  ;;  %v7776_v34 = vsel %vm1081_vm0, %v20523_v52, 0.0  ;;  %v18353_v56 = vadd.f32 %v18191_v36, %v7348_v8  ;;  %v7747_v11 = vrot.slane %v7746_v13, 1 }
 0x573   : > { %20747 = vst [vmem:[#allocation28_spill] sm:$0xff] %v18346_v14  ;;  %v20520_v7 = vmax.f32 %v18346_v14, 0.0  ;;  %v7761_v24 = vrot.slane %v7760_v40, 4  ;;  %v8024_v9 = vadd.f32 %v8023_v27, %v7776_v34  ;;  %v8113_v37 = vsel %vm8112_vm3, %v7985_v30, %v7984_v28 }
 0x574   : > { %20748 = vst [vmem:[#allocation29_spill] sm:$0xff] %v18353_v56  ;;  %v14145_v61 = vpop.f32.mrb[40].mxu1  ;;  %v20522_v38 = vmax.f32 %v18353_v56, 0.0  ;;  %v7730_v22 = vadd.f32 %v7729_v6, %v7728_v50  ;;  %v7756_v60 = vrot.slane %v7755_v2, 1  ;;  %v7770_v12 = vrot.slane %v7769_v20, 4 }
 0x575   : > { %v7786_v45 = vsel %vm1081_vm0, %v20520_v7, 0.0  ;;  %v18361_v25 = vadd.f32 %v18200_v1, %v14145_v61  ;;  %v7358_v36 = vpop.f32.mrb[41].mxu1  ;;  %v7986_v27 = vmul.f32 0.0625, %v7721_v55  ;;  %v7739_v1 = vadd.f32 %v7738_v59, %v7737_v35 }
 0x576   : > { %v8040_v33 = vadd.f32 %v8039_v48, %v7786_v45  ;;  %v7785_v30 = vsel %vm1081_vm0, %v20522_v38, 0.0  ;;  %v18368_v8 = vadd.f32 %v18204_v43, %v7358_v36  ;;  %v7748_v61 = vadd.f32 %v7747_v11, %v7746_v13 }
 0x577   : > { %20749 = vst [vmem:[#allocation30_spill] sm:$0xff] %v18361_v25  ;;  %v20526_v28 = vmax.f32 %v18361_v25, 0.0  ;;  %v7762_v7 = vadd.f32 %v7761_v24, %v7760_v40  ;;  %v7778_v23 = vadd.f32 %v7777_v0, %v7776_v34  ;;  %v8025_v50 = vadd.f32 %v8024_v9, %v7785_v30 }
 0x578   : > { %20750 = vst [vmem:[#allocation31_spill] sm:$0xff] %v18368_v8  ;;  %v14148_v6 = vpop.f32.mrb[42].mxu1  ;;  %v20527_v48 = vmax.f32 %v18368_v8, 0.0  ;;  %v7987_v43 = vmul.f32 0.0625, %v7730_v22  ;;  %v7771_v36 = vadd.f32 %v7770_v12, %v7769_v20  ;;  %v7787_v14 = vadd.f32 %v7786_v45, %v7785_v30 }
 0x579   : > { %v7795_v55 = vsel %vm1081_vm0, %v20526_v28, 0.0  ;;  %v18375_v38 = vadd.f32 %v18208_v42, %v14148_v6  ;;  %v7368_v52 = vpop.f32.mrb[43].mxu1  ;;  %v7757_v35 = vadd.f32 %v7756_v60, %v7755_v2  ;;  %v7988_v59 = vmul.f32 0.0625, %v7739_v1 }
 0x57a   : > { %v8041_v13 = vadd.f32 %v8040_v33, %v7795_v55  ;;  %v7794_v40 = vsel %vm1081_vm0, %v20527_v48, 0.0  ;;  %v18382_v34 = vadd.f32 %v18212_v16, %v7368_v52  ;;  %v7763_v11 = vrot.slane %v7762_v7, 2 }
 0x57b   : > { %20751 = vst [vmem:[#allocation32_spill] sm:$0xff] %v18375_v38  ;;  %v20525_v0 = vmax.f32 %v18375_v38, 0.0  ;;  %v7779_v24 = vrot.slane %v7778_v23, 4  ;;  %v7796_v42 = vadd.f32 %v7795_v55, %v7794_v40  ;;  %v7989_v6 = vmul.f32 0.0625, %v7748_v61  ;;  %v20754_v38 = vld [vmem:[#allocation37_spill] sm:$0xff] }
 0x57c   : > { %20752 = vst [vmem:[#allocation33_spill] sm:$0xff] %v18382_v34  ;;  %v14151_v9 = vpop.f32.mrb[44].mxu1  ;;  %v8026_v22 = vadd.f32 %v8025_v50, %v7794_v40  ;;  %v20529_v20 = vmax.f32 %v18382_v34, 0.0  ;;  %v7772_v60 = vrot.slane %v7771_v36, 2  ;;  %v7788_v12 = vrot.slane %v7787_v14, 4 }
 0x57d   : > { %v7804_v2 = vsel %vm1081_vm0, %v20525_v0, 0.0  ;;  %v7378_v45 = vpop.f32.mrb[45].mxu1  ;;  %v7990_v33 = vmul.f32 0.0625, %v7757_v35  ;;  %v8115_v16 = vsel %vm8114_vm4, %v7986_v27, %v8113_v37  ;;  %v18394_v61 = vadd.f32 %v18218_v46, %v14151_v9 }
 0x57e   : > { %v8042_v52 = vadd.f32 %v8041_v13, %v7804_v2  ;;  %v7803_v30 = vsel %vm1081_vm0, %v20529_v20, 0.0  ;;  %v8117_v1 = vsel %vm8116_vm5, %v7987_v43, %v8115_v16  ;;  %v7764_v50 = vadd.f32 %v7763_v11, %v7762_v7 }
 0x57f   : > { %20753 = vst [vmem:[#allocation34_spill] sm:$0xff] %v18394_v61  ;;  %v7780_v55 = vadd.f32 %v7779_v24, %v7778_v23  ;;  %v7797_v40 = vrot.slane %v7796_v42, 4  ;;  %v8119_v0 = vsel %vm8118_vm6, %v7988_v59, %v8117_v1  ;;  %v7805_v48 = vadd.f32 %v7804_v2, %v7803_v30  ;;  %v20756_v24 = vld [vmem:[#allocation38_spill] sm:$0xff] }
 0x580   : > { %v14154_v28 = vpop.f32.mrb[46].mxu1  ;;  %v8027_v35 = vadd.f32 %v8026_v22, %v7803_v30  ;;  %v8121_v37 = vsel %vm8120_vm7, %v7989_v6, %v8119_v0  ;;  %v20530_v27 = vmax.f32 %v18394_v61, 0.0  ;;  %v18401_v20 = vadd.f32 %v18016_v29, %v20754_v38  ;;  %v20757_v38 = vld [vmem:[#allocation39_spill] sm:$0xff] }
 0x581   : > { %v7388_v13 = vpop.f32.mrb[47].mxu1  ;;  %v7773_v43 = vadd.f32 %v7772_v60, %v7771_v36  ;;  %v7789_v46 = vadd.f32 %v7788_v12, %v7787_v14  ;;  %v8123_v7 = vsel %vm8122_vm8, %v7990_v33, %v8121_v37  ;;  %v7806_v23 = vrot.slane %v7805_v48, 4  ;;  %v20758_v36 = vld [vmem:[#allocation40_spill] sm:$0xff] }
 0x582   : > { %v18405_v11 = vsel %vm8149_vm9, 0.0, %v8123_v7  ;;  %v7813_v59 = vsel %vm1081_vm0, %v20530_v27, 0.0  ;;  %v18411_v0 = vadd.f32 %v18224_v58, %v7378_v45  ;;  %v18415_v9 = vadd.f32 %v20756_v24, %v18016_v29  ;;  %v20763_v24 = vld [vmem:[#allocation41_spill] sm:$0xff] }
 0x583   : > { %v18419_v14 = vadd.f32 %v18016_v29, %v20757_v38  ;;  %v18423_v6 = vadd.f32 %v20758_v36, %v18016_v29  ;;  %v7798_v22 = vadd.f32 %v7797_v40, %v7796_v42  ;;  %14214 = vmatprep.mubr.msk.f32.mxu0 %vm1081_vm0, %v18405_v11  ;;  %v7765_v60 = vrot.slane %v7764_v50, 1 }
 0x584   : > { %20755 = vst [vmem:[#allocation35_spill] sm:$0xff] %v18411_v0  ;;  %v14157_v2 = vpop.f32.mrb[48].mxu1  ;;  %v7781_v58 = vrot.slane %v7780_v55, 2  ;;  %v8043_v45 = vadd.f32 %v8042_v52, %v7813_v59  ;;  %v20531_v12 = vmax.f32 %v18411_v0, 0.0  ;;  %v7790_v16 = vrot.slane %v7789_v46, 2 }
 0x585   : > { %v7398_v33 = vpop.f32.mrb[49].mxu1  ;;  %v7807_v30 = vadd.f32 %v7806_v23, %v7805_v48  ;;  %v18429_v1 = vadd.f32 %v18236_v19, %v14154_v28  ;;  %v18432_v37 = vadd.f32 %v18240_v5, %v7388_v13  ;;  %v7774_v7 = vrot.slane %v7773_v43, 1  ;;  %v20764_v13 = vld [vmem:[#allocation42_spill] sm:$0xff] }
 0x586   : > { %v7812_v42 = vsel %vm1081_vm0, %v20531_v12, 0.0  ;;  %v18438_v40 = vadd.f32 %v18244_v3, %v14157_v2  ;;  %v18441_v52 = vadd.f32 %v18250_v39, %v7398_v33  ;;  %v18445_v48 = vadd.f32 %v18016_v29, %v20763_v24 }
 0x587   : > { %20759 = vst [vmem:[#allocation36_spill] sm:$0xff] %v18429_v1  ;;  %20760 = vst [vmem:[#allocation37_spill] sm:$0xff] %v18432_v37  ;;  %v7799_v19 = vrot.slane %v7798_v22, 2  ;;  %v7814_v28 = vadd.f32 %v7813_v59, %v7812_v42  ;;  %v8028_v23 = vadd.f32 %v8027_v35, %v7812_v42  ;;  %v18449_v38 = vadd.f32 %v20764_v13, %v18016_v29 }
 0x588   : > { %20761 = vst [vmem:[#allocation38_spill] sm:$0xff] %v18438_v40  ;;  %20762 = vst [vmem:[#allocation39_spill] sm:$0xff] %v18441_v52  ;;  %v14160_v5 = vpop.f32.mrb[50].mxu1  ;;  %v7782_v36 = vadd.f32 %v7781_v58, %v7780_v55  ;;  %v20535_v27 = vmax.f32 %v18429_v1, 0.0  ;;  %v20538_v3 = vmax.f32 %v18432_v37, 0.0  ;;  %v7791_v39 = vadd.f32 %v7790_v16, %v7789_v46  ;;  %v20766_v16 = vld [vmem:[#allocation43_spill] sm:$0xff] }
 0x589   : > { %v7408_v2 = vpop.f32.mrb[51].mxu1  ;;  %v7808_v33 = vrot.slane %v7807_v30, 2  ;;  %v7815_v12 = vrot.slane %v7814_v28, 4  ;;  %v18454_v24 = vadd.f32 %v18266_v51, %v14160_v5  ;;  %v7766_v61 = vadd.f32 %v7765_v60, %v7764_v50 }
 0x58a   : > { %v7775_v59 = vadd.f32 %v7774_v7, %v7773_v43  ;;  %v7822_v35 = vsel %vm1081_vm0, %v20535_v27, 0.0  ;;  %v7821_v55 = vsel %vm1081_vm0, %v20538_v3, 0.0  ;;  %v7800_v58 = vadd.f32 %v7799_v19, %v7798_v22 }
 0x58b   : > { %20765 = vst [vmem:[#allocation40_spill] sm:$0xff] %v18454_v24  ;;  %v7816_v42 = vadd.f32 %v7815_v12, %v7814_v28  ;;  %v8044_v13 = vadd.f32 %v8043_v45, %v7822_v35  ;;  %v7823_v0 = vadd.f32 %v7822_v35, %v7821_v55  ;;  %v18464_v34 = vadd.f32 %v18016_v29, %v20766_v16 }
 0x58c   : > { %v14163_v46 = vpop.f32.mrb[52].mxu1  ;;  %v7783_v51 = vrot.slane %v7782_v36, 1  ;;  %v8029_v50 = vadd.f32 %v8028_v23, %v7821_v55  ;;  %v7792_v60 = vrot.slane %v7791_v39, 1  ;;  %v7809_v7 = vadd.f32 %v7808_v33, %v7807_v30 }
 0x58d   : > { %v7418_v43 = vpop.f32.mrb[53].mxu1  ;;  %v7817_v5 = vrot.slane %v7816_v42, 2  ;;  %v7824_v27 = vrot.slane %v7823_v0, 4  ;;  %v7991_v1 = vmul.f32 0.0625, %v7766_v61  ;;  %v7992_v37 = vmul.f32 0.0625, %v7775_v59 }
 0x58e   : > { %v20539_v22 = vmax.f32 %v18454_v24, 0.0  ;;  %v18468_v45 = vadd.f32 %v18270_v63, %v7408_v2  ;;  %v7801_v12 = vrot.slane %v7800_v58, 1  ;;  %v20541_v28 = vmax.f32 %v18438_v40, 0.0 }
 0x58f   : > { %v7825_v19 = vadd.f32 %v7824_v27, %v7823_v0  ;;  %v20542_v35 = vmax.f32 %v18441_v52, 0.0  ;;  %v7818_v23 = vadd.f32 %v7817_v5, %v7816_v42  ;;  %v18474_v30 = vadd.f32 %v18276_v53, %v14163_v46  ;;  %v20770_v42 = vld [vmem:[#allocation44_spill] sm:$0xff]  ;;  %v10372_v52 = vld [vmem:[%s20458_s11 + $0x10] sm:$0xff] }
 0x590   : > { %20767 = vst [vmem:[#allocation41_spill] sm:$0xff] %v18468_v45  ;;  %v14166_v16 = vpop.f32.mrb[54].mxu1  ;;  %v20540_v55 = vmax.f32 %v18468_v45, 0.0  ;;  %v18477_v61 = vadd.f32 %v18292_v31, %v7418_v43  ;;  %v7784_v59 = vadd.f32 %v7783_v51, %v7782_v36  ;;  %v7793_v63 = vadd.f32 %v7792_v60, %v7791_v39 }
 0x591   : > { %20768 = vst [vmem:[#allocation42_spill] sm:$0xff] %v18474_v30  ;;  %v7428_v33 = vpop.f32.mrb[55].mxu1  ;;  %v7810_v2 = vrot.slane %v7809_v7, 1  ;;  %v7826_v3 = vrot.slane %v7825_v19, 2  ;;  %v18482_v27 = vsel %vm1081_vm0, %v20539_v22, 0.0  ;;  %v20543_v53 = vmax.f32 %v18474_v30, 0.0 }
 0x592   : > { %20769 = vst [vmem:[#allocation43_spill] sm:$0xff] %v18477_v61  ;;  %v18487_v0 = vsel %vm1081_vm0, %v20540_v55, 0.0  ;;  %v18493_v36 = vadd.f32 %v20770_v42, %v18016_v29  ;;  %v8125_v39 = vsel %vm8124_vm10, %v7992_v37, %v7991_v1  ;;  %v7802_v46 = vadd.f32 %v7801_v12, %v7800_v58 }
 0x593   : > { %v7827_v51 = vadd.f32 %v7826_v3, %v7825_v19  ;;  %v7819_v60 = vrot.slane %v7818_v23, 1  ;;  %v7831_v5 = vsel %vm1081_vm0, %v20541_v28, 0.0  ;;  %v7830_v22 = vsel %vm1081_vm0, %v20542_v35, 0.0 }
 0x594   : > { %v14169_v43 = vpop.f32.mrb[56].mxu1  ;;  %v18505_v55 = vsel %vm1081_vm0, %v20543_v53, 0.0  ;;  %v7993_v31 = vmul.f32 0.0625, %v7784_v59  ;;  %v7994_v1 = vmul.f32 0.0625, %v7793_v63  ;;  %v7841_v3 = vadd.f32 %v18482_v27, %v18487_v0 }
 0x595   : > { %v7438_v42 = vpop.f32.mrb[57].mxu1  ;;  %v7828_v37 = vrot.slane %v7827_v51, 1  ;;  %v7811_v58 = vadd.f32 %v7810_v2, %v7809_v7  ;;  %v20771_v12 = vmax.f32 %v18477_v61, 0.0  ;;  %v18515_v28 = vadd.f32 %v18296_v41, %v14166_v16 }
 0x596   : > { %v18518_v35 = vadd.f32 %v18401_v20, %v7428_v33  ;;  %v7995_v53 = vmul.f32 0.0625, %v7802_v46  ;;  %v8045_v30 = vadd.f32 %v8044_v13, %v7831_v5  ;;  %v7832_v59 = vadd.f32 %v7831_v5, %v7830_v22 }
 0x597   : > { %v18512_v19 = vsel %vm1081_vm0, %v20771_v12, 0.0  ;;  %20772 = vst [vmem:[#allocation44_spill] sm:$0xff] %v18515_v28  ;;  %v7820_v45 = vadd.f32 %v7819_v60, %v7818_v23  ;;  %v20548_v7 = vmax.f32 %v18515_v28, 0.0  ;;  %v18525_v12 = vadd.f32 %v18415_v9, %v14169_v43 }
 0x598   : > { %20773 = vst [vmem:[#allocation58_spill] sm:$0xff] %v18518_v35  ;;  %v7850_v63 = vadd.f32 %v18505_v55, %v18512_v19  ;;  %v14172_v24 = vpop.f32.mrb[58].mxu1  ;;  %v20549_v2 = vmax.f32 %v18518_v35, 0.0  ;;  %v7829_v16 = vadd.f32 %v7828_v37, %v7827_v51  ;;  %v7842_v61 = vrot.slane %v7841_v3, 4 }
 0x599   : > { %20774 = vst [vmem:[#allocation59_spill] sm:$0xff] %v18525_v12  ;;  %v7448_v41 = vpop.f32.mrb[59].mxu1  ;;  %v18528_v33 = vadd.f32 %v18419_v14, %v7438_v42  ;;  %v7996_v13 = vmul.f32 0.0625, %v7811_v58  ;;  %v8030_v46 = vadd.f32 %v8029_v50, %v7830_v22  ;;  %v18533_v23 = vsel %vm1081_vm0, %v20548_v7, 0.0  ;;  %v20776_v50 = vld [vmem:[#allocation45_spill] sm:$0xff] }
 0x59a   : > { %v7851_v20 = vrot.slane %v7850_v63, 4  ;;  %v18538_v60 = vsel %vm1081_vm0, %v20549_v2, 0.0  ;;  %v18540_v9 = vmul.f32 0.0625, %v8045_v30  ;;  %v14760_v22 = vadd.f32 %v18016_v29, %v20776_v50 }
 0x59b   : > { %20775 = vst [vmem:[#allocation60_spill] sm:$0xff] %v18528_v33  ;;  %v7859_v43 = vadd.f32 %v18533_v23, %v18538_v60  ;;  %v8126_v42 = vsel %vm8112_vm3, %v7993_v31, %v8125_v39  ;;  %v7997_v37 = vmul.f32 0.0625, %v7820_v45  ;;  %v20554_v58 = vmax.f32 %v18528_v33, 0.0 }
 0x59c   : > { %v7852_v51 = vadd.f32 %v7851_v20, %v7850_v63  ;;  %v14175_v5 = vpop.f32.mrb[60].mxu1  ;;  %v8127_v2 = vsel %vm8114_vm4, %v7994_v1, %v8126_v42  ;;  %v7998_v30 = vmul.f32 0.0625, %v7829_v16  ;;  %v7843_v28 = vadd.f32 %v7842_v61, %v7841_v3 }
 0x59d   : > { %v7458_v7 = vpop.f32.mrb[61].mxu1  ;;  %v7860_v63 = vrot.slane %v7859_v43, 4  ;;  %v8128_v20 = vsel %vm8116_vm5, %v7995_v53, %v8127_v2  ;;  %v7833_v35 = vrot.slane %v7832_v59, 4  ;;  %v18552_v14 = vadd.f32 %v18423_v6, %v14172_v24 }
 0x59e   : > { %v7853_v40 = vrot.slane %v7852_v51, 2  ;;  %v20557_v29 = vrot.slane %v18540_v9, 7  ;;  %v18555_v50 = vmul.f32 0.0625, %v8030_v46  ;;  %v20778_v45 = vmax.f32 %v18525_v12, 0.0 }
 0x59f   : > { %20777 = vst [vmem:[#allocation45_spill] sm:$0xff] %v18552_v14  ;;  %v8129_v39 = vsel %vm8118_vm6, %v7996_v13, %v8128_v20  ;;  %v18566_v53 = vsel %vm1081_vm0, %v20554_v58, 0.0  ;;  %v20553_v6 = vmax.f32 %v18552_v14, 0.0  ;;  %v18571_v1 = vadd.f32 %v18445_v48, %v7448_v41 }
 0x5a0   : > { %v18560_v31 = vsel %vm1081_vm0, %v20778_v45, 0.0  ;;  %v14178_v61 = vpop.f32.mrb[62].mxu1  ;;  %v8130_v24 = vsel %vm8120_vm7, %v7997_v37, %v8129_v39  ;;  %v7844_v16 = vrot.slane %v7843_v28, 2  ;;  %v7861_v46 = vadd.f32 %v7860_v63, %v7859_v43 }
 0x5a1   : > { %20779 = vst [vmem:[#allocation61_spill] sm:$0xff] %v18571_v1  ;;  %v7468_v3 = vpop.f32.mrb[63].mxu1  ;;  %v18575_v13 = vsel %vm8122_vm8, %v7998_v30, %v8130_v24  ;;  %v7854_v42 = vadd.f32 %v7853_v40, %v7852_v51  ;;  %v18580_v20 = vsel %vm1081_vm0, %v20553_v6, 0.0  ;;  %v20555_v48 = vmax.f32 %v18571_v1, 0.0 }
 0x5a2   : > { %14215 = vmatmul.mubr.msk.f32.vlgmr.msra.gmra.mrb[128].mxu0 %vm1081_vm0, %v18575_v13  ;;  %v18586_v41 = vadd.f32 %v18449_v38, %v14175_v5  ;;  %v18591_v43 = vsel %vm8149_vm9, %v20557_v29, 0.0  ;;  %v18593_v37 = vadd.f32 %v7833_v35, %v7832_v59  ;;  %v7868_v51 = vadd.f32 %v18560_v31, %v18566_v53 }
 0x5a3   : > { %v18601_v63 = vsel %vm1081_vm0, %v20555_v48, 0.0  ;;  %v18605_v5 = vadd.f32 %v18464_v34, %v7458_v7  ;;  %v18608_v45 = vadd.f32 %v18493_v36, %v14178_v61  ;;  %v7845_v59 = vadd.f32 %v7844_v16, %v7843_v28 }
 0x5a4   : > { %20780 = vst [vmem:[#allocation62_spill] sm:$0xff] %v18586_v41  ;;  %v14181_v30 = vpop.f32.mrb[0].mxu1  ;;  %v20556_v38 = vmax.f32 %v18586_v41, 0.0  ;;  %v8061_v39 = vadd.f32 %v18505_v55, %v18482_v27  ;;  %v7862_v24 = vrot.slane %v7861_v46, 2  ;;  %v7877_v6 = vadd.f32 %v18580_v20, %v18601_v63 }
 0x5a5   : > { %20781 = vst [vmem:[#allocation63_spill] sm:$0xff] %v18605_v5  ;;  %20782 = vst [vmem:[#allocation64_spill] sm:$0xff] %v18608_v45  ;;  %v7478_v35 = vpop.f32.mrb[1].mxu1  ;;  %v7855_v58 = vrot.slane %v7854_v42, 1  ;;  %v20560_v34 = vmax.f32 %v18605_v5, 0.0  ;;  %v7835_v7 = vrot.slane %v18593_v37, 2  ;;  %v8046_v28 = vadd.f32 %v18512_v19, %v18487_v0 }
 0x5a6   : > { %v18617_v48 = vsel %vm1081_vm0, %v20556_v38, 0.0  ;;  %v7869_v55 = vrot.slane %v7868_v51, 4  ;;  %v7878_v27 = vrot.slane %v7877_v6, 4  ;;  %v8062_v2 = vadd.f32 %v8061_v39, %v18533_v23 }
 0x5a7   : > { %v18629_v38 = vsel %vm1081_vm0, %v20560_v34, 0.0  ;;  %v18631_v40 = vadd.f32 %v14760_v22, %v7468_v3  ;;  %v7846_v36 = vrot.slane %v7845_v59, 1  ;;  %v7863_v41 = vadd.f32 %v7862_v24, %v7861_v46 }
 0x5a8   : > { %v14184_v61 = vpop.f32.mrb[2].mxu1  ;;  %v8047_v14 = vadd.f32 %v8046_v28, %v18538_v60  ;;  %v7886_v0 = vadd.f32 %v18617_v48, %v18629_v38  ;;  %v7856_v19 = vadd.f32 %v7855_v58, %v7854_v42  ;;  %v20784_v16 = vmax.f32 %v18608_v45, 0.0 }
 0x5a9   : > { %20783 = vst [vmem:[#allocation65_spill] sm:$0xff] %v18631_v40  ;;  %v7488_v29 = vpop.f32.mrb[3].mxu1  ;;  %v20562_v39 = vmax.f32 %v18631_v40, 0.0  ;;  %v18643_v34 = vadd.f32 %v18020_v47, %v14181_v30  ;;  %v7870_v22 = vadd.f32 %v7869_v55, %v7868_v51  ;;  %v7879_v3 = vadd.f32 %v7878_v27, %v7877_v6 }
 0x5aa   : > { %v18639_v23 = vsel %vm1081_vm0, %v20784_v16, 0.0  ;;  %v7887_v5 = vrot.slane %v7886_v0, 4  ;;  %v18646_v46 = vadd.f32 %v18024_v54, %v7478_v35  ;;  %v18655_v24 = vadd.f32 %v18028_v4, %v14184_v61 }
 0x5ab   : > { %20785 = vst [vmem:[#allocation66_spill] sm:$0xff] %v18643_v34  ;;  %v18651_v58 = vsel %vm1081_vm0, %v20562_v39, 0.0  ;;  %v20564_v42 = vmax.f32 %v18643_v34, 0.0  ;;  %v18658_v47 = vadd.f32 %v18032_v26, %v7488_v29  ;;  %v7847_v6 = vadd.f32 %v7846_v36, %v7845_v59 }
 0x5ac   : > { %20786 = vst [vmem:[#allocation67_spill] sm:$0xff] %v18646_v46  ;;  %v14187_v60 = vpop.f32.mrb[4].mxu1  ;;  %20787 = vst [vmem:[#allocation68_spill] sm:$0xff] %v18655_v24  ;;  %v7864_v30 = vrot.slane %v7863_v41, 1  ;;  %v7888_v28 = vadd.f32 %v7887_v5, %v7886_v0  ;;  %v7895_v54 = vadd.f32 %v18639_v23, %v18651_v58  ;;  %v8063_v35 = vadd.f32 %v8062_v2, %v18560_v31 }
 0x5ad   : > { %20788 = vst [vmem:[#allocation69_spill] sm:$0xff] %v18658_v47  ;;  %v7498_v51 = vpop.f32.mrb[5].mxu1  ;;  %v8048_v55 = vadd.f32 %v8047_v14, %v18566_v53  ;;  %v20565_v27 = vmax.f32 %v18646_v46, 0.0  ;;  %v8001_v4 = vmul.f32 0.0625, %v7856_v19  ;;  %v7871_v61 = vrot.slane %v7870_v22, 2 }
 0x5ae   : > { %v7880_v39 = vrot.slane %v7879_v3, 2  ;;  %v7896_v26 = vrot.slane %v7895_v54, 4  ;;  %v7903_v5 = vsel %vm1081_vm0, %v20564_v42, 0.0  ;;  %v20566_v14 = vmax.f32 %v18658_v47, 0.0 }
 0x5af   : > { %v18672_v59 = vsel %vm1081_vm0, %v20565_v27, 0.0  ;;  %v18676_v31 = vadd.f32 %v18036_v44, %v14187_v60  ;;  %v8000_v2 = vmul.f32 0.0625, %v7847_v6  ;;  %v7865_v36 = vadd.f32 %v7864_v30, %v7863_v41 }
 0x5b0   : > { %v14190_v29 = vpop.f32.mrb[6].mxu1  ;;  %v7889_v0 = vrot.slane %v7888_v28, 2  ;;  %v7897_v19 = vadd.f32 %v7896_v26, %v7895_v54  ;;  %v8064_v16 = vadd.f32 %v8063_v35, %v18580_v20  ;;  %v20790_v34 = vmax.f32 %v18655_v24, 0.0 }
 0x5b1   : > { %20789 = vst [vmem:[#allocation70_spill] sm:$0xff] %v18676_v31  ;;  %v7508_v53 = vpop.f32.mrb[7].mxu1  ;;  %v18687_v27 = vsel %vm1081_vm0, %v20566_v14, 0.0  ;;  %v18691_v60 = vadd.f32 %v7835_v7, %v18593_v37  ;;  %v7872_v41 = vadd.f32 %v7871_v61, %v7870_v22  ;;  %v8049_v6 = vadd.f32 %v8048_v55, %v18601_v63 }
 0x5b2   : > { %v18682_v42 = vsel %vm1081_vm0, %v20790_v34, 0.0  ;;  %v7904_v20 = vadd.f32 %v7903_v5, %v18672_v59  ;;  %v18696_v54 = vsel %vm8112_vm3, %v8001_v4, %v8000_v2  ;;  %v7881_v34 = vadd.f32 %v7880_v39, %v7879_v3 }
 0x5b3   : > { %v8065_v35 = vadd.f32 %v8064_v16, %v18617_v48  ;;  %v18700_v26 = vadd.f32 %v18042_v62, %v7498_v51  ;;  %v18702_v44 = vmul.f32 0.0625, %v7865_v36  ;;  %v7890_v37 = vadd.f32 %v7889_v0, %v7888_v28 }
 0x5b4   : > { %v14193_v30 = vpop.f32.mrb[8].mxu1  ;;  %v7898_v7 = vrot.slane %v7897_v19, 2  ;;  %v7913_v63 = vadd.f32 %v18682_v42, %v18687_v27  ;;  %v20792_v22 = vmax.f32 %v18676_v31, 0.0  ;;  %v18713_v48 = vadd.f32 %v18046_v32, %v14190_v29 }
 0x5b5   : > { %20791 = vst [vmem:[#allocation71_spill] sm:$0xff] %v18700_v26  ;;  %v7518_v14 = vpop.f32.mrb[9].mxu1  ;;  %v20567_v39 = vmax.f32 %v18700_v26, 0.0  ;;  %v18716_v62 = vadd.f32 %v18050_v17, %v7508_v53  ;;  %v7873_v3 = vrot.slane %v7872_v41, 1  ;;  %v8050_v51 = vadd.f32 %v8049_v6, %v18629_v38 }
 0x5b6   : > { %v18709_v55 = vsel %vm1081_vm0, %v20792_v22, 0.0  ;;  %20793 = vst [vmem:[#allocation72_spill] sm:$0xff] %v18713_v48  ;;  %v7905_v28 = vrot.slane %v7904_v20, 4  ;;  %v18720_v16 = vadd.f32 %v18056_v18, %v14193_v30  ;;  %v7882_v61 = vrot.slane %v7881_v34, 1 }
 0x5b7   : > { %20794 = vst [vmem:[#allocation73_spill] sm:$0xff] %v18716_v62  ;;  %v7920_v2 = vsel %vm1081_vm0, %v20567_v39, 0.0  ;;  %v20570_v36 = vmax.f32 %v18713_v48, 0.0  ;;  %v20573_v32 = vmax.f32 %v18716_v62, 0.0  ;;  %v7899_v17 = vadd.f32 %v7898_v7, %v7897_v19 }
 0x5b8   : > { %20795 = vst [vmem:[#allocation74_spill] sm:$0xff] %v18720_v16  ;;  %v14196_v4 = vpop.f32.mrb[10].mxu1  ;;  %v7914_v53 = vrot.slane %v7913_v63, 4  ;;  %v7922_v0 = vadd.f32 %v18709_v55, %v7920_v2  ;;  %v7891_v6 = vrot.slane %v7890_v37, 1  ;;  %v18740_v22 = vadd.f32 %v18060_v10, %v7518_v14 }
 0x5b9   : > { %v7528_v29 = vpop.f32.mrb[11].mxu1  ;;  %v18732_v18 = vsel %vm1081_vm0, %v20570_v36, 0.0  ;;  %v18737_v30 = vsel %vm1081_vm0, %v20573_v32, 0.0  ;;  %v8066_v19 = vadd.f32 %v8065_v35, %v18639_v23  ;;  %v7906_v7 = vadd.f32 %v7905_v28, %v7904_v20 }
 0x5ba   : > { %20796 = vst [vmem:[#allocation75_spill] sm:$0xff] %v18740_v22  ;;  %v7923_v39 = vrot.slane %v7922_v0, 4  ;;  %v7931_v38 = vadd.f32 %v18732_v18, %v18737_v30  ;;  %v7874_v48 = vadd.f32 %v7873_v3, %v7872_v41  ;;  %v8051_v36 = vadd.f32 %v8050_v51, %v18651_v58  ;;  %v20798_v41 = vld [vmem:[#allocation46_spill] sm:$0xff]  ;;  %v20800_v3 = vld [vmem:[#allocation48_spill] sm:$0xff] }
 0x5bb   : > { %v20797_v26 = vmax.f32 %v18720_v16, 0.0  ;;  %v20577_v32 = vmax.f32 %v18740_v22, 0.0  ;;  %v7883_v14 = vadd.f32 %v7882_v61, %v7881_v34  ;;  %v7900_v24 = vrot.slane %v7899_v17, 1 }
 0x5bc   : > { %v14199_v31 = vpop.f32.mrb[12].mxu1  ;;  %v8067_v23 = vadd.f32 %v8066_v19, %v7903_v5  ;;  %v7915_v20 = vadd.f32 %v7914_v53, %v7913_v63  ;;  %v7892_v35 = vadd.f32 %v7891_v6, %v7890_v37  ;;  %v18758_v58 = vadd.f32 %v20798_v41, %v14196_v4 }
 0x5bd   : > { %v18749_v62 = vsel %vm1081_vm0, %v20797_v26, 0.0  ;;  %v7538_v10 = vpop.f32.mrb[13].mxu1  ;;  %v18755_v28 = vsel %vm1081_vm0, %v20577_v32, 0.0  ;;  %v18761_v51 = vadd.f32 %v20800_v3, %v7528_v29  ;;  %v7907_v26 = vrot.slane %v7906_v7, 2 }
 0x5be   : > { %20799 = vst [vmem:[#allocation46_spill] sm:$0xff] %v18758_v58  ;;  %v7924_v16 = vadd.f32 %v7923_v39, %v7922_v0  ;;  %v7932_v47 = vrot.slane %v7931_v38, 4  ;;  %v7940_v34 = vadd.f32 %v18749_v62, %v18755_v28  ;;  %v8003_v63 = vmul.f32 0.0625, %v7874_v48 }
 0x5bf   : > { %20801 = vst [vmem:[#allocation48_spill] sm:$0xff] %v18761_v51  ;;  %v8052_v37 = vadd.f32 %v8051_v36, %v18672_v59  ;;  %v20578_v61 = vmax.f32 %v18758_v58, 0.0  ;;  %v20580_v53 = vmax.f32 %v18761_v51, 0.0  ;;  %v8068_v4 = vadd.f32 %v8067_v23, %v18682_v42 }
 0x5c0   : > { %v14202_v5 = vpop.f32.mrb[14].mxu1  ;;  %v7916_v19 = vrot.slane %v7915_v20, 2  ;;  %v7941_v29 = vrot.slane %v7940_v34, 4  ;;  %v7901_v41 = vadd.f32 %v7900_v24, %v7899_v17  ;;  %v8004_v3 = vmul.f32 0.0625, %v7883_v14 }
 0x5c1   : > { %v7548_v6 = vpop.f32.mrb[15].mxu1  ;;  %v8053_v39 = vadd.f32 %v8052_v37, %v18687_v27  ;;  %v18773_v0 = vsel %vm1081_vm0, %v20578_v61, 0.0  ;;  %v18778_v59 = vsel %vm1081_vm0, %v20580_v53, 0.0  ;;  %v8005_v48 = vmul.f32 0.0625, %v7892_v35 }
 0x5c2   : > { %v7908_v36 = vadd.f32 %v7907_v26, %v7906_v7  ;;  %v7925_v32 = vrot.slane %v7924_v16, 2  ;;  %v7933_v42 = vadd.f32 %v7932_v47, %v7931_v38  ;;  %v8069_v24 = vadd.f32 %v8068_v4, %v18709_v55  ;;  %v20802_v38 = vld [vmem:[#allocation49_spill] sm:$0xff]  ;;  %v20804_v55 = vld [vmem:[#allocation50_spill] sm:$0xff] }
 0x5c3   : > { %v7949_v27 = vadd.f32 %v18773_v0, %v18778_v59  ;;  %v8006_v17 = vmul.f32 0.0625, %v7901_v41  ;;  %v8133_v14 = vsel %vm8114_vm4, %v18702_v44, %v18696_v54  ;;  %v7917_v61 = vadd.f32 %v7916_v19, %v7915_v20 }
 0x5c4   : > { %v14205_v23 = vpop.f32.mrb[16].mxu1  ;;  %v8054_v58 = vadd.f32 %v8053_v39, %v7920_v2  ;;  %v7942_v53 = vadd.f32 %v7941_v29, %v7940_v34  ;;  %v8134_v35 = vsel %vm8116_vm5, %v8003_v63, %v8133_v14  ;;  %v18789_v26 = vadd.f32 %v20802_v38, %v14199_v31  ;;  %v20806_v29 = vld [vmem:[#allocation52_spill] sm:$0xff]  ;;  %v8283_v14 = vld [vmem:[#allocation8] sm:$0xff] }
 0x5c5   : > { %v7558_v37 = vpop.f32.mrb[17].mxu1  ;;  %v7950_v7 = vrot.slane %v7949_v27, 4  ;;  %v8135_v47 = vsel %vm8118_vm6, %v8004_v3, %v8134_v35  ;;  %v18792_v4 = vadd.f32 %v20804_v55, %v7538_v10  ;;  %v7909_v41 = vrot.slane %v7908_v36, 1  ;;  %v8284_v38 = vld [vmem:[#allocation8 + $0x8] sm:$0xff]  ;;  %v8285_v55 = vld [vmem:[#allocation8 + $0x10] sm:$0xff] }
 0x5c6   : > { %20803 = vst [vmem:[#allocation49_spill] sm:$0xff] %v18789_v26  ;;  %v7926_v51 = vadd.f32 %v7925_v32, %v7924_v16  ;;  %v7934_v22 = vrot.slane %v7933_v42, 2  ;;  %v8136_v44 = vsel %vm8120_vm7, %v8005_v48, %v8135_v47  ;;  %v20583_v20 = vmax.f32 %v18789_v26, 0.0 }
 0x5c7   : > { %20805 = vst [vmem:[#allocation50_spill] sm:$0xff] %v18792_v4  ;;  %v7951_v54 = vadd.f32 %v7950_v7, %v7949_v27  ;;  %v8137_v2 = vsel %vm8122_vm8, %v8006_v17, %v8136_v44  ;;  %v20584_v34 = vmax.f32 %v18792_v4, 0.0  ;;  %v7918_v63 = vrot.slane %v7917_v61, 1  ;;  %v20808_v7 = vld [vmem:[#allocation53_spill] sm:$0xff]  ;;  %v8286_v44 = vld [vmem:[#allocation8 + $0x18] sm:$0xff] }
 0x5c8   : > { %v7943_v19 = vrot.slane %v7942_v53, 2  ;;  %v18799_v31 = vsel %vm8149_vm9, 0.0, %v8137_v2  ;;  %v18802_v10 = vadd.f32 %v20806_v29, %v14202_v5  ;;  %v8070_v32 = vadd.f32 %v8069_v24, %v18732_v18 }
 0x5c9   : > { %v7952_v3 = vrot.slane %v7951_v54, 2  ;;  %14217 = vmatprep.mubr.msk.f32.mxu0 %vm1081_vm0, %v18799_v31  ;;  %v7957_v39 = vsel %vm1081_vm0, %v20583_v20, 0.0  ;;  %v7910_v48 = vadd.f32 %v7909_v41, %v7908_v36  ;;  %v8055_v27 = vadd.f32 %v8054_v58, %v18737_v30  ;;  %v20810_v41 = vld [vmem:[#allocation54_spill] sm:$0xff]  ;;  %v20812_v58 = vld [vmem:[#allocation55_spill] sm:$0xff] }
 0x5ca   : > { %20807 = vst [vmem:[#allocation52_spill] sm:$0xff] %v18802_v10  ;;  %v7956_v5 = vsel %vm1081_vm0, %v20584_v34, 0.0  ;;  %v20586_v17 = vmax.f32 %v18802_v10, 0.0  ;;  %v7927_v35 = vrot.slane %v7926_v51, 1  ;;  %v7935_v18 = vadd.f32 %v7934_v22, %v7933_v42 }
 0x5cb   : > { %v7958_v24 = vadd.f32 %v7957_v39, %v7956_v5  ;;  %v18817_v47 = vadd.f32 %v20808_v7, %v7548_v6  ;;  %v7919_v2 = vadd.f32 %v7918_v63, %v7917_v61  ;;  %v7944_v36 = vadd.f32 %v7943_v19, %v7942_v53 }
 0x5cc   : > { %v18820_v30 = vadd.f32 %v20810_v41, %v14205_v23  ;;  %v18823_v29 = vadd.f32 %v20812_v58, %v7558_v37  ;;  %v7953_v20 = vadd.f32 %v7952_v3, %v7951_v54  ;;  %v7966_v22 = vsel %vm1081_vm0, %v20586_v17, 0.0 }
 0x5cd   : > { %20809 = vst [vmem:[#allocation53_spill] sm:$0xff] %v18817_v47  ;;  %v7959_v34 = vrot.slane %v7958_v24, 4  ;;  %v20587_v6 = vmax.f32 %v18817_v47, 0.0  ;;  %v14610_v61 = vpack.c.bf16 %v8284_v38, %v8283_v14  ;;  %v14614_v53 = vpack.c.bf16 %v8286_v44, %v8285_v55 }
 0x5ce   : > { %20811 = vst [vmem:[#allocation54_spill] sm:$0xff] %v18820_v30  ;;  %20813 = vst [vmem:[#allocation55_spill] sm:$0xff] %v18823_v29  ;;  %v20585_v42 = vmax.f32 %v18820_v30, 0.0  ;;  %v20588_v7 = vmax.f32 %v18823_v29, 0.0  ;;  %v7928_v63 = vadd.f32 %v7927_v35, %v7926_v51  ;;  %v7936_v23 = vrot.slane %v7935_v18, 1 }
 0x5cf   : > { %v7960_v19 = vadd.f32 %v7959_v34, %v7958_v24  ;;  %v7965_v37 = vsel %vm1081_vm0, %v20587_v6, 0.0  ;;  %v7945_v54 = vrot.slane %v7944_v36, 1  ;;  %14611 = vmatprep.subr.bf16.mxu0 %v14610_v61  ;;  %v8071_v14 = vadd.f32 %v8070_v32, %v18749_v62  ;;  %v12036_v62 = vld [vmem:[%s20452_s5 + $0x20] sm:$0xff] }
 0x5d0   : > { %v7967_v3 = vadd.f32 %v7966_v22, %v7965_v37  ;;  %v7975_v41 = vsel %vm1081_vm0, %v20585_v42, 0.0  ;;  %v7974_v58 = vsel %vm1081_vm0, %v20588_v7, 0.0  ;;  %v8056_v51 = vadd.f32 %v8055_v27, %v18755_v28  ;;  %14613 = vmatpush3.bf16.msra.mxu0 %v14610_v61  ;;  %v12037_v28 = vld [vmem:[%s20452_s5 + $0x28] sm:$0xff] }
 0x5d1   : > { %v7961_v34 = vrot.slane %v7960_v19, 2  ;;  %v7976_v35 = vadd.f32 %v7975_v41, %v7974_v58  ;;  %v8007_v24 = vmul.f32 0.0625, %v7910_v48  ;;  %v8008_v38 = vmul.f32 0.0625, %v7919_v2  ;;  %14615 = vmatprep.subr.bf16.mxu0 %v14614_v53 }
 0x5d2   : > { %v7954_v55 = vrot.slane %v7953_v20, 1  ;;  %v7968_v44 = vrot.slane %v7967_v3, 4  ;;  %v8072_v42 = vadd.f32 %v8071_v14, %v18773_v0  ;;  %v8057_v17 = vadd.f32 %v8056_v51, %v18778_v59 }
 0x5d3   : > { %v7962_v6 = vadd.f32 %v7961_v34, %v7960_v19  ;;  %v7977_v7 = vrot.slane %v7976_v35, 4  ;;  %v8009_v32 = vmul.f32 0.0625, %v7928_v63  ;;  %v7937_v48 = vadd.f32 %v7936_v23, %v7935_v18 }
 0x5d4   : > { %v7946_v27 = vadd.f32 %v7945_v54, %v7944_v36  ;;  %v7969_v2 = vadd.f32 %v7968_v44, %v7967_v3  ;;  %v8073_v61 = vadd.f32 %v8072_v42, %v7957_v39  ;;  %v8058_v30 = vadd.f32 %v8057_v17, %v7956_v5  ;;  %14617 = vmatpush3.bf16.msra.mxu0 %v14614_v53 }
 0x5d5   : > { %v7963_v16 = vrot.slane %v7962_v6, 1  ;;  %v7978_v0 = vadd.f32 %v7977_v7, %v7976_v35  ;;  %v7955_v59 = vadd.f32 %v7954_v55, %v7953_v20  ;;  %v14618_v14 = vpack.c.bf16 %v12037_v28, %v12036_v62 }
 0x5d6   : > { %v7970_v19 = vrot.slane %v7969_v2, 2  ;;  %v20814_v51 = vrot.slane %v18540_v9, 7  ;;  %v20815_v34 = vrot.slane %v18555_v50, 7  ;;  %v8059_v47 = vadd.f32 %v8058_v30, %v7965_v37 }
 0x5d7   : > { %v7964_v10 = vadd.f32 %v7963_v16, %v7962_v6  ;;  %v7979_v63 = vrot.slane %v7978_v0, 2  ;;  %v8138_v5 = vsel %vm8124_vm10, %v8008_v38, %v8007_v24  ;;  %v8010_v17 = vmul.f32 0.0625, %v7937_v48  ;;  %14619 = vmatprep.subr.bf16.mxu0 %v14618_v14 }
 0x5d8   : > { %v8160_v29 = vsel %vm8149_vm9, %v20815_v34, %v20814_v51  ;;  %v20816_v18 = vmov %v20815_v34  ;;  %v7971_v36 = vadd.f32 %v7970_v19, %v7969_v2  ;;  %v8396_v20 = vrot.slane %v18575_v13, 1  ;;  %v12038_v19 = vld [vmem:[%s20452_s5 + $0x30] sm:$0xff]  ;;  %v12039_v51 = vld [vmem:[%s20452_s5 + $0x38] sm:$0xff] }
 0x5d9   : > { %v8168_v39 = vsel %vm8149_vm9, 0.0, %v20816_v18  ;;  %v8011_v42 = vmul.f32 0.0625, %v7946_v27  ;;  %v8074_v9 = vadd.f32 %v8073_v61, %v7966_v22  ;;  %v7980_v7 = vadd.f32 %v7979_v63, %v7978_v0 }
 0x5da   : > { %v8060_v53 = vadd.f32 %v8059_v47, %v7974_v58  ;;  %v8012_v23 = vmul.f32 0.0625, %v7955_v59  ;;  %v7972_v54 = vrot.slane %v7971_v36, 1  ;;  %v8509_v16 = vrot.slane %v8168_v39, 1 }
 0x5db   : > { %v20817_v50 = vrot.slane %v18405_v11, 1  ;;  %v8013_v6 = vmul.f32 0.0625, %v7964_v10  ;;  %v8139_v37 = vsel %vm8112_vm3, %v8009_v32, %v8138_v5  ;;  %v8075_v3 = vadd.f32 %v8074_v9, %v7975_v41 }
 0x5dc   : > { %v7973_v35 = vadd.f32 %v7972_v54, %v7971_v36  ;;  %v8140_v24 = vsel %vm8114_vm4, %v8010_v17, %v8139_v37  ;;  %v8510_v38 = vrot.slane %v8160_v29, 1  ;;  %v20818_v47 = vrot.slane %v18691_v60, 1  ;;  %v8520_v36 = vld [vmem:[#allocation8 + $0x20] sm:$0xff]  ;;  %v8523_v37 = vld [vmem:[#allocation8 + $0x38] sm:$0xff] }
 0x5dd   : > { %v8397_v30 = vsel %vm8394_vm11, %v20817_v50, %v8396_v20  ;;  %v7981_v58 = vrot.slane %v7980_v7, 1  ;;  %v8078_v55 = vmul.f32 0.0625, %v8060_v53  ;;  %v8141_v44 = vsel %vm8116_vm5, %v8011_v42, %v8140_v24  ;;  %v8521_v42 = vld [vmem:[#allocation8 + $0x28] sm:$0xff] }
 0x5de   : > { %v7838_v22 = vadd.f32 %v20818_v47, %v18691_v60  ;;  %v8014_v62 = vmul.f32 0.0625, %v7973_v35  ;;  %v8142_v28 = vsel %vm8118_vm6, %v8012_v23, %v8141_v44  ;;  %v18873_v10 = vsel %vm8394_vm11, %v8509_v16, %v8510_v38  ;;  %v12048_v47 = vld [vmem:[%s20452_s5 + $0x40] sm:$0xff]  ;;  %v12051_v44 = vld [vmem:[%s20452_s5 + $0x58] sm:$0xff] }
 0x5df   : > { %v20819_v41 = vrot.slane %v18591_v43, 1  ;;  %v8622_v48 = vrot.slane %v18405_v11, 2  ;;  %v8737_v27 = vrot.slane %v18591_v43, 2  ;;  %v8143_v60 = vsel %vm8120_vm7, %v8013_v6, %v8142_v28  ;;  %v8522_v6 = vld [vmem:[#allocation8 + $0x30] sm:$0xff] }
 0x5e0   : > { %v8623_v2 = vrot.slane %v18575_v13, 2  ;;  %v8079_v61 = vmul.f32 0.0625, %v8075_v3  ;;  %v18885_v0 = vsel %vm8122_vm8, %v8014_v62, %v8143_v60  ;;  %v8734_v59 = vrot.slane %v8168_v39, 2  ;;  %v8745_v60 = vld [vmem:[#allocation8 + $0x40] sm:$0xff] }
 0x5e1   : > { %v18878_v32 = vsel %vm8394_vm11, %v8510_v38, %v20819_v41  ;;  %v7999_v11 = vmul.f32 0.0625, %v7838_v22  ;;  %v7982_v43 = vadd.f32 %v7981_v58, %v7980_v7  ;;  %v8161_v34 = vrot.slane %v8078_v55, 7  ;;  %14218 = vmatmul.mubr.msk.f32.gmra.mrb[130].mxu0 %vm1081_vm0, %v18885_v0  ;;  %v12049_v22 = vld [vmem:[%s20452_s5 + $0x48] sm:$0xff]  ;;  %v12050_v55 = vld [vmem:[%s20452_s5 + $0x50] sm:$0xff] }
 0x5e2   : > { %v18898_v63 = vsel %vm8621_vm12, %v8622_v48, %v8623_v2  ;;  %14228 = vmatprep.mubr.msk.f32.mxu0 %vm1081_vm0, %v8168_v39  ;;  %v8735_v18 = vrot.slane %v8160_v29, 2  ;;  %v14622_v5 = vpack.c.bf16 %v12039_v51, %v12038_v19  ;;  %v8162_v17 = vrot.slane %v8079_v61, 7  ;;  %v8746_v61 = vld [vmem:[#allocation8 + $0x48] sm:$0xff] }
 0x5e3   : > { %v18908_v53 = vsel %vm8149_vm9, %v7999_v11, 0.0  ;;  %v8015_v23 = vmul.f32 0.0625, %v7982_v43  ;;  %v18912_v54 = vsel %vm8149_vm9, 0.0, %v8161_v34  ;;  %v14626_v39 = vpack.c.bf16 %v8521_v42, %v8520_v36  ;;  %v8748_v43 = vld [vmem:[#allocation8 + $0x58] sm:$0xff] }
 0x5e4   : > { %v18902_v9 = vsel %vm8621_vm12, %v8734_v59, %v8735_v18  ;;  %v18905_v7 = vsel %vm8621_vm12, %v8735_v18, %v8737_v27  ;;  %v18917_v16 = vsel %vm8149_vm9, %v8161_v34, %v8162_v17  ;;  %v8398_v50 = vrot.slane %v18908_v53, 1 }
 0x5e5   : > { %14229 = vmatmul.mubr.msk.f32.vlgmr.msra.gmra.mrb[132].mxu0 %vm1081_vm0, %v8160_v29  ;;  %v8401_v3 = vrot.slane %v18885_v0, 1  ;;  %v8153_v29 = vsel %vm8149_vm9, %v8015_v23, 0.0  ;;  %v14630_v35 = vpack.c.bf16 %v8523_v37, %v8522_v6  ;;  %v14634_v58 = vpack.c.bf16 %v12049_v22, %v12048_v47 }
 0x5e6   : > { %14621 = vmatpush3.bf16.msra.mxu0 %v14618_v14  ;;  %14231 = vmatprep.mubr.msk.f32.mxu0 %vm1081_vm0, %v18912_v54  ;;  %v8400_v14 = vrot.slane %v18799_v31, 1  ;;  %v8399_v24 = vsel %vm8394_vm11, %v8396_v20, %v8398_v50  ;;  %v8403_v38 = vrot.slane %v8153_v29, 1  ;;  %v8171_v62 = vsel %vm8149_vm9, %v8162_v17, 0.0 }
 0x5e7   : > { %14623 = vmatprep.subr.bf16.mxu0 %v14622_v5  ;;  %v8514_v28 = vrot.slane %v18912_v54, 1  ;;  %v8515_v41 = vrot.slane %v18917_v16, 1  ;;  %v14638_v48 = vpack.c.bf16 %v12051_v44, %v12050_v55  ;;  %v8517_v27 = vrot.slane %v8171_v62, 1 }
 0x5e8   : > { %v8404_v20 = vsel %vm8394_vm11, %v8401_v3, %v8403_v38  ;;  %v14642_v19 = vpack.c.bf16 %v8746_v61, %v8745_v60  ;;  %v8625_v11 = vrot.slane %v18908_v53, 2  ;;  %v8628_v34 = vrot.slane %v18885_v0, 2  ;;  %v9334_v53 = vld [vmem:[%s20456_s9] sm:$0xff] }
 0x5e9   : > { %14232 = vmatmul.mubr.msk.f32.gmra.mrb[134].mxu0 %vm1081_vm0, %v18917_v16  ;;  %v8516_v59 = vsel %vm8394_vm11, %v8514_v28, %v8515_v41  ;;  %v8518_v51 = vsel %vm8394_vm11, %v8515_v41, %v8517_v27  ;;  %v8630_v17 = vrot.slane %v8153_v29, 2  ;;  %v8742_v13 = vrot.slane %v8171_v62, 2  ;;  %v12030_v29 = vld [vmem:[%s20453_s6] ss:$0 sm:$0xff] }
 0x5ea   : > { %14625 = vmatpush3.bf16.msra.mxu0 %v14622_v5  ;;  %14242 = vmatprep.mubr.msk.f32.mxu0 %vm1081_vm0, %v8397_v30  ;;  %v8402_v30 = vsel %vm8394_vm11, %v8400_v14, %v8401_v3  ;;  %v8626_v5 = vsel %vm8621_vm12, %v8623_v2, %v8625_v11  ;;  %v8854_v6 = vlaneseq }
 0x5eb   : > { %14627 = vmatprep.subr.bf16.mxu0 %v14626_v39  ;;  %v8631_v0 = vsel %vm8621_vm12, %v8628_v34, %v8630_v17 }
 0x5ec   : > { %v8855_v3 = vshrl.u32 %v8854_v6, 7 }
 0x5ed   : > { %14243 = vmatmul.mubr.msk.f32.vlgmr.msra.gmra.mrb[128].mxu0 %vm1081_vm0, %v8399_v24 }
 0x5ee   : > { %14629 = vmatpush3.bf16.msra.mxu0 %v14626_v39  ;;  %14245 = vmatprep.mubr.msk.f32.mxu0 %vm1081_vm0, %v8402_v30 }
 0x5ef   : > { %14631 = vmatprep.subr.bf16.mxu0 %v14630_v35 }
 0x5f1   : > { %14246 = vmatmul.mubr.msk.f32.gmra.mrb[130].mxu0 %vm1081_vm0, %v8404_v20 }
 0x5f2   : > { %14633 = vmatpush3.bf16.msra.mxu0 %v14630_v35  ;;  %14256 = vmatprep.mubr.msk.f32.mxu0 %vm1081_vm0, %v18873_v10  ;;  %v8747_v10 = vld [vmem:[#allocation8 + $0x50] sm:$0xff] }
 0x5f3   : > { %14635 = vmatprep.subr.bf16.mxu0 %v14634_v58  ;;  %v14646_v18 = vpack.c.bf16 %v8748_v43, %v8747_v10 }
 0x5f5   : > { %14257 = vmatmul.mubr.msk.f32.vlgmr.msra.gmra.mrb[132].mxu0 %vm1081_vm0, %v18878_v32  ;;  %v8627_v32 = vrot.slane %v18799_v31, 2  ;;  %v8740_v31 = vrot.slane %v18917_v16, 2  ;;  %v15836_v16 = vmov 1966171168  }
 0x5f6   : > { %14637 = vmatpush3.bf16.msra.mxu0 %v14634_v58  ;;  %14259 = vmatprep.mubr.msk.f32.mxu0 %vm1081_vm0, %v8516_v59  ;;  %v8852_v50 = vunpack.c.l.s4 %v15836_v16 }
 0x5f7   : > { %14639 = vmatprep.subr.bf16.mxu0 %v14638_v48  ;;  %v8629_v36 = vsel %vm8621_vm12, %v8627_v32, %v8628_v34  ;;  %v8743_v42 = vsel %vm8621_vm12, %v8740_v31, %v8742_v13  ;;  %v19016_v32 = vld [vmem:[%s20455_s8] ss:$0 sm:$0xff] }
 0x5f8   : > { %v8853_v37 = vunpack.c.0.s8 %v8852_v50 }
 0x5f9   : > { %14260 = vmatmul.mubr.msk.f32.gmra.mrb[134].mxu0 %vm1081_vm0, %v8518_v51 }
 0x5fa   : > { %14641 = vmatpush3.bf16.msra.mxu0 %v14638_v48  ;;  %14270 = vmatprep.mubr.msk.f32.mxu0 %vm1081_vm0, %v18898_v63  ;;  %v8739_v63 = vrot.slane %v18912_v54, 2  ;;  %v9337_v54 = vld [vmem:[%s20456_s9 + $0x18] sm:$0xff]  ;;  %v18995_v35 = vsub.s32 %v8853_v37, %v8855_v3  ;;  %v19000_v48 = vsub.s32 0, %v8855_v3 }
 0x5fb   : > { %14643 = vmatprep.subr.bf16.mxu0 %v14642_v19 }
 0x5fc   : > { %v8741_v2 = vsel %vm8621_vm12, %v8739_v63, %v8740_v31 }
 0x5fd   : > { %14271 = vmatmul.mubr.msk.f32.vlgmr.msra.gmra.mrb[128].mxu0 %vm1081_vm0, %v8626_v5 }
 0x5fe   : > { %14645 = vmatpush3.bf16.msra.mxu0 %v14642_v19  ;;  %14273 = vmatprep.mubr.msk.f32.mxu0 %vm1081_vm0, %v8629_v36 }
 0x5ff   : > { %14647 = vmatprep.subr.bf16.mxu0 %v14646_v18 }
 0x601   : > { %14274 = vmatmul.mubr.msk.f32.gmra.mrb[130].mxu0 %vm1081_vm0, %v8631_v0 }
 0x602   : > { %14649 = vmatpush3.bf16.msra.mxu0 %v14646_v18  ;;  %14284 = vmatprep.mubr.msk.f32.mxu0 %vm1081_vm0, %v18902_v9  ;;  %v9335_v9 = vld [vmem:[%s20456_s9 + $0x8] sm:$0xff] }
 0x603   : > { %v14650_v23 = vpack.c.bf16 %v9335_v9, %v9334_v53 }
 0x605   : > { %14285 = vmatmul.mubr.msk.f32.vlgmr.msra.gmra.mrb[132].mxu0 %vm1081_vm0, %v18905_v7  ;;  %v9336_v7 = vld [vmem:[%s20456_s9 + $0x10] sm:$0xff]  ;;  %14651 = vmatprep.subr.bf16.mxu0 %v14650_v23 }
 0x606   : > { %14287 = vmatprep.mubr.msk.f32.mxu0 %vm1081_vm0, %v8741_v2  ;;  %v14654_v39 = vpack.c.bf16 %v9337_v54, %v9336_v7  ;;  %14653 = vmatpush3.bf16.msra.mxu0 %v14650_v23 }
 0x608   : > { %14655 = vmatprep.subr.bf16.mxu0 %v14654_v39 }
 0x609   : > { %14288 = vmatmul.mubr.msk.f32.gmra.mrb[134].mxu0 %vm1081_vm0, %v8743_v42 }
 0x60a   : > { %14657 = vmatpush3.bf16.msra.mxu0 %v14654_v39 }
 0x6d0   : > { %v14272_v14 = vpop.f32.mrb[128].mxu0 }
 0x6d1   : > { %v8711_v24 = vpop.f32.mrb[129].mxu0  ;;  %v14798_v47 = vadd.f32 %v14272_v14, %v12030_v29 }
 0x6d2   : > { %v14799_v38 = vadd.f32 %v12030_v29, %v8711_v24 }
 0x6d3   : > { %v8899_v28 = vcombine.high %v14798_v47, %v14798_v47  ;;  %v8906_v41 = vrot.slane %v14798_v47, %v18995_v35 }
 0x6d4   : > { %v8850_v22 = vcombine.high %v14799_v38, %v14799_v38  ;;  %v8857_v30 = vrot.slane %v14799_v38, %v18995_v35  ;;  %v14275_v58 = vpop.f32.mrb[130].mxu0 }
 0x6d5   : > { %v14800_v20 = vadd.f32 %v14275_v58, %v12030_v29  ;;  %v8721_v55 = vpop.f32.mrb[131].mxu0  ;;  %v19005_v11 = vrot.slane %v8899_v28, %v18995_v35  ;;  %v8914_v10 = vcombine.high %v8906_v41, %v8906_v41  ;;  %v19008_v43 = vrot.slane %v8906_v41, %v18995_v35 }
 0x6d6   : > { %v8864_v44 = vrot.slane %v8850_v22, %v18995_v35  ;;  %v8865_v62 = vcombine.high %v8857_v30, %v8857_v30  ;;  %v8873_v60 = vrot.slane %v8857_v30, %v18995_v35  ;;  %v14801_v19 = vadd.f32 %v12030_v29, %v8721_v55 }
 0x6d7   : > { %v8997_v63 = vcombine.high %v14800_v20, %v14800_v20  ;;  %v9004_v31 = vrot.slane %v14800_v20, %v18995_v35 }
 0x6d8   : > { %v8866_v27 = vcombine.high %v8864_v44, %v8864_v44  ;;  %v8887_v61 = vrot.slane %v8865_v62, %v18995_v35  ;;  %v14286_v59 = vpop.f32.mrb[132].mxu0  ;;  %v19011_v34 = vrot.slane %v8864_v44, %v18995_v35  ;;  %v8895_v5 = vcombine.high %v8873_v60, %v8873_v60 }
 0x6d9   : > { %v8823_v51 = vpop.f32.mrb[133].mxu0  ;;  %v9049_v36 = vrot.slane %v8873_v60, %v19000_v48  ;;  %v8948_v13 = vcombine.high %v14801_v19, %v14801_v19  ;;  %v8955_v2 = vrot.slane %v14801_v19, %v18995_v35  ;;  %v19028_v9 = vadd.f32 %v14286_v59, %v19016_v32 }
 0x6da   : > { %v19019_v18 = vrot.slane %v8866_v27, %v18995_v35  ;;  %v8897_v17 = vcombine.high %v8887_v61, %v8887_v61  ;;  %v9053_v53 = vrot.slane %v8887_v61, %v19000_v48  ;;  %v19031_v23 = vadd.f32 %v19016_v32, %v8823_v51 }
 0x6db   : > { %v9011_v54 = vrot.slane %v8997_v63, %v18995_v35  ;;  %v9012_v39 = vcombine.high %v9004_v31, %v9004_v31  ;;  %v9020_v16 = vrot.slane %v9004_v31, %v18995_v35  ;;  %v8962_v50 = vrot.slane %v8948_v13, %v18995_v35 }
 0x6dc   : > { %v14289_v0 = vpop.f32.mrb[134].mxu0  ;;  %v8963_v6 = vcombine.high %v8955_v2, %v8955_v2  ;;  %v19040_v37 = vrot.slane %v8955_v2, %v18995_v35  ;;  %v9206_v3 = vadd.f32 %v19031_v23, %v9049_v36  ;;  %v9207_v29 = vadd.f32 %v19028_v9, %v9049_v36 }
 0x6dd   : > { %v19024_v42 = vpop.f32.mrb[135].mxu0  ;;  %v19034_v7 = vadd.f32 %v14289_v0, %v19016_v32  ;;  %v9013_v14 = vcombine.high %v9011_v54, %v9011_v54  ;;  %v19045_v24 = vrot.slane %v9011_v54, %v18995_v35  ;;  %v19048_v38 = vrot.slane %v9012_v39, %v18995_v35 }
 0x6de   : > { %v9042_v47 = vcombine.high %v9020_v16, %v9020_v16  ;;  %v19051_v22 = vrot.slane %v9020_v16, %v19000_v48  ;;  %v8964_v30 = vcombine.high %v8962_v50, %v8962_v50  ;;  %v19054_v58 = vrot.slane %v8962_v50, %v18995_v35 }
 0x6df   : > { %v19057_v20 = vrot.slane %v8963_v6, %v18995_v35  ;;  %v9057_v55 = vrot.slane %v8895_v5, %v19000_v48  ;;  %v9065_v44 = vrot.slane %v19011_v34, %v19000_v48  ;;  %v19063_v62 = vrot.slane %v9013_v14, %v18995_v35 }
 0x6e0   : > { %v19067_v28 = vrot.slane %v19048_v38, %v19000_v48  ;;  %v19070_v41 = vrot.slane %v9042_v47, %v19000_v48  ;;  %v19074_v27 = vrot.slane %v19045_v24, %v19000_v48  ;;  %v19077_v60 = vrot.slane %v8964_v30, %v18995_v35 }
 0x6e1   : > { %v8993_v61 = vcombine.high %v19040_v37, %v19040_v37  ;;  %v8915_v59 = vcombine.high %v19005_v11, %v19005_v11  ;;  %v8936_v19 = vrot.slane %v8914_v10, %v18995_v35  ;;  %v8944_v51 = vcombine.high %v19008_v43, %v19008_v43 }
 0x6e2   : > { %v8896_v5 = vcombine.high %v19011_v34, %v19011_v34  ;;  %v8898_v36 = vcombine.high %v19019_v18, %v19019_v18  ;;  %v19092_v0 = vrot.slane %v19057_v20, %v19000_v48  ;;  %v19099_v31 = vrot.slane %v19054_v58, %v19000_v48 }
 0x6e3   : > { %v19095_v63 = vrot.slane %v8993_v61, %v19000_v48  ;;  %v9270_v10 = vmax.f32 %v9206_v3, 0.0  ;;  %v9271_v13 = vmax.f32 %v9207_v29, 0.0  ;;  %v9208_v2 = vadd.f32 %v19031_v23, %v9053_v53 }
 0x6e4   : > { %v9209_v34 = vadd.f32 %v19028_v9, %v9053_v53  ;;  %v9210_v54 = vadd.f32 %v19031_v23, %v9057_v55  ;;  %v9211_v39 = vadd.f32 %v19028_v9, %v9057_v55  ;;  %v9061_v16 = vrot.slane %v8897_v17, %v19000_v48 }
 0x6e5   : > { %v19107_v50 = vadd.f32 %v19031_v23, %v9065_v44  ;;  %v8929_v6 = vrot.slane %v19005_v11, %v18995_v35  ;;  %14298 = vmatprep.mubr.msk.f32.mxu0 %vm1081_vm0, %v9270_v10  ;;  %v9272_v3 = vmax.f32 %v9208_v2, 0.0  ;;  %v19113_v29 = vadd.f32 %v19028_v9, %v9065_v44 }
 0x6e6   : > { %v9069_v53 = vrot.slane %v19019_v18, %v19000_v48  ;;  %v8943_v14 = vrot.slane %v8915_v59, %v18995_v35  ;;  %v9081_v17 = vrot.slane %v19008_v43, %v19000_v48  ;;  %14299 = vmatmul.mubr.msk.f32.vlgmr.msra.gmra.mrb[136].mxu0 %vm1081_vm0, %v9271_v13  ;;  %v9212_v47 = vadd.f32 %v19031_v23, %v9061_v16 }
 0x6e7   : > { %v9213_v11 = vadd.f32 %v19028_v9, %v9061_v16  ;;  %v8946_v30 = vcombine.high %v8936_v19, %v8936_v19  ;;  %v9085_v55 = vrot.slane %v8936_v19, %v19000_v48  ;;  %14301 = vmatprep.mubr.msk.f32.mxu0 %vm1081_vm0, %v9272_v3  ;;  %v9089_v35 = vrot.slane %v8944_v51, %v19000_v48 }
 0x6e8   : > { %v9216_v44 = vadd.f32 %v19031_v23, %v9069_v53  ;;  %v19127_v18 = vadd.f32 %v19028_v9, %v9069_v53  ;;  %v9273_v61 = vmax.f32 %v9209_v34, 0.0  ;;  %v9073_v43 = vrot.slane %v8896_v5, %v19000_v48 }
 0x6e9   : > { %v9077_v59 = vrot.slane %v8898_v36, %v19000_v48  ;;  %v9097_v10 = vrot.slane %v8929_v6, %v19000_v48  ;;  %v9274_v13 = vmax.f32 %v9210_v54, 0.0  ;;  %v19134_v2 = vadd.f32 %v19031_v23, %v9081_v17 }
 0x6ea   : > { %v19137_v19 = vadd.f32 %v19028_v9, %v9081_v17  ;;  %14302 = vmatmul.mubr.msk.f32.gmra.mrb[138].mxu0 %vm1081_vm0, %v9273_v61  ;;  %v19141_v16 = vadd.f32 %v19031_v23, %v9073_v43  ;;  %v19144_v51 = vadd.f32 %v19028_v9, %v9073_v43  ;;  %v8945_v34 = vcombine.high %v8929_v6, %v8929_v6 }
 0x6eb   : > { %v19147_v5 = vadd.f32 %v19031_v23, %v9077_v59  ;;  %v19150_v36 = vadd.f32 %v19028_v9, %v9077_v59  ;;  %v8947_v54 = vcombine.high %v8943_v14, %v8943_v14  ;;  %14304 = vmatprep.mubr.msk.f32.mxu0 %vm1081_vm0, %v9274_v13  ;;  %v19154_v3 = vadd.f32 %v19031_v23, %v9085_v55 }
 0x6ec   : > { %v19157_v53 = vadd.f32 %v19028_v9, %v9085_v55  ;;  %v9275_v17 = vmax.f32 %v9211_v39, 0.0  ;;  %v9276_v61 = vmax.f32 %v9212_v47, 0.0  ;;  %v19160_v43 = vadd.f32 %v19031_v23, %v9089_v35 }
 0x6ed   : > { %v19163_v26 = vadd.f32 %v19028_v9, %v9089_v35  ;;  %v9093_v6 = vrot.slane %v8946_v30, %v19000_v48  ;;  %v19168_v59 = vadd.f32 %v19031_v23, %v9097_v10  ;;  %v19171_v13 = vadd.f32 %v19028_v9, %v9097_v10 }
 0x6ee   : > { %14305 = vmatmul.mubr.msk.f32.gmra.mrb[140].mxu0 %vm1081_vm0, %v9275_v17  ;;  %v9101_v55 = vrot.slane %v8943_v14, %v19000_v48  ;;  %v9113_v39 = vrot.slane %v19040_v37, %v19000_v48  ;;  %v19178_v47 = vadd.f32 %v19016_v32, %v19024_v42  ;;  %v9105_v35 = vrot.slane %v8945_v34, %v19000_v48 }
 0x6ef   : > { %14307 = vmatprep.mubr.msk.f32.mxu0 %vm1081_vm0, %v9276_v61  ;;  %v9109_v30 = vrot.slane %v8947_v54, %v19000_v48  ;;  %v9277_v17 = vmax.f32 %v9213_v11, 0.0  ;;  %v9278_v4 = vmax.f32 %v19107_v50, 0.0  ;;  %v19185_v10 = vadd.f32 %v19031_v23, %v9093_v6 }
 0x6f0   : > { %v19188_v14 = vadd.f32 %v19028_v9, %v9093_v6  ;;  %v19191_v37 = vadd.f32 %v19031_v23, %v9101_v55  ;;  %v19194_v32 = vadd.f32 %v19028_v9, %v9101_v55  ;;  %v19197_v42 = vadd.f32 %v19031_v23, %v9105_v35 }
 0x6f1   : > { %v19200_v34 = vadd.f32 %v19028_v9, %v9105_v35  ;;  %v8995_v50 = vcombine.high %v19057_v20, %v19057_v20  ;;  %v19206_v11 = vadd.f32 %v19031_v23, %v9109_v30  ;;  %v19209_v54 = vadd.f32 %v19028_v9, %v9109_v30 }
 0x6f2   : > { %14308 = vmatmul.mubr.msk.f32.gmra.mrb[142].mxu0 %vm1081_vm0, %v9277_v17  ;;  %v8994_v61 = vcombine.high %v19054_v58, %v19054_v58  ;;  %v8996_v6 = vcombine.high %v19077_v60, %v19077_v60  ;;  %v9279_v55 = vmax.f32 %v19113_v29, 0.0  ;;  %v9280_v35 = vmax.f32 %v9216_v44, 0.0 }
 0x6f3   : > { %14310 = vmatprep.mubr.msk.f32.mxu0 %vm1081_vm0, %v9278_v4  ;;  %v19218_v20 = vadd.f32 %v19178_v47, %v9113_v39  ;;  %v19221_v23 = vadd.f32 %v19034_v7, %v9113_v39  ;;  %v19225_v9 = vadd.f32 %v19178_v47, %v19092_v0  ;;  %v19229_v58 = vadd.f32 %v19034_v7, %v19092_v0 }
 0x6f4   : > { %v19233_v4 = vadd.f32 %v19178_v47, %v19095_v63  ;;  %v19237_v29 = vadd.f32 %v19034_v7, %v19095_v63  ;;  %v9125_v44 = vrot.slane %v8995_v50, %v19000_v48  ;;  %v19243_v39 = vadd.f32 %v19178_v47, %v19099_v31 }
 0x6f5   : > { %v9281_v0 = vmax.f32 %v19127_v18, 0.0  ;;  %v9282_v30 = vmax.f32 %v19141_v16, 0.0  ;;  %v9133_v50 = vrot.slane %v19077_v60, %v19000_v48  ;;  %v9137_v46 = vrot.slane %v8994_v61, %v19000_v48 }
 0x6f6   : > { %14311 = vmatmul.mubr.msk.f32.gmra.mrb[144].mxu0 %vm1081_vm0, %v9279_v55  ;;  %v19249_v17 = vadd.f32 %v19178_v47, %v9125_v44  ;;  %v19252_v63 = vadd.f32 %v19034_v7, %v9125_v44  ;;  %v19256_v55 = vadd.f32 %v19034_v7, %v19099_v31  ;;  %v19264_v18 = vadd.f32 %v19178_v47, %v19051_v22 }
 0x6f7   : > { %14313 = vmatprep.mubr.msk.f32.mxu0 %vm1081_vm0, %v9280_v35  ;;  %v9141_v35 = vrot.slane %v8996_v6, %v19000_v48  ;;  %v9044_v16 = vcombine.high %v19048_v38, %v19048_v38  ;;  %v19271_v31 = vadd.f32 %v19034_v7, %v19051_v22  ;;  %v19275_v60 = vadd.f32 %v19178_v47, %v9133_v50 }
 0x6f8   : > { %v19278_v61 = vadd.f32 %v19034_v7, %v9133_v50  ;;  %v19281_v6 = vadd.f32 %v19178_v47, %v9137_v46  ;;  %v19284_v44 = vadd.f32 %v19034_v7, %v9137_v46  ;;  %v9283_v38 = vmax.f32 %v19144_v51, 0.0 }
 0x6f9   : > { %v19291_v22 = vadd.f32 %v19034_v7, %v9141_v35  ;;  %v9043_v50 = vcombine.high %v19045_v24, %v19045_v24  ;;  %v19299_v45 = vadd.f32 %v19178_v47, %v19067_v28  ;;  %v19303_v46 = vadd.f32 %v19034_v7, %v19067_v28  ;;  %v10370_v28 = vld [vmem:[%s20458_s11] sm:$0xff] }
 0x6fa   : > { %14314 = vmatmul.mubr.msk.f32.gmra.mrb[146].mxu0 %vm1081_vm0, %v9281_v0  ;;  %v19288_v0 = vadd.f32 %v19178_v47, %v9141_v35  ;;  %v19308_v51 = vadd.f32 %v19178_v47, %v19070_v41  ;;  %v9157_v24 = vrot.slane %v9044_v16, %v19000_v48  ;;  %v19317_v35 = vadd.f32 %v19178_v47, %v19074_v27 }
 0x6fb   : > { %14316 = vmatprep.mubr.msk.f32.mxu0 %vm1081_vm0, %v9282_v30  ;;  %v9284_v30 = vmax.f32 %v19147_v5, 0.0  ;;  %v19312_v5 = vadd.f32 %v19034_v7, %v19070_v41  ;;  %v9285_v41 = vmax.f32 %v19150_v36, 0.0  ;;  %v19330_v16 = vadd.f32 %v19034_v7, %v19074_v27  ;;  %v10373_v27 = vld [vmem:[%s20458_s11 + $0x18] sm:$0xff] }
 0x6fc   : > { %v9165_v40 = vrot.slane %v19063_v62, %v19000_v48  ;;  %v9286_v1 = vmax.f32 %v19134_v2, 0.0  ;;  %v19336_v12 = vadd.f32 %v19178_v47, %v9157_v24  ;;  %v19339_v33 = vadd.f32 %v19034_v7, %v9157_v24 }
 0x6fd   : > { %v9169_v24 = vrot.slane %v9043_v50, %v19000_v48  ;;  %v9287_v25 = vmax.f32 %v19137_v19, 0.0  ;;  %v14662_v56 = vpack.c.bf16 %v10373_v27, %v10372_v52  ;;  %v9288_v21 = vmax.f32 %v19154_v3, 0.0 }
 0x6fe   : > { %14317 = vmatmul.mubr.msk.f32.gmra.mrb[148].mxu0 %vm1081_vm0, %v9283_v38  ;;  %v10371_v38 = vld [vmem:[%s20458_s11 + $0x8] sm:$0xff]  ;;  %v19353_v36 = vadd.f32 %v19034_v7, %v9165_v40  ;;  %v9289_v52 = vmax.f32 %v19157_v53, 0.0  ;;  %v9292_v19 = vmax.f32 %v19185_v10, 0.0  ;;  %v9298_v3 = vmax.f32 %v19197_v42, 0.0 }
 0x6ff   : > { %14319 = vmatprep.mubr.msk.f32.mxu0 %vm1081_vm0, %v9284_v30  ;;  %v9045_v30 = vcombine.high %v19063_v62, %v19063_v62  ;;  %v19349_v62 = vadd.f32 %v19178_v47, %v9165_v40  ;;  %v14658_v2 = vpack.c.bf16 %v10371_v38, %v10370_v28  ;;  %v19363_v28 = vadd.f32 %v19034_v7, %v9169_v24 }
 0x700   : > { %v9299_v53 = vmax.f32 %v19200_v34, 0.0  ;;  %v9304_v10 = vmax.f32 %v19225_v9, 0.0  ;;  %v9308_v42 = vmax.f32 %v19249_v17, 0.0  ;;  %v9309_v34 = vmax.f32 %v19252_v63, 0.0 }
 0x701   : > { %14659 = vmatprep.subr.bf16.mxu0 %v14658_v2  ;;  %v9173_v8 = vrot.slane %v9045_v30, %v19000_v48  ;;  %v9290_v48 = vmax.f32 %v19160_v43, 0.0  ;;  %v9300_v43 = vmax.f32 %v19206_v11, 0.0  ;;  %v9310_v11 = vmax.f32 %v19243_v39, 0.0 }
 0x702   : > { %14320 = vmatmul.mubr.msk.f32.gmra.mrb[150].mxu0 %vm1081_vm0, %v9285_v41  ;;  %v19360_v41 = vadd.f32 %v19178_v47, %v9169_v24  ;;  %v9314_v9 = vmax.f32 %v19281_v6, 0.0  ;;  %v9318_v39 = vmax.f32 %v19264_v18, 0.0  ;;  %v9319_v17 = vmax.f32 %v19271_v31, 0.0 }
 0x703   : > { %14322 = vmatprep.mubr.msk.f32.mxu0 %vm1081_vm0, %v9286_v1  ;;  %14661 = vmatpush3.bf16.msra.mxu0 %v14658_v2  ;;  %v19367_v1 = vadd.f32 %v19178_v47, %v9173_v8  ;;  %v19370_v40 = vadd.f32 %v19034_v7, %v9173_v8  ;;  %v9293_v8 = vmax.f32 %v19188_v14, 0.0  ;;  %v9296_v7 = vmax.f32 %v19191_v37, 0.0 }
 0x704   : > { %14663 = vmatprep.subr.bf16.mxu0 %v14662_v56  ;;  %v9303_v47 = vmax.f32 %v19221_v23, 0.0  ;;  %v9305_v14 = vmax.f32 %v19229_v58, 0.0  ;;  %v9306_v37 = vmax.f32 %v19233_v4, 0.0  ;;  %v9313_v23 = vmax.f32 %v19278_v61, 0.0 }
 0x705   : > { %v9315_v58 = vmax.f32 %v19284_v44, 0.0  ;;  %v9316_v4 = vmax.f32 %v19288_v0, 0.0  ;;  %v9320_v63 = vmax.f32 %v19299_v45, 0.0  ;;  %v9323_v18 = vmax.f32 %v19312_v5, 0.0 }
 0x706   : > { %14323 = vmatmul.mubr.msk.f32.gmra.mrb[152].mxu0 %vm1081_vm0, %v9287_v25  ;;  %v9291_v25 = vmax.f32 %v19163_v26, 0.0  ;;  %v9297_v26 = vmax.f32 %v19194_v32, 0.0  ;;  %v9307_v32 = vmax.f32 %v19237_v29, 0.0  ;;  %v9317_v29 = vmax.f32 %v19291_v22, 0.0 }
 0x707   : > { %14325 = vmatprep.mubr.msk.f32.mxu0 %vm1081_vm0, %v9288_v21  ;;  %14665 = vmatpush3.bf16.msra.mxu0 %v14662_v56  ;;  %v9294_v21 = vmax.f32 %v19168_v59, 0.0  ;;  %v9295_v56 = vmax.f32 %v19171_v13, 0.0  ;;  %v9301_v59 = vmax.f32 %v19209_v54, 0.0  ;;  %v9302_v13 = vmax.f32 %v19218_v20, 0.0 }
 0x708   : > { %v9311_v54 = vmax.f32 %v19256_v55, 0.0  ;;  %v9312_v20 = vmax.f32 %v19275_v60, 0.0  ;;  %v9321_v55 = vmax.f32 %v19303_v46, 0.0  ;;  %v9322_v60 = vmax.f32 %v19308_v51, 0.0  ;;  %v19466_v46 = vld [vmem:[%s20820_s10] ss:$0 sm:$0xff] }
 0x709   : > { %v9324_v61 = vmax.f32 %v19336_v12, 0.0  ;;  %v9325_v45 = vmax.f32 %v19339_v33, 0.0  ;;  %v9326_v31 = vmax.f32 %v19317_v35, 0.0  ;;  %v9327_v6 = vmax.f32 %v19330_v16, 0.0 }
 0x70a   : > { %14326 = vmatmul.mubr.msk.f32.gmra.mrb[154].mxu0 %vm1081_vm0, %v9289_v52  ;;  %v9328_v44 = vmax.f32 %v19349_v62, 0.0  ;;  %v9329_v12 = vmax.f32 %v19353_v36, 0.0  ;;  %v9330_v0 = vmax.f32 %v19360_v41, 0.0  ;;  %v9331_v33 = vmax.f32 %v19363_v28, 0.0 }
 0x70b   : > { %14328 = vmatprep.mubr.msk.f32.mxu0 %vm1081_vm0, %v9290_v48  ;;  %v9332_v22 = vmax.f32 %v19367_v1, 0.0  ;;  %v9333_v50 = vmax.f32 %v19370_v40, 0.0 }
 0x70e   : > { %14329 = vmatmul.mubr.msk.f32.gmra.mrb[156].mxu0 %vm1081_vm0, %v9291_v25 }
 0x70f   : > { %14331 = vmatprep.mubr.msk.f32.mxu0 %vm1081_vm0, %v9292_v19 }
 0x712   : > { %14332 = vmatmul.mubr.msk.f32.gmra.mrb[158].mxu0 %vm1081_vm0, %v9293_v8 }
 0x713   : > { %14334 = vmatprep.mubr.msk.f32.mxu0 %vm1081_vm0, %v9294_v21 }
 0x716   : > { %14335 = vmatmul.mubr.msk.f32.gmra.mrb[160].mxu0 %vm1081_vm0, %v9295_v56 }
 0x717   : > { %14337 = vmatprep.mubr.msk.f32.mxu0 %vm1081_vm0, %v9296_v7 }
 0x71a   : > { %14338 = vmatmul.mubr.msk.f32.gmra.mrb[162].mxu0 %vm1081_vm0, %v9297_v26 }
 0x71b   : > { %14340 = vmatprep.mubr.msk.f32.mxu0 %vm1081_vm0, %v9298_v3 }
 0x71e   : > { %14341 = vmatmul.mubr.msk.f32.gmra.mrb[164].mxu0 %vm1081_vm0, %v9299_v53 }
 0x71f   : > { %14343 = vmatprep.mubr.msk.f32.mxu0 %vm1081_vm0, %v9300_v43 }
 0x722   : > { %14344 = vmatmul.mubr.msk.f32.gmra.mrb[166].mxu0 %vm1081_vm0, %v9301_v59 }
 0x723   : > { %14346 = vmatprep.mubr.msk.f32.mxu0 %vm1081_vm0, %v9302_v13 }
 0x726   : > { %14347 = vmatmul.mubr.msk.f32.gmra.mrb[168].mxu0 %vm1081_vm0, %v9303_v47 }
 0x727   : > { %14349 = vmatprep.mubr.msk.f32.mxu0 %vm1081_vm0, %v9304_v10 }
 0x72a   : > { %14350 = vmatmul.mubr.msk.f32.gmra.mrb[170].mxu0 %vm1081_vm0, %v9305_v14 }
 0x72b   : > { %14352 = vmatprep.mubr.msk.f32.mxu0 %vm1081_vm0, %v9306_v37 }
 0x72e   : > { %14353 = vmatmul.mubr.msk.f32.gmra.mrb[172].mxu0 %vm1081_vm0, %v9307_v32 }
 0x72f   : > { %14355 = vmatprep.mubr.msk.f32.mxu0 %vm1081_vm0, %v9308_v42 }
 0x732   : > { %14356 = vmatmul.mubr.msk.f32.gmra.mrb[174].mxu0 %vm1081_vm0, %v9309_v34 }
 0x733   : > { %14358 = vmatprep.mubr.msk.f32.mxu0 %vm1081_vm0, %v9310_v11 }
 0x736   : > { %14359 = vmatmul.mubr.msk.f32.gmra.mrb[176].mxu0 %vm1081_vm0, %v9311_v54 }
 0x737   : > { %14361 = vmatprep.mubr.msk.f32.mxu0 %vm1081_vm0, %v9312_v20 }
 0x73a   : > { %14362 = vmatmul.mubr.msk.f32.gmra.mrb[178].mxu0 %vm1081_vm0, %v9313_v23 }
 0x73b   : > { %14364 = vmatprep.mubr.msk.f32.mxu0 %vm1081_vm0, %v9314_v9 }
 0x73e   : > { %14365 = vmatmul.mubr.msk.f32.gmra.mrb[180].mxu0 %vm1081_vm0, %v9315_v58 }
 0x73f   : > { %14367 = vmatprep.mubr.msk.f32.mxu0 %vm1081_vm0, %v9316_v4 }
 0x742   : > { %14368 = vmatmul.mubr.msk.f32.gmra.mrb[182].mxu0 %vm1081_vm0, %v9317_v29 }
 0x743   : > { %14370 = vmatprep.mubr.msk.f32.mxu0 %vm1081_vm0, %v9318_v39 }
 0x746   : > { %14371 = vmatmul.mubr.msk.f32.gmra.mrb[184].mxu0 %vm1081_vm0, %v9319_v17 }
 0x747   : > { %14373 = vmatprep.mubr.msk.f32.mxu0 %vm1081_vm0, %v9320_v63 }
 0x74a   : > { %14374 = vmatmul.mubr.msk.f32.gmra.mrb[186].mxu0 %vm1081_vm0, %v9321_v55 }
 0x74b   : > { %14376 = vmatprep.mubr.msk.f32.mxu0 %vm1081_vm0, %v9322_v60 }
 0x74e   : > { %14377 = vmatmul.mubr.msk.f32.gmra.mrb[188].mxu0 %vm1081_vm0, %v9323_v18 }
 0x74f   : > { %14379 = vmatprep.mubr.msk.f32.mxu0 %vm1081_vm0, %v9324_v61 }
 0x752   : > { %14380 = vmatmul.mubr.msk.f32.gmra.mrb[190].mxu0 %vm1081_vm0, %v9325_v45 }
 0x753   : > { %14382 = vmatprep.mubr.msk.f32.mxu0 %vm1081_vm0, %v9326_v31 }
 0x756   : > { %14383 = vmatmul.mubr.msk.f32.gmra.mrb[192].mxu0 %vm1081_vm0, %v9327_v6 }
 0x757   : > { %14385 = vmatprep.mubr.msk.f32.mxu0 %vm1081_vm0, %v9328_v44 }
 0x75a   : > { %14386 = vmatmul.mubr.msk.f32.gmra.mrb[194].mxu0 %vm1081_vm0, %v9329_v12 }
 0x75b   : > { %14388 = vmatprep.mubr.msk.f32.mxu0 %vm1081_vm0, %v9330_v0 }
 0x75e   : > { %14389 = vmatmul.mubr.msk.f32.gmra.mrb[196].mxu0 %vm1081_vm0, %v9331_v33 }
 0x75f   : > { %14391 = vmatprep.mubr.msk.f32.mxu0 %vm1081_vm0, %v9332_v22 }
 0x762   : > { %14392 = vmatmul.mubr.msk.f32.gmra.mrb[198].mxu0 %vm1081_vm0, %v9333_v50 }
 0x7b9   : > { %v14300_v51 = vpop.f32.mrb[136].mxu0 }
 0x7ba   : > { %v9609_v5 = vadd.f32 %v14300_v51, %v19466_v46  ;;  %v9603_v35 = vpop.f32.mrb[137].mxu0 }
 0x7bb   : > { %v9604_v38 = vadd.f32 %v19466_v46, %v9603_v35 }
 0x7bc   : > { %v12126_v30 = vmul.f32 -1.442695, %v9609_v5 }
 0x7bd   : > { %v12125_v16 = vmul.f32 -1.442695, %v9604_v38  ;;  %v14303_v27 = vpop.f32.mrb[138].mxu0  ;;  %v20821_v38 = vld [vmem:[#allocation51_spill] sm:$0xff] }
 0x7be   : > { %15343 = vpow2.f32 %v12126_v30  ;;  %v9619_v62 = vadd.f32 %v14303_v27, %v19466_v46  ;;  %v9613_v2 = vpop.f32.mrb[139].mxu0  ;;  %v20822_v30 = vmax.f32 %v20821_v38, 0.0 }
 0x7bf   : > { %15345 = vpow2.f32 %v12125_v16  ;;  %v9614_v36 = vadd.f32 %v19466_v46, %v9613_v2 }
 0x7c0   : > { %v12128_v24 = vmul.f32 -1.442695, %v9619_v62  ;;  %v20823_v62 = vld [vmem:[#allocation47_spill] sm:$0xff] }
 0x7c1   : > { %v12127_v41 = vmul.f32 -1.442695, %v9614_v36  ;;  %v14306_v28 = vpop.f32.mrb[140].mxu0  ;;  %v20824_v2 = vmax.f32 %v20823_v62, 0.0 }
 0x7c2   : > { %15347 = vpow2.f32 %v12128_v24  ;;  %v9629_v1 = vadd.f32 %v14306_v28, %v19466_v46  ;;  %v9623_v40 = vpop.f32.mrb[141].mxu0 }
 0x7c3   : > { %15349 = vpow2.f32 %v12127_v41  ;;  %v9624_v52 = vadd.f32 %v19466_v46, %v9623_v40 }
 0x7c4   : > { %v12130_v48 = vmul.f32 -1.442695, %v9629_v1 }
 0x7c5   : > { %v12129_v25 = vmul.f32 -1.442695, %v9624_v52  ;;  %v14309_v19 = vpop.f32.mrb[142].mxu0 }
 0x7c6   : > { %15351 = vpow2.f32 %v12130_v48  ;;  %v9639_v8 = vadd.f32 %v14309_v19, %v19466_v46  ;;  %v9633_v21 = vpop.f32.mrb[143].mxu0 }
 0x7c7   : > { %15353 = vpow2.f32 %v12129_v25  ;;  %v9634_v56 = vadd.f32 %v19466_v46, %v9633_v21 }
 0x7c8   : > { %v15344_v7 = vpop.eup %15343  ;;  %v12132_v26 = vmul.f32 -1.442695, %v9639_v8 }
 0x7c9   : > { %v15346_v3 = vpop.eup %15345  ;;  %v10115_v53 = vadd.f32 1.0, %v15344_v7  ;;  %v12131_v43 = vmul.f32 -1.442695, %v9634_v56  ;;  %v14312_v59 = vpop.f32.mrb[144].mxu0  ;;  %v20825_v56 = vld [vmem:[#allocation57_spill] sm:$0xff] }
 0x7ca   : > { %v10114_v13 = vadd.f32 1.0, %v15346_v3  ;;  %15355 = vpow2.f32 %v12132_v26  ;;  %v9649_v47 = vadd.f32 %v14312_v59, %v19466_v46  ;;  %v9643_v10 = vpop.f32.mrb[145].mxu0  ;;  %v20826_v7 = vmax.f32 %v20825_v56, 0.0  ;;  %v20827_v59 = vld [vmem:[#allocation56_spill] sm:$0xff] }
 0x7cb   : > { %15357 = vrcp.f32 %v10115_v53  ;;  %v9644_v14 = vadd.f32 %v19466_v46, %v9643_v10 }
 0x7cc   : > { %v15348_v37 = vpop.eup %15347  ;;  %15359 = vrcp.f32 %v10114_v13  ;;  %v12134_v32 = vmul.f32 -1.442695, %v9649_v47  ;;  %v20828_v13 = vmax.f32 %v20827_v59, 0.0 }
 0x7cd   : > { %v15350_v42 = vpop.eup %15349  ;;  %v10117_v34 = vadd.f32 1.0, %v15348_v37  ;;  %15361 = vpow2.f32 %v12131_v43  ;;  %v12133_v11 = vmul.f32 -1.442695, %v9644_v14  ;;  %v14315_v54 = vpop.f32.mrb[146].mxu0 }
 0x7ce   : > { %v10116_v20 = vadd.f32 1.0, %v15350_v42  ;;  %15363 = vpow2.f32 %v12134_v32  ;;  %v9659_v23 = vadd.f32 %v14315_v54, %v19466_v46  ;;  %v9653_v9 = vpop.f32.mrb[147].mxu0 }
 0x7cf   : > { %15365 = vrcp.f32 %v10117_v34  ;;  %v9654_v58 = vadd.f32 %v19466_v46, %v9653_v9 }
 0x7d0   : > { %v15352_v4 = vpop.eup %15351  ;;  %15367 = vrcp.f32 %v10116_v20  ;;  %v12136_v29 = vmul.f32 -1.442695, %v9659_v23  ;;  %v20829_v23 = vld [vmem:[#allocation22_spill] sm:$0xff] }
 0x7d1   : > { %v15354_v39 = vpop.eup %15353  ;;  %v10119_v17 = vadd.f32 1.0, %v15352_v4  ;;  %15369 = vpow2.f32 %v12133_v11  ;;  %v12135_v63 = vmul.f32 -1.442695, %v9654_v58  ;;  %v14318_v55 = vpop.f32.mrb[148].mxu0  ;;  %v20830_v9 = vmax.f32 %v20829_v23, 0.0 }
 0x7d2   : > { %v10118_v60 = vadd.f32 1.0, %v15354_v39  ;;  %15371 = vpow2.f32 %v12136_v29  ;;  %v9669_v18 = vadd.f32 %v14318_v55, %v19466_v46  ;;  %v9663_v61 = vpop.f32.mrb[149].mxu0 }
 0x7d3   : > { %15373 = vrcp.f32 %v10119_v17  ;;  %v9664_v45 = vadd.f32 %v19466_v46, %v9663_v61  ;;  %v20831_v17 = vld [vmem:[#allocation21_spill] sm:$0xff] }
 0x7d4   : > { %v15356_v31 = vpop.eup %15355  ;;  %15375 = vrcp.f32 %v10118_v60  ;;  %v12138_v6 = vmul.f32 -1.442695, %v9669_v18 }
 0x7d5   : > { %v15358_v44 = vpop.eup %15357  ;;  %v10121_v12 = vadd.f32 1.0, %v15356_v31  ;;  %15377 = vpow2.f32 %v12135_v63  ;;  %v12137_v0 = vmul.f32 -1.442695, %v9664_v45  ;;  %v14321_v33 = vpop.f32.mrb[150].mxu0  ;;  %v20832_v63 = vmax.f32 %v20831_v17, 0.0 }
 0x7d6   : > { %v15360_v22 = vpop.eup %15359  ;;  %15379 = vpow2.f32 %v12138_v6  ;;  %v9679_v50 = vadd.f32 %v14321_v33, %v19466_v46  ;;  %v9673_v51 = vpop.f32.mrb[151].mxu0  ;;  %v10307_v36 = vmul.f32 %v15358_v44, %v20824_v2  ;;  %v20835_v2 = vld [vmem:[#allocation15_spill] sm:$0xff] }
 0x7d7   : > { %v15362_v5 = vpop.eup %15361  ;;  %v9674_v35 = vadd.f32 %v19466_v46, %v9673_v51  ;;  %v10306_v16 = vmul.f32 %v15360_v22, %v20822_v30  ;;  %15381 = vpow2.f32 %v12137_v0 }
 0x7d8   : > { %v15364_v27 = vpop.eup %15363  ;;  %v10120_v24 = vadd.f32 1.0, %v15362_v5  ;;  %v12140_v41 = vmul.f32 -1.442695, %v9679_v50  ;;  %15383 = vrcp.f32 %v10121_v12 }
 0x7d9   : > { %v15366_v28 = vpop.eup %15365  ;;  %v10123_v1 = vadd.f32 1.0, %v15364_v27  ;;  %v12139_v40 = vmul.f32 -1.442695, %v9674_v35  ;;  %v14324_v52 = vpop.f32.mrb[152].mxu0  ;;  %14402 = vmatprep.mubr.msk.f32.mxu0 %vm1081_vm0, %v10306_v16  ;;  %v20833_v35 = vld [vmem:[#allocation16_spill] sm:$0xff] }
 0x7da   : > { %v15368_v48 = vpop.eup %15367  ;;  %15385 = vrcp.f32 %v10120_v24  ;;  %v9689_v25 = vadd.f32 %v14324_v52, %v19466_v46  ;;  %v9683_v19 = vpop.f32.mrb[153].mxu0  ;;  %14403 = vmatmul.mubr.msk.f32.vlgmr.msra.gmra.mrb[200].mxu0 %vm1081_vm0, %v10307_v36  ;;  %v10309_v47 = vmul.f32 %v15366_v28, %v20828_v13  ;;  %v20834_v38 = vmax.f32 %v20833_v35, 0.0 }
 0x7db   : > { %v15370_v8 = vpop.eup %15369  ;;  %15387 = vrcp.f32 %v10123_v1  ;;  %v9684_v21 = vadd.f32 %v19466_v46, %v9683_v19  ;;  %v10308_v26 = vmul.f32 %v15368_v48, %v20826_v7  ;;  %v20836_v36 = vmax.f32 %v20835_v2, 0.0 }
 0x7dc   : > { %v15372_v3 = vpop.eup %15371  ;;  %v10122_v53 = vadd.f32 1.0, %v15370_v8  ;;  %15389 = vpow2.f32 %v12140_v41  ;;  %v12142_v43 = vmul.f32 -1.442695, %v9689_v25 }
 0x7dd   : > { %v15374_v10 = vpop.eup %15373  ;;  %v10125_v14 = vadd.f32 1.0, %v15372_v3  ;;  %15391 = vpow2.f32 %v12139_v40  ;;  %v12141_v37 = vmul.f32 -1.442695, %v9684_v21  ;;  %v14327_v32 = vpop.f32.mrb[154].mxu0  ;;  %14405 = vmatprep.mubr.msk.f32.mxu0 %vm1081_vm0, %v10308_v26  ;;  %v20837_v21 = vld [vmem:[#allocation18_spill] sm:$0xff] }
 0x7de   : > { %v15376_v42 = vpop.eup %15375  ;;  %15393 = vrcp.f32 %v10122_v53  ;;  %v9699_v34 = vadd.f32 %v14327_v32, %v19466_v46  ;;  %v9693_v11 = vpop.f32.mrb[155].mxu0  ;;  %14406 = vmatmul.mubr.msk.f32.gmra.mrb[202].mxu0 %vm1081_vm0, %v10309_v47  ;;  %v10311_v55 = vmul.f32 %v15374_v10, %v20832_v63  ;;  %v20838_v56 = vmax.f32 %v20837_v21, 0.0 }
 0x7df   : > { %v15378_v54 = vpop.eup %15377  ;;  %15395 = vrcp.f32 %v10125_v14  ;;  %v9694_v20 = vadd.f32 %v19466_v46, %v9693_v11  ;;  %v10310_v58 = vmul.f32 %v15376_v42, %v20830_v9 }
 0x7e0   : > { %v15380_v4 = vpop.eup %15379  ;;  %v10124_v29 = vadd.f32 1.0, %v15378_v54  ;;  %15397 = vpow2.f32 %v12142_v43  ;;  %v12144_v39 = vmul.f32 -1.442695, %v9699_v34  ;;  %v20839_v43 = vld [vmem:[#allocation17_spill] sm:$0xff] }
 0x7e1   : > { %v10127_v60 = vadd.f32 1.0, %v15380_v4  ;;  %15399 = vpow2.f32 %v12141_v37  ;;  %v14330_v18 = vpop.f32.mrb[156].mxu0  ;;  %14408 = vmatprep.mubr.msk.f32.mxu0 %vm1081_vm0, %v10310_v58  ;;  %v15382_v61 = vpop.eup %15381  ;;  %v12143_v45 = vmul.f32 -1.442695, %v9694_v20  ;;  %v20840_v59 = vmax.f32 %v20839_v43, 0.0  ;;  %v20841_v20 = vld [vmem:[#allocation20_spill] sm:$0xff] }
 0x7e2   : > { %15401 = vrcp.f32 %v10124_v29  ;;  %v9709_v31 = vadd.f32 %v14330_v18, %v19466_v46  ;;  %v9703_v6 = vpop.f32.mrb[157].mxu0  ;;  %14409 = vmatmul.mubr.msk.f32.gmra.mrb[204].mxu0 %vm1081_vm0, %v10311_v55  ;;  %v15384_v44 = vpop.eup %15383  ;;  %v10126_v12 = vadd.f32 1.0, %v15382_v61  ;;  %v20842_v23 = vmax.f32 %v20841_v20, 0.0 }
 0x7e3   : > { %15403 = vrcp.f32 %v10127_v60  ;;  %v9704_v0 = vadd.f32 %v19466_v46, %v9703_v6  ;;  %v10313_v24 = vmul.f32 %v15384_v44, %v20836_v36 }
 0x7e4   : > { %v15386_v33 = vpop.eup %15385  ;;  %15405 = vpow2.f32 %v12144_v39  ;;  %v12146_v22 = vmul.f32 -1.442695, %v9709_v31  ;;  %v20843_v39 = vld [vmem:[#allocation19_spill] sm:$0xff]  ;;  %v20845_v31 = vld [vmem:[#allocation24_spill] sm:$0xff] }
 0x7e5   : > { %v15388_v50 = vpop.eup %15387  ;;  %15407 = vrcp.f32 %v10126_v12  ;;  %v12145_v51 = vmul.f32 -1.442695, %v9704_v0  ;;  %v14333_v5 = vpop.f32.mrb[158].mxu0  ;;  %v10312_v30 = vmul.f32 %v15386_v33, %v20834_v38  ;;  %v20844_v17 = vmax.f32 %v20843_v39, 0.0 }
 0x7e6   : > { %v15390_v16 = vpop.eup %15389  ;;  %15409 = vpow2.f32 %v12143_v45  ;;  %v9719_v27 = vadd.f32 %v14333_v5, %v19466_v46  ;;  %v9713_v62 = vpop.f32.mrb[159].mxu0  ;;  %v10315_v13 = vmul.f32 %v15388_v50, %v20840_v59  ;;  %v20846_v6 = vmax.f32 %v20845_v31, 0.0  ;;  %v20851_v59 = vld [vmem:[#allocation26_spill] sm:$0xff] }
 0x7e7   : > { %v15392_v41 = vpop.eup %15391  ;;  %v10129_v28 = vadd.f32 1.0, %v15390_v16  ;;  %15411 = vpow2.f32 %v12146_v22  ;;  %14411 = vmatprep.mubr.msk.f32.mxu0 %vm1081_vm0, %v10312_v30  ;;  %v9714_v1 = vadd.f32 %v19466_v46, %v9713_v62  ;;  %v20847_v22 = vld [vmem:[#allocation23_spill] sm:$0xff] }
 0x7e8   : > { %v15394_v40 = vpop.eup %15393  ;;  %v10128_v52 = vadd.f32 1.0, %v15392_v41  ;;  %15413 = vpow2.f32 %v12145_v51  ;;  %v12148_v48 = vmul.f32 -1.442695, %v9719_v27  ;;  %14412 = vmatmul.mubr.msk.f32.gmra.mrb[206].mxu0 %vm1081_vm0, %v10313_v24  ;;  %v20848_v50 = vmax.f32 %v20847_v22, 0.0 }
 0x7e9   : > { %v15396_v25 = vpop.eup %15395  ;;  %15415 = vrcp.f32 %v10129_v28  ;;  %v12147_v19 = vmul.f32 -1.442695, %v9714_v1  ;;  %v14336_v8 = vpop.f32.mrb[160].mxu0  ;;  %v10314_v7 = vmul.f32 %v15394_v40, %v20838_v56  ;;  %v20849_v1 = vmax.f32 %v18307_v49, 0.0 }
 0x7ea   : > { %v15398_v26 = vpop.eup %15397  ;;  %15417 = vrcp.f32 %v10128_v52  ;;  %v9729_v3 = vadd.f32 %v14336_v8, %v19466_v46  ;;  %v9723_v53 = vpop.f32.mrb[161].mxu0  ;;  %v10317_v63 = vmul.f32 %v15396_v25, %v20844_v17  ;;  %v20850_v52 = vmax.f32 %v18301_v15, 0.0 }
 0x7eb   : > { %v15400_v47 = vpop.eup %15399  ;;  %v10131_v10 = vadd.f32 1.0, %v15398_v26  ;;  %15419 = vpow2.f32 %v12148_v48  ;;  %14414 = vmatprep.mubr.msk.f32.mxu0 %vm1081_vm0, %v10314_v7  ;;  %v9724_v14 = vadd.f32 %v19466_v46, %v9723_v53 }
 0x7ec   : > { %v15402_v37 = vpop.eup %15401  ;;  %v10130_v32 = vadd.f32 1.0, %v15400_v47  ;;  %15421 = vpow2.f32 %v12147_v19  ;;  %v12150_v42 = vmul.f32 -1.442695, %v9729_v3  ;;  %14415 = vmatmul.mubr.msk.f32.gmra.mrb[208].mxu0 %vm1081_vm0, %v10315_v13  ;;  %v20852_v13 = vmax.f32 %v20851_v59, 0.0  ;;  %v20864_v59 = vld [vmem:[#allocation30_spill] sm:$0xff] }
 0x7ed   : > { %v15404_v34 = vpop.eup %15403  ;;  %15423 = vrcp.f32 %v10131_v10  ;;  %v12149_v11 = vmul.f32 -1.442695, %v9724_v14  ;;  %v14339_v54 = vpop.f32.mrb[162].mxu0  ;;  %v10316_v9 = vmul.f32 %v15402_v37, %v20842_v23  ;;  %v20853_v10 = vld [vmem:[#allocation25_spill] sm:$0xff] }
 0x7ee   : > { %v15406_v58 = vpop.eup %15405  ;;  %15425 = vrcp.f32 %v10130_v32  ;;  %v9739_v4 = vadd.f32 %v14339_v54, %v19466_v46  ;;  %v9733_v29 = vpop.f32.mrb[163].mxu0  ;;  %v10319_v51 = vmul.f32 %v15404_v34, %v20848_v50  ;;  %v20854_v14 = vmax.f32 %v20853_v10, 0.0  ;;  %v20858_v50 = vld [vmem:[#allocation29_spill] sm:$0xff] }
 0x7ef   : > { %v15408_v55 = vpop.eup %15407  ;;  %v10133_v60 = vadd.f32 1.0, %v15406_v58  ;;  %15427 = vpow2.f32 %v12150_v42  ;;  %14417 = vmatprep.mubr.msk.f32.mxu0 %vm1081_vm0, %v10316_v9  ;;  %v9734_v18 = vadd.f32 %v19466_v46, %v9733_v29 }
 0x7f0   : > { %v15410_v61 = vpop.eup %15409  ;;  %15429 = vpow2.f32 %v12149_v11  ;;  %v12152_v45 = vmul.f32 -1.442695, %v9739_v4  ;;  %14418 = vmatmul.mubr.msk.f32.gmra.mrb[210].mxu0 %vm1081_vm0, %v10317_v63  ;;  %v10318_v44 = vmul.f32 %v15408_v55, %v20846_v6 }
 0x7f1   : > { %v15412_v12 = vpop.eup %15411  ;;  %15431 = vrcp.f32 %v10133_v60  ;;  %v10132_v0 = vadd.f32 1.0, %v15410_v61  ;;  %v14342_v33 = vpop.f32.mrb[164].mxu0  ;;  %v12151_v38 = vmul.f32 -1.442695, %v9734_v18  ;;  %v20855_v18 = vmax.f32 %v18339_v57, 0.0 }
 0x7f2   : > { %v15414_v5 = vpop.eup %15413  ;;  %v10135_v35 = vadd.f32 1.0, %v15412_v12  ;;  %15433 = vpow2.f32 %v12152_v45  ;;  %v9749_v30 = vadd.f32 %v14342_v33, %v19466_v46  ;;  %14420 = vmatprep.mubr.msk.f32.mxu0 %vm1081_vm0, %v10318_v44  ;;  %v9743_v16 = vpop.f32.mrb[165].mxu0  ;;  %v20856_v44 = vld [vmem:[#allocation27_spill] sm:$0xff] }
 0x7f3   : > { %v15416_v27 = vpop.eup %15415  ;;  %15435 = vrcp.f32 %v10132_v0  ;;  %v10134_v62 = vadd.f32 1.0, %v15414_v5  ;;  %v9744_v2 = vadd.f32 %v19466_v46, %v9743_v16  ;;  %v20857_v12 = vmax.f32 %v20856_v44, 0.0 }
 0x7f4   : > { %v15418_v36 = vpop.eup %15417  ;;  %15437 = vrcp.f32 %v10135_v35  ;;  %v12154_v24 = vmul.f32 -1.442695, %v9749_v30  ;;  %14421 = vmatmul.mubr.msk.f32.gmra.mrb[212].mxu0 %vm1081_vm0, %v10319_v51  ;;  %v10321_v48 = vmul.f32 %v15416_v27, %v20850_v52  ;;  %v20859_v51 = vmax.f32 %v20858_v50, 0.0 }
 0x7f5   : > { %v15420_v41 = vpop.eup %15419  ;;  %15439 = vrcp.f32 %v10134_v62  ;;  %v14345_v28 = vpop.f32.mrb[166].mxu0  ;;  %v10320_v40 = vmul.f32 %v15418_v36, %v20849_v1  ;;  %v12153_v8 = vmul.f32 -1.442695, %v9744_v2 }
 0x7f6   : > { %v15422_v25 = vpop.eup %15421  ;;  %v10137_v19 = vadd.f32 1.0, %v15420_v41  ;;  %15441 = vpow2.f32 %v12151_v38  ;;  %v9759_v21 = vadd.f32 %v14345_v28, %v19466_v46  ;;  %v9753_v56 = vpop.f32.mrb[167].mxu0  ;;  %v20860_v41 = vld [vmem:[#allocation28_spill] sm:$0xff] }
 0x7f7   : > { %v15424_v7 = vpop.eup %15423  ;;  %v10136_v26 = vadd.f32 1.0, %v15422_v25  ;;  %15443 = vpow2.f32 %v12154_v24  ;;  %14423 = vmatprep.mubr.msk.f32.mxu0 %vm1081_vm0, %v10320_v40  ;;  %v9754_v3 = vadd.f32 %v19466_v46, %v9753_v56  ;;  %v20861_v28 = vmax.f32 %v20860_v41, 0.0 }
 0x7f8   : > { %v15426_v53 = vpop.eup %15425  ;;  %15445 = vrcp.f32 %v10137_v19  ;;  %v12156_v49 = vmul.f32 -1.442695, %v9759_v21  ;;  %14424 = vmatmul.mubr.msk.f32.gmra.mrb[214].mxu0 %vm1081_vm0, %v10321_v48  ;;  %v10323_v37 = vmul.f32 %v15424_v7, %v20854_v14  ;;  %v20862_v48 = vld [vmem:[#allocation31_spill] sm:$0xff] }
 0x7f9   : > { %v15428_v15 = vpop.eup %15427  ;;  %15447 = vrcp.f32 %v10136_v26  ;;  %v14348_v43 = vpop.f32.mrb[168].mxu0  ;;  %v10322_v47 = vmul.f32 %v15426_v53, %v20852_v13  ;;  %v12155_v34 = vmul.f32 -1.442695, %v9754_v3  ;;  %v20863_v25 = vmax.f32 %v20862_v48, 0.0 }
 0x7fa   : > { %v15430_v32 = vpop.eup %15429  ;;  %v10139_v42 = vadd.f32 1.0, %v15428_v15  ;;  %15449 = vpow2.f32 %v12153_v8  ;;  %v9769_v11 = vadd.f32 %v14348_v43, %v19466_v46  ;;  %v9763_v54 = vpop.f32.mrb[169].mxu0  ;;  %v20865_v13 = vmax.f32 %v20864_v59, 0.0 }
 0x7fb   : > { %v15432_v20 = vpop.eup %15431  ;;  %v10138_v23 = vadd.f32 1.0, %v15430_v32  ;;  %15451 = vpow2.f32 %v12156_v49  ;;  %14426 = vmatprep.mubr.msk.f32.mxu0 %vm1081_vm0, %v10322_v47  ;;  %v9764_v9 = vadd.f32 %v19466_v46, %v9763_v54 }
 0x7fc   : > { %v15434_v58 = vpop.eup %15433  ;;  %15453 = vrcp.f32 %v10139_v42  ;;  %v12158_v4 = vmul.f32 -1.442695, %v9769_v11  ;;  %14427 = vmatmul.mubr.msk.f32.gmra.mrb[216].mxu0 %vm1081_vm0, %v10323_v37  ;;  %v10325_v0 = vmul.f32 %v15432_v20, %v20857_v12  ;;  %v20866_v37 = vld [vmem:[#allocation33_spill] sm:$0xff] }
 0x7fd   : > { %v15436_v29 = vpop.eup %15435  ;;  %15455 = vrcp.f32 %v10138_v23  ;;  %v10141_v39 = vadd.f32 1.0, %v15434_v58  ;;  %v12157_v17 = vmul.f32 -1.442695, %v9764_v9  ;;  %v14351_v63 = vpop.f32.mrb[170].mxu0  ;;  %v20867_v32 = vmax.f32 %v20866_v37, 0.0 }
 0x7fe   : > { %v15438_v55 = vpop.eup %15437  ;;  %15457 = vpow2.f32 %v12155_v34  ;;  %v9779_v60 = vadd.f32 %v14351_v63, %v19466_v46  ;;  %v10324_v61 = vmul.f32 %v15436_v29, %v20855_v18  ;;  %v9773_v45 = vpop.f32.mrb[171].mxu0 }
 0x7ff   : > { %v15440_v31 = vpop.eup %15439  ;;  %15459 = vrcp.f32 %v10141_v39  ;;  %v9774_v6 = vadd.f32 %v19466_v46, %v9773_v45  ;;  %v10327_v1 = vmul.f32 %v15438_v55, %v20861_v28 }
 0x800   : > { %v15442_v33 = vpop.eup %15441  ;;  %15461 = vpow2.f32 %v12158_v4  ;;  %v12160_v22 = vmul.f32 -1.442695, %v9779_v60  ;;  %14429 = vmatprep.mubr.msk.f32.mxu0 %vm1081_vm0, %v10324_v61  ;;  %v10326_v5 = vmul.f32 %v15440_v31, %v20859_v51 }
 0x801   : > { %v15444_v35 = vpop.eup %15443  ;;  %v10140_v38 = vadd.f32 1.0, %v15442_v33  ;;  %15463 = vpow2.f32 %v12157_v17  ;;  %v12159_v57 = vmul.f32 -1.442695, %v9774_v6  ;;  %14430 = vmatmul.mubr.msk.f32.gmra.mrb[218].mxu0 %vm1081_vm0, %v10325_v0  ;;  %v14354_v30 = vpop.f32.mrb[172].mxu0  ;;  %v20868_v17 = vld [vmem:[#allocation32_spill] sm:$0xff]  ;;  %v20870_v33 = vld [vmem:[#allocation35_spill] sm:$0xff] }
 0x802   : > { %v15446_v16 = vpop.eup %15445  ;;  %v10143_v27 = vadd.f32 1.0, %v15444_v35  ;;  %15465 = vpow2.f32 %v12160_v22  ;;  %v9789_v62 = vadd.f32 %v14354_v30, %v19466_v46  ;;  %14432 = vmatprep.mubr.msk.f32.mxu0 %vm1081_vm0, %v10326_v5  ;;  %v9783_v2 = vpop.f32.mrb[173].mxu0  ;;  %v20869_v63 = vmax.f32 %v20868_v17, 0.0  ;;  %v20882_v17 = vld [vmem:[#allocation41_spill] sm:$0xff] }
 0x803   : > { %v15448_v36 = vpop.eup %15447  ;;  %15467 = vrcp.f32 %v10140_v38  ;;  %v9784_v24 = vadd.f32 %v19466_v46, %v9783_v2  ;;  %v10329_v47 = vmul.f32 %v15446_v16, %v20865_v13  ;;  %v20871_v22 = vmax.f32 %v20870_v33, 0.0  ;;  %v20872_v38 = vld [vmem:[#allocation34_spill] sm:$0xff] }
 0x804   : > { %v15450_v40 = vpop.eup %15449  ;;  %15469 = vrcp.f32 %v10143_v27  ;;  %v12162_v52 = vmul.f32 -1.442695, %v9789_v62  ;;  %v10328_v19 = vmul.f32 %v15448_v36, %v20863_v25 }
 0x805   : > { %v15452_v8 = vpop.eup %15451  ;;  %v10142_v21 = vadd.f32 1.0, %v15450_v40  ;;  %15471 = vpow2.f32 %v12159_v57  ;;  %v12161_v56 = vmul.f32 -1.442695, %v9784_v24  ;;  %14433 = vmatmul.mubr.msk.f32.gmra.mrb[220].mxu0 %vm1081_vm0, %v10327_v1  ;;  %v14357_v7 = vpop.f32.mrb[174].mxu0  ;;  %v20873_v57 = vmax.f32 %v20872_v38, 0.0  ;;  %v20874_v40 = vld [vmem:[#allocation37_spill] sm:$0xff] }
 0x806   : > { %v15454_v26 = vpop.eup %15453  ;;  %v10145_v3 = vadd.f32 1.0, %v15452_v8  ;;  %15473 = vpow2.f32 %v12162_v52  ;;  %v9799_v53 = vadd.f32 %v14357_v7, %v19466_v46  ;;  %14435 = vmatprep.mubr.msk.f32.mxu0 %vm1081_vm0, %v10328_v19  ;;  %v9793_v49 = vpop.f32.mrb[175].mxu0  ;;  %v20875_v52 = vmax.f32 %v20874_v40, 0.0  ;;  %v20886_v38 = vld [vmem:[#allocation43_spill] sm:$0xff] }
 0x807   : > { %v15456_v15 = vpop.eup %15455  ;;  %15475 = vrcp.f32 %v10142_v21  ;;  %v9794_v43 = vadd.f32 %v19466_v46, %v9793_v49  ;;  %v10331_v55 = vmul.f32 %v15454_v26, %v20869_v63  ;;  %v20876_v21 = vld [vmem:[#allocation36_spill] sm:$0xff]  ;;  %v20883_v63 = vmax.f32 %v20882_v17, 0.0 }
 0x808   : > { %v15458_v10 = vpop.eup %15457  ;;  %15477 = vrcp.f32 %v10145_v3  ;;  %v12164_v14 = vmul.f32 -1.442695, %v9799_v53  ;;  %v10330_v42 = vmul.f32 %v15456_v15, %v20867_v32 }
 0x809   : > { %v15460_v34 = vpop.eup %15459  ;;  %v10144_v11 = vadd.f32 1.0, %v15458_v10  ;;  %15479 = vpow2.f32 %v12161_v56  ;;  %v12163_v54 = vmul.f32 -1.442695, %v9794_v43  ;;  %14436 = vmatmul.mubr.msk.f32.gmra.mrb[222].mxu0 %vm1081_vm0, %v10329_v47  ;;  %v14360_v20 = vpop.f32.mrb[176].mxu0  ;;  %v20877_v56 = vmax.f32 %v20876_v21, 0.0  ;;  %v20878_v10 = vld [vmem:[#allocation39_spill] sm:$0xff] }
 0x80a   : > { %v15462_v23 = vpop.eup %15461  ;;  %15481 = vpow2.f32 %v12164_v14  ;;  %v9809_v9 = vadd.f32 %v14360_v20, %v19466_v46  ;;  %14438 = vmatprep.mubr.msk.f32.mxu0 %vm1081_vm0, %v10330_v42  ;;  %v9803_v58 = vpop.f32.mrb[177].mxu0  ;;  %v10333_v30 = vmul.f32 %v15460_v34, %v20873_v57  ;;  %v20879_v14 = vmax.f32 %v20878_v10, 0.0  ;;  %v20890_v21 = vld [vmem:[#allocation58_spill] sm:$0xff] }
 0x80b   : > { %v15464_v4 = vpop.eup %15463  ;;  %15483 = vrcp.f32 %v10144_v11  ;;  %v10147_v29 = vadd.f32 1.0, %v15462_v23  ;;  %v9804_v39 = vadd.f32 %v19466_v46, %v9803_v58  ;;  %v20887_v57 = vmax.f32 %v20886_v38, 0.0 }
 0x80c   : > { %v15466_v60 = vpop.eup %15465  ;;  %v10146_v18 = vadd.f32 1.0, %v15464_v4  ;;  %15485 = vpow2.f32 %v12163_v54  ;;  %v12166_v61 = vmul.f32 -1.442695, %v9809_v9  ;;  %v20880_v54 = vld [vmem:[#allocation38_spill] sm:$0xff] }
 0x80d   : > { %v15468_v45 = vpop.eup %15467  ;;  %15487 = vrcp.f32 %v10147_v29  ;;  %v10149_v31 = vadd.f32 1.0, %v15466_v60  ;;  %v12165_v6 = vmul.f32 -1.442695, %v9804_v39  ;;  %14439 = vmatmul.mubr.msk.f32.gmra.mrb[224].mxu0 %vm1081_vm0, %v10331_v55  ;;  %v14363_v44 = vpop.f32.mrb[178].mxu0  ;;  %v20881_v20 = vmax.f32 %v20880_v54, 0.0 }
 0x80e   : > { %v15470_v12 = vpop.eup %15469  ;;  %15489 = vrcp.f32 %v10146_v18  ;;  %v9819_v0 = vadd.f32 %v14363_v44, %v19466_v46  ;;  %v10332_v50 = vmul.f32 %v15468_v45, %v20871_v22  ;;  %v9813_v51 = vpop.f32.mrb[179].mxu0  ;;  %v20884_v44 = vld [vmem:[#allocation40_spill] sm:$0xff] }
 0x80f   : > { %v15472_v5 = vpop.eup %15471  ;;  %15491 = vrcp.f32 %v10149_v31  ;;  %v9814_v35 = vadd.f32 %v19466_v46, %v9813_v51  ;;  %v10335_v7 = vmul.f32 %v15470_v12, %v20877_v56  ;;  %v20885_v12 = vmax.f32 %v20884_v44, 0.0 }
 0x810   : > { %v15474_v16 = vpop.eup %15473  ;;  %v10148_v27 = vadd.f32 1.0, %v15472_v5  ;;  %15493 = vpow2.f32 %v12166_v61  ;;  %v12168_v62 = vmul.f32 -1.442695, %v9819_v0  ;;  %14441 = vmatprep.mubr.msk.f32.mxu0 %vm1081_vm0, %v10332_v50  ;;  %v20891_v56 = vmax.f32 %v20890_v21, 0.0 }
 0x811   : > { %v15476_v2 = vpop.eup %15475  ;;  %v10151_v36 = vadd.f32 1.0, %v15474_v16  ;;  %15495 = vpow2.f32 %v12165_v6  ;;  %v12167_v24 = vmul.f32 -1.442695, %v9814_v35  ;;  %14442 = vmatmul.mubr.msk.f32.gmra.mrb[226].mxu0 %vm1081_vm0, %v10333_v30  ;;  %v14366_v41 = vpop.f32.mrb[180].mxu0 }
 0x812   : > { %v15478_v28 = vpop.eup %15477  ;;  %15497 = vrcp.f32 %v10148_v27  ;;  %v9829_v1 = vadd.f32 %v14366_v41, %v19466_v46  ;;  %v10334_v48 = vmul.f32 %v15476_v2, %v20875_v52  ;;  %v9823_v25 = vpop.f32.mrb[181].mxu0  ;;  %v20888_v41 = vld [vmem:[#allocation42_spill] sm:$0xff] }
 0x813   : > { %v15480_v19 = vpop.eup %15479  ;;  %15499 = vrcp.f32 %v10151_v36  ;;  %v9824_v8 = vadd.f32 %v19466_v46, %v9823_v25  ;;  %v10337_v23 = vmul.f32 %v15478_v28, %v20881_v20  ;;  %v20889_v28 = vmax.f32 %v20888_v41, 0.0 }
 0x814   : > { %v15482_v26 = vpop.eup %15481  ;;  %v10150_v3 = vadd.f32 1.0, %v15480_v19  ;;  %15501 = vpow2.f32 %v12168_v62  ;;  %v12170_v53 = vmul.f32 -1.442695, %v9829_v1  ;;  %14444 = vmatprep.mubr.msk.f32.mxu0 %vm1081_vm0, %v10334_v48 }
 0x815   : > { %v15484_v49 = vpop.eup %15483  ;;  %v10153_v15 = vadd.f32 1.0, %v15482_v26  ;;  %15503 = vpow2.f32 %v12167_v24  ;;  %14445 = vmatmul.mubr.msk.f32.gmra.mrb[228].mxu0 %vm1081_vm0, %v10335_v7  ;;  %v14369_v43 = vpop.f32.mrb[182].mxu0  ;;  %v12169_v13 = vmul.f32 -1.442695, %v9824_v8 }
 0x816   : > { %v15486_v59 = vpop.eup %15485  ;;  %15505 = vrcp.f32 %v10150_v3  ;;  %v9839_v47 = vadd.f32 %v14369_v43, %v19466_v46  ;;  %v10336_v37 = vmul.f32 %v15484_v49, %v20879_v14  ;;  %v9833_v32 = vpop.f32.mrb[183].mxu0 }
 0x817   : > { %v15488_v42 = vpop.eup %15487  ;;  %15507 = vrcp.f32 %v10153_v15  ;;  %v10152_v34 = vadd.f32 1.0, %v15486_v59  ;;  %v9834_v11 = vadd.f32 %v19466_v46, %v9833_v32  ;;  %v20892_v59 = vld [vmem:[#allocation44_spill] sm:$0xff] }
 0x818   : > { %v15490_v9 = vpop.eup %15489  ;;  %15509 = vpow2.f32 %v12170_v53  ;;  %v12172_v58 = vmul.f32 -1.442695, %v9839_v47  ;;  %14447 = vmatprep.mubr.msk.f32.mxu0 %vm1081_vm0, %v10336_v37  ;;  %v10339_v0 = vmul.f32 %v15488_v42, %v20885_v12  ;;  %v20894_v37 = vld [vmem:[#allocation60_spill] sm:$0xff] }
 0x819   : > { %v15492_v4 = vpop.eup %15491  ;;  %15511 = vrcp.f32 %v10152_v34  ;;  %v12171_v29 = vmul.f32 -1.442695, %v9834_v11  ;;  %14448 = vmatmul.mubr.msk.f32.gmra.mrb[230].mxu0 %vm1081_vm0, %v10337_v23  ;;  %v14372_v39 = vpop.f32.mrb[184].mxu0  ;;  %v10338_v55 = vmul.f32 %v15490_v9, %v20883_v63  ;;  %v20895_v32 = vmax.f32 %v20894_v37, 0.0  ;;  %v20896_v63 = vld [vmem:[#allocation59_spill] sm:$0xff] }
 0x81a   : > { %v15494_v60 = vpop.eup %15493  ;;  %15513 = vpow2.f32 %v12169_v13  ;;  %v9849_v18 = vadd.f32 %v14372_v39, %v19466_v46  ;;  %v9843_v61 = vpop.f32.mrb[185].mxu0  ;;  %v10341_v1 = vmul.f32 %v15492_v4, %v20889_v28  ;;  %v20893_v13 = vmax.f32 %v20892_v59, 0.0 }
 0x81b   : > { %v15496_v45 = vpop.eup %15495  ;;  %v10155_v31 = vadd.f32 1.0, %v15494_v60  ;;  %15515 = vpow2.f32 %v12172_v58  ;;  %14450 = vmatprep.mubr.msk.f32.mxu0 %vm1081_vm0, %v10338_v55  ;;  %v9844_v6 = vadd.f32 %v19466_v46, %v9843_v61  ;;  %v20897_v55 = vmax.f32 %v20896_v63, 0.0 }
 0x81c   : > { %v15498_v33 = vpop.eup %15497  ;;  %v10154_v22 = vadd.f32 1.0, %v15496_v45  ;;  %15517 = vpow2.f32 %v12171_v29  ;;  %v12174_v50 = vmul.f32 -1.442695, %v9849_v18 }
 0x81d   : > { %v15500_v51 = vpop.eup %15499  ;;  %15519 = vrcp.f32 %v10155_v31  ;;  %v12173_v5 = vmul.f32 -1.442695, %v9844_v6  ;;  %14451 = vmatmul.mubr.msk.f32.gmra.mrb[232].mxu0 %vm1081_vm0, %v10339_v0  ;;  %v14375_v35 = vpop.f32.mrb[186].mxu0  ;;  %v10340_v30 = vmul.f32 %v15498_v33, %v20887_v57  ;;  %v20898_v6 = vld [vmem:[#allocation61_spill] sm:$0xff] }
 0x81e   : > { %v15502_v16 = vpop.eup %15501  ;;  %15521 = vrcp.f32 %v10154_v22  ;;  %v9859_v27 = vadd.f32 %v14375_v35, %v19466_v46  ;;  %v9853_v62 = vpop.f32.mrb[187].mxu0  ;;  %v10343_v47 = vmul.f32 %v15500_v51, %v20893_v13  ;;  %v20899_v44 = vmax.f32 %v20898_v6, 0.0  ;;  %v20900_v57 = vld [vmem:[#allocation45_spill] sm:$0xff] }
 0x81f   : > { %v15504_v2 = vpop.eup %15503  ;;  %v10157_v36 = vadd.f32 1.0, %v15502_v16  ;;  %15523 = vpow2.f32 %v12174_v50  ;;  %14453 = vmatprep.mubr.msk.f32.mxu0 %vm1081_vm0, %v10340_v30  ;;  %v9854_v24 = vadd.f32 %v19466_v46, %v9853_v62  ;;  %v20901_v30 = vmax.f32 %v20900_v57, 0.0 }
 0x820   : > { %v15506_v40 = vpop.eup %15505  ;;  %v10156_v52 = vadd.f32 1.0, %v15504_v2  ;;  %15525 = vpow2.f32 %v12173_v5  ;;  %v12176_v48 = vmul.f32 -1.442695, %v9859_v27 }
 0x821   : > { %v15508_v25 = vpop.eup %15507  ;;  %15527 = vrcp.f32 %v10157_v36  ;;  %v12175_v19 = vmul.f32 -1.442695, %v9854_v24  ;;  %14454 = vmatmul.mubr.msk.f32.gmra.mrb[234].mxu0 %vm1081_vm0, %v10341_v1  ;;  %v14378_v8 = vpop.f32.mrb[188].mxu0  ;;  %v10342_v7 = vmul.f32 %v15506_v40, %v20891_v56  ;;  %v20902_v24 = vld [vmem:[#allocation63_spill] sm:$0xff]  ;;  %v20904_v56 = vld [vmem:[#allocation62_spill] sm:$0xff] }
 0x822   : > { %v15510_v26 = vpop.eup %15509  ;;  %15529 = vrcp.f32 %v10156_v52  ;;  %v9869_v3 = vadd.f32 %v14378_v8, %v19466_v46  ;;  %v9863_v53 = vpop.f32.mrb[189].mxu0  ;;  %v10345_v60 = vmul.f32 %v15508_v25, %v20897_v55  ;;  %v20903_v41 = vmax.f32 %v20902_v24, 0.0 }
 0x823   : > { %v15512_v49 = vpop.eup %15511  ;;  %v10159_v15 = vadd.f32 1.0, %v15510_v26  ;;  %15531 = vpow2.f32 %v12176_v48  ;;  %14456 = vmatprep.mubr.msk.f32.mxu0 %vm1081_vm0, %v10342_v7  ;;  %v9864_v43 = vadd.f32 %v19466_v46, %v9863_v53  ;;  %v20905_v7 = vmax.f32 %v20904_v56, 0.0 }
 0x824   : > { %v15514_v10 = vpop.eup %15513  ;;  %15533 = vpow2.f32 %v12175_v19  ;;  %v12178_v14 = vmul.f32 -1.442695, %v9869_v3  ;;  %v10344_v42 = vmul.f32 %v15512_v49, %v20895_v32 }
 0x825   : > { %v15516_v34 = vpop.eup %15515  ;;  %15535 = vrcp.f32 %v10159_v15  ;;  %v10158_v11 = vadd.f32 1.0, %v15514_v10  ;;  %14457 = vmatmul.mubr.msk.f32.gmra.mrb[236].mxu0 %vm1081_vm0, %v10343_v47  ;;  %v14381_v54 = vpop.f32.mrb[190].mxu0  ;;  %v12177_v9 = vmul.f32 -1.442695, %v9864_v43  ;;  %v20906_v10 = vld [vmem:[#allocation65_spill] sm:$0xff] }
 0x826   : > { %v15518_v20 = vpop.eup %15517  ;;  %v10161_v23 = vadd.f32 1.0, %v15516_v34  ;;  %15537 = vpow2.f32 %v12178_v14  ;;  %v9879_v58 = vadd.f32 %v14381_v54, %v19466_v46  ;;  %14459 = vmatprep.mubr.msk.f32.mxu0 %vm1081_vm0, %v10344_v42  ;;  %v9873_v4 = vpop.f32.mrb[191].mxu0  ;;  %v20907_v14 = vmax.f32 %v20906_v10, 0.0 }
 0x827   : > { %v15520_v29 = vpop.eup %15519  ;;  %15539 = vrcp.f32 %v10158_v11  ;;  %v10160_v39 = vadd.f32 1.0, %v15518_v20  ;;  %v9874_v17 = vadd.f32 %v19466_v46, %v9873_v4  ;;  %v20908_v11 = vld [vmem:[#allocation64_spill] sm:$0xff] }
 0x828   : > { %v15522_v18 = vpop.eup %15521  ;;  %15541 = vrcp.f32 %v10161_v23  ;;  %v12180_v61 = vmul.f32 -1.442695, %v9879_v58  ;;  %v10347_v16 = vmul.f32 %v15520_v29, %v20901_v30  ;;  %v20909_v54 = vmax.f32 %v20908_v11, 0.0  ;;  %v20910_v58 = vld [vmem:[#allocation67_spill] sm:$0xff] }
 0x829   : > { %v15524_v45 = vpop.eup %15523  ;;  %15543 = vrcp.f32 %v10160_v39  ;;  %14460 = vmatmul.mubr.msk.f32.gmra.mrb[238].mxu0 %vm1081_vm0, %v10345_v60  ;;  %v14384_v31 = vpop.f32.mrb[192].mxu0  ;;  %v10346_v12 = vmul.f32 %v15522_v18, %v20899_v44  ;;  %v12179_v22 = vmul.f32 -1.442695, %v9874_v17  ;;  %v20911_v4 = vmax.f32 %v20910_v58, 0.0  ;;  %v20912_v44 = vld [vmem:[#allocation66_spill] sm:$0xff] }
 0x82a   : > { %v15526_v0 = vpop.eup %15525  ;;  %v10163_v33 = vadd.f32 1.0, %v15524_v45  ;;  %15545 = vpow2.f32 %v12177_v9  ;;  %v9889_v50 = vadd.f32 %v14384_v31, %v19466_v46  ;;  %v9883_v51 = vpop.f32.mrb[193].mxu0 }
 0x82b   : > { %v15528_v5 = vpop.eup %15527  ;;  %v10162_v35 = vadd.f32 1.0, %v15526_v0  ;;  %15547 = vpow2.f32 %v12180_v61  ;;  %14462 = vmatprep.mubr.msk.f32.mxu0 %vm1081_vm0, %v10346_v12  ;;  %v9884_v38 = vadd.f32 %v19466_v46, %v9883_v51  ;;  %v15607_v46 = vld [vmem:[%s20820_s10] ss:$0 sm:$0xff]  ;;  %v20913_v12 = vmax.f32 %v20912_v44, 0.0 }
 0x82c   : > { %v15530_v27 = vpop.eup %15529  ;;  %15549 = vrcp.f32 %v10163_v33  ;;  %v12182_v62 = vmul.f32 -1.442695, %v9889_v50  ;;  %v10349_v26 = vmul.f32 %v15528_v5, %v20905_v7  ;;  %v20914_v50 = vld [vmem:[#allocation69_spill] sm:$0xff] }
 0x82d   : > { %v15532_v2 = vpop.eup %15531  ;;  %15551 = vrcp.f32 %v10162_v35  ;;  %14463 = vmatmul.mubr.msk.f32.gmra.mrb[240].mxu0 %vm1081_vm0, %v10347_v16  ;;  %v14387_v36 = vpop.f32.mrb[194].mxu0  ;;  %v10348_v28 = vmul.f32 %v15530_v27, %v20903_v41  ;;  %v12181_v52 = vmul.f32 -1.442695, %v9884_v38  ;;  %v20915_v51 = vmax.f32 %v20914_v50, 0.0  ;;  %v20918_v41 = vld [vmem:[#allocation71_spill] sm:$0xff] }
 0x82e   : > { %v15534_v1 = vpop.eup %15533  ;;  %v10165_v40 = vadd.f32 1.0, %v15532_v2  ;;  %15553 = vpow2.f32 %v12179_v22  ;;  %v9899_v48 = vadd.f32 %v15607_v46, %v14387_v36  ;;  %v9893_v25 = vpop.f32.mrb[195].mxu0 }
 0x82f   : > { %v15536_v19 = vpop.eup %15535  ;;  %v10164_v8 = vadd.f32 1.0, %v15534_v1  ;;  %15555 = vpow2.f32 %v12182_v62  ;;  %14465 = vmatprep.mubr.msk.f32.mxu0 %vm1081_vm0, %v10348_v28  ;;  %v9894_v21 = vadd.f32 %v15607_v46, %v9893_v25  ;;  %v20916_v62 = vld [vmem:[#allocation68_spill] sm:$0xff]  ;;  %v20919_v28 = vmax.f32 %v20918_v41, 0.0  ;;  %v20944_v41 = vld [vmem:[#allocation54_spill] sm:$0xff] }
 0x830   : > { %v15538_v3 = vpop.eup %15537  ;;  %15557 = vrcp.f32 %v10165_v40  ;;  %v12184_v53 = vmul.f32 -1.442695, %v9899_v48  ;;  %v10351_v20 = vmul.f32 %v15536_v19, %v20909_v54  ;;  %v20917_v2 = vmax.f32 %v20916_v62, 0.0  ;;  %v20920_v19 = vld [vmem:[#allocation70_spill] sm:$0xff] }
 0x831   : > { %v15540_v49 = vpop.eup %15539  ;;  %15559 = vrcp.f32 %v10164_v8  ;;  %v10167_v15 = vadd.f32 1.0, %v15538_v3  ;;  %v12183_v43 = vmul.f32 -1.442695, %v9894_v21  ;;  %14466 = vmatmul.mubr.msk.f32.gmra.mrb[242].mxu0 %vm1081_vm0, %v10349_v26  ;;  %v14390_v59 = vpop.f32.mrb[196].mxu0  ;;  %v20921_v8 = vmax.f32 %v20920_v19, 0.0 }
 0x832   : > { %v15542_v13 = vpop.eup %15541  ;;  %15561 = vpow2.f32 %v12181_v52  ;;  %v9909_v47 = vadd.f32 %v15607_v46, %v14390_v59  ;;  %v10350_v37 = vmul.f32 %v15540_v49, %v20907_v14  ;;  %v9903_v32 = vpop.f32.mrb[197].mxu0  ;;  %v20922_v49 = vld [vmem:[#allocation73_spill] sm:$0xff] }
 0x833   : > { %v15544_v42 = vpop.eup %15543  ;;  %15563 = vrcp.f32 %v10167_v15  ;;  %v9904_v34 = vadd.f32 %v15607_v46, %v9903_v32  ;;  %v10353_v0 = vmul.f32 %v15542_v13, %v20913_v12  ;;  %v20923_v15 = vmax.f32 %v20922_v49, 0.0  ;;  %v20924_v13 = vld [vmem:[#allocation72_spill] sm:$0xff] }
 0x834   : > { %v15546_v23 = vpop.eup %15545  ;;  %15565 = vpow2.f32 %v12184_v53  ;;  %v12186_v9 = vmul.f32 -1.442695, %v9909_v47  ;;  %14468 = vmatprep.mubr.msk.f32.mxu0 %vm1081_vm0, %v10350_v37  ;;  %v10352_v29 = vmul.f32 %v15544_v42, %v20911_v4  ;;  %v20925_v47 = vmax.f32 %v20924_v13, 0.0 }
 0x835   : > { %v15548_v39 = vpop.eup %15547  ;;  %v10166_v17 = vadd.f32 1.0, %v15546_v23  ;;  %15567 = vpow2.f32 %v12183_v43  ;;  %v12185_v63 = vmul.f32 -1.442695, %v9904_v34  ;;  %14469 = vmatmul.mubr.msk.f32.gmra.mrb[244].mxu0 %vm1081_vm0, %v10351_v20  ;;  %v14393_v55 = vpop.f32.mrb[198].mxu0  ;;  %v20926_v34 = vld [vmem:[#allocation75_spill] sm:$0xff]  ;;  %v20928_v23 = vld [vmem:[#allocation74_spill] sm:$0xff] }
 0x836   : > { %v15550_v60 = vpop.eup %15549  ;;  %v10169_v18 = vadd.f32 1.0, %v15548_v39  ;;  %15569 = vpow2.f32 %v12186_v9  ;;  %v9919_v61 = vadd.f32 %v15607_v46, %v14393_v55  ;;  %14471 = vmatprep.mubr.msk.f32.mxu0 %vm1081_vm0, %v10352_v29  ;;  %v9913_v45 = vpop.f32.mrb[199].mxu0  ;;  %v20927_v11 = vmax.f32 %v20926_v34, 0.0 }
 0x837   : > { %v15552_v31 = vpop.eup %15551  ;;  %15571 = vrcp.f32 %v10166_v17  ;;  %v9914_v6 = vadd.f32 %v15607_v46, %v9913_v45  ;;  %v10355_v36 = vmul.f32 %v15550_v60, %v20917_v2  ;;  %v20929_v9 = vmax.f32 %v20928_v23, 0.0  ;;  %v20930_v17 = vld [vmem:[#allocation48_spill] sm:$0xff]  ;;  %v20942_v2 = vld [vmem:[#allocation55_spill] sm:$0xff] }
 0x838   : > { %v15554_v33 = vpop.eup %15553  ;;  %15573 = vrcp.f32 %v10169_v18  ;;  %v12188_v22 = vmul.f32 -1.442695, %v9919_v61  ;;  %v10354_v5 = vmul.f32 %v15552_v31, %v20915_v51  ;;  %v20932_v18 = vld [vmem:[#allocation46_spill] sm:$0xff] }
 0x839   : > { %v15556_v35 = vpop.eup %15555  ;;  %v10168_v38 = vadd.f32 1.0, %v15554_v33  ;;  %15575 = vpow2.f32 %v12185_v63  ;;  %v12187_v57 = vmul.f32 -1.442695, %v9914_v6  ;;  %14472 = vmatmul.mubr.msk.f32.gmra.mrb[246].mxu0 %vm1081_vm0, %v10353_v0  ;;  %v20931_v63 = vmax.f32 %v20930_v17, 0.0  ;;  %v20934_v6 = vld [vmem:[#allocation50_spill] sm:$0xff]  ;;  %v20936_v33 = vld [vmem:[#allocation49_spill] sm:$0xff] }
 0x83a   : > { %v15558_v30 = vpop.eup %15557  ;;  %v10171_v16 = vadd.f32 1.0, %v15556_v35  ;;  %15577 = vpow2.f32 %v12188_v22  ;;  %14474 = vmatprep.mubr.msk.f32.mxu0 %vm1081_vm0, %v10354_v5  ;;  %v20933_v61 = vmax.f32 %v20932_v18, 0.0  ;;  %v20935_v44 = vmax.f32 %v20934_v6, 0.0  ;;  %v20938_v5 = vld [vmem:[#allocation53_spill] sm:$0xff] }
 0x83b   : > { %v15560_v27 = vpop.eup %15559  ;;  %15579 = vrcp.f32 %v10168_v38  ;;  %v10357_v21 = vmul.f32 %v15558_v30, %v20921_v8  ;;  %v20937_v22 = vmax.f32 %v20936_v33, 0.0  ;;  %v20939_v35 = vmax.f32 %v20938_v5, 0.0  ;;  %v20940_v30 = vld [vmem:[#allocation52_spill] sm:$0xff] }
 0x83c   : > { %v15562_v24 = vpop.eup %15561  ;;  %v10356_v1 = vmul.f32 %v15560_v27, %v20919_v28  ;;  %15581 = vpow2.f32 %v12187_v57  ;;  %v20945_v28 = vmax.f32 %v20944_v41, 0.0 }
 0x83d   : > { %v15564_v40 = vpop.eup %15563  ;;  %v10170_v52 = vadd.f32 1.0, %v15562_v24  ;;  %14475 = vmatmul.mubr.msk.f32.gmra.mrb[248].mxu0 %vm1081_vm0, %v10355_v36  ;;  %15583 = vrcp.f32 %v10171_v16  ;;  %v20941_v16 = vmax.f32 %v20940_v30, 0.0  ;;  %v20943_v36 = vmax.f32 %v20942_v2, 0.0 }
 0x83e   : > { %v15566_v46 = vpop.eup %15565  ;;  %14477 = vmatprep.mubr.msk.f32.mxu0 %vm1081_vm0, %v10356_v1  ;;  %v10359_v10 = vmul.f32 %v15564_v40, %v20925_v47  ;;  %v19724_v40 = vld [vmem:[%s20946_s15] ss:$0 sm:$0xff]  ;;  %s20981_s15 = sld [smem:[#allocation80_spill]] }
 0x83f   : > { %v15568_v48 = vpop.eup %15567  ;;  %15585 = vrcp.f32 %v10170_v52  ;;  %v10173_v25 = vadd.f32 1.0, %v15566_v46 }
 0x840   : > { %v15570_v56 = vpop.eup %15569  ;;  %v10172_v7 = vadd.f32 1.0, %v15568_v48 }
 0x841   : > { %v15572_v26 = vpop.eup %15571  ;;  %15587 = vrcp.f32 %v10173_v25  ;;  %v10175_v3 = vadd.f32 1.0, %v15570_v56  ;;  %14478 = vmatmul.mubr.msk.f32.gmra.mrb[250].mxu0 %vm1081_vm0, %v10357_v21 }
 0x842   : > { %v15574_v53 = vpop.eup %15573  ;;  %15589 = vrcp.f32 %v10172_v7  ;;  %v10358_v43 = vmul.f32 %v15572_v26, %v20923_v15 }
 0x843   : > { %v15576_v59 = vpop.eup %15575  ;;  %15591 = vrcp.f32 %v10175_v3  ;;  %v10361_v58 = vmul.f32 %v15574_v53, %v20929_v9 }
 0x844   : > { %v15578_v14 = vpop.eup %15577  ;;  %v10174_v37 = vadd.f32 1.0, %v15576_v59  ;;  %14480 = vmatprep.mubr.msk.f32.mxu0 %vm1081_vm0, %v10358_v43  ;;  %s20385_s30 = scalar_lea.hbm %s20981_s15, %s12265_s23 }
 0x845   : > { %v15580_v32 = vpop.eup %15579  ;;  %v10177_v42 = vadd.f32 1.0, %v15578_v14  ;;  %14481 = vmatmul.mubr.msk.f32.gmra.mrb[252].mxu0 %vm1081_vm0, %v10359_v10 }
 0x846   : > { %15593 = vrcp.f32 %v10174_v37  ;;  %v10360_v54 = vmul.f32 %v15580_v32, %v20927_v11  ;;  %v15582_v20 = vpop.eup %15581 }
 0x847   : > { %v15584_v4 = vpop.eup %15583  ;;  %v10176_v29 = vadd.f32 1.0, %v15582_v20  ;;  %15595 = vrcp.f32 %v10177_v42 }
 0x848   : > { %14483 = vmatprep.mubr.msk.f32.mxu0 %vm1081_vm0, %v10360_v54  ;;  %v10363_v45 = vmul.f32 %v15584_v4, %v20933_v61 }
 0x849   : > { %v15586_v39 = vpop.eup %15585  ;;  %14484 = vmatmul.mubr.msk.f32.gmra.mrb[254].mxu0 %vm1081_vm0, %v10361_v58  ;;  %15597 = vrcp.f32 %v10176_v29 }
 0x84a   : > { %v10362_v55 = vmul.f32 %v15586_v39, %v20931_v63 }
 0x84b   : > { %v15588_v60 = vpop.eup %15587 }
 0x84c   : > { %v15590_v31 = vpop.eup %15589  ;;  %14486 = vmatprep.mubr.msk.f32.mxu0 %vm1081_vm0, %v10362_v55  ;;  %v10365_v50 = vmul.f32 %v15588_v60, %v20937_v22 }
 0x84d   : > { %14487 = vmatmul.mubr.msk.f32.gmra.mrb[0].mxu0 %vm1081_vm0, %v10363_v45  ;;  %v10364_v12 = vmul.f32 %v15590_v31, %v20935_v44  ;;  %v15592_v0 = vpop.eup %15591 }
 0x84e   : > { %v10367_v27 = vmul.f32 %v15592_v0, %v20941_v16 }
 0x84f   : > { %14489 = vmatprep.mubr.msk.f32.mxu0 %vm1081_vm0, %v10364_v12 }
 0x850   : > { %v15594_v51 = vpop.eup %15593 }
 0x851   : > { %14490 = vmatmul.mubr.msk.f32.gmra.mrb[2].mxu0 %vm1081_vm0, %v10365_v50  ;;  %v10366_v38 = vmul.f32 %v15594_v51, %v20939_v35  ;;  %v15596_v57 = vpop.eup %15595 }
 0x852   : > { %v10369_v1 = vmul.f32 %v15596_v57, %v20945_v28 }
 0x853   : > { %14492 = vmatprep.mubr.msk.f32.mxu0 %vm1081_vm0, %v10366_v38  ;;  %v15598_v62 = vpop.eup %15597 }
 0x854   : > { %v10368_v24 = vmul.f32 %v15598_v62, %v20943_v36 }
 0x855   : > { %14493 = vmatmul.mubr.msk.f32.gmra.mrb[4].mxu0 %vm1081_vm0, %v10367_v27 }
 0x856   : > { %14495 = vmatprep.mubr.msk.f32.mxu0 %vm1081_vm0, %v10368_v24 }
 0x859   : > { %14496 = vmatmul.mubr.msk.f32.gmra.mrb[6].mxu0 %vm1081_vm0, %v10369_v1 }
 0x8ad   : > { %v14404_v52 = vpop.f32.mrb[200].mxu0 }
 0x8ae   : > { %v10639_v46 = vpop.f32.mrb[201].mxu0  ;;  %v19727_v48 = vadd.f32 %v14404_v52, %v19724_v40 }
 0x8af   : > { %v19730_v25 = vadd.f32 %v19724_v40, %v10639_v46 }
 0x8b1   : > { %v14407_v19 = vpop.f32.mrb[202].mxu0  ;;  %v10958_v21 = vadd.f32 %v19727_v48, %v19730_v25 }
 0x8b2   : > { %v10649_v8 = vpop.f32.mrb[203].mxu0  ;;  %v19738_v7 = vadd.f32 %v14407_v19, %v19724_v40 }
 0x8b3   : > { %v19735_v56 = vadd.f32 %v19724_v40, %v10649_v8 }
 0x8b5   : > { %v10959_v26 = vadd.f32 %v10958_v21, %v19735_v56  ;;  %v14410_v3 = vpop.f32.mrb[204].mxu0 }
 0x8b6   : > { %v10659_v53 = vpop.f32.mrb[205].mxu0  ;;  %v19746_v43 = vadd.f32 %v14410_v3, %v19724_v40 }
 0x8b7   : > { %v19742_v49 = vadd.f32 %v19724_v40, %v10659_v53  ;;  %v10960_v15 = vadd.f32 %v10959_v26, %v19738_v7 }
 0x8b9   : > { %v10961_v59 = vadd.f32 %v10960_v15, %v19742_v49 }
 0x8bb   : > { %v14413_v13 = vpop.f32.mrb[206].mxu0  ;;  %v10962_v47 = vadd.f32 %v10961_v59, %v19746_v43 }
 0x8bc   : > { %v10669_v10 = vpop.f32.mrb[207].mxu0  ;;  %v19754_v37 = vadd.f32 %v14413_v13, %v19724_v40 }
 0x8bd   : > { %v19751_v14 = vadd.f32 %v19724_v40, %v10669_v10 }
 0x8bf   : > { %v10963_v32 = vadd.f32 %v10962_v47, %v19751_v14  ;;  %v14416_v42 = vpop.f32.mrb[208].mxu0 }
 0x8c0   : > { %v10679_v34 = vpop.f32.mrb[209].mxu0  ;;  %v19762_v20 = vadd.f32 %v14416_v42, %v19724_v40 }
 0x8c1   : > { %v19758_v11 = vadd.f32 %v19724_v40, %v10679_v34  ;;  %v10964_v54 = vadd.f32 %v10963_v32, %v19754_v37 }
 0x8c3   : > { %v10965_v23 = vadd.f32 %v10964_v54, %v19758_v11  ;;  %v14419_v9 = vpop.f32.mrb[210].mxu0 }
 0x8c4   : > { %v10689_v58 = vpop.f32.mrb[211].mxu0  ;;  %v19770_v39 = vadd.f32 %v14419_v9, %v19724_v40 }
 0x8c5   : > { %v19766_v4 = vadd.f32 %v19724_v40, %v10689_v58  ;;  %v10966_v29 = vadd.f32 %v10965_v23, %v19762_v20 }
 0x8c7   : > { %v10967_v17 = vadd.f32 %v10966_v29, %v19766_v4  ;;  %v14422_v63 = vpop.f32.mrb[212].mxu0 }
 0x8c8   : > { %v10699_v55 = vpop.f32.mrb[213].mxu0  ;;  %v19778_v61 = vadd.f32 %v14422_v63, %v19724_v40 }
 0x8c9   : > { %v19774_v60 = vadd.f32 %v19724_v40, %v10699_v55  ;;  %v10968_v18 = vadd.f32 %v10967_v17, %v19770_v39 }
 0x8cb   : > { %v10969_v45 = vadd.f32 %v10968_v18, %v19774_v60  ;;  %v14425_v31 = vpop.f32.mrb[214].mxu0 }
 0x8cc   : > { %v10709_v6 = vpop.f32.mrb[215].mxu0  ;;  %v19786_v0 = vadd.f32 %v14425_v31, %v19724_v40 }
 0x8cd   : > { %v19782_v44 = vadd.f32 %v19724_v40, %v10709_v6  ;;  %v10970_v12 = vadd.f32 %v10969_v45, %v19778_v61 }
 0x8cf   : > { %v10971_v33 = vadd.f32 %v10970_v12, %v19782_v44  ;;  %v14428_v22 = vpop.f32.mrb[216].mxu0 }
 0x8d0   : > { %v10719_v50 = vpop.f32.mrb[217].mxu0  ;;  %v19794_v35 = vadd.f32 %v14428_v22, %v19724_v40 }
 0x8d1   : > { %v19790_v51 = vadd.f32 %v19724_v40, %v10719_v50  ;;  %v10972_v5 = vadd.f32 %v10971_v33, %v19786_v0 }
 0x8d3   : > { %v10973_v38 = vadd.f32 %v10972_v5, %v19790_v51 }
 0x8d4   : > { %v14431_v57 = vpop.f32.mrb[218].mxu0 }
 0x8d5   : > { %v10729_v30 = vpop.f32.mrb[219].mxu0  ;;  %v10974_v16 = vadd.f32 %v10973_v38, %v19794_v35  ;;  %v19802_v62 = vadd.f32 %v14431_v57, %v19724_v40 }
 0x8d6   : > { %v19799_v27 = vadd.f32 %v19724_v40, %v10729_v30 }
 0x8d8   : > { %v10975_v2 = vadd.f32 %v10974_v16, %v19799_v27  ;;  %v14434_v36 = vpop.f32.mrb[220].mxu0 }
 0x8d9   : > { %v10739_v24 = vpop.f32.mrb[221].mxu0  ;;  %v19810_v1 = vadd.f32 %v14434_v36, %v19724_v40 }
 0x8da   : > { %v19806_v41 = vadd.f32 %v19724_v40, %v10739_v24  ;;  %v10976_v28 = vadd.f32 %v10975_v2, %v19802_v62 }
 0x8dc   : > { %v10977_v52 = vadd.f32 %v10976_v28, %v19806_v41  ;;  %v14437_v46 = vpop.f32.mrb[222].mxu0 }
 0x8dd   : > { %v10749_v19 = vpop.f32.mrb[223].mxu0  ;;  %v19818_v26 = vadd.f32 %v14437_v46, %v19724_v40 }
 0x8de   : > { %v19814_v8 = vadd.f32 %v19724_v40, %v10749_v19  ;;  %v10978_v21 = vadd.f32 %v10977_v52, %v19810_v1 }
 0x8e0   : > { %v10979_v3 = vadd.f32 %v10978_v21, %v19814_v8  ;;  %v14440_v53 = vpop.f32.mrb[224].mxu0 }
 0x8e1   : > { %v10759_v15 = vpop.f32.mrb[225].mxu0  ;;  %v19826_v47 = vadd.f32 %v14440_v53, %v19724_v40 }
 0x8e2   : > { %v19822_v59 = vadd.f32 %v19724_v40, %v10759_v15  ;;  %v10980_v13 = vadd.f32 %v10979_v3, %v19818_v26 }
 0x8e4   : > { %v10981_v10 = vadd.f32 %v10980_v13, %v19822_v59  ;;  %v14443_v32 = vpop.f32.mrb[226].mxu0 }
 0x8e5   : > { %v10769_v42 = vpop.f32.mrb[227].mxu0  ;;  %v19834_v23 = vadd.f32 %v14443_v32, %v19724_v40 }
 0x8e6   : > { %v19830_v34 = vadd.f32 %v19724_v40, %v10769_v42  ;;  %v10982_v54 = vadd.f32 %v10981_v10, %v19826_v47 }
 0x8e8   : > { %v10983_v9 = vadd.f32 %v10982_v54, %v19830_v34  ;;  %v14446_v58 = vpop.f32.mrb[228].mxu0 }
 0x8e9   : > { %v10779_v29 = vpop.f32.mrb[229].mxu0  ;;  %v19842_v55 = vadd.f32 %v14446_v58, %v19724_v40 }
 0x8ea   : > { %v19838_v17 = vadd.f32 %v19724_v40, %v10779_v29  ;;  %v10984_v63 = vadd.f32 %v10983_v9, %v19834_v23 }
 0x8ec   : > { %v10985_v18 = vadd.f32 %v10984_v63, %v19838_v17  ;;  %v14449_v45 = vpop.f32.mrb[230].mxu0 }
 0x8ed   : > { %v10789_v31 = vpop.f32.mrb[231].mxu0  ;;  %v19850_v33 = vadd.f32 %v14449_v45, %v19724_v40  ;;  %v19884_v45 = vld [vmem:[%s20947_s26] sm:$0xff] }
 0x8ee   : > { %v19846_v6 = vadd.f32 %v19724_v40, %v10789_v31  ;;  %v10986_v12 = vadd.f32 %v10985_v18, %v19842_v55 }
 0x8f0   : > { %v10987_v22 = vadd.f32 %v10986_v12, %v19846_v6  ;;  %v14452_v50 = vpop.f32.mrb[232].mxu0 }
 0x8f1   : > { %v10799_v5 = vpop.f32.mrb[233].mxu0  ;;  %v19855_v57 = vadd.f32 %v14452_v50, %v19724_v40 }
 0x8f2   : > { %v10988_v38 = vadd.f32 %v10987_v22, %v19850_v33  ;;  %v19858_v30 = vadd.f32 %v19724_v40, %v10799_v5 }
 0x8f4   : > { %v10989_v16 = vrot.slane %v10988_v38, 4  ;;  %v14455_v2 = vpop.f32.mrb[234].mxu0  ;;  %v10995_v24 = vadd.f32 %v19855_v57, %v19858_v30 }
 0x8f5   : > { %v10809_v36 = vpop.f32.mrb[235].mxu0  ;;  %v19866_v46 = vadd.f32 %v14455_v2, %v19724_v40 }
 0x8f6   : > { %v19863_v28 = vadd.f32 %v19724_v40, %v10809_v36  ;;  %v10990_v52 = vadd.f32 %v10989_v16, %v10988_v38 }
 0x8f8   : > { %v10996_v19 = vadd.f32 %v10995_v24, %v19863_v28  ;;  %v14458_v21 = vpop.f32.mrb[236].mxu0  ;;  %v10991_v3 = vrot.slane %v10990_v52, 2 }
 0x8f9   : > { %v10819_v53 = vpop.f32.mrb[237].mxu0  ;;  %v19874_v32 = vadd.f32 %v14458_v21, %v19724_v40 }
 0x8fa   : > { %v19870_v15 = vadd.f32 %v19724_v40, %v10819_v53  ;;  %v10997_v13 = vadd.f32 %v10996_v19, %v19866_v46  ;;  %v10992_v10 = vadd.f32 %v10991_v3, %v10990_v52 }
 0x8fc   : > { %v10998_v42 = vadd.f32 %v10997_v13, %v19870_v15  ;;  %v14461_v54 = vpop.f32.mrb[238].mxu0  ;;  %v10993_v9 = vrot.slane %v10992_v10, 1 }
 0x8fd   : > { %v10829_v58 = vpop.f32.mrb[239].mxu0  ;;  %v19887_v31 = vadd.f32 %v14461_v54, %v19724_v40 }
 0x8fe   : > { %v19878_v29 = vadd.f32 %v19724_v40, %v10829_v58  ;;  %v10999_v63 = vadd.f32 %v10998_v42, %v19874_v32  ;;  %v10994_v18 = vadd.f32 %v10993_v9, %v10992_v10 }
 0x900   : > { %v11000_v12 = vadd.f32 %v10999_v63, %v19878_v29  ;;  %v14464_v22 = vpop.f32.mrb[240].mxu0  ;;  %v11033_v50 = vmul.f32 0.00390625, %v10994_v18 }
 0x901   : > { %v10839_v5 = vpop.f32.mrb[241].mxu0  ;;  %v19896_v36 = vadd.f32 %v14464_v22, %v19724_v40 }
 0x902   : > { %v19891_v38 = vadd.f32 %v19724_v40, %v10839_v5  ;;  %v11001_v16 = vadd.f32 %v11000_v12, %v19887_v31  ;;  %v11036_v2 = vmul.f32 %v19884_v45, %v11033_v50 }
 0x904   : > { %v11002_v24 = vadd.f32 %v11001_v16, %v19891_v38  ;;  %v14467_v52 = vpop.f32.mrb[242].mxu0  ;;  %11038 = vadd.xlane.f32.xlu0 %v11036_v2 }
 0x905   : > { %v10849_v19 = vpop.f32.mrb[243].mxu0  ;;  %v19904_v53 = vadd.f32 %v14467_v52, %v19724_v40 }
 0x906   : > { %v19900_v21 = vadd.f32 %v19724_v40, %v10849_v19  ;;  %v11003_v3 = vadd.f32 %v11002_v24, %v19896_v36 }
 0x908   : > { %v11004_v13 = vadd.f32 %v11003_v3, %v19900_v21  ;;  %v14470_v10 = vpop.f32.mrb[244].mxu0 }
 0x909   : > { %v10859_v42 = vpop.f32.mrb[245].mxu0  ;;  %v19912_v58 = vadd.f32 %v14470_v10, %v19724_v40 }
 0x90a   : > { %v19908_v54 = vadd.f32 %v19724_v40, %v10859_v42  ;;  %v11005_v9 = vadd.f32 %v11004_v13, %v19904_v53 }
 0x90b   : > { %20948 = vst [vmem:[#allocation51_spill] sm:$0xff] %v19912_v58 }
 0x90c   : > { %v11006_v63 = vadd.f32 %v11005_v9, %v19908_v54  ;;  %v14473_v18 = vpop.f32.mrb[246].mxu0 }
 0x90d   : > { %v10869_v12 = vpop.f32.mrb[247].mxu0  ;;  %v19920_v5 = vadd.f32 %v14473_v18, %v19724_v40 }
 0x90e   : > { %v19916_v22 = vadd.f32 %v19724_v40, %v10869_v12  ;;  %v11007_v50 = vadd.f32 %v11006_v63, %v19912_v58 }
 0x90f   : > { %20950 = vst [vmem:[#allocation57_spill] sm:$0xff] %v19920_v5 }
 0x910   : > { %20949 = vst [vmem:[#allocation47_spill] sm:$0xff] %v19916_v22  ;;  %v11008_v16 = vadd.f32 %v11007_v50, %v19916_v22  ;;  %v14476_v2 = vpop.f32.mrb[248].mxu0 }
 0x911   : > { %v10879_v24 = vpop.f32.mrb[249].mxu0  ;;  %v19928_v3 = vadd.f32 %v14476_v2, %v19724_v40 }
 0x912   : > { %v19924_v52 = vadd.f32 %v19724_v40, %v10879_v24  ;;  %v11009_v19 = vadd.f32 %v11008_v16, %v19920_v5 }
 0x913   : > { %20952 = vst [vmem:[#allocation22_spill] sm:$0xff] %v19928_v3 }
 0x914   : > { %20951 = vst [vmem:[#allocation56_spill] sm:$0xff] %v19924_v52  ;;  %v11010_v13 = vadd.f32 %v11009_v19, %v19924_v52  ;;  %v14479_v10 = vpop.f32.mrb[250].mxu0 }
 0x915   : > { %v10889_v42 = vpop.f32.mrb[251].mxu0  ;;  %v19936_v18 = vadd.f32 %v14479_v10, %v19724_v40 }
 0x916   : > { %v19932_v9 = vadd.f32 %v19724_v40, %v10889_v42  ;;  %v11011_v63 = vadd.f32 %v11010_v13, %v19928_v3 }
 0x917   : > { %20954 = vst [vmem:[#allocation16_spill] sm:$0xff] %v19936_v18 }
 0x918   : > { %20953 = vst [vmem:[#allocation21_spill] sm:$0xff] %v19932_v9  ;;  %v11012_v12 = vadd.f32 %v11011_v63, %v19932_v9  ;;  %v14482_v50 = vpop.f32.mrb[252].mxu0 }
 0x919   : > { %v10899_v24 = vpop.f32.mrb[253].mxu0  ;;  %v19944_v19 = vadd.f32 %v14482_v50, %v19724_v40 }
 0x91a   : > { %v19940_v16 = vadd.f32 %v19724_v40, %v10899_v24  ;;  %v11013_v2 = vadd.f32 %v11012_v12, %v19936_v18 }
 0x91b   : > { %20956 = vst [vmem:[#allocation18_spill] sm:$0xff] %v19944_v19 }
 0x91c   : > { %20955 = vst [vmem:[#allocation15_spill] sm:$0xff] %v19940_v16  ;;  %v11014_v42 = vadd.f32 %v11013_v2, %v19940_v16  ;;  %v14485_v52 = vpop.f32.mrb[254].mxu0 }
 0x91d   : > { %v10909_v5 = vpop.f32.mrb[255].mxu0  ;;  %v19952_v63 = vadd.f32 %v14485_v52, %v19724_v40 }
 0x91e   : > { %v19948_v13 = vadd.f32 %v19724_v40, %v10909_v5  ;;  %v11015_v10 = vadd.f32 %v11014_v42, %v19944_v19 }
 0x91f   : > { %20958 = vst [vmem:[#allocation20_spill] sm:$0xff] %v19952_v63 }
 0x920   : > { %20957 = vst [vmem:[#allocation17_spill] sm:$0xff] %v19948_v13  ;;  %v11016_v24 = vadd.f32 %v11015_v10, %v19948_v13  ;;  %v14488_v9 = vpop.f32.mrb[0].mxu0 }
 0x921   : > { %v10919_v3 = vpop.f32.mrb[1].mxu0  ;;  %v19960_v2 = vadd.f32 %v14488_v9, %v19724_v40 }
 0x922   : > { %v19956_v12 = vadd.f32 %v19724_v40, %v10919_v3  ;;  %v11017_v50 = vadd.f32 %v11016_v24, %v19952_v63 }
 0x923   : > { %20960 = vst [vmem:[#allocation24_spill] sm:$0xff] %v19960_v2 }
 0x924   : > { %20959 = vst [vmem:[#allocation19_spill] sm:$0xff] %v19956_v12  ;;  %v11018_v5 = vadd.f32 %v11017_v50, %v19956_v12  ;;  %v14491_v16 = vpop.f32.mrb[2].mxu0 }
 0x925   : > { %v10929_v18 = vpop.f32.mrb[3].mxu0  ;;  %v19968_v10 = vadd.f32 %v14491_v16, %v19724_v40 }
 0x926   : > { %v19964_v42 = vadd.f32 %v19724_v40, %v10929_v18  ;;  %v11019_v52 = vadd.f32 %v11018_v5, %v19960_v2 }
 0x927   : > { %20962 = vst [vmem:[#allocation26_spill] sm:$0xff] %v19968_v10 }
 0x928   : > { %20961 = vst [vmem:[#allocation23_spill] sm:$0xff] %v19964_v42  ;;  %v11020_v3 = vadd.f32 %v11019_v52, %v19964_v42  ;;  %v14494_v13 = vpop.f32.mrb[4].mxu0 }
 0x929   : > { %v10939_v19 = vpop.f32.mrb[5].mxu0  ;;  %v19976_v50 = vadd.f32 %v14494_v13, %v19724_v40 }
 0x92a   : > { %v19972_v24 = vadd.f32 %v19724_v40, %v10939_v19  ;;  %v11021_v9 = vadd.f32 %v11020_v3, %v19968_v10 }
 0x92c   : > { %20963 = vst [vmem:[#allocation25_spill] sm:$0xff] %v19972_v24  ;;  %v11022_v18 = vadd.f32 %v11021_v9, %v19972_v24  ;;  %v14497_v12 = vpop.f32.mrb[6].mxu0 }
 0x92d   : > { %v10949_v63 = vpop.f32.mrb[7].mxu0  ;;  %v19984_v52 = vadd.f32 %v14497_v12, %v19724_v40 }
 0x92e   : > { %v19980_v5 = vadd.f32 %v19724_v40, %v10949_v63  ;;  %v11023_v16 = vadd.f32 %v11022_v18, %v19976_v50  ;;  %v19992_v63 = vld [vmem:[%s20964_s16] sm:$0xff]  ;;  %s15764_s16 = scalar_lea.vmem %s15763_s18, 16384 }
 0x930   : > { %v11024_v19 = vadd.f32 %v11023_v16, %v19980_v5 }
 0x932   : > { %v11025_v42 = vadd.f32 %v11024_v19, %v19984_v52 }
 0x934   : > { %v11026_v3 = vrot.slane %v11025_v42, 4 }
 0x936   : > { %v11027_v10 = vadd.f32 %v11026_v3, %v11025_v42 }
 0x938   : > { %v11028_v13 = vrot.slane %v11027_v10, 2 }
 0x93a   : > { %v11029_v2 = vadd.f32 %v11028_v13, %v11027_v10 }
 0x93c   : > { %v11030_v22 = vrot.slane %v11029_v2, 1 }
 0x93e   : > { %v11031_v9 = vadd.f32 %v11030_v22, %v11029_v2 }
 0x940   : > { %v11034_v24 = vmul.f32 0.00390625, %v11031_v9 }
 0x942   : > { %v11037_v58 = vmul.f32 %v19884_v45, %v11034_v24 }
 0x944   : > { %11040 = vadd.xlane.f32.xlu0 %v11037_v58 }
 0x991   : > { %v11039_v40 = vpop.xlane.xlu0 %11038 }
 0x992   : > { %v11042_v12 = vmax.f32 %v11039_v40, 0.0 }
 0x994   : > { %v11045_v18 = vmul.f32 %v19992_v63, %v11042_v12 }
 0x996   : > { %v11047_v16 = vrot.slane %v11045_v18, 4 }
 0x998   : > { %v11048_v19 = vadd.f32 %v11047_v16, %v11045_v18 }
 0x99a   : > { %v11049_v42 = vrot.slane %v11048_v19, 2 }
 0x99c   : > { %v11050_v3 = vadd.f32 %v11049_v42, %v11048_v19 }
 0x99e   : > { %v11051_v10 = vrot.slane %v11050_v3, 1 }
 0x9a0   : > { %v11052_v13 = vadd.f32 %v11051_v10, %v11050_v3 }
 0x9a2   : > { %v12254_v22 = vmul.f32 -1.442695, %v11052_v13  ;;  %v15613_v13 = vld [vmem:[%s16107_s29 + $0x28] sm:$0xff] }
 0x9a4   : > { %15599 = vpow2.f32 %v12254_v22 }
 0x9ae   : > { %v15600_v2 = vpop.eup %15599 }
 0x9af   : > { %v11065_v45 = vadd.f32 1.0, %v15600_v2  ;;  %v15614_v2 = vld [vmem:[%s16107_s29 + $0x30] sm:$0xff] }
 0x9b1   : > { %15601 = vrcp.f32 %v11065_v45 }
 0x9bb   : > { %v15602_v58 = vpop.eup %15601 }
 0x9bc   : > { %v11071_v24 = vmul.f32 %v15602_v58, %v19730_v25  ;;  %v11072_v9 = vmul.f32 %v15602_v58, %v19727_v48  ;;  %v11073_v40 = vmul.f32 %v15602_v58, %v19735_v56  ;;  %v11074_v12 = vmul.f32 %v15602_v58, %v19738_v7 }
 0x9bd   : > { %v11075_v18 = vmul.f32 %v15602_v58, %v19742_v49  ;;  %v11076_v16 = vmul.f32 %v15602_v58, %v19746_v43  ;;  %v11077_v19 = vmul.f32 %v15602_v58, %v19751_v14  ;;  %v11078_v42 = vmul.f32 %v15602_v58, %v19754_v37 }
 0x9be   : > { %v11079_v3 = vmul.f32 %v15602_v58, %v19758_v11  ;;  %v11080_v10 = vmul.f32 %v15602_v58, %v19762_v20  ;;  %v11081_v25 = vmul.f32 %v15602_v58, %v19766_v4  ;;  %v11082_v48 = vmul.f32 %v15602_v58, %v19770_v39 }
 0x9bf   : > { %v11083_v56 = vmul.f32 %v15602_v58, %v19774_v60  ;;  %v11084_v7 = vmul.f32 %v15602_v58, %v19778_v61  ;;  %v11085_v49 = vmul.f32 %v15602_v58, %v19782_v44  ;;  %v11086_v43 = vmul.f32 %v15602_v58, %v19786_v0 }
 0x9c0   : > { %v11087_v14 = vmul.f32 %v15602_v58, %v19790_v51  ;;  %v11088_v37 = vmul.f32 %v15602_v58, %v19794_v35  ;;  %v11089_v11 = vmul.f32 %v15602_v58, %v19799_v27  ;;  %v11090_v20 = vmul.f32 %v15602_v58, %v19802_v62 }
 0x9c1   : > { %v11091_v4 = vmul.f32 %v15602_v58, %v19806_v41  ;;  %v11092_v39 = vmul.f32 %v15602_v58, %v19810_v1  ;;  %v11093_v60 = vmul.f32 %v15602_v58, %v19814_v8  ;;  %v11094_v61 = vmul.f32 %v15602_v58, %v19818_v26  ;;  %v15608_v8 = vld [vmem:[%s16107_s29] sm:$0xff] }
 0x9c2   : > { %v11095_v44 = vmul.f32 %v15602_v58, %v19822_v59  ;;  %v11096_v0 = vmul.f32 %v15602_v58, %v19826_v47  ;;  %v11097_v51 = vmul.f32 %v15602_v58, %v19830_v34  ;;  %v11098_v35 = vmul.f32 %v15602_v58, %v19834_v23  ;;  %v15609_v59 = vld [vmem:[%s16107_s29 + $0x8] sm:$0xff]  ;;  %v15610_v34 = vld [vmem:[%s16107_s29 + $0x10] sm:$0xff] }
 0x9c3   : > { %v11099_v27 = vmul.f32 %v15602_v58, %v19838_v17  ;;  %v11100_v62 = vmul.f32 %v15602_v58, %v19842_v55  ;;  %v20026_v41 = vmul.f32 %v15602_v58, %v19846_v6  ;;  %v20029_v1 = vmul.f32 %v15602_v58, %v19850_v33  ;;  %v15611_v17 = vld [vmem:[%s16107_s29 + $0x18] sm:$0xff]  ;;  %v15612_v6 = vld [vmem:[%s16107_s29 + $0x20] sm:$0xff] }
 0x9c4   : > { %v20032_v26 = vadd.f32 %v15608_v8, %v11071_v24  ;;  %v20035_v47 = vadd.f32 %v15609_v59, %v11072_v9  ;;  %v20038_v23 = vadd.f32 %v15610_v34, %v11073_v40  ;;  %v20041_v55 = vadd.f32 %v15611_v17, %v11074_v12  ;;  %v15615_v58 = vld [vmem:[%s16107_s29 + $0x38] sm:$0xff]  ;;  %v15616_v9 = vld [vmem:[%s16107_s29 + $0x40] sm:$0xff]  ;;  %v15617_v12 = vld [vmem:[%s16107_s29 + $0x48] sm:$0xff] }
 0x9c5   : > { %v20044_v33 = vadd.f32 %v15612_v6, %v11075_v18  ;;  %v20047_v22 = vadd.f32 %v15613_v13, %v11076_v16  ;;  %v20050_v45 = vadd.f32 %v15614_v2, %v11077_v19  ;;  %v20053_v24 = vadd.f32 %v15615_v58, %v11078_v42  ;;  %v15618_v8 = vld [vmem:[%s16107_s29 + $0x50] sm:$0xff]  ;;  %v15619_v59 = vld [vmem:[%s16107_s29 + $0x58] sm:$0xff]  ;;  %v15620_v34 = vld [vmem:[%s16107_s29 + $0x60] sm:$0xff] }
 0x9c6   : > { %v20056_v40 = vadd.f32 %v15616_v9, %v11079_v3  ;;  %v20059_v18 = vadd.f32 %v15617_v12, %v11080_v10  ;;  %v20062_v16 = vadd.f32 %v15618_v8, %v11081_v25  ;;  %v20065_v19 = vadd.f32 %v15619_v59, %v11082_v48  ;;  %v15621_v17 = vld [vmem:[%s16107_s29 + $0x68] sm:$0xff]  ;;  %v15622_v6 = vld [vmem:[%s16107_s29 + $0x70] sm:$0xff]  ;;  %v15623_v13 = vld [vmem:[%s16107_s29 + $0x78] sm:$0xff] }
 0x9c7   : > { %v20068_v42 = vadd.f32 %v15620_v34, %v11083_v56  ;;  %v20071_v3 = vadd.f32 %v15621_v17, %v11084_v7  ;;  %v20074_v10 = vadd.f32 %v15622_v6, %v11085_v49  ;;  %v20077_v25 = vadd.f32 %v15623_v13, %v11086_v43  ;;  %v15624_v2 = vld [vmem:[%s16107_s29 + $0x80] sm:$0xff]  ;;  %v15625_v58 = vld [vmem:[%s16107_s29 + $0x88] sm:$0xff]  ;;  %v15626_v9 = vld [vmem:[%s16107_s29 + $0x90] sm:$0xff] }
 0x9c8   : > { %v20080_v48 = vadd.f32 %v15624_v2, %v11087_v14  ;;  %v20083_v56 = vadd.f32 %v15625_v58, %v11088_v37  ;;  %v20086_v7 = vadd.f32 %v15626_v9, %v11089_v11  ;;  %v15627_v12 = vld [vmem:[%s16107_s29 + $0x98] sm:$0xff]  ;;  %v15628_v8 = vld [vmem:[%s16107_s29 + $0xa0] sm:$0xff]  ;;  %v15629_v59 = vld [vmem:[%s16107_s29 + $0xa8] sm:$0xff] }
 0x9c9   : > { %v20089_v49 = vadd.f32 %v15627_v12, %v11090_v20  ;;  %v20092_v43 = vadd.f32 %v15628_v8, %v11091_v4  ;;  %v20095_v14 = vadd.f32 %v15629_v59, %v11092_v39  ;;  %v15630_v34 = vld [vmem:[%s16107_s29 + $0xb0] sm:$0xff]  ;;  %v15631_v17 = vld [vmem:[%s16107_s29 + $0xb8] sm:$0xff]  ;;  %v15632_v6 = vld [vmem:[%s16107_s29 + $0xc0] sm:$0xff] }
 0x9ca   : > { %v20098_v37 = vadd.f32 %v15630_v34, %v11093_v60  ;;  %v20101_v11 = vadd.f32 %v15631_v17, %v11094_v61  ;;  %v20104_v13 = vadd.f32 %v15632_v6, %v11095_v44  ;;  %v15633_v20 = vld [vmem:[%s16107_s29 + $0xc8] sm:$0xff]  ;;  %v15634_v4 = vld [vmem:[%s16107_s29 + $0xd0] sm:$0xff]  ;;  %v15635_v9 = vld [vmem:[%s16107_s29 + $0xd8] sm:$0xff]  ;;  %v11201_v17 = vmax.f32 %v20038_v23, 0.0 }
 0x9cb   : > { %v20107_v2 = vadd.f32 %v15633_v20, %v11096_v0  ;;  %v20110_v58 = vadd.f32 %v15634_v4, %v11097_v51  ;;  %v20113_v39 = vadd.f32 %v15635_v9, %v11098_v35  ;;  %v15636_v12 = vld [vmem:[%s16107_s29 + $0xe0] sm:$0xff]  ;;  %v15637_v60 = vld [vmem:[%s16107_s29 + $0xe8] sm:$0xff]  ;;  %v15638_v61 = vld [vmem:[%s16107_s29 + $0xf0] sm:$0xff]  ;;  %v11199_v51 = vmax.f32 %v20032_v26, 0.0 }
 0x9cc   : > { %v20116_v8 = vadd.f32 %v15636_v12, %v11099_v27  ;;  %v20119_v59 = vadd.f32 %v15637_v60, %v11100_v62  ;;  %v20123_v44 = vadd.f32 %v15638_v61, %v20026_v41  ;;  %v15639_v34 = vld [vmem:[%s16107_s29 + $0xf8] sm:$0xff]  ;;  %v11200_v35 = vmax.f32 %v20035_v47, 0.0  ;;  %11265 = vst [vmem:[%s20143_s28 + $0x10] sm:$0xff] %v11201_v17 }
 0x9cd   : > { %v20127_v0 = vadd.f32 %v15639_v34, %v20029_v1  ;;  %v11202_v27 = vmax.f32 %v20041_v55, 0.0  ;;  %v11203_v62 = vmax.f32 %v20044_v33, 0.0  ;;  %v11204_v6 = vmax.f32 %v20047_v22, 0.0  ;;  %11263 = vst [vmem:[%s20143_s28] sm:$0xff] %v11199_v51 }
 0x9ce   : > { %v11205_v20 = vmax.f32 %v20050_v45, 0.0  ;;  %v11206_v41 = vmax.f32 %v20053_v24, 0.0  ;;  %v11207_v4 = vmax.f32 %v20056_v40, 0.0  ;;  %v11208_v1 = vmax.f32 %v20059_v18, 0.0  ;;  %11264 = vst [vmem:[%s20143_s28 + $0x8] sm:$0xff] %v11200_v35 }
 0x9cf   : > { %v11209_v26 = vmax.f32 %v20062_v16, 0.0  ;;  %v11210_v47 = vmax.f32 %v20065_v19, 0.0  ;;  %11266 = vst [vmem:[%s20143_s28 + $0x18] sm:$0xff] %v11202_v27  ;;  %v11211_v23 = vmax.f32 %v20068_v42, 0.0  ;;  %v11212_v55 = vmax.f32 %v20071_v3, 0.0  ;;  %11267 = vst [vmem:[%s20143_s28 + $0x20] sm:$0xff] %v11203_v62 }
 0x9d0   : > { %v11213_v33 = vmax.f32 %v20074_v10, 0.0  ;;  %v11214_v22 = vmax.f32 %v20077_v25, 0.0  ;;  %11268 = vst [vmem:[%s20143_s28 + $0x28] sm:$0xff] %v11204_v6  ;;  %11269 = vst [vmem:[%s20143_s28 + $0x30] sm:$0xff] %v11205_v20  ;;  %v11215_v45 = vmax.f32 %v20080_v48, 0.0  ;;  %v11216_v24 = vmax.f32 %v20083_v56, 0.0 }
 0x9d1   : > { %11270 = vst [vmem:[%s20143_s28 + $0x38] sm:$0xff] %v11206_v41  ;;  %v11217_v40 = vmax.f32 %v20086_v7, 0.0  ;;  %v11218_v18 = vmax.f32 %v20089_v49, 0.0  ;;  %11271 = vst [vmem:[%s20143_s28 + $0x40] sm:$0xff] %v11207_v4  ;;  %v11041_v16 = vpop.xlane.xlu0 %11040  ;;  %v11219_v19 = vmax.f32 %v20092_v43, 0.0  ;;  %v11220_v42 = vmax.f32 %v20095_v14, 0.0 }
 0x9d2   : > { %11272 = vst [vmem:[%s20143_s28 + $0x48] sm:$0xff] %v11208_v1  ;;  %11273 = vst [vmem:[%s20143_s28 + $0x50] sm:$0xff] %v11209_v26  ;;  %v11221_v3 = vmax.f32 %v20098_v37, 0.0  ;;  %v11222_v10 = vmax.f32 %v20101_v11, 0.0  ;;  %v11043_v25 = vmax.f32 %v11041_v16, 0.0  ;;  %v11223_v48 = vmax.f32 %v20104_v13, 0.0 }
 0x9d3   : > { %11274 = vst [vmem:[%s20143_s28 + $0x58] sm:$0xff] %v11210_v47  ;;  %11275 = vst [vmem:[%s20143_s28 + $0x60] sm:$0xff] %v11211_v23  ;;  %v11224_v56 = vmax.f32 %v20107_v2, 0.0  ;;  %v11225_v7 = vmax.f32 %v20110_v58, 0.0  ;;  %v11226_v49 = vmax.f32 %v20113_v39, 0.0  ;;  %v11227_v43 = vmax.f32 %v20116_v8, 0.0 }
 0x9d4   : > { %11276 = vst [vmem:[%s20143_s28 + $0x68] sm:$0xff] %v11212_v55  ;;  %11277 = vst [vmem:[%s20143_s28 + $0x70] sm:$0xff] %v11213_v33  ;;  %v11228_v14 = vmax.f32 %v20119_v59, 0.0  ;;  %v11229_v37 = vmax.f32 %v20123_v44, 0.0  ;;  %v11046_v11 = vmul.f32 %v19992_v63, %v11043_v25  ;;  %v11230_v13 = vmax.f32 %v20127_v0, 0.0  ;;  %v20965_v41 = vld [vmem:[#allocation51_spill] sm:$0xff] }
 0x9d5   : > { %11278 = vst [vmem:[%s20143_s28 + $0x78] sm:$0xff] %v11214_v22  ;;  %11279 = vst [vmem:[%s20143_s28 + $0x80] sm:$0xff] %v11215_v45  ;;  %v20966_v4 = vld [vmem:[#allocation47_spill] sm:$0xff]  ;;  %v20967_v1 = vld [vmem:[#allocation57_spill] sm:$0xff] }
 0x9d6   : > { %11280 = vst [vmem:[%s20143_s28 + $0x88] sm:$0xff] %v11216_v24  ;;  %11281 = vst [vmem:[%s20143_s28 + $0x90] sm:$0xff] %v11217_v40  ;;  %v11053_v2 = vrot.slane %v11046_v11, 4  ;;  %v20968_v26 = vld [vmem:[#allocation56_spill] sm:$0xff]  ;;  %v20969_v47 = vld [vmem:[#allocation22_spill] sm:$0xff] }
 0x9d7   : > { %11282 = vst [vmem:[%s20143_s28 + $0x98] sm:$0xff] %v11218_v18  ;;  %11283 = vst [vmem:[%s20143_s28 + $0xa0] sm:$0xff] %v11219_v19  ;;  %v20972_v55 = vld [vmem:[#allocation15_spill] sm:$0xff]  ;;  %v20973_v33 = vld [vmem:[#allocation18_spill] sm:$0xff] }
 0x9d8   : > { %11284 = vst [vmem:[%s20143_s28 + $0xa8] sm:$0xff] %v11220_v42  ;;  %11285 = vst [vmem:[%s20143_s28 + $0xb0] sm:$0xff] %v11221_v3  ;;  %v11054_v58 = vadd.f32 %v11053_v2, %v11046_v11  ;;  %v20974_v22 = vld [vmem:[#allocation17_spill] sm:$0xff]  ;;  %v20975_v24 = vld [vmem:[#allocation20_spill] sm:$0xff] }
 0x9d9   : > { %11286 = vst [vmem:[%s20143_s28 + $0xb8] sm:$0xff] %v11222_v10  ;;  %11287 = vst [vmem:[%s20143_s28 + $0xc0] sm:$0xff] %v11223_v48  ;;  %v20976_v18 = vld [vmem:[#allocation19_spill] sm:$0xff]  ;;  %v20977_v19 = vld [vmem:[#allocation24_spill] sm:$0xff] }
 0x9da   : > { %11288 = vst [vmem:[%s20143_s28 + $0xc8] sm:$0xff] %v11224_v56  ;;  %11289 = vst [vmem:[%s20143_s28 + $0xd0] sm:$0xff] %v11225_v7  ;;  %v11055_v9 = vrot.slane %v11054_v58, 2  ;;  %v20978_v3 = vld [vmem:[#allocation23_spill] sm:$0xff]  ;;  %v20979_v25 = vld [vmem:[#allocation26_spill] sm:$0xff] }
 0x9db   : > { %11290 = vst [vmem:[%s20143_s28 + $0xd8] sm:$0xff] %v11226_v49  ;;  %11291 = vst [vmem:[%s20143_s28 + $0xe0] sm:$0xff] %v11227_v43  ;;  %v20980_v56 = vld [vmem:[#allocation25_spill] sm:$0xff] }
 0x9dc   : > { %11292 = vst [vmem:[%s20143_s28 + $0xe8] sm:$0xff] %v11228_v14  ;;  %11293 = vst [vmem:[%s20143_s28 + $0xf0] sm:$0xff] %v11229_v37  ;;  %v11056_v39 = vadd.f32 %v11055_v9, %v11054_v58  ;;  %v15640_v37 = vld [vmem:[%s16107_s29 + $0x100] sm:$0xff]  ;;  %v15642_v58 = vld [vmem:[%s16107_s29 + $0x110] sm:$0xff] }
 0x9dd   : > { %11294 = vst [vmem:[%s20143_s28 + $0xf8] sm:$0xff] %v11230_v13  ;;  %v15641_v13 = vld [vmem:[%s16107_s29 + $0x108] sm:$0xff] }
 0x9de   : > { %v11057_v12 = vrot.slane %v11056_v39, 1 }
 0x9e0   : > { %v11058_v8 = vadd.f32 %v11057_v12, %v11056_v39  ;;  %v15644_v39 = vld [vmem:[%s16107_s29 + $0x120] sm:$0xff]  ;;  %v15645_v12 = vld [vmem:[%s16107_s29 + $0x128] sm:$0xff] }
 0x9e2   : > { %v12255_v60 = vmul.f32 -1.442695, %v11058_v8 }
 0x9e4   : > { %15603 = vpow2.f32 %v12255_v60  ;;  %v15646_v60 = vld [vmem:[%s16107_s29 + $0x130] sm:$0xff] }
 0x9ee   : > { %v15604_v59 = vpop.eup %15603 }
 0x9ef   : > { %v11066_v63 = vadd.f32 1.0, %v15604_v59 }
 0x9f1   : > { %15605 = vrcp.f32 %v11066_v63  ;;  %v15647_v63 = vld [vmem:[%s16107_s29 + $0x138] sm:$0xff] }
 0x9fb   : > { %v15606_v61 = vpop.eup %15605 }
 0x9fc   : > { %v11103_v44 = vmul.f32 %v15606_v61, %v19858_v30  ;;  %v11104_v34 = vmul.f32 %v15606_v61, %v19855_v57  ;;  %v11105_v0 = vmul.f32 %v15606_v61, %v19863_v28  ;;  %v11106_v51 = vmul.f32 %v15606_v61, %v19866_v46 }
 0x9fd   : > { %v11107_v35 = vmul.f32 %v15606_v61, %v19870_v15  ;;  %v11108_v17 = vmul.f32 %v15606_v61, %v19874_v32  ;;  %v11109_v27 = vmul.f32 %v15606_v61, %v19878_v29  ;;  %v11110_v62 = vmul.f32 %v15606_v61, %v19887_v31 }
 0x9fe   : > { %v11111_v6 = vmul.f32 %v15606_v61, %v19891_v38  ;;  %v11112_v20 = vmul.f32 %v15606_v61, %v19896_v36  ;;  %v11113_v30 = vmul.f32 %v15606_v61, %v19900_v21  ;;  %v11114_v57 = vmul.f32 %v15606_v61, %v19904_v53  ;;  %v20970_v38 = vld [vmem:[#allocation21_spill] sm:$0xff]  ;;  %v20971_v36 = vld [vmem:[#allocation16_spill] sm:$0xff] }
 0x9ff   : > { %v11115_v28 = vmul.f32 %v15606_v61, %v19908_v54  ;;  %v11116_v46 = vmul.f32 %v15606_v61, %v20965_v41  ;;  %v11117_v15 = vmul.f32 %v15606_v61, %v20966_v4  ;;  %v11118_v32 = vmul.f32 %v15606_v61, %v20967_v1  ;;  %v15651_v41 = vld [vmem:[%s16107_s29 + $0x158] sm:$0xff]  ;;  %v15652_v4 = vld [vmem:[%s16107_s29 + $0x160] sm:$0xff]  ;;  %v15653_v1 = vld [vmem:[%s16107_s29 + $0x168] sm:$0xff] }
 0xa00   : > { %v11119_v29 = vmul.f32 %v15606_v61, %v20968_v26  ;;  %v11120_v31 = vmul.f32 %v15606_v61, %v20969_v47  ;;  %v11121_v23 = vmul.f32 %v15606_v61, %v20970_v38  ;;  %v11122_v21 = vmul.f32 %v15606_v61, %v20971_v36  ;;  %v15654_v26 = vld [vmem:[%s16107_s29 + $0x170] sm:$0xff]  ;;  %v15655_v47 = vld [vmem:[%s16107_s29 + $0x178] sm:$0xff]  ;;  %v15656_v38 = vld [vmem:[%s16107_s29 + $0x180] sm:$0xff] }
 0xa01   : > { %v11123_v53 = vmul.f32 %v15606_v61, %v20972_v55  ;;  %v11124_v54 = vmul.f32 %v15606_v61, %v20973_v33  ;;  %v11125_v45 = vmul.f32 %v15606_v61, %v20974_v22  ;;  %v11126_v40 = vmul.f32 %v15606_v61, %v20975_v24  ;;  %v15657_v36 = vld [vmem:[%s16107_s29 + $0x188] sm:$0xff]  ;;  %v15658_v55 = vld [vmem:[%s16107_s29 + $0x190] sm:$0xff]  ;;  %v15659_v33 = vld [vmem:[%s16107_s29 + $0x198] sm:$0xff] }
 0xa02   : > { %v11127_v16 = vmul.f32 %v15606_v61, %v20976_v18  ;;  %v11128_v42 = vmul.f32 %v15606_v61, %v20977_v19  ;;  %v11129_v10 = vmul.f32 %v15606_v61, %v20978_v3  ;;  %v11130_v48 = vmul.f32 %v15606_v61, %v20979_v25  ;;  %v15660_v22 = vld [vmem:[%s16107_s29 + $0x1a0] sm:$0xff]  ;;  %v15661_v24 = vld [vmem:[%s16107_s29 + $0x1a8] sm:$0xff]  ;;  %v15662_v18 = vld [vmem:[%s16107_s29 + $0x1b0] sm:$0xff] }
 0xa03   : > { %v11131_v7 = vmul.f32 %v15606_v61, %v20980_v56  ;;  %v11132_v49 = vmul.f32 %v15606_v61, %v19976_v50  ;;  %v20229_v43 = vmul.f32 %v15606_v61, %v19980_v5  ;;  %v20232_v14 = vmul.f32 %v15606_v61, %v19984_v52  ;;  %v15643_v50 = vld [vmem:[%s16107_s29 + $0x118] sm:$0xff]  ;;  %v15664_v3 = vld [vmem:[%s16107_s29 + $0x1c0] sm:$0xff] }
 0xa04   : > { %v20235_v11 = vadd.f32 %v15640_v37, %v11103_v44  ;;  %v20238_v2 = vadd.f32 %v15641_v13, %v11104_v34  ;;  %v20241_v9 = vadd.f32 %v15642_v58, %v11105_v0  ;;  %v20244_v5 = vadd.f32 %v15643_v50, %v11106_v51  ;;  %v15648_v44 = vld [vmem:[%s16107_s29 + $0x140] sm:$0xff]  ;;  %v15649_v0 = vld [vmem:[%s16107_s29 + $0x148] sm:$0xff]  ;;  %v15663_v19 = vld [vmem:[%s16107_s29 + $0x1b8] sm:$0xff] }
 0xa05   : > { %v20247_v52 = vadd.f32 %v15644_v39, %v11107_v35  ;;  %v20250_v8 = vadd.f32 %v15645_v12, %v11108_v17  ;;  %v20253_v59 = vadd.f32 %v15646_v60, %v11109_v27  ;;  %v20256_v61 = vadd.f32 %v15647_v63, %v11110_v62  ;;  %v15650_v35 = vld [vmem:[%s16107_s29 + $0x150] sm:$0xff]  ;;  %v15667_v13 = vld [vmem:[%s16107_s29 + $0x1d8] sm:$0xff]  ;;  %v15668_v58 = vld [vmem:[%s16107_s29 + $0x1e0] sm:$0xff] }
 0xa06   : > { %v20259_v34 = vadd.f32 %v15648_v44, %v11111_v6  ;;  %v20262_v51 = vadd.f32 %v15649_v0, %v11112_v20  ;;  %v20265_v17 = vadd.f32 %v15650_v35, %v11113_v30  ;;  %v20268_v27 = vadd.f32 %v15651_v41, %v11114_v57 }
 0xa07   : > { %v20271_v62 = vadd.f32 %v15652_v4, %v11115_v28  ;;  %v20274_v6 = vadd.f32 %v15653_v1, %v11116_v46  ;;  %v20277_v20 = vadd.f32 %v15654_v26, %v11117_v15  ;;  %v20280_v30 = vadd.f32 %v15655_v47, %v11118_v32 }
 0xa08   : > { %v20283_v57 = vadd.f32 %v15656_v38, %v11119_v29  ;;  %v20286_v28 = vadd.f32 %v15657_v36, %v11120_v31  ;;  %v20289_v46 = vadd.f32 %v15658_v55, %v11121_v23  ;;  %v20292_v15 = vadd.f32 %v15659_v33, %v11122_v21  ;;  %v15665_v21 = vld [vmem:[%s16107_s29 + $0x1c8] sm:$0xff] }
 0xa09   : > { %v20295_v32 = vadd.f32 %v15660_v22, %v11123_v53  ;;  %v20298_v29 = vadd.f32 %v15661_v24, %v11124_v54  ;;  %v20301_v31 = vadd.f32 %v15662_v18, %v11125_v45  ;;  %v20304_v23 = vadd.f32 %v15663_v19, %v11126_v40  ;;  %v15666_v53 = vld [vmem:[%s16107_s29 + $0x1d0] sm:$0xff]  ;;  %v15669_v45 = vld [vmem:[%s16107_s29 + $0x1e8] sm:$0xff] }
 0xa0a   : > { %v20307_v25 = vadd.f32 %v15664_v3, %v11127_v16  ;;  %v20310_v56 = vadd.f32 %v15665_v21, %v11128_v42  ;;  %v20313_v37 = vadd.f32 %v15666_v53, %v11129_v10  ;;  %v20316_v54 = vadd.f32 %v15667_v13, %v11130_v48  ;;  %v15670_v40 = vld [vmem:[%s16107_s29 + $0x1f0] sm:$0xff]  ;;  %v15671_v42 = vld [vmem:[%s16107_s29 + $0x1f8] sm:$0xff]  ;;  %s11342_s29 = sshll.u32 %s20143_s28, 4  ;;  %s20387_s29 = int_to_ptr.vmem [resolvable:$true] %s11342_s29 }
 0xa0b   : > { %v20319_v50 = vadd.f32 %v15668_v58, %v11131_v7  ;;  %v20322_v39 = vadd.f32 %v15669_v45, %v11132_v49  ;;  %v20326_v16 = vadd.f32 %v15670_v40, %v20229_v43  ;;  %v20330_v10 = vadd.f32 %v15671_v42, %v20232_v14  ;;  %s15758_s26 = scalar_lea.vmem %s20387_s29, 8192  ;;  %p15765_p7 = scmp.lt.s32.totalorder %s20387_s29, %s15763_s18 }
 0xa0c   : > { %v11231_v48 = vmax.f32 %v20235_v11, 0.0  ;;  %v11232_v7 = vmax.f32 %v20238_v2, 0.0  ;;  %v11233_v12 = vmax.f32 %v20241_v9, 0.0  ;;  %v11234_v49 = vmax.f32 %v20244_v5, 0.0  ;;  %p15759_p11 = scmp.ne.s32.totalorder %s20387_s29, %s15758_s26  ;;  %p15766_p9 = scmp.lt.s32.totalorder %s15764_s16, %s15758_s26 }
 0xa0d   : > { %v11235_v60 = vmax.f32 %v20247_v52, 0.0  ;;  %v11236_v43 = vmax.f32 %v20250_v8, 0.0  ;;  %v11237_v63 = vmax.f32 %v20253_v59, 0.0  ;;  %v11238_v14 = vmax.f32 %v20256_v61, 0.0 }
 0xa0e   : > { %v11239_v11 = vmax.f32 %v20259_v34, 0.0  ;;  %v11240_v2 = vmax.f32 %v20262_v51, 0.0  ;;  %v11241_v9 = vmax.f32 %v20265_v17, 0.0  ;;  %v11242_v5 = vmax.f32 %v20268_v27, 0.0  ;;  %11295 = vst [vmem:[%s20143_s28 + $0x100] sm:$0xff] %v11231_v48  ;;  %11296 = vst [vmem:[%s20143_s28 + $0x108] sm:$0xff] %v11232_v7  ;;  %p15760_p2 = pnand %p15759_p11, %p20982_p0  ;;  %p15767_p12 = por %p15766_p9, %p15765_p7 }
 0xa0f   : > { %11297 = vst [vmem:[%s20143_s28 + $0x110] sm:$0xff] %v11233_v12  ;;  %11298 = vst [vmem:[%s20143_s28 + $0x118] sm:$0xff] %v11234_v49  ;;  %v11243_v52 = vmax.f32 %v20271_v62, 0.0  ;;  %v11244_v8 = vmax.f32 %v20274_v6, 0.0  ;;  %v11245_v59 = vmax.f32 %v20277_v20, 0.0  ;;  %v11246_v61 = vmax.f32 %v20280_v30, 0.0 }
 0xa10   : > { %11299 = vst [vmem:[%s20143_s28 + $0x120] sm:$0xff] %v11235_v60  ;;  %11300 = vst [vmem:[%s20143_s28 + $0x128] sm:$0xff] %v11236_v43  ;;  %v11247_v44 = vmax.f32 %v20283_v57, 0.0  ;;  %v11248_v34 = vmax.f32 %v20286_v28, 0.0  ;;  %v11249_v0 = vmax.f32 %v20289_v46, 0.0  ;;  %v11250_v51 = vmax.f32 %v20292_v15, 0.0  ;;  %p15761_p3 = pneg %p15760_p2 }
 0xa11   : > { %11301 = vst [vmem:[%s20143_s28 + $0x130] sm:$0xff] %v11237_v63  ;;  %11302 = vst [vmem:[%s20143_s28 + $0x138] sm:$0xff] %v11238_v14  ;;  %v11251_v35 = vmax.f32 %v20295_v32, 0.0  ;;  %v11252_v17 = vmax.f32 %v20298_v29, 0.0  ;;  %v11253_v41 = vmax.f32 %v20301_v31, 0.0  ;;  %v11254_v27 = vmax.f32 %v20304_v23, 0.0 }
 0xa12   : > { %11303 = vst [vmem:[%s20143_s28 + $0x140] sm:$0xff] %v11239_v11  ;;  %11304 = vst [vmem:[%s20143_s28 + $0x148] sm:$0xff] %v11240_v2  ;;  %v11255_v4 = vmax.f32 %v20307_v25, 0.0  ;;  %v11256_v62 = vmax.f32 %v20310_v56, 0.0  ;;  %v11257_v1 = vmax.f32 %v20313_v37, 0.0  ;;  %v11258_v6 = vmax.f32 %v20316_v54, 0.0  ;;  %p15768_p1 = pnand %p15767_p12, %p15761_p3 }
 0xa13   : > { %11305 = vst [vmem:[%s20143_s28 + $0x150] sm:$0xff] %v11241_v9  ;;  %11306 = vst [vmem:[%s20143_s28 + $0x158] sm:$0xff] %v11242_v5  ;;  %v11259_v26 = vmax.f32 %v20319_v50, 0.0  ;;  %v11260_v20 = vmax.f32 %v20322_v39, 0.0  ;;  %v11261_v47 = vmax.f32 %v20326_v16, 0.0  ;;  %v11262_v30 = vmax.f32 %v20330_v10, 0.0 }
 0xa14   : > { %11307 = vst [vmem:[%s20143_s28 + $0x160] sm:$0xff] %v11243_v52  ;;  %11308 = vst [vmem:[%s20143_s28 + $0x168] sm:$0xff] %v11244_v8 }
 0xa15   : > { %11309 = vst [vmem:[%s20143_s28 + $0x170] sm:$0xff] %v11245_v59  ;;  %11310 = vst [vmem:[%s20143_s28 + $0x178] sm:$0xff] %v11246_v61 }
 0xa16   : > { %11311 = vst [vmem:[%s20143_s28 + $0x180] sm:$0xff] %v11247_v44  ;;  %11312 = vst [vmem:[%s20143_s28 + $0x188] sm:$0xff] %v11248_v34 }
 0xa17   : > { %11313 = vst [vmem:[%s20143_s28 + $0x190] sm:$0xff] %v11249_v0  ;;  %11314 = vst [vmem:[%s20143_s28 + $0x198] sm:$0xff] %v11250_v51 }
 0xa18   : > { %11315 = vst [vmem:[%s20143_s28 + $0x1a0] sm:$0xff] %v11251_v35  ;;  %11316 = vst [vmem:[%s20143_s28 + $0x1a8] sm:$0xff] %v11252_v17 }
 0xa19   : > { %11317 = vst [vmem:[%s20143_s28 + $0x1b0] sm:$0xff] %v11253_v41  ;;  %11318 = vst [vmem:[%s20143_s28 + $0x1b8] sm:$0xff] %v11254_v27 }
 0xa1a   : > { %11319 = vst [vmem:[%s20143_s28 + $0x1c0] sm:$0xff] %v11255_v4  ;;  %11320 = vst [vmem:[%s20143_s28 + $0x1c8] sm:$0xff] %v11256_v62 }
 0xa1b   : > { %11321 = vst [vmem:[%s20143_s28 + $0x1d0] sm:$0xff] %v11257_v1  ;;  %11322 = vst [vmem:[%s20143_s28 + $0x1d8] sm:$0xff] %v11258_v6 }
 0xa1c   : > { %11323 = vst [vmem:[%s20143_s28 + $0x1e0] sm:$0xff] %v11259_v26  ;;  %11324 = vst [vmem:[%s20143_s28 + $0x1e8] sm:$0xff] %v11260_v20 }
 0xa1d   : > { %11325 = vst [vmem:[%s20143_s28 + $0x1f0] sm:$0xff] %v11261_v47  ;;  %11326 = vst [vmem:[%s20143_s28 + $0x1f8] sm:$0xff] %v11262_v30 }
 0xa1e   : > { %15771 = shalt.err (!%p15768_p1)
}
 0xa1f   : > { %s15772_s28 = scalar_lea.hbm %s20385_s30, 8192  ;;  %s15776_s24 = scalar_lea.hbm %s20981_s15, 16384 }
 0xa20   : > { %p15773_p13 = scmp.ne.s32.totalorder %s20385_s30, %s15772_s28  ;;  %p15777_p4 = scmp.lt.u32.totalorder %s20385_s30, %s20981_s15 }
 0xa21   : > { %p15778_p5 = scmp.lt.u32.totalorder %s15776_s24, %s15772_s28  ;;  %p15780_p11 = scmp.lt.u32.totalorder %s15772_s28, %s20385_s30 }
 0xa22   : > { %p15774_p6 = pnand %p15773_p13, %p20982_p0 }
 0xa23   : > { %p15779_p8 = por %p15778_p5, %p15777_p4 }
 0xa24   : > { %p15775_p10 = pneg %p15774_p6 }
 0xa25   : > { %p15781_p2 = por %p15780_p11, %p15779_p8 }
 0xa27   : > { %p15782_p3 = pnand %p15781_p2, %p15775_p10 }
 0xa29   : > { %15785 = shalt.err (!%p15782_p3)
}
 0xa2a   : > { %s15838_s26 = smov 128   ;;  %s15839_s16 = smov 8  }
 0xa2b   : > { %15280 = dma.vmem_to_hbm [thread:$0]  (%p20982_p0), %s20387_s29, 8192, %s20385_s30, %s11328_s27, %s15838_s26, %s15838_s26, %s15839_s16  }
 0xa2c PF: > { %s20983_s23 = sld [smem:[#allocation13_spill]]  ;;  %s20984_s22 = sld [smem:[#allocation14_spill]] }
 0xa2d   : > { %p20986_p9 = scmp.ge.s32.totalorder %s15828_s21, 2 }
 0xa32   : > { %s11357_s14 = sand.u32 1, %s20983_s23   ;;  %p20985_p7 = scmp.ne.s32.totalorder %s20984_s22, 0 }
 0xa33   : > { %s11358_s28 = scalar_lea.sflag [#allocation5], %s11357_s14 }
 0xa34   : > { %p15294_p12 = pnand %p20986_p9, %p20985_p7 }
 0xa36   : > { %15811 = dma.done.wait (!%p15294_p12), %s11358_s28, 8192  }
 0xa37   : > { %15813 = vsyncadd (!%p15294_p12), %s11358_s28, 4294959104  ;;  %p29_p1 = scmp.ge.s32.totalorder %s16036_s13, 4   ;;  %s20987_s18 = smov %s15820_s19 }
 0xa38   : > { %s20988_s19 = smov %s15824_s20  ;;  %s20989_s20 = smov %s16052_s17 }
 0xa39   : > { %s20990_s21 = smov %s16036_s13  ;;  %31 = sbr.rel (!%p29_p1) target bundleno = 12 (0xc), region = 148 }
 0xa40   :  { %11363 = vsyncpa [#allocation4], 1 }
 0xa41   :  { %11365 = vsyncpa [#allocation4 + $0x1], 1 }
 0xa42   :  { %11366 = vsyncpa [#allocation7], 1 }
 0xa43   :  { %11367 = vsyncpa [#allocation5], 1 }
 0xa44   :  { %11369 = vsyncpa [#allocation5 + $0x1], 1 }

</bundles_post_ra>
